<compile_context>
chip_gen: v5e
topology: v5e:2x2
jax: 0.10.0
libtpu: 0.0.40
codegen_flags: <defaults>
</compile_context>

<pallas_src>
import functools

import jax
import jax.numpy as jnp
from jax import lax
from jax.experimental import pallas as pl
from jax.experimental.pallas import tpu as pltpu

EPS = 1e-5
VMEM_LIMIT_BYTES = 32 * 1024 * 1024  # safe scoped-VMEM request on v5e/v6e/v7x


# ----------------------------------------------------------------------------
# Kernel 1: 3x3 dilated conv (9 shifted matmuls) + per-channel sum / sum-sq
# ----------------------------------------------------------------------------
def _conv_stats_kernel(xp_ref, w_ref, y_ref, sum_ref, sq_ref, acc_ref, *,
                       H, W, dilation):
    # xp_ref : (1, Hp, Wp, Cin)   padded NHWC image (compute dtype)
    # w_ref  : (3, 3, Cin, Cout)  conv weights (compute dtype), VMEM-resident
    # y_ref  : (1, H*W, Cout)     raw conv output for this image
    # sum_ref: (1, Cout) f32      per-channel sum   (accumulated over batch)
    # sq_ref : (1, Cout) f32      per-channel sumsq (accumulated over batch)
    # acc_ref: (H*W, Cout) f32    scratch accumulator
    n = pl.program_id(0)

    @pl.when(n == 0)
    def _():
        sum_ref[...] = jnp.zeros_like(sum_ref)
        sq_ref[...] = jnp.zeros_like(sq_ref)

    acc_ref[...] = jnp.zeros_like(acc_ref)
    c_in = xp_ref.shape[-1]
    for kh in range(3):
        for kw in range(3):
            h0 = kh * dilation
            w0 = kw * dilation
            xs = xp_ref[0, h0:h0 + H, w0:w0 + W, :]          # (H, W, Cin)
            xs = xs.reshape(H * W, c_in)                     # (H*W, Cin)
            acc_ref[...] += jnp.dot(xs, w_ref[kh, kw],
                                    preferred_element_type=jnp.float32)

    y = acc_ref[...]                                         # (H*W, Cout) f32
    sum_ref[...] += jnp.sum(y, axis=0, keepdims=True)
    sq_ref[...] += jnp.sum(y * y, axis=0, keepdims=True)
    y_ref[...] = y.astype(y_ref.dtype).reshape(y_ref.shape)


def _conv3x3_bn_stats(x_nhwc, w_khwio, *, dilation, out_dtype, compute_dtype):
    """x: (N,H,W,Cin); w: (3,3,Cin,Cout) -> (y_raw (N,H*W,Cout), sum, sumsq)."""
    n, h, w, c_in = x_nhwc.shape
    c_out = w_khwio.shape[-1]
    pad = dilation  # 3x3 kernel, pad == dilation -> 'same' output size
    x_c = x_nhwc.astype(compute_dtype)
    w_c = w_khwio.astype(compute_dtype)
    xp = jnp.pad(x_c, ((0, 0), (pad, pad), (pad, pad), (0, 0)))
    hp, wp = h + 2 * pad, w + 2 * pad

    # NOTE: one image per grid step keeps the (H*W, Cout) accumulator in VMEM;
    # for very large H*W this kernel would additionally tile H (halo DMA).
    kernel = functools.partial(_conv_stats_kernel, H=h, W=w, dilation=dilation)

    in_bytes = xp.dtype.itemsize
    out_bytes = jnp.finfo(out_dtype).bits // 8
    cost = pl.CostEstimate(
        flops=2 * n * h * w * 9 * c_in * c_out,
        transcendentals=0,
        bytes_accessed=(xp.size * in_bytes + w_c.size * in_bytes
                        + n * h * w * c_out * out_bytes + 2 * c_out * 4),
    )

    y, s, sq = pl.pallas_call(
        kernel,
        out_shape=(
            jax.ShapeDtypeStruct((n, h * w, c_out), out_dtype),
            jax.ShapeDtypeStruct((1, c_out), jnp.float32),
            jax.ShapeDtypeStruct((1, c_out), jnp.float32),
        ),
        grid_spec=pltpu.PrefetchScalarGridSpec(
            num_scalar_prefetch=0,
            grid=(n,),
            in_specs=[
                pl.BlockSpec((1, hp, wp, c_in), lambda i: (i, 0, 0, 0)),
                # constant index_map -> weights DMA'd once, stay resident
                pl.BlockSpec((3, 3, c_in, c_out), lambda i: (0, 0, 0, 0)),
            ],
            out_specs=[
                pl.BlockSpec((1, h * w, c_out), lambda i: (i, 0, 0)),
                pl.BlockSpec((1, c_out), lambda i: (0, 0)),
                pl.BlockSpec((1, c_out), lambda i: (0, 0)),
            ],
            scratch_shapes=[pltpu.VMEM((h * w, c_out), jnp.float32)],
        ),
        compiler_params=pltpu.CompilerParams(
            # stats accumulate across the batch axis -> must stay sequential
            dimension_semantics=("arbitrary",),
            vmem_limit_bytes=VMEM_LIMIT_BYTES),
        cost_estimate=cost,
    )(xp, w_c)
    return y, s, sq


# ----------------------------------------------------------------------------
# Kernel 2: BatchNorm (global stats) + affine + ReLU, tiled over M rows
# ----------------------------------------------------------------------------
def _bn_relu_kernel(y_ref, sum_ref, sq_ref, g_ref, b_ref, o_ref, *, m_total):
    inv_m = 1.0 / m_total
    mean = sum_ref[...] * inv_m                       # (1, C) f32
    var = sq_ref[...] * inv_m - mean * mean           # biased variance
    scale = g_ref[...] * lax.rsqrt(var + EPS)
    shift = b_ref[...] - mean * scale
    y = y_ref[...].astype(jnp.float32)
    o_ref[...] = jnp.maximum(y * scale + shift, 0.0).astype(o_ref.dtype)


def _row_tile(m, max_rows=1024):
    """Largest multiple-of-8 divisor of m that is <= max_rows (else m)."""
    t = min(m, max_rows)
    t -= t % 8
    while t >= 8:
        if m % t == 0:
            return t
        t -= 8
    return m


def _bn_relu(y_flat, s, sq, gamma, beta, *, out_dtype):
    m, c = y_flat.shape
    tm = _row_tile(m)
    kernel = functools.partial(_bn_relu_kernel, m_total=float(m))
    const = lambda i: (0, 0)
    return pl.pallas_call(
        kernel,
        out_shape=jax.ShapeDtypeStruct((m, c), out_dtype),
        grid_spec=pltpu.PrefetchScalarGridSpec(
            num_scalar_prefetch=0,
            grid=(m // tm,),
            in_specs=[
                pl.BlockSpec((tm, c), lambda i: (i, 0)),
                pl.BlockSpec((1, c), const),
                pl.BlockSpec((1, c), const),
                pl.BlockSpec((1, c), const),
                pl.BlockSpec((1, c), const),
            ],
            out_specs=pl.BlockSpec((tm, c), lambda i: (i, 0)),
        ),
        compiler_params=pltpu.CompilerParams(
            dimension_semantics=("parallel",),   # shards across TCs on v7x
            vmem_limit_bytes=VMEM_LIMIT_BYTES),
        cost_estimate=pl.CostEstimate(
            flops=4 * m * c, transcendentals=c,
            bytes_accessed=2 * m * c * 4 + 4 * c * 4),
    )(y_flat, s, sq,
      gamma.reshape(1, c).astype(jnp.float32),
      beta.reshape(1, c).astype(jnp.float32))


# ----------------------------------------------------------------------------
# Forward pass of DoubleConvolution
# ----------------------------------------------------------------------------
def double_convolution(x_nchw, params, compute_dtype=jnp.bfloat16):
    """x: (N, C_in, H, W) float32 -> (N, C_out, H, W) float32."""
    n, _, h, w = x_nchw.shape
    x = jnp.transpose(x_nchw, (0, 2, 3, 1))                # NHWC
    w1 = jnp.transpose(params["w1"], (2, 3, 1, 0))         # (3,3,Cin,Cmid)
    w2 = jnp.transpose(params["w2"], (2, 3, 1, 0))         # (3,3,Cmid,Cout)
    c_mid, c_out = w1.shape[-1], w2.shape[-1]
    # Conv biases (params["b1"], params["b2"]) are intentionally not applied:
    # training-mode BN mean subtraction cancels them exactly.

    # Stage 1: Conv(3x3, pad=2, dilation=2) -> BN -> ReLU
    y1_raw, s1, sq1 = _conv3x3_bn_stats(
        x, w1, dilation=2, out_dtype=compute_dtype, compute_dtype=compute_dtype)
    y1_act = _bn_relu(y1_raw.reshape(n * h * w, c_mid), s1, sq1,
                      params["g1"], params["beta1"], out_dtype=compute_dtype)
    y1_act = y1_act.reshape(n, h, w, c_mid)

    # Stage 2: Conv(3x3, pad=1, dilation=1) -> BN -> ReLU
    y2_raw, s2, sq2 = _conv3x3_bn_stats(
        y1_act, w2, dilation=1, out_dtype=compute_dtype,
        compute_dtype=compute_dtype)
    y2 = _bn_relu(y2_raw.reshape(n * h * w, c_out), s2, sq2,
                  params["g2"], params["beta2"], out_dtype=jnp.float32)
    y2 = y2.reshape(n, h, w, c_out)
    return jnp.transpose(y2, (0, 3, 1, 2))                 # back to NCHW


# ----------------------------------------------------------------------------
# Pure-JAX f32 reference (PyTorch semantics, including conv bias)
# ----------------------------------------------------------------------------
def reference(x_nchw, params):
    def conv(x, w, b, dilation, padding):
        y = lax.conv_general_dilated(
            x, w, window_strides=(1, 1),
            padding=((padding, padding), (padding, padding)),
            rhs_dilation=(dilation, dilation),
            dimension_numbers=("NCHW", "OIHW", "NCHW"))
        return y + b[None, :, None, None]

    def bn_relu(y, g, beta):
        mean = jnp.mean(y, axis=(0, 2, 3), keepdims=True)
        var = jnp.mean((y - mean) ** 2, axis=(0, 2, 3), keepdims=True)
        yh = (y - mean) * lax.rsqrt(var + EPS)
        return jnp.maximum(yh * g[None, :, None, None]
                           + beta[None, :, None, None], 0.0)

    y = conv(x_nchw, params["w1"], params["b1"], dilation=2, padding=2)
    y = bn_relu(y, params["g1"], params["beta1"])
    y = conv(y, params["w2"], params["b2"], dilation=1, padding=1)
    y = bn_relu(y, params["g2"], params["beta2"])
    return y


# ----------------------------------------------------------------------------
# Deterministic parameter init (PyTorch-style uniform bounds, synthetic)
# ----------------------------------------------------------------------------
def init_params(key, c_in, c_mid, c_out):
    k = jax.random.split(key, 4)
    bound1 = 1.0 / jnp.sqrt(c_in * 9)
    bound2 = 1.0 / jnp.sqrt(c_mid * 9)
    return {
        "w1": jax.random.uniform(k[0], (c_mid, c_in, 3, 3), jnp.float32,
                                 -bound1, bound1),
        "b1": jax.random.uniform(k[1], (c_mid,), jnp.float32, -bound1, bound1),
        "g1": jnp.ones((c_mid,), jnp.float32),
        "beta1": jnp.zeros((c_mid,), jnp.float32),
        "w2": jax.random.uniform(k[2], (c_out, c_mid, 3, 3), jnp.float32,
                                 -bound2, bound2),
        "b2": jax.random.uniform(k[3], (c_out,), jnp.float32, -bound2, bound2),
        "g2": jnp.ones((c_out,), jnp.float32),
        "beta2": jnp.zeros((c_out,), jnp.float32),
    }


if __name__ == "__main__":
    key = jax.random.PRNGKey(0)
    kx, kp = jax.random.split(key)

    N, C_IN, C_MID, C_OUT, H, W = 2, 4, 8, 8, 16, 16
    x = jax.random.normal(kx, (N, C_IN, H, W), jnp.float32)
    params = init_params(kp, C_IN, C_MID, C_OUT)

    ref = jax.block_until_ready(reference(x, params))

    # 1) f32 compute path: tight correctness check against the lax reference.
    fwd_f32 = jax.jit(functools.partial(double_convolution, params=params,
                                        compute_dtype=jnp.float32))
    out_f32 = jax.block_until_ready(fwd_f32(x))
    assert out_f32.shape == (N, C_OUT, H, W), out_f32.shape
    err_f32 = float(jnp.max(jnp.abs(out_f32 - ref)))
    assert err_f32 < 1e-3, err_f32

    # 2) bf16 compute path (the performance configuration): loose tolerance
    #    accounts only for bf16 MXU-input rounding through two conv+BN stages.
    fwd_bf16 = jax.jit(functools.partial(double_convolution, params=params,
                                         compute_dtype=jnp.bfloat16))
    out_bf16 = jax.block_until_ready(fwd_bf16(x))
    assert out_bf16.shape == (N, C_OUT, H, W), out_bf16.shape
    err_max = float(jnp.max(jnp.abs(out_bf16 - ref)))
    rel_fro = float(jnp.linalg.norm(out_bf16 - ref) / (jnp.linalg.norm(ref) + 1e-12))
    assert err_max < 0.1, err_max
    assert rel_fro < 0.03, rel_fro

    print("KERNEL_OK")
</pallas_src>

<mosaic_0001>
module attributes {stable_mosaic.version = 11 : i64} {
  func.func @_conv_stats_kernel(%arg0: i32, %arg1: memref<1x20x20x4xf32, #tpu.memory_space<vmem>>, %arg2: memref<3x3x4x8xf32, #tpu.memory_space<vmem>>, %arg3: memref<1x256x8xf32, #tpu.memory_space<vmem>>, %arg4: memref<1x8xf32, #tpu.memory_space<vmem>>, %arg5: memref<1x8xf32, #tpu.memory_space<vmem>>, %arg6: memref<256x8xf32, #tpu.memory_space<vmem>>) attributes {dimension_semantics = [#tpu.dimension_semantics<arbitrary>], iteration_bounds = array<i64: 2>, scalar_prefetch = 0 : i64, scratch_operands = 1 : i64, tpu.core_type = #tpu.core_type<tc>, window_params = [{transform_indices = @transform_0, window_bounds = array<i64: 1, 20, 20, 4>}, {pipeline_mode = #tpu.pipeline_mode<synchronous>, transform_indices = @transform_1, window_bounds = array<i64: 3, 3, 4, 8>}, {transform_indices = @transform_2, window_bounds = array<i64: 1, 256, 8>}, {pipeline_mode = #tpu.pipeline_mode<synchronous>, transform_indices = @transform_3, window_bounds = array<i64: 1, 8>}, {pipeline_mode = #tpu.pipeline_mode<synchronous>, transform_indices = @transform_4, window_bounds = array<i64: 1, 8>}]} {
    %c0_i32 = arith.constant 0 : i32
    %0 = arith.cmpi eq, %arg0, %c0_i32 : i32
    %1 = arith.extui %0 : i1 to i32
    %c0_i32_0 = arith.constant 0 : i32
    %2 = arith.cmpi ne, %1, %c0_i32_0 : i32
    scf.if %2 {
      %cst_131 = arith.constant 0.000000e+00 : f32
      %100 = vector.broadcast %cst_131 : f32 to vector<1x8xf32>
      %c0_132 = arith.constant 0 : index
      %c0_133 = arith.constant 0 : index
      %101 = vector.load %arg4[%c0_132, %c0_133] : memref<1x8xf32, #tpu.memory_space<vmem>>, vector<1x8xf32>
      tpu.vector_store %arg4[%c0_132, %c0_133], %100 {strides = array<i32>} : memref<1x8xf32, #tpu.memory_space<vmem>>, vector<1x8xf32>,
      %cst_134 = arith.constant 0.000000e+00 : f32
      %102 = vector.broadcast %cst_134 : f32 to vector<1x8xf32>
      %c0_135 = arith.constant 0 : index
      %c0_136 = arith.constant 0 : index
      %103 = vector.load %arg5[%c0_135, %c0_136] : memref<1x8xf32, #tpu.memory_space<vmem>>, vector<1x8xf32>
      tpu.vector_store %arg5[%c0_135, %c0_136], %102 {strides = array<i32>} : memref<1x8xf32, #tpu.memory_space<vmem>>, vector<1x8xf32>,
    } else {
    }
    %cst = arith.constant 0.000000e+00 : f32
    %3 = vector.broadcast %cst : f32 to vector<256x8xf32>
    %c0 = arith.constant 0 : index
    %c0_1 = arith.constant 0 : index
    %4 = vector.load %arg6[%c0, %c0_1] : memref<256x8xf32, #tpu.memory_space<vmem>>, vector<256x8xf32>
    tpu.vector_store %arg6[%c0, %c0_1], %3 {strides = array<i32>} : memref<256x8xf32, #tpu.memory_space<vmem>>, vector<256x8xf32>,
    %c0_2 = arith.constant 0 : index
    %c0_3 = arith.constant 0 : index
    %c0_4 = arith.constant 0 : index
    %c0_5 = arith.constant 0 : index
    %5 = vector.load %arg1[%c0_2, %c0_3, %c0_4, %c0_5] : memref<1x20x20x4xf32, #tpu.memory_space<vmem>>, vector<1x16x16x4xf32>
    %6 = vector.shape_cast %5 : vector<1x16x16x4xf32> to vector<16x16x4xf32>
    %7 = vector.shape_cast %6 : vector<16x16x4xf32> to vector<256x4xf32>
    %c0_6 = arith.constant 0 : index
    %c0_7 = arith.constant 0 : index
    %8 = vector.load %arg6[%c0_6, %c0_7] : memref<256x8xf32, #tpu.memory_space<vmem>>, vector<256x8xf32>
    %c0_8 = arith.constant 0 : index
    %c0_9 = arith.constant 0 : index
    %c0_10 = arith.constant 0 : index
    %c0_11 = arith.constant 0 : index
    %9 = vector.load %arg2[%c0_8, %c0_9, %c0_10, %c0_11] : memref<3x3x4x8xf32, #tpu.memory_space<vmem>>, vector<1x1x4x8xf32>
    %10 = vector.shape_cast %9 : vector<1x1x4x8xf32> to vector<4x8xf32>
    %cst_12 = arith.constant dense<0.000000e+00> : vector<256x8xf32>
    %11 = tpu.matmul %7, %10, %cst_12 {dimension_numbers = #tpu.dot_dimension_numbers<[1], [0], [0], [1], [0, 0, 1, 1], [], []>} : vector<256x4xf32>, vector<4x8xf32>, vector<256x8xf32> -> vector<256x8xf32>
    %12 = arith.addf %8, %11 : vector<256x8xf32>
    %c0_13 = arith.constant 0 : index
    %c0_14 = arith.constant 0 : index
    %13 = vector.load %arg6[%c0_13, %c0_14] : memref<256x8xf32, #tpu.memory_space<vmem>>, vector<256x8xf32>
    tpu.vector_store %arg6[%c0_13, %c0_14], %12 {strides = array<i32>} : memref<256x8xf32, #tpu.memory_space<vmem>>, vector<256x8xf32>,
    %c0_15 = arith.constant 0 : index
    %c0_16 = arith.constant 0 : index
    %c2 = arith.constant 2 : index
    %c0_17 = arith.constant 0 : index
    %14 = vector.load %arg1[%c0_15, %c0_16, %c2, %c0_17] : memref<1x20x20x4xf32, #tpu.memory_space<vmem>>, vector<1x16x16x4xf32>
    %15 = vector.shape_cast %14 : vector<1x16x16x4xf32> to vector<16x16x4xf32>
    %16 = vector.shape_cast %15 : vector<16x16x4xf32> to vector<256x4xf32>
    %c0_18 = arith.constant 0 : index
    %c0_19 = arith.constant 0 : index
    %17 = vector.load %arg6[%c0_18, %c0_19] : memref<256x8xf32, #tpu.memory_space<vmem>>, vector<256x8xf32>
    %c0_20 = arith.constant 0 : index
    %c1 = arith.constant 1 : index
    %c0_21 = arith.constant 0 : index
    %c0_22 = arith.constant 0 : index
    %18 = vector.load %arg2[%c0_20, %c1, %c0_21, %c0_22] : memref<3x3x4x8xf32, #tpu.memory_space<vmem>>, vector<1x1x4x8xf32>
    %19 = vector.shape_cast %18 : vector<1x1x4x8xf32> to vector<4x8xf32>
    %cst_23 = arith.constant dense<0.000000e+00> : vector<256x8xf32>
    %20 = tpu.matmul %16, %19, %cst_23 {dimension_numbers = #tpu.dot_dimension_numbers<[1], [0], [0], [1], [0, 0, 1, 1], [], []>} : vector<256x4xf32>, vector<4x8xf32>, vector<256x8xf32> -> vector<256x8xf32>
    %21 = arith.addf %17, %20 : vector<256x8xf32>
    %c0_24 = arith.constant 0 : index
    %c0_25 = arith.constant 0 : index
    %22 = vector.load %arg6[%c0_24, %c0_25] : memref<256x8xf32, #tpu.memory_space<vmem>>, vector<256x8xf32>
    tpu.vector_store %arg6[%c0_24, %c0_25], %21 {strides = array<i32>} : memref<256x8xf32, #tpu.memory_space<vmem>>, vector<256x8xf32>,
    %c0_26 = arith.constant 0 : index
    %c0_27 = arith.constant 0 : index
    %c4 = arith.constant 4 : index
    %c0_28 = arith.constant 0 : index
    %23 = vector.load %arg1[%c0_26, %c0_27, %c4, %c0_28] : memref<1x20x20x4xf32, #tpu.memory_space<vmem>>, vector<1x16x16x4xf32>
    %24 = vector.shape_cast %23 : vector<1x16x16x4xf32> to vector<16x16x4xf32>
    %25 = vector.shape_cast %24 : vector<16x16x4xf32> to vector<256x4xf32>
    %c0_29 = arith.constant 0 : index
    %c0_30 = arith.constant 0 : index
    %26 = vector.load %arg6[%c0_29, %c0_30] : memref<256x8xf32, #tpu.memory_space<vmem>>, vector<256x8xf32>
    %c0_31 = arith.constant 0 : index
    %c2_32 = arith.constant 2 : index
    %c0_33 = arith.constant 0 : index
    %c0_34 = arith.constant 0 : index
    %27 = vector.load %arg2[%c0_31, %c2_32, %c0_33, %c0_34] : memref<3x3x4x8xf32, #tpu.memory_space<vmem>>, vector<1x1x4x8xf32>
    %28 = vector.shape_cast %27 : vector<1x1x4x8xf32> to vector<4x8xf32>
    %cst_35 = arith.constant dense<0.000000e+00> : vector<256x8xf32>
    %29 = tpu.matmul %25, %28, %cst_35 {dimension_numbers = #tpu.dot_dimension_numbers<[1], [0], [0], [1], [0, 0, 1, 1], [], []>} : vector<256x4xf32>, vector<4x8xf32>, vector<256x8xf32> -> vector<256x8xf32>
    %30 = arith.addf %26, %29 : vector<256x8xf32>
    %c0_36 = arith.constant 0 : index
    %c0_37 = arith.constant 0 : index
    %31 = vector.load %arg6[%c0_36, %c0_37] : memref<256x8xf32, #tpu.memory_space<vmem>>, vector<256x8xf32>
    tpu.vector_store %arg6[%c0_36, %c0_37], %30 {strides = array<i32>} : memref<256x8xf32, #tpu.memory_space<vmem>>, vector<256x8xf32>,
    %c0_38 = arith.constant 0 : index
    %c2_39 = arith.constant 2 : index
    %c0_40 = arith.constant 0 : index
    %c0_41 = arith.constant 0 : index
    %32 = vector.load %arg1[%c0_38, %c2_39, %c0_40, %c0_41] : memref<1x20x20x4xf32, #tpu.memory_space<vmem>>, vector<1x16x16x4xf32>
    %33 = vector.shape_cast %32 : vector<1x16x16x4xf32> to vector<16x16x4xf32>
    %34 = vector.shape_cast %33 : vector<16x16x4xf32> to vector<256x4xf32>
    %c0_42 = arith.constant 0 : index
    %c0_43 = arith.constant 0 : index
    %35 = vector.load %arg6[%c0_42, %c0_43] : memref<256x8xf32, #tpu.memory_space<vmem>>, vector<256x8xf32>
    %c1_44 = arith.constant 1 : index
    %c0_45 = arith.constant 0 : index
    %c0_46 = arith.constant 0 : index
    %c0_47 = arith.constant 0 : index
    %36 = vector.load %arg2[%c1_44, %c0_45, %c0_46, %c0_47] : memref<3x3x4x8xf32, #tpu.memory_space<vmem>>, vector<1x1x4x8xf32>
    %37 = vector.shape_cast %36 : vector<1x1x4x8xf32> to vector<4x8xf32>
    %cst_48 = arith.constant dense<0.000000e+00> : vector<256x8xf32>
    %38 = tpu.matmul %34, %37, %cst_48 {dimension_numbers = #tpu.dot_dimension_numbers<[1], [0], [0], [1], [0, 0, 1, 1], [], []>} : vector<256x4xf32>, vector<4x8xf32>, vector<256x8xf32> -> vector<256x8xf32>
    %39 = arith.addf %35, %38 : vector<256x8xf32>
    %c0_49 = arith.constant 0 : index
    %c0_50 = arith.constant 0 : index
    %40 = vector.load %arg6[%c0_49, %c0_50] : memref<256x8xf32, #tpu.memory_space<vmem>>, vector<256x8xf32>
    tpu.vector_store %arg6[%c0_49, %c0_50], %39 {strides = array<i32>} : memref<256x8xf32, #tpu.memory_space<vmem>>, vector<256x8xf32>,
    %c0_51 = arith.constant 0 : index
    %c2_52 = arith.constant 2 : index
    %c2_53 = arith.constant 2 : index
    %c0_54 = arith.constant 0 : index
    %41 = vector.load %arg1[%c0_51, %c2_52, %c2_53, %c0_54] : memref<1x20x20x4xf32, #tpu.memory_space<vmem>>, vector<1x16x16x4xf32>
    %42 = vector.shape_cast %41 : vector<1x16x16x4xf32> to vector<16x16x4xf32>
    %43 = vector.shape_cast %42 : vector<16x16x4xf32> to vector<256x4xf32>
    %c0_55 = arith.constant 0 : index
    %c0_56 = arith.constant 0 : index
    %44 = vector.load %arg6[%c0_55, %c0_56] : memref<256x8xf32, #tpu.memory_space<vmem>>, vector<256x8xf32>
    %c1_57 = arith.constant 1 : index
    %c1_58 = arith.constant 1 : index
    %c0_59 = arith.constant 0 : index
    %c0_60 = arith.constant 0 : index
    %45 = vector.load %arg2[%c1_57, %c1_58, %c0_59, %c0_60] : memref<3x3x4x8xf32, #tpu.memory_space<vmem>>, vector<1x1x4x8xf32>
    %46 = vector.shape_cast %45 : vector<1x1x4x8xf32> to vector<4x8xf32>
    %cst_61 = arith.constant dense<0.000000e+00> : vector<256x8xf32>
    %47 = tpu.matmul %43, %46, %cst_61 {dimension_numbers = #tpu.dot_dimension_numbers<[1], [0], [0], [1], [0, 0, 1, 1], [], []>} : vector<256x4xf32>, vector<4x8xf32>, vector<256x8xf32> -> vector<256x8xf32>
    %48 = arith.addf %44, %47 : vector<256x8xf32>
    %c0_62 = arith.constant 0 : index
    %c0_63 = arith.constant 0 : index
    %49 = vector.load %arg6[%c0_62, %c0_63] : memref<256x8xf32, #tpu.memory_space<vmem>>, vector<256x8xf32>
    tpu.vector_store %arg6[%c0_62, %c0_63], %48 {strides = array<i32>} : memref<256x8xf32, #tpu.memory_space<vmem>>, vector<256x8xf32>,
    %c0_64 = arith.constant 0 : index
    %c2_65 = arith.constant 2 : index
    %c4_66 = arith.constant 4 : index
    %c0_67 = arith.constant 0 : index
    %50 = vector.load %arg1[%c0_64, %c2_65, %c4_66, %c0_67] : memref<1x20x20x4xf32, #tpu.memory_space<vmem>>, vector<1x16x16x4xf32>
    %51 = vector.shape_cast %50 : vector<1x16x16x4xf32> to vector<16x16x4xf32>
    %52 = vector.shape_cast %51 : vector<16x16x4xf32> to vector<256x4xf32>
    %c0_68 = arith.constant 0 : index
    %c0_69 = arith.constant 0 : index
    %53 = vector.load %arg6[%c0_68, %c0_69] : memref<256x8xf32, #tpu.memory_space<vmem>>, vector<256x8xf32>
    %c1_70 = arith.constant 1 : index
    %c2_71 = arith.constant 2 : index
    %c0_72 = arith.constant 0 : index
    %c0_73 = arith.constant 0 : index
    %54 = vector.load %arg2[%c1_70, %c2_71, %c0_72, %c0_73] : memref<3x3x4x8xf32, #tpu.memory_space<vmem>>, vector<1x1x4x8xf32>
    %55 = vector.shape_cast %54 : vector<1x1x4x8xf32> to vector<4x8xf32>
    %cst_74 = arith.constant dense<0.000000e+00> : vector<256x8xf32>
    %56 = tpu.matmul %52, %55, %cst_74 {dimension_numbers = #tpu.dot_dimension_numbers<[1], [0], [0], [1], [0, 0, 1, 1], [], []>} : vector<256x4xf32>, vector<4x8xf32>, vector<256x8xf32> -> vector<256x8xf32>
    %57 = arith.addf %53, %56 : vector<256x8xf32>
    %c0_75 = arith.constant 0 : index
    %c0_76 = arith.constant 0 : index
    %58 = vector.load %arg6[%c0_75, %c0_76] : memref<256x8xf32, #tpu.memory_space<vmem>>, vector<256x8xf32>
    tpu.vector_store %arg6[%c0_75, %c0_76], %57 {strides = array<i32>} : memref<256x8xf32, #tpu.memory_space<vmem>>, vector<256x8xf32>,
    %c0_77 = arith.constant 0 : index
    %c4_78 = arith.constant 4 : index
    %c0_79 = arith.constant 0 : index
    %c0_80 = arith.constant 0 : index
    %59 = vector.load %arg1[%c0_77, %c4_78, %c0_79, %c0_80] : memref<1x20x20x4xf32, #tpu.memory_space<vmem>>, vector<1x16x16x4xf32>
    %60 = vector.shape_cast %59 : vector<1x16x16x4xf32> to vector<16x16x4xf32>
    %61 = vector.shape_cast %60 : vector<16x16x4xf32> to vector<256x4xf32>
    %c0_81 = arith.constant 0 : index
    %c0_82 = arith.constant 0 : index
    %62 = vector.load %arg6[%c0_81, %c0_82] : memref<256x8xf32, #tpu.memory_space<vmem>>, vector<256x8xf32>
    %c2_83 = arith.constant 2 : index
    %c0_84 = arith.constant 0 : index
    %c0_85 = arith.constant 0 : index
    %c0_86 = arith.constant 0 : index
    %63 = vector.load %arg2[%c2_83, %c0_84, %c0_85, %c0_86] : memref<3x3x4x8xf32, #tpu.memory_space<vmem>>, vector<1x1x4x8xf32>
    %64 = vector.shape_cast %63 : vector<1x1x4x8xf32> to vector<4x8xf32>
    %cst_87 = arith.constant dense<0.000000e+00> : vector<256x8xf32>
    %65 = tpu.matmul %61, %64, %cst_87 {dimension_numbers = #tpu.dot_dimension_numbers<[1], [0], [0], [1], [0, 0, 1, 1], [], []>} : vector<256x4xf32>, vector<4x8xf32>, vector<256x8xf32> -> vector<256x8xf32>
    %66 = arith.addf %62, %65 : vector<256x8xf32>
    %c0_88 = arith.constant 0 : index
    %c0_89 = arith.constant 0 : index
    %67 = vector.load %arg6[%c0_88, %c0_89] : memref<256x8xf32, #tpu.memory_space<vmem>>, vector<256x8xf32>
    tpu.vector_store %arg6[%c0_88, %c0_89], %66 {strides = array<i32>} : memref<256x8xf32, #tpu.memory_space<vmem>>, vector<256x8xf32>,
    %c0_90 = arith.constant 0 : index
    %c4_91 = arith.constant 4 : index
    %c2_92 = arith.constant 2 : index
    %c0_93 = arith.constant 0 : index
    %68 = vector.load %arg1[%c0_90, %c4_91, %c2_92, %c0_93] : memref<1x20x20x4xf32, #tpu.memory_space<vmem>>, vector<1x16x16x4xf32>
    %69 = vector.shape_cast %68 : vector<1x16x16x4xf32> to vector<16x16x4xf32>
    %70 = vector.shape_cast %69 : vector<16x16x4xf32> to vector<256x4xf32>
    %c0_94 = arith.constant 0 : index
    %c0_95 = arith.constant 0 : index
    %71 = vector.load %arg6[%c0_94, %c0_95] : memref<256x8xf32, #tpu.memory_space<vmem>>, vector<256x8xf32>
    %c2_96 = arith.constant 2 : index
    %c1_97 = arith.constant 1 : index
    %c0_98 = arith.constant 0 : index
    %c0_99 = arith.constant 0 : index
    %72 = vector.load %arg2[%c2_96, %c1_97, %c0_98, %c0_99] : memref<3x3x4x8xf32, #tpu.memory_space<vmem>>, vector<1x1x4x8xf32>
    %73 = vector.shape_cast %72 : vector<1x1x4x8xf32> to vector<4x8xf32>
    %cst_100 = arith.constant dense<0.000000e+00> : vector<256x8xf32>
    %74 = tpu.matmul %70, %73, %cst_100 {dimension_numbers = #tpu.dot_dimension_numbers<[1], [0], [0], [1], [0, 0, 1, 1], [], []>} : vector<256x4xf32>, vector<4x8xf32>, vector<256x8xf32> -> vector<256x8xf32>
    %75 = arith.addf %71, %74 : vector<256x8xf32>
    %c0_101 = arith.constant 0 : index
    %c0_102 = arith.constant 0 : index
    %76 = vector.load %arg6[%c0_101, %c0_102] : memref<256x8xf32, #tpu.memory_space<vmem>>, vector<256x8xf32>
    tpu.vector_store %arg6[%c0_101, %c0_102], %75 {strides = array<i32>} : memref<256x8xf32, #tpu.memory_space<vmem>>, vector<256x8xf32>,
    %c0_103 = arith.constant 0 : index
    %c4_104 = arith.constant 4 : index
    %c4_105 = arith.constant 4 : index
    %c0_106 = arith.constant 0 : index
    %77 = vector.load %arg1[%c0_103, %c4_104, %c4_105, %c0_106] : memref<1x20x20x4xf32, #tpu.memory_space<vmem>>, vector<1x16x16x4xf32>
    %78 = vector.shape_cast %77 : vector<1x16x16x4xf32> to vector<16x16x4xf32>
    %79 = vector.shape_cast %78 : vector<16x16x4xf32> to vector<256x4xf32>
    %c0_107 = arith.constant 0 : index
    %c0_108 = arith.constant 0 : index
    %80 = vector.load %arg6[%c0_107, %c0_108] : memref<256x8xf32, #tpu.memory_space<vmem>>, vector<256x8xf32>
    %c2_109 = arith.constant 2 : index
    %c2_110 = arith.constant 2 : index
    %c0_111 = arith.constant 0 : index
    %c0_112 = arith.constant 0 : index
    %81 = vector.load %arg2[%c2_109, %c2_110, %c0_111, %c0_112] : memref<3x3x4x8xf32, #tpu.memory_space<vmem>>, vector<1x1x4x8xf32>
    %82 = vector.shape_cast %81 : vector<1x1x4x8xf32> to vector<4x8xf32>
    %cst_113 = arith.constant dense<0.000000e+00> : vector<256x8xf32>
    %83 = tpu.matmul %79, %82, %cst_113 {dimension_numbers = #tpu.dot_dimension_numbers<[1], [0], [0], [1], [0, 0, 1, 1], [], []>} : vector<256x4xf32>, vector<4x8xf32>, vector<256x8xf32> -> vector<256x8xf32>
    %84 = arith.addf %80, %83 : vector<256x8xf32>
    %c0_114 = arith.constant 0 : index
    %c0_115 = arith.constant 0 : index
    %85 = vector.load %arg6[%c0_114, %c0_115] : memref<256x8xf32, #tpu.memory_space<vmem>>, vector<256x8xf32>
    tpu.vector_store %arg6[%c0_114, %c0_115], %84 {strides = array<i32>} : memref<256x8xf32, #tpu.memory_space<vmem>>, vector<256x8xf32>,
    %c0_116 = arith.constant 0 : index
    %c0_117 = arith.constant 0 : index
    %86 = vector.load %arg6[%c0_116, %c0_117] : memref<256x8xf32, #tpu.memory_space<vmem>>, vector<256x8xf32>
    %c0_118 = arith.constant 0 : index
    %c0_119 = arith.constant 0 : index
    %87 = vector.load %arg4[%c0_118, %c0_119] : memref<1x8xf32, #tpu.memory_space<vmem>>, vector<1x8xf32>
    %cst_120 = arith.constant dense<0.000000e+00> : vector<8xf32>
    %88 = vector.multi_reduction <add>, %86, %cst_120 [0] : vector<256x8xf32> to vector<8xf32>
    %89 = vector.shape_cast %88 : vector<8xf32> to vector<1x8xf32>
    %90 = arith.addf %87, %89 : vector<1x8xf32>
    %c0_121 = arith.constant 0 : index
    %c0_122 = arith.constant 0 : index
    %91 = vector.load %arg4[%c0_121, %c0_122] : memref<1x8xf32, #tpu.memory_space<vmem>>, vector<1x8xf32>
    tpu.vector_store %arg4[%c0_121, %c0_122], %90 {strides = array<i32>} : memref<1x8xf32, #tpu.memory_space<vmem>>, vector<1x8xf32>,
    %c0_123 = arith.constant 0 : index
    %c0_124 = arith.constant 0 : index
    %92 = vector.load %arg5[%c0_123, %c0_124] : memref<1x8xf32, #tpu.memory_space<vmem>>, vector<1x8xf32>
    %93 = arith.mulf %86, %86 : vector<256x8xf32>
    %cst_125 = arith.constant dense<0.000000e+00> : vector<8xf32>
    %94 = vector.multi_reduction <add>, %93, %cst_125 [0] : vector<256x8xf32> to vector<8xf32>
    %95 = vector.shape_cast %94 : vector<8xf32> to vector<1x8xf32>
    %96 = arith.addf %92, %95 : vector<1x8xf32>
    %c0_126 = arith.constant 0 : index
    %c0_127 = arith.constant 0 : index
    %97 = vector.load %arg5[%c0_126, %c0_127] : memref<1x8xf32, #tpu.memory_space<vmem>>, vector<1x8xf32>
    tpu.vector_store %arg5[%c0_126, %c0_127], %96 {strides = array<i32>} : memref<1x8xf32, #tpu.memory_space<vmem>>, vector<1x8xf32>,
    %98 = vector.shape_cast %86 : vector<256x8xf32> to vector<1x256x8xf32>
    %c0_128 = arith.constant 0 : index
    %c0_129 = arith.constant 0 : index
    %c0_130 = arith.constant 0 : index
    %99 = vector.load %arg3[%c0_128, %c0_129, %c0_130] : memref<1x256x8xf32, #tpu.memory_space<vmem>>, vector<1x256x8xf32>
    tpu.vector_store %arg3[%c0_128, %c0_129, %c0_130], %98 {strides = array<i32>} : memref<1x256x8xf32, #tpu.memory_space<vmem>>, vector<1x256x8xf32>,
    return
  }
  func.func @transform_0(%arg0: i32) -> (i32, i32, i32, i32) {
    %c0_i32 = arith.constant 0 : i32
    %c0_i32_0 = arith.constant 0 : i32
    %c0_i32_1 = arith.constant 0 : i32
    %c0_i32_2 = arith.constant 0 : i32
    return %arg0, %c0_i32, %c0_i32_0, %c0_i32_1 : i32, i32, i32, i32
  }
  func.func @transform_1(%arg0: i32) -> (i32, i32, i32, i32) {
    %c0_i32 = arith.constant 0 : i32
    %c0_i32_0 = arith.constant 0 : i32
    %c0_i32_1 = arith.constant 0 : i32
    %c0_i32_2 = arith.constant 0 : i32
    %c0_i32_3 = arith.constant 0 : i32
    return %c0_i32, %c0_i32_0, %c0_i32_1, %c0_i32_2 : i32, i32, i32, i32
  }
  func.func @transform_2(%arg0: i32) -> (i32, i32, i32) {
    %c0_i32 = arith.constant 0 : i32
    %c0_i32_0 = arith.constant 0 : i32
    %c0_i32_1 = arith.constant 0 : i32
    return %arg0, %c0_i32, %c0_i32_0 : i32, i32, i32
  }
  func.func @transform_3(%arg0: i32) -> (i32, i32) {
    %c0_i32 = arith.constant 0 : i32
    %c0_i32_0 = arith.constant 0 : i32
    %c0_i32_1 = arith.constant 0 : i32
    return %c0_i32, %c0_i32_0 : i32, i32
  }
  func.func @transform_4(%arg0: i32) -> (i32, i32) {
    %c0_i32 = arith.constant 0 : i32
    %c0_i32_0 = arith.constant 0 : i32
    %c0_i32_1 = arith.constant 0 : i32
    return %c0_i32, %c0_i32_0 : i32, i32
  }
}

module attributes {stable_mosaic.version = 11 : i64} {
  func.func @_bn_relu_kernel(%arg0: i32, %arg1: memref<512x8xf32, #tpu.memory_space<vmem>>, %arg2: memref<1x8xf32, #tpu.memory_space<vmem>>, %arg3: memref<1x8xf32, #tpu.memory_space<vmem>>, %arg4: memref<1x8xf32, #tpu.memory_space<vmem>>, %arg5: memref<1x8xf32, #tpu.memory_space<vmem>>, %arg6: memref<512x8xf32, #tpu.memory_space<vmem>>) attributes {dimension_semantics = [#tpu.dimension_semantics<parallel>], iteration_bounds = array<i64: 1>, scalar_prefetch = 0 : i64, scratch_operands = 0 : i64, tpu.core_type = #tpu.core_type<tc>, window_params = [{transform_indices = @transform_0, window_bounds = array<i64: 512, 8>}, {pipeline_mode = #tpu.pipeline_mode<synchronous>, transform_indices = @transform_1, window_bounds = array<i64: 1, 8>}, {pipeline_mode = #tpu.pipeline_mode<synchronous>, transform_indices = @transform_2, window_bounds = array<i64: 1, 8>}, {pipeline_mode = #tpu.pipeline_mode<synchronous>, transform_indices = @transform_3, window_bounds = array<i64: 1, 8>}, {pipeline_mode = #tpu.pipeline_mode<synchronous>, transform_indices = @transform_4, window_bounds = array<i64: 1, 8>}, {transform_indices = @transform_5, window_bounds = array<i64: 512, 8>}]} {
    %c0 = arith.constant 0 : index
    %c0_0 = arith.constant 0 : index
    %0 = vector.load %arg2[%c0, %c0_0] : memref<1x8xf32, #tpu.memory_space<vmem>>, vector<1x8xf32>
    %cst = arith.constant 0.001953125 : f32
    %1 = vector.broadcast %cst : f32 to vector<1x8xf32>
    %2 = arith.mulf %0, %1 : vector<1x8xf32>
    %c0_1 = arith.constant 0 : index
    %c0_2 = arith.constant 0 : index
    %3 = vector.load %arg3[%c0_1, %c0_2] : memref<1x8xf32, #tpu.memory_space<vmem>>, vector<1x8xf32>
    %cst_3 = arith.constant 0.001953125 : f32
    %4 = vector.broadcast %cst_3 : f32 to vector<1x8xf32>
    %5 = arith.mulf %3, %4 : vector<1x8xf32>
    %6 = arith.mulf %2, %2 : vector<1x8xf32>
    %7 = arith.subf %5, %6 : vector<1x8xf32>
    %c0_4 = arith.constant 0 : index
    %c0_5 = arith.constant 0 : index
    %8 = vector.load %arg4[%c0_4, %c0_5] : memref<1x8xf32, #tpu.memory_space<vmem>>, vector<1x8xf32>
    %cst_6 = arith.constant 9.99999974E-6 : f32
    %9 = vector.broadcast %cst_6 : f32 to vector<1x8xf32>
    %10 = arith.addf %7, %9 : vector<1x8xf32>
    %11 = math.rsqrt %10 : vector<1x8xf32>
    %12 = arith.mulf %8, %11 : vector<1x8xf32>
    %c0_7 = arith.constant 0 : index
    %c0_8 = arith.constant 0 : index
    %13 = vector.load %arg5[%c0_7, %c0_8] : memref<1x8xf32, #tpu.memory_space<vmem>>, vector<1x8xf32>
    %14 = arith.mulf %2, %12 : vector<1x8xf32>
    %15 = arith.subf %13, %14 : vector<1x8xf32>
    %c0_9 = arith.constant 0 : index
    %c0_10 = arith.constant 0 : index
    %16 = vector.load %arg1[%c0_9, %c0_10] : memref<512x8xf32, #tpu.memory_space<vmem>>, vector<512x8xf32>
    %17 = vector.broadcast %12 : vector<1x8xf32> to vector<512x8xf32>
    %18 = arith.mulf %16, %17 : vector<512x8xf32>
    %19 = vector.broadcast %15 : vector<1x8xf32> to vector<512x8xf32>
    %20 = arith.addf %18, %19 : vector<512x8xf32>
    %cst_11 = arith.constant 0.000000e+00 : f32
    %21 = vector.broadcast %cst_11 : f32 to vector<512x8xf32>
    %22 = arith.maximumf %20, %21 : vector<512x8xf32>
    %c0_12 = arith.constant 0 : index
    %c0_13 = arith.constant 0 : index
    %23 = vector.load %arg6[%c0_12, %c0_13] : memref<512x8xf32, #tpu.memory_space<vmem>>, vector<512x8xf32>
    tpu.vector_store %arg6[%c0_12, %c0_13], %22 {strides = array<i32>} : memref<512x8xf32, #tpu.memory_space<vmem>>, vector<512x8xf32>,
    return
  }
  func.func @transform_0(%arg0: i32) -> (i32, i32) {
    %c0_i32 = arith.constant 0 : i32
    %c0_i32_0 = arith.constant 0 : i32
    return %arg0, %c0_i32 : i32, i32
  }
  func.func @transform_1(%arg0: i32) -> (i32, i32) {
    %c0_i32 = arith.constant 0 : i32
    %c0_i32_0 = arith.constant 0 : i32
    %c0_i32_1 = arith.constant 0 : i32
    return %c0_i32, %c0_i32_0 : i32, i32
  }
  func.func @transform_2(%arg0: i32) -> (i32, i32) {
    %c0_i32 = arith.constant 0 : i32
    %c0_i32_0 = arith.constant 0 : i32
    %c0_i32_1 = arith.constant 0 : i32
    return %c0_i32, %c0_i32_0 : i32, i32
  }
  func.func @transform_3(%arg0: i32) -> (i32, i32) {
    %c0_i32 = arith.constant 0 : i32
    %c0_i32_0 = arith.constant 0 : i32
    %c0_i32_1 = arith.constant 0 : i32
    return %c0_i32, %c0_i32_0 : i32, i32
  }
  func.func @transform_4(%arg0: i32) -> (i32, i32) {
    %c0_i32 = arith.constant 0 : i32
    %c0_i32_0 = arith.constant 0 : i32
    %c0_i32_1 = arith.constant 0 : i32
    return %c0_i32, %c0_i32_0 : i32, i32
  }
  func.func @transform_5(%arg0: i32) -> (i32, i32) {
    %c0_i32 = arith.constant 0 : i32
    %c0_i32_0 = arith.constant 0 : i32
    return %arg0, %c0_i32 : i32, i32
  }
}

module attributes {stable_mosaic.version = 11 : i64} {
  func.func @_conv_stats_kernel(%arg0: i32, %arg1: memref<1x18x18x8xf32, #tpu.memory_space<vmem>>, %arg2: memref<3x3x8x8xf32, #tpu.memory_space<vmem>>, %arg3: memref<1x256x8xf32, #tpu.memory_space<vmem>>, %arg4: memref<1x8xf32, #tpu.memory_space<vmem>>, %arg5: memref<1x8xf32, #tpu.memory_space<vmem>>, %arg6: memref<256x8xf32, #tpu.memory_space<vmem>>) attributes {dimension_semantics = [#tpu.dimension_semantics<arbitrary>], iteration_bounds = array<i64: 2>, scalar_prefetch = 0 : i64, scratch_operands = 1 : i64, tpu.core_type = #tpu.core_type<tc>, window_params = [{transform_indices = @transform_0, window_bounds = array<i64: 1, 18, 18, 8>}, {pipeline_mode = #tpu.pipeline_mode<synchronous>, transform_indices = @transform_1, window_bounds = array<i64: 3, 3, 8, 8>}, {transform_indices = @transform_2, window_bounds = array<i64: 1, 256, 8>}, {pipeline_mode = #tpu.pipeline_mode<synchronous>, transform_indices = @transform_3, window_bounds = array<i64: 1, 8>}, {pipeline_mode = #tpu.pipeline_mode<synchronous>, transform_indices = @transform_4, window_bounds = array<i64: 1, 8>}]} {
    %c0_i32 = arith.constant 0 : i32
    %0 = arith.cmpi eq, %arg0, %c0_i32 : i32
    %1 = arith.extui %0 : i1 to i32
    %c0_i32_0 = arith.constant 0 : i32
    %2 = arith.cmpi ne, %1, %c0_i32_0 : i32
    scf.if %2 {
      %cst_132 = arith.constant 0.000000e+00 : f32
      %100 = vector.broadcast %cst_132 : f32 to vector<1x8xf32>
      %c0_133 = arith.constant 0 : index
      %c0_134 = arith.constant 0 : index
      %101 = vector.load %arg4[%c0_133, %c0_134] : memref<1x8xf32, #tpu.memory_space<vmem>>, vector<1x8xf32>
      tpu.vector_store %arg4[%c0_133, %c0_134], %100 {strides = array<i32>} : memref<1x8xf32, #tpu.memory_space<vmem>>, vector<1x8xf32>,
      %cst_135 = arith.constant 0.000000e+00 : f32
      %102 = vector.broadcast %cst_135 : f32 to vector<1x8xf32>
      %c0_136 = arith.constant 0 : index
      %c0_137 = arith.constant 0 : index
      %103 = vector.load %arg5[%c0_136, %c0_137] : memref<1x8xf32, #tpu.memory_space<vmem>>, vector<1x8xf32>
      tpu.vector_store %arg5[%c0_136, %c0_137], %102 {strides = array<i32>} : memref<1x8xf32, #tpu.memory_space<vmem>>, vector<1x8xf32>,
    } else {
    }
    %cst = arith.constant 0.000000e+00 : f32
    %3 = vector.broadcast %cst : f32 to vector<256x8xf32>
    %c0 = arith.constant 0 : index
    %c0_1 = arith.constant 0 : index
    %4 = vector.load %arg6[%c0, %c0_1] : memref<256x8xf32, #tpu.memory_space<vmem>>, vector<256x8xf32>
    tpu.vector_store %arg6[%c0, %c0_1], %3 {strides = array<i32>} : memref<256x8xf32, #tpu.memory_space<vmem>>, vector<256x8xf32>,
    %c0_2 = arith.constant 0 : index
    %c0_3 = arith.constant 0 : index
    %c0_4 = arith.constant 0 : index
    %c0_5 = arith.constant 0 : index
    %5 = vector.load %arg1[%c0_2, %c0_3, %c0_4, %c0_5] : memref<1x18x18x8xf32, #tpu.memory_space<vmem>>, vector<1x16x16x8xf32>
    %6 = vector.shape_cast %5 : vector<1x16x16x8xf32> to vector<16x16x8xf32>
    %7 = vector.shape_cast %6 : vector<16x16x8xf32> to vector<256x8xf32>
    %c0_6 = arith.constant 0 : index
    %c0_7 = arith.constant 0 : index
    %8 = vector.load %arg6[%c0_6, %c0_7] : memref<256x8xf32, #tpu.memory_space<vmem>>, vector<256x8xf32>
    %c0_8 = arith.constant 0 : index
    %c0_9 = arith.constant 0 : index
    %c0_10 = arith.constant 0 : index
    %c0_11 = arith.constant 0 : index
    %9 = vector.load %arg2[%c0_8, %c0_9, %c0_10, %c0_11] : memref<3x3x8x8xf32, #tpu.memory_space<vmem>>, vector<1x1x8x8xf32>
    %10 = vector.shape_cast %9 : vector<1x1x8x8xf32> to vector<8x8xf32>
    %cst_12 = arith.constant dense<0.000000e+00> : vector<256x8xf32>
    %11 = tpu.matmul %7, %10, %cst_12 {dimension_numbers = #tpu.dot_dimension_numbers<[1], [0], [0], [1], [0, 0, 1, 1], [], []>} : vector<256x8xf32>, vector<8x8xf32>, vector<256x8xf32> -> vector<256x8xf32>
    %12 = arith.addf %8, %11 : vector<256x8xf32>
    %c0_13 = arith.constant 0 : index
    %c0_14 = arith.constant 0 : index
    %13 = vector.load %arg6[%c0_13, %c0_14] : memref<256x8xf32, #tpu.memory_space<vmem>>, vector<256x8xf32>
    tpu.vector_store %arg6[%c0_13, %c0_14], %12 {strides = array<i32>} : memref<256x8xf32, #tpu.memory_space<vmem>>, vector<256x8xf32>,
    %c0_15 = arith.constant 0 : index
    %c0_16 = arith.constant 0 : index
    %c1 = arith.constant 1 : index
    %c0_17 = arith.constant 0 : index
    %14 = vector.load %arg1[%c0_15, %c0_16, %c1, %c0_17] : memref<1x18x18x8xf32, #tpu.memory_space<vmem>>, vector<1x16x16x8xf32>
    %15 = vector.shape_cast %14 : vector<1x16x16x8xf32> to vector<16x16x8xf32>
    %16 = vector.shape_cast %15 : vector<16x16x8xf32> to vector<256x8xf32>
    %c0_18 = arith.constant 0 : index
    %c0_19 = arith.constant 0 : index
    %17 = vector.load %arg6[%c0_18, %c0_19] : memref<256x8xf32, #tpu.memory_space<vmem>>, vector<256x8xf32>
    %c0_20 = arith.constant 0 : index
    %c1_21 = arith.constant 1 : index
    %c0_22 = arith.constant 0 : index
    %c0_23 = arith.constant 0 : index
    %18 = vector.load %arg2[%c0_20, %c1_21, %c0_22, %c0_23] : memref<3x3x8x8xf32, #tpu.memory_space<vmem>>, vector<1x1x8x8xf32>
    %19 = vector.shape_cast %18 : vector<1x1x8x8xf32> to vector<8x8xf32>
    %cst_24 = arith.constant dense<0.000000e+00> : vector<256x8xf32>
    %20 = tpu.matmul %16, %19, %cst_24 {dimension_numbers = #tpu.dot_dimension_numbers<[1], [0], [0], [1], [0, 0, 1, 1], [], []>} : vector<256x8xf32>, vector<8x8xf32>, vector<256x8xf32> -> vector<256x8xf32>
    %21 = arith.addf %17, %20 : vector<256x8xf32>
    %c0_25 = arith.constant 0 : index
    %c0_26 = arith.constant 0 : index
    %22 = vector.load %arg6[%c0_25, %c0_26] : memref<256x8xf32, #tpu.memory_space<vmem>>, vector<256x8xf32>
    tpu.vector_store %arg6[%c0_25, %c0_26], %21 {strides = array<i32>} : memref<256x8xf32, #tpu.memory_space<vmem>>, vector<256x8xf32>,
    %c0_27 = arith.constant 0 : index
    %c0_28 = arith.constant 0 : index
    %c2 = arith.constant 2 : index
    %c0_29 = arith.constant 0 : index
    %23 = vector.load %arg1[%c0_27, %c0_28, %c2, %c0_29] : memref<1x18x18x8xf32, #tpu.memory_space<vmem>>, vector<1x16x16x8xf32>
    %24 = vector.shape_cast %23 : vector<1x16x16x8xf32> to vector<16x16x8xf32>
    %25 = vector.shape_cast %24 : vector<16x16x8xf32> to vector<256x8xf32>
    %c0_30 = arith.constant 0 : index
    %c0_31 = arith.constant 0 : index
    %26 = vector.load %arg6[%c0_30, %c0_31] : memref<256x8xf32, #tpu.memory_space<vmem>>, vector<256x8xf32>
    %c0_32 = arith.constant 0 : index
    %c2_33 = arith.constant 2 : index
    %c0_34 = arith.constant 0 : index
    %c0_35 = arith.constant 0 : index
    %27 = vector.load %arg2[%c0_32, %c2_33, %c0_34, %c0_35] : memref<3x3x8x8xf32, #tpu.memory_space<vmem>>, vector<1x1x8x8xf32>
    %28 = vector.shape_cast %27 : vector<1x1x8x8xf32> to vector<8x8xf32>
    %cst_36 = arith.constant dense<0.000000e+00> : vector<256x8xf32>
    %29 = tpu.matmul %25, %28, %cst_36 {dimension_numbers = #tpu.dot_dimension_numbers<[1], [0], [0], [1], [0, 0, 1, 1], [], []>} : vector<256x8xf32>, vector<8x8xf32>, vector<256x8xf32> -> vector<256x8xf32>
    %30 = arith.addf %26, %29 : vector<256x8xf32>
    %c0_37 = arith.constant 0 : index
    %c0_38 = arith.constant 0 : index
    %31 = vector.load %arg6[%c0_37, %c0_38] : memref<256x8xf32, #tpu.memory_space<vmem>>, vector<256x8xf32>
    tpu.vector_store %arg6[%c0_37, %c0_38], %30 {strides = array<i32>} : memref<256x8xf32, #tpu.memory_space<vmem>>, vector<256x8xf32>,
    %c0_39 = arith.constant 0 : index
    %c1_40 = arith.constant 1 : index
    %c0_41 = arith.constant 0 : index
    %c0_42 = arith.constant 0 : index
    %32 = vector.load %arg1[%c0_39, %c1_40, %c0_41, %c0_42] : memref<1x18x18x8xf32, #tpu.memory_space<vmem>>, vector<1x16x16x8xf32>
    %33 = vector.shape_cast %32 : vector<1x16x16x8xf32> to vector<16x16x8xf32>
    %34 = vector.shape_cast %33 : vector<16x16x8xf32> to vector<256x8xf32>
    %c0_43 = arith.constant 0 : index
    %c0_44 = arith.constant 0 : index
    %35 = vector.load %arg6[%c0_43, %c0_44] : memref<256x8xf32, #tpu.memory_space<vmem>>, vector<256x8xf32>
    %c1_45 = arith.constant 1 : index
    %c0_46 = arith.constant 0 : index
    %c0_47 = arith.constant 0 : index
    %c0_48 = arith.constant 0 : index
    %36 = vector.load %arg2[%c1_45, %c0_46, %c0_47, %c0_48] : memref<3x3x8x8xf32, #tpu.memory_space<vmem>>, vector<1x1x8x8xf32>
    %37 = vector.shape_cast %36 : vector<1x1x8x8xf32> to vector<8x8xf32>
    %cst_49 = arith.constant dense<0.000000e+00> : vector<256x8xf32>
    %38 = tpu.matmul %34, %37, %cst_49 {dimension_numbers = #tpu.dot_dimension_numbers<[1], [0], [0], [1], [0, 0, 1, 1], [], []>} : vector<256x8xf32>, vector<8x8xf32>, vector<256x8xf32> -> vector<256x8xf32>
    %39 = arith.addf %35, %38 : vector<256x8xf32>
    %c0_50 = arith.constant 0 : index
    %c0_51 = arith.constant 0 : index
    %40 = vector.load %arg6[%c0_50, %c0_51] : memref<256x8xf32, #tpu.memory_space<vmem>>, vector<256x8xf32>
    tpu.vector_store %arg6[%c0_50, %c0_51], %39 {strides = array<i32>} : memref<256x8xf32, #tpu.memory_space<vmem>>, vector<256x8xf32>,
    %c0_52 = arith.constant 0 : index
    %c1_53 = arith.constant 1 : index
    %c1_54 = arith.constant 1 : index
    %c0_55 = arith.constant 0 : index
    %41 = vector.load %arg1[%c0_52, %c1_53, %c1_54, %c0_55] : memref<1x18x18x8xf32, #tpu.memory_space<vmem>>, vector<1x16x16x8xf32>
    %42 = vector.shape_cast %41 : vector<1x16x16x8xf32> to vector<16x16x8xf32>
    %43 = vector.shape_cast %42 : vector<16x16x8xf32> to vector<256x8xf32>
    %c0_56 = arith.constant 0 : index
    %c0_57 = arith.constant 0 : index
    %44 = vector.load %arg6[%c0_56, %c0_57] : memref<256x8xf32, #tpu.memory_space<vmem>>, vector<256x8xf32>
    %c1_58 = arith.constant 1 : index
    %c1_59 = arith.constant 1 : index
    %c0_60 = arith.constant 0 : index
    %c0_61 = arith.constant 0 : index
    %45 = vector.load %arg2[%c1_58, %c1_59, %c0_60, %c0_61] : memref<3x3x8x8xf32, #tpu.memory_space<vmem>>, vector<1x1x8x8xf32>
    %46 = vector.shape_cast %45 : vector<1x1x8x8xf32> to vector<8x8xf32>
    %cst_62 = arith.constant dense<0.000000e+00> : vector<256x8xf32>
    %47 = tpu.matmul %43, %46, %cst_62 {dimension_numbers = #tpu.dot_dimension_numbers<[1], [0], [0], [1], [0, 0, 1, 1], [], []>} : vector<256x8xf32>, vector<8x8xf32>, vector<256x8xf32> -> vector<256x8xf32>
    %48 = arith.addf %44, %47 : vector<256x8xf32>
    %c0_63 = arith.constant 0 : index
    %c0_64 = arith.constant 0 : index
    %49 = vector.load %arg6[%c0_63, %c0_64] : memref<256x8xf32, #tpu.memory_space<vmem>>, vector<256x8xf32>
    tpu.vector_store %arg6[%c0_63, %c0_64], %48 {strides = array<i32>} : memref<256x8xf32, #tpu.memory_space<vmem>>, vector<256x8xf32>,
    %c0_65 = arith.constant 0 : index
    %c1_66 = arith.constant 1 : index
    %c2_67 = arith.constant 2 : index
    %c0_68 = arith.constant 0 : index
    %50 = vector.load %arg1[%c0_65, %c1_66, %c2_67, %c0_68] : memref<1x18x18x8xf32, #tpu.memory_space<vmem>>, vector<1x16x16x8xf32>
    %51 = vector.shape_cast %50 : vector<1x16x16x8xf32> to vector<16x16x8xf32>
    %52 = vector.shape_cast %51 : vector<16x16x8xf32> to vector<256x8xf32>
    %c0_69 = arith.constant 0 : index
    %c0_70 = arith.constant 0 : index
    %53 = vector.load %arg6[%c0_69, %c0_70] : memref<256x8xf32, #tpu.memory_space<vmem>>, vector<256x8xf32>
    %c1_71 = arith.constant 1 : index
    %c2_72 = arith.constant 2 : index
    %c0_73 = arith.constant 0 : index
    %c0_74 = arith.constant 0 : index
    %54 = vector.load %arg2[%c1_71, %c2_72, %c0_73, %c0_74] : memref<3x3x8x8xf32, #tpu.memory_space<vmem>>, vector<1x1x8x8xf32>
    %55 = vector.shape_cast %54 : vector<1x1x8x8xf32> to vector<8x8xf32>
    %cst_75 = arith.constant dense<0.000000e+00> : vector<256x8xf32>
    %56 = tpu.matmul %52, %55, %cst_75 {dimension_numbers = #tpu.dot_dimension_numbers<[1], [0], [0], [1], [0, 0, 1, 1], [], []>} : vector<256x8xf32>, vector<8x8xf32>, vector<256x8xf32> -> vector<256x8xf32>
    %57 = arith.addf %53, %56 : vector<256x8xf32>
    %c0_76 = arith.constant 0 : index
    %c0_77 = arith.constant 0 : index
    %58 = vector.load %arg6[%c0_76, %c0_77] : memref<256x8xf32, #tpu.memory_space<vmem>>, vector<256x8xf32>
    tpu.vector_store %arg6[%c0_76, %c0_77], %57 {strides = array<i32>} : memref<256x8xf32, #tpu.memory_space<vmem>>, vector<256x8xf32>,
    %c0_78 = arith.constant 0 : index
    %c2_79 = arith.constant 2 : index
    %c0_80 = arith.constant 0 : index
    %c0_81 = arith.constant 0 : index
    %59 = vector.load %arg1[%c0_78, %c2_79, %c0_80, %c0_81] : memref<1x18x18x8xf32, #tpu.memory_space<vmem>>, vector<1x16x16x8xf32>
    %60 = vector.shape_cast %59 : vector<1x16x16x8xf32> to vector<16x16x8xf32>
    %61 = vector.shape_cast %60 : vector<16x16x8xf32> to vector<256x8xf32>
    %c0_82 = arith.constant 0 : index
    %c0_83 = arith.constant 0 : index
    %62 = vector.load %arg6[%c0_82, %c0_83] : memref<256x8xf32, #tpu.memory_space<vmem>>, vector<256x8xf32>
    %c2_84 = arith.constant 2 : index
    %c0_85 = arith.constant 0 : index
    %c0_86 = arith.constant 0 : index
    %c0_87 = arith.constant 0 : index
    %63 = vector.load %arg2[%c2_84, %c0_85, %c0_86, %c0_87] : memref<3x3x8x8xf32, #tpu.memory_space<vmem>>, vector<1x1x8x8xf32>
    %64 = vector.shape_cast %63 : vector<1x1x8x8xf32> to vector<8x8xf32>
    %cst_88 = arith.constant dense<0.000000e+00> : vector<256x8xf32>
    %65 = tpu.matmul %61, %64, %cst_88 {dimension_numbers = #tpu.dot_dimension_numbers<[1], [0], [0], [1], [0, 0, 1, 1], [], []>} : vector<256x8xf32>, vector<8x8xf32>, vector<256x8xf32> -> vector<256x8xf32>
    %66 = arith.addf %62, %65 : vector<256x8xf32>
    %c0_89 = arith.constant 0 : index
    %c0_90 = arith.constant 0 : index
    %67 = vector.load %arg6[%c0_89, %c0_90] : memref<256x8xf32, #tpu.memory_space<vmem>>, vector<256x8xf32>
    tpu.vector_store %arg6[%c0_89, %c0_90], %66 {strides = array<i32>} : memref<256x8xf32, #tpu.memory_space<vmem>>, vector<256x8xf32>,
    %c0_91 = arith.constant 0 : index
    %c2_92 = arith.constant 2 : index
    %c1_93 = arith.constant 1 : index
    %c0_94 = arith.constant 0 : index
    %68 = vector.load %arg1[%c0_91, %c2_92, %c1_93, %c0_94] : memref<1x18x18x8xf32, #tpu.memory_space<vmem>>, vector<1x16x16x8xf32>
    %69 = vector.shape_cast %68 : vector<1x16x16x8xf32> to vector<16x16x8xf32>
    %70 = vector.shape_cast %69 : vector<16x16x8xf32> to vector<256x8xf32>
    %c0_95 = arith.constant 0 : index
    %c0_96 = arith.constant 0 : index
    %71 = vector.load %arg6[%c0_95, %c0_96] : memref<256x8xf32, #tpu.memory_space<vmem>>, vector<256x8xf32>
    %c2_97 = arith.constant 2 : index
    %c1_98 = arith.constant 1 : index
    %c0_99 = arith.constant 0 : index
    %c0_100 = arith.constant 0 : index
    %72 = vector.load %arg2[%c2_97, %c1_98, %c0_99, %c0_100] : memref<3x3x8x8xf32, #tpu.memory_space<vmem>>, vector<1x1x8x8xf32>
    %73 = vector.shape_cast %72 : vector<1x1x8x8xf32> to vector<8x8xf32>
    %cst_101 = arith.constant dense<0.000000e+00> : vector<256x8xf32>
    %74 = tpu.matmul %70, %73, %cst_101 {dimension_numbers = #tpu.dot_dimension_numbers<[1], [0], [0], [1], [0, 0, 1, 1], [], []>} : vector<256x8xf32>, vector<8x8xf32>, vector<256x8xf32> -> vector<256x8xf32>
    %75 = arith.addf %71, %74 : vector<256x8xf32>
    %c0_102 = arith.constant 0 : index
    %c0_103 = arith.constant 0 : index
    %76 = vector.load %arg6[%c0_102, %c0_103] : memref<256x8xf32, #tpu.memory_space<vmem>>, vector<256x8xf32>
    tpu.vector_store %arg6[%c0_102, %c0_103], %75 {strides = array<i32>} : memref<256x8xf32, #tpu.memory_space<vmem>>, vector<256x8xf32>,
    %c0_104 = arith.constant 0 : index
    %c2_105 = arith.constant 2 : index
    %c2_106 = arith.constant 2 : index
    %c0_107 = arith.constant 0 : index
    %77 = vector.load %arg1[%c0_104, %c2_105, %c2_106, %c0_107] : memref<1x18x18x8xf32, #tpu.memory_space<vmem>>, vector<1x16x16x8xf32>
    %78 = vector.shape_cast %77 : vector<1x16x16x8xf32> to vector<16x16x8xf32>
    %79 = vector.shape_cast %78 : vector<16x16x8xf32> to vector<256x8xf32>
    %c0_108 = arith.constant 0 : index
    %c0_109 = arith.constant 0 : index
    %80 = vector.load %arg6[%c0_108, %c0_109] : memref<256x8xf32, #tpu.memory_space<vmem>>, vector<256x8xf32>
    %c2_110 = arith.constant 2 : index
    %c2_111 = arith.constant 2 : index
    %c0_112 = arith.constant 0 : index
    %c0_113 = arith.constant 0 : index
    %81 = vector.load %arg2[%c2_110, %c2_111, %c0_112, %c0_113] : memref<3x3x8x8xf32, #tpu.memory_space<vmem>>, vector<1x1x8x8xf32>
    %82 = vector.shape_cast %81 : vector<1x1x8x8xf32> to vector<8x8xf32>
    %cst_114 = arith.constant dense<0.000000e+00> : vector<256x8xf32>
    %83 = tpu.matmul %79, %82, %cst_114 {dimension_numbers = #tpu.dot_dimension_numbers<[1], [0], [0], [1], [0, 0, 1, 1], [], []>} : vector<256x8xf32>, vector<8x8xf32>, vector<256x8xf32> -> vector<256x8xf32>
    %84 = arith.addf %80, %83 : vector<256x8xf32>
    %c0_115 = arith.constant 0 : index
    %c0_116 = arith.constant 0 : index
    %85 = vector.load %arg6[%c0_115, %c0_116] : memref<256x8xf32, #tpu.memory_space<vmem>>, vector<256x8xf32>
    tpu.vector_store %arg6[%c0_115, %c0_116], %84 {strides = array<i32>} : memref<256x8xf32, #tpu.memory_space<vmem>>, vector<256x8xf32>,
    %c0_117 = arith.constant 0 : index
    %c0_118 = arith.constant 0 : index
    %86 = vector.load %arg6[%c0_117, %c0_118] : memref<256x8xf32, #tpu.memory_space<vmem>>, vector<256x8xf32>
    %c0_119 = arith.constant 0 : index
    %c0_120 = arith.constant 0 : index
    %87 = vector.load %arg4[%c0_119, %c0_120] : memref<1x8xf32, #tpu.memory_space<vmem>>, vector<1x8xf32>
    %cst_121 = arith.constant dense<0.000000e+00> : vector<8xf32>
    %88 = vector.multi_reduction <add>, %86, %cst_121 [0] : vector<256x8xf32> to vector<8xf32>
    %89 = vector.shape_cast %88 : vector<8xf32> to vector<1x8xf32>
    %90 = arith.addf %87, %89 : vector<1x8xf32>
    %c0_122 = arith.constant 0 : index
    %c0_123 = arith.constant 0 : index
    %91 = vector.load %arg4[%c0_122, %c0_123] : memref<1x8xf32, #tpu.memory_space<vmem>>, vector<1x8xf32>
    tpu.vector_store %arg4[%c0_122, %c0_123], %90 {strides = array<i32>} : memref<1x8xf32, #tpu.memory_space<vmem>>, vector<1x8xf32>,
    %c0_124 = arith.constant 0 : index
    %c0_125 = arith.constant 0 : index
    %92 = vector.load %arg5[%c0_124, %c0_125] : memref<1x8xf32, #tpu.memory_space<vmem>>, vector<1x8xf32>
    %93 = arith.mulf %86, %86 : vector<256x8xf32>
    %cst_126 = arith.constant dense<0.000000e+00> : vector<8xf32>
    %94 = vector.multi_reduction <add>, %93, %cst_126 [0] : vector<256x8xf32> to vector<8xf32>
    %95 = vector.shape_cast %94 : vector<8xf32> to vector<1x8xf32>
    %96 = arith.addf %92, %95 : vector<1x8xf32>
    %c0_127 = arith.constant 0 : index
    %c0_128 = arith.constant 0 : index
    %97 = vector.load %arg5[%c0_127, %c0_128] : memref<1x8xf32, #tpu.memory_space<vmem>>, vector<1x8xf32>
    tpu.vector_store %arg5[%c0_127, %c0_128], %96 {strides = array<i32>} : memref<1x8xf32, #tpu.memory_space<vmem>>, vector<1x8xf32>,
    %98 = vector.shape_cast %86 : vector<256x8xf32> to vector<1x256x8xf32>
    %c0_129 = arith.constant 0 : index
    %c0_130 = arith.constant 0 : index
    %c0_131 = arith.constant 0 : index
    %99 = vector.load %arg3[%c0_129, %c0_130, %c0_131] : memref<1x256x8xf32, #tpu.memory_space<vmem>>, vector<1x256x8xf32>
    tpu.vector_store %arg3[%c0_129, %c0_130, %c0_131], %98 {strides = array<i32>} : memref<1x256x8xf32, #tpu.memory_space<vmem>>, vector<1x256x8xf32>,
    return
  }
  func.func @transform_0(%arg0: i32) -> (i32, i32, i32, i32) {
    %c0_i32 = arith.constant 0 : i32
    %c0_i32_0 = arith.constant 0 : i32
    %c0_i32_1 = arith.constant 0 : i32
    %c0_i32_2 = arith.constant 0 : i32
    return %arg0, %c0_i32, %c0_i32_0, %c0_i32_1 : i32, i32, i32, i32
  }
  func.func @transform_1(%arg0: i32) -> (i32, i32, i32, i32) {
    %c0_i32 = arith.constant 0 : i32
    %c0_i32_0 = arith.constant 0 : i32
    %c0_i32_1 = arith.constant 0 : i32
    %c0_i32_2 = arith.constant 0 : i32
    %c0_i32_3 = arith.constant 0 : i32
    return %c0_i32, %c0_i32_0, %c0_i32_1, %c0_i32_2 : i32, i32, i32, i32
  }
  func.func @transform_2(%arg0: i32) -> (i32, i32, i32) {
    %c0_i32 = arith.constant 0 : i32
    %c0_i32_0 = arith.constant 0 : i32
    %c0_i32_1 = arith.constant 0 : i32
    return %arg0, %c0_i32, %c0_i32_0 : i32, i32, i32
  }
  func.func @transform_3(%arg0: i32) -> (i32, i32) {
    %c0_i32 = arith.constant 0 : i32
    %c0_i32_0 = arith.constant 0 : i32
    %c0_i32_1 = arith.constant 0 : i32
    return %c0_i32, %c0_i32_0 : i32, i32
  }
  func.func @transform_4(%arg0: i32) -> (i32, i32) {
    %c0_i32 = arith.constant 0 : i32
    %c0_i32_0 = arith.constant 0 : i32
    %c0_i32_1 = arith.constant 0 : i32
    return %c0_i32, %c0_i32_0 : i32, i32
  }
}

</mosaic_0001>

<bundles_post_ra>
// kernel: double_convolution.5
= control target key start
LH: loop header
LB: loop body
LE: loop exit
PB: predicated region body
PF: predicated region fallthrough
CT: control target
= control target key end

     0   :  { %vm304_vm3 = vcmask 64512   ;;  %s1000_s1 = inlined_call_operand.vmem [shape: f32[1,8], index: 1, kind: input, shape index: {}]   ;;  %s1001_s2 = inlined_call_operand.vmem [shape: f32[1,8], index: 2, kind: input, shape index: {}]   ;;  %s1002_s3 = inlined_call_operand.vmem [shape: f32[1,8], index: 3, kind: input, shape index: {}]   ;;  %s1003_s4 = inlined_call_operand.vmem [shape: f32[1,8], index: 4, kind: input, shape index: {}]   ;;  %s1004_s0 = inlined_call_operand.vmem [shape: f32[512,8], index: 0, kind: input, shape index: {}]   ;;  %s1005_s5 = inlined_call_operand.vmem [shape: f32[512,8], index: 5, kind: output, shape index: {}]  }
   0x1   :  { %v20_v0 = vld [vmem:[%s1000_s1] sm:$0x1]  ;;  %v43_v18 = vld [vmem:[%s1004_s0 + $0x8] sm:$0xff]  ;;  %v44_v19 = vld [vmem:[%s1004_s0 + $0x10] sm:$0xff] }
   0x2   :  { %v22_v1 = vld [vmem:[%s1001_s2] sm:$0x1]  ;;  %v21_v2 = vmul.f32 0.001953125, %v20_v0  ;;  %v45_v22 = vld [vmem:[%s1004_s0 + $0x18] sm:$0xff]  ;;  %v47_v24 = vld [vmem:[%s1004_s0 + $0x28] sm:$0xff] }
   0x3   :  { %v23_v3 = vmul.f32 0.001953125, %v22_v1  ;;  %v26_v12 = vld [vmem:[%s1002_s3] sm:$0x1]  ;;  %v48_v25 = vld [vmem:[%s1004_s0 + $0x30] sm:$0xff]  ;;  %v49_v30 = vld [vmem:[%s1004_s0 + $0x38] sm:$0xff] }
   0x4   :  { %v24_v4 = vmul.f32 %v21_v2, %v21_v2  ;;  %v39_v16 = vld [vmem:[%s1003_s4] sm:$0x1]  ;;  %v51_v37 = vld [vmem:[%s1004_s0 + $0x48] sm:$0xff]  ;;  %v52_v38 = vld [vmem:[%s1004_s0 + $0x50] sm:$0xff] }
   0x5   :  { %v42_v17 = vld [vmem:[%s1004_s0] sm:$0xff]  ;;  %v53_v45 = vld [vmem:[%s1004_s0 + $0x58] sm:$0xff]  ;;  %v55_v55 = vld [vmem:[%s1004_s0 + $0x68] sm:$0xff] }
   0x6   :  { %v25_v5 = vsub.f32 %v23_v3, %v24_v4  ;;  %v46_v23 = vld [vmem:[%s1004_s0 + $0x20] sm:$0xff]  ;;  %v56_v59 = vld [vmem:[%s1004_s0 + $0x70] sm:$0xff]  ;;  %v57_v63 = vld [vmem:[%s1004_s0 + $0x78] sm:$0xff] }
   0x7   :  { %v50_v31 = vld [vmem:[%s1004_s0 + $0x40] sm:$0xff] }
   0x8   :  { %v27_v6 = vadd.f32 1e-05, %v25_v5  ;;  %v54_v50 = vld [vmem:[%s1004_s0 + $0x60] sm:$0xff] }
   0x9   :  { %v58_v3 = vld [vmem:[%s1004_s0 + $0x80] sm:$0xff] }
   0xa   :  { %373 = vrsqrt.f32 %v27_v6  ;;  %vm34_vm0 = vweird.f32 %v27_v6 }
  0x10   :  { %v374_v7 = vpop.eup %373 }
  0x11   :  { %v29_v8 = vmul.f32 %v374_v7, %v27_v6  ;;  %vm35_vm1 = vweird.f32 %v374_v7 }
  0x12   :  { %vm36_vm2 = vmor %vm34_vm0, %vm35_vm1 }
  0x13   :  { %v30_v9 = vmul.f32 %v374_v7, %v29_v8 }
  0x15   :  { %v31_v10 = vmul.f32 0.5, %v30_v9 }
  0x17   :  { %v32_v11 = vsub.f32 1.5, %v31_v10 }
  0x19   :  { %v33_v13 = vmul.f32 %v374_v7, %v32_v11  ;;  %v60_v11 = vld [vmem:[%s1004_s0 + $0x90] sm:$0xff] }
  0x1b   :  { %v37_v14 = vsel %vm36_vm2, %v374_v7, %v33_v13  ;;  %v59_v7 = vld [vmem:[%s1004_s0 + $0x88] sm:$0xff] }
  0x1c   :  { %v38_v15 = vmul.f32 %v37_v14, %v26_v12 }
  0x1e   :  { %v40_v20 = vmul.f32 %v38_v15, %v21_v2  ;;  %v426_v21 = vperm.slane %v38_v15, 0  ;;  %v61_v15 = vld [vmem:[%s1004_s0 + $0x98] sm:$0xff] }
  0x20   :  { %v41_v26 = vsub.f32 %v39_v16, %v40_v20  ;;  %v109_v27 = vmul.f32 %v426_v21, %v42_v17  ;;  %v110_v28 = vmul.f32 %v426_v21, %v43_v18  ;;  %v111_v29 = vmul.f32 %v426_v21, %v44_v19  ;;  %v62_v19 = vld [vmem:[%s1004_s0 + $0xa0] sm:$0xff] }
  0x21   :  { %v112_v32 = vmul.f32 %v426_v21, %v45_v22  ;;  %v113_v33 = vmul.f32 %v426_v21, %v46_v23  ;;  %v114_v34 = vmul.f32 %v426_v21, %v47_v24  ;;  %v115_v36 = vmul.f32 %v426_v21, %v48_v25  ;;  %v63_v24 = vld [vmem:[%s1004_s0 + $0xa8] sm:$0xff] }
  0x22   :  { %v452_v35 = vperm.slane %v41_v26, 0  ;;  %v116_v39 = vmul.f32 %v426_v21, %v49_v30  ;;  %v117_v40 = vmul.f32 %v426_v21, %v50_v31  ;;  %v118_v48 = vmul.f32 %v426_v21, %v51_v37  ;;  %v66_v37 = vld [vmem:[%s1004_s0 + $0xc0] sm:$0xff] }
  0x23   :  { %v119_v49 = vmul.f32 %v426_v21, %v52_v38  ;;  %v120_v58 = vmul.f32 %v426_v21, %v53_v45  ;;  %v121_v62 = vmul.f32 %v426_v21, %v54_v50  ;;  %v122_v2 = vmul.f32 %v426_v21, %v55_v55  ;;  %v68_v45 = vld [vmem:[%s1004_s0 + $0xd0] sm:$0xff] }
  0x24   :  { %v176_v41 = vadd.f32 %v452_v35, %v109_v27  ;;  %v177_v42 = vadd.f32 %v452_v35, %v110_v28  ;;  %v178_v43 = vadd.f32 %v452_v35, %v111_v29  ;;  %v179_v44 = vadd.f32 %v452_v35, %v112_v32  ;;  %v64_v28 = vld [vmem:[%s1004_s0 + $0xb0] sm:$0xff]  ;;  %v65_v32 = vld [vmem:[%s1004_s0 + $0xb8] sm:$0xff] }
  0x25   :  { %v180_v46 = vadd.f32 %v452_v35, %v113_v33  ;;  %v181_v47 = vadd.f32 %v452_v35, %v114_v34  ;;  %v182_v54 = vadd.f32 %v452_v35, %v115_v36  ;;  %v183_v57 = vadd.f32 %v452_v35, %v116_v39 }
  0x26   :  { %v240_v51 = vmax.f32 %v176_v41, 0.0  ;;  %v241_v52 = vmax.f32 %v177_v42, 0.0  ;;  %v242_v53 = vmax.f32 %v178_v43, 0.0  ;;  %v243_v56 = vmax.f32 %v179_v44, 0.0  ;;  %v67_v41 = vld [vmem:[%s1004_s0 + $0xc8] sm:$0xff] }
  0x27   :  { %v244_v60 = vmax.f32 %v180_v46, 0.0  ;;  %v184_v61 = vadd.f32 %v452_v35, %v117_v40  ;;  %v245_v0 = vmax.f32 %v181_v47, 0.0  ;;  %v185_v1 = vadd.f32 %v452_v35, %v118_v48 }
  0x28   :  { %305 = vst.msk [vmem:[%s1005_s5] sm:$0xff] %vm304_vm3, %v240_v51  ;;  %v246_v4 = vmax.f32 %v182_v54, 0.0  ;;  %v186_v5 = vadd.f32 %v452_v35, %v119_v49  ;;  %v123_v6 = vmul.f32 %v426_v21, %v56_v59  ;;  %v247_v8 = vmax.f32 %v183_v57, 0.0  ;;  %v69_v49 = vld [vmem:[%s1004_s0 + $0xd8] sm:$0xff]  ;;  %v71_v57 = vld [vmem:[%s1004_s0 + $0xe8] sm:$0xff] }
  0x29   :  { %306 = vst.msk [vmem:[%s1005_s5 + $0x8] sm:$0xff] %vm304_vm3, %v241_v52  ;;  %v187_v9 = vadd.f32 %v452_v35, %v120_v58  ;;  %v124_v10 = vmul.f32 %v426_v21, %v57_v63  ;;  %v248_v12 = vmax.f32 %v184_v61, 0.0  ;;  %v188_v13 = vadd.f32 %v452_v35, %v121_v62  ;;  %v72_v61 = vld [vmem:[%s1004_s0 + $0xf0] sm:$0xff] }
  0x2a   :  { %307 = vst.msk [vmem:[%s1005_s5 + $0x10] sm:$0xff] %vm304_vm3, %v242_v53  ;;  %v125_v14 = vmul.f32 %v426_v21, %v58_v3  ;;  %v249_v16 = vmax.f32 %v185_v1, 0.0  ;;  %v189_v17 = vadd.f32 %v452_v35, %v122_v2  ;;  %v126_v18 = vmul.f32 %v426_v21, %v59_v7  ;;  %v70_v53 = vld [vmem:[%s1004_s0 + $0xe0] sm:$0xff]  ;;  %v73_v1 = vld [vmem:[%s1004_s0 + $0xf8] sm:$0xff] }
  0x2b   :  { %308 = vst.msk [vmem:[%s1005_s5 + $0x18] sm:$0xff] %vm304_vm3, %v243_v56  ;;  %v250_v20 = vmax.f32 %v186_v5, 0.0  ;;  %v190_v22 = vadd.f32 %v452_v35, %v123_v6  ;;  %v127_v23 = vmul.f32 %v426_v21, %v60_v11  ;;  %v251_v25 = vmax.f32 %v187_v9, 0.0  ;;  %v74_v5 = vld [vmem:[%s1004_s0 + $0x100] sm:$0xff]  ;;  %v75_v9 = vld [vmem:[%s1004_s0 + $0x108] sm:$0xff] }
  0x2c   :  { %309 = vst.msk [vmem:[%s1005_s5 + $0x20] sm:$0xff] %vm304_vm3, %v244_v60  ;;  %v191_v26 = vadd.f32 %v452_v35, %v124_v10  ;;  %v128_v27 = vmul.f32 %v426_v21, %v61_v15  ;;  %v252_v29 = vmax.f32 %v188_v13, 0.0  ;;  %v192_v30 = vadd.f32 %v452_v35, %v125_v14  ;;  %v76_v13 = vld [vmem:[%s1004_s0 + $0x110] sm:$0xff] }
  0x2d   :  { %310 = vst.msk [vmem:[%s1005_s5 + $0x28] sm:$0xff] %vm304_vm3, %v245_v0  ;;  %v129_v31 = vmul.f32 %v426_v21, %v62_v19  ;;  %v253_v33 = vmax.f32 %v189_v17, 0.0  ;;  %v193_v34 = vadd.f32 %v452_v35, %v126_v18  ;;  %v130_v36 = vmul.f32 %v426_v21, %v63_v24  ;;  %v77_v17 = vld [vmem:[%s1004_s0 + $0x118] sm:$0xff] }
  0x2e   :  { %311 = vst.msk [vmem:[%s1005_s5 + $0x30] sm:$0xff] %vm304_vm3, %v246_v4  ;;  %v254_v38 = vmax.f32 %v190_v22, 0.0  ;;  %v194_v39 = vadd.f32 %v452_v35, %v127_v23  ;;  %v131_v40 = vmul.f32 %v426_v21, %v64_v28  ;;  %v255_v42 = vmax.f32 %v191_v26, 0.0  ;;  %v78_v22 = vld [vmem:[%s1004_s0 + $0x120] sm:$0xff]  ;;  %v79_v26 = vld [vmem:[%s1004_s0 + $0x128] sm:$0xff] }
  0x2f   :  { %312 = vst.msk [vmem:[%s1005_s5 + $0x38] sm:$0xff] %vm304_vm3, %v247_v8  ;;  %v195_v43 = vadd.f32 %v452_v35, %v128_v27  ;;  %v132_v44 = vmul.f32 %v426_v21, %v65_v32  ;;  %v256_v46 = vmax.f32 %v192_v30, 0.0  ;;  %v196_v47 = vadd.f32 %v452_v35, %v129_v31  ;;  %v80_v30 = vld [vmem:[%s1004_s0 + $0x130] sm:$0xff] }
  0x30   :  { %313 = vst.msk [vmem:[%s1005_s5 + $0x40] sm:$0xff] %vm304_vm3, %v248_v12  ;;  %v133_v48 = vmul.f32 %v426_v21, %v66_v37  ;;  %v257_v50 = vmax.f32 %v193_v34, 0.0  ;;  %v197_v51 = vadd.f32 %v452_v35, %v130_v36  ;;  %v134_v52 = vmul.f32 %v426_v21, %v67_v41  ;;  %v81_v34 = vld [vmem:[%s1004_s0 + $0x138] sm:$0xff] }
  0x31   :  { %314 = vst.msk [vmem:[%s1005_s5 + $0x48] sm:$0xff] %vm304_vm3, %v249_v16  ;;  %v258_v54 = vmax.f32 %v194_v39, 0.0  ;;  %v198_v55 = vadd.f32 %v452_v35, %v131_v40  ;;  %v135_v56 = vmul.f32 %v426_v21, %v68_v45  ;;  %v259_v58 = vmax.f32 %v195_v43, 0.0  ;;  %v82_v39 = vld [vmem:[%s1004_s0 + $0x140] sm:$0xff]  ;;  %v83_v43 = vld [vmem:[%s1004_s0 + $0x148] sm:$0xff] }
  0x32   :  { %315 = vst.msk [vmem:[%s1005_s5 + $0x50] sm:$0xff] %vm304_vm3, %v250_v20  ;;  %v199_v59 = vadd.f32 %v452_v35, %v132_v44  ;;  %v136_v60 = vmul.f32 %v426_v21, %v69_v49  ;;  %v260_v62 = vmax.f32 %v196_v47, 0.0  ;;  %v200_v63 = vadd.f32 %v452_v35, %v133_v48  ;;  %v84_v47 = vld [vmem:[%s1004_s0 + $0x150] sm:$0xff] }
  0x33   :  { %316 = vst.msk [vmem:[%s1005_s5 + $0x58] sm:$0xff] %vm304_vm3, %v251_v25  ;;  %v137_v0 = vmul.f32 %v426_v21, %v70_v53  ;;  %v261_v2 = vmax.f32 %v197_v51, 0.0  ;;  %v201_v3 = vadd.f32 %v452_v35, %v134_v52  ;;  %v138_v4 = vmul.f32 %v426_v21, %v71_v57  ;;  %v85_v51 = vld [vmem:[%s1004_s0 + $0x158] sm:$0xff] }
  0x34   :  { %317 = vst.msk [vmem:[%s1005_s5 + $0x60] sm:$0xff] %vm304_vm3, %v252_v29  ;;  %v262_v6 = vmax.f32 %v198_v55, 0.0  ;;  %v202_v7 = vadd.f32 %v452_v35, %v135_v56  ;;  %v139_v8 = vmul.f32 %v426_v21, %v72_v61  ;;  %v263_v10 = vmax.f32 %v199_v59, 0.0  ;;  %v86_v55 = vld [vmem:[%s1004_s0 + $0x160] sm:$0xff]  ;;  %v87_v59 = vld [vmem:[%s1004_s0 + $0x168] sm:$0xff] }
  0x35   :  { %318 = vst.msk [vmem:[%s1005_s5 + $0x68] sm:$0xff] %vm304_vm3, %v253_v33  ;;  %v203_v11 = vadd.f32 %v452_v35, %v136_v60  ;;  %v140_v12 = vmul.f32 %v426_v21, %v73_v1  ;;  %v264_v14 = vmax.f32 %v200_v63, 0.0  ;;  %v204_v15 = vadd.f32 %v452_v35, %v137_v0  ;;  %v88_v63 = vld [vmem:[%s1004_s0 + $0x170] sm:$0xff] }
  0x36   :  { %319 = vst.msk [vmem:[%s1005_s5 + $0x70] sm:$0xff] %vm304_vm3, %v254_v38  ;;  %v141_v16 = vmul.f32 %v426_v21, %v74_v5  ;;  %v265_v18 = vmax.f32 %v201_v3, 0.0  ;;  %v205_v19 = vadd.f32 %v452_v35, %v138_v4  ;;  %v142_v20 = vmul.f32 %v426_v21, %v75_v9  ;;  %v89_v3 = vld [vmem:[%s1004_s0 + $0x178] sm:$0xff] }
  0x37   :  { %320 = vst.msk [vmem:[%s1005_s5 + $0x78] sm:$0xff] %vm304_vm3, %v255_v42  ;;  %v266_v23 = vmax.f32 %v202_v7, 0.0  ;;  %v206_v24 = vadd.f32 %v452_v35, %v139_v8  ;;  %v143_v25 = vmul.f32 %v426_v21, %v76_v13  ;;  %v267_v27 = vmax.f32 %v203_v11, 0.0  ;;  %v90_v7 = vld [vmem:[%s1004_s0 + $0x180] sm:$0xff]  ;;  %v91_v11 = vld [vmem:[%s1004_s0 + $0x188] sm:$0xff] }
  0x38   :  { %321 = vst.msk [vmem:[%s1005_s5 + $0x80] sm:$0xff] %vm304_vm3, %v256_v46  ;;  %v207_v28 = vadd.f32 %v452_v35, %v140_v12  ;;  %v144_v29 = vmul.f32 %v426_v21, %v77_v17  ;;  %v268_v31 = vmax.f32 %v204_v15, 0.0  ;;  %v208_v32 = vadd.f32 %v452_v35, %v141_v16  ;;  %v105_v12 = vld [vmem:[%s1004_s0 + $0x1f8] sm:$0xff]  ;;  %v92_v16 = vld [vmem:[%s1004_s0 + $0x190] sm:$0xff] }
  0x39   :  { %322 = vst.msk [vmem:[%s1005_s5 + $0x88] sm:$0xff] %vm304_vm3, %v257_v50  ;;  %v145_v33 = vmul.f32 %v426_v21, %v78_v22  ;;  %v269_v36 = vmax.f32 %v205_v19, 0.0  ;;  %v209_v37 = vadd.f32 %v452_v35, %v142_v20  ;;  %v146_v38 = vmul.f32 %v426_v21, %v79_v26  ;;  %v93_v20 = vld [vmem:[%s1004_s0 + $0x198] sm:$0xff] }
  0x3a   :  { %323 = vst.msk [vmem:[%s1005_s5 + $0x90] sm:$0xff] %vm304_vm3, %v258_v54  ;;  %v270_v40 = vmax.f32 %v206_v24, 0.0  ;;  %v210_v41 = vadd.f32 %v452_v35, %v143_v25  ;;  %v147_v42 = vmul.f32 %v426_v21, %v80_v30  ;;  %v271_v44 = vmax.f32 %v207_v28, 0.0  ;;  %v94_v25 = vld [vmem:[%s1004_s0 + $0x1a0] sm:$0xff]  ;;  %v95_v30 = vld [vmem:[%s1004_s0 + $0x1a8] sm:$0xff] }
  0x3b   :  { %324 = vst.msk [vmem:[%s1005_s5 + $0x98] sm:$0xff] %vm304_vm3, %v259_v58  ;;  %v211_v45 = vadd.f32 %v452_v35, %v144_v29  ;;  %v148_v46 = vmul.f32 %v426_v21, %v81_v34  ;;  %v272_v48 = vmax.f32 %v208_v32, 0.0  ;;  %v212_v49 = vadd.f32 %v452_v35, %v145_v33  ;;  %v96_v34 = vld [vmem:[%s1004_s0 + $0x1b0] sm:$0xff] }
  0x3c   :  { %325 = vst.msk [vmem:[%s1005_s5 + $0xa0] sm:$0xff] %vm304_vm3, %v260_v62  ;;  %v149_v50 = vmul.f32 %v426_v21, %v82_v39  ;;  %v273_v52 = vmax.f32 %v209_v37, 0.0  ;;  %v213_v53 = vadd.f32 %v452_v35, %v146_v38  ;;  %v150_v54 = vmul.f32 %v426_v21, %v83_v43 }
  0x3d   :  { %326 = vst.msk [vmem:[%s1005_s5 + $0xa8] sm:$0xff] %vm304_vm3, %v261_v2  ;;  %v274_v56 = vmax.f32 %v210_v41, 0.0  ;;  %v214_v57 = vadd.f32 %v452_v35, %v147_v42  ;;  %v151_v58 = vmul.f32 %v426_v21, %v84_v47  ;;  %v275_v60 = vmax.f32 %v211_v45, 0.0 }
  0x3e   :  { %327 = vst.msk [vmem:[%s1005_s5 + $0xb0] sm:$0xff] %vm304_vm3, %v262_v6  ;;  %v215_v61 = vadd.f32 %v452_v35, %v148_v46  ;;  %v152_v62 = vmul.f32 %v426_v21, %v85_v51  ;;  %v276_v0 = vmax.f32 %v212_v49, 0.0  ;;  %v216_v1 = vadd.f32 %v452_v35, %v149_v50 }
  0x3f   :  { %328 = vst.msk [vmem:[%s1005_s5 + $0xb8] sm:$0xff] %vm304_vm3, %v263_v10  ;;  %v153_v2 = vmul.f32 %v426_v21, %v86_v55  ;;  %v277_v4 = vmax.f32 %v213_v53, 0.0  ;;  %v217_v5 = vadd.f32 %v452_v35, %v150_v54  ;;  %v154_v6 = vmul.f32 %v426_v21, %v87_v59 }
  0x40   :  { %329 = vst.msk [vmem:[%s1005_s5 + $0xc0] sm:$0xff] %vm304_vm3, %v264_v14  ;;  %v278_v8 = vmax.f32 %v214_v57, 0.0  ;;  %v218_v9 = vadd.f32 %v452_v35, %v151_v58  ;;  %v155_v10 = vmul.f32 %v426_v21, %v88_v63  ;;  %v279_v13 = vmax.f32 %v215_v61, 0.0 }
  0x41   :  { %330 = vst.msk [vmem:[%s1005_s5 + $0xc8] sm:$0xff] %vm304_vm3, %v265_v18  ;;  %v219_v14 = vadd.f32 %v452_v35, %v152_v62  ;;  %v156_v15 = vmul.f32 %v426_v21, %v89_v3  ;;  %v280_v17 = vmax.f32 %v216_v1, 0.0  ;;  %v220_v18 = vadd.f32 %v452_v35, %v153_v2 }
  0x42   :  { %331 = vst.msk [vmem:[%s1005_s5 + $0xd0] sm:$0xff] %vm304_vm3, %v266_v23  ;;  %v157_v19 = vmul.f32 %v426_v21, %v90_v7  ;;  %v281_v22 = vmax.f32 %v217_v5, 0.0  ;;  %v221_v23 = vadd.f32 %v452_v35, %v154_v6  ;;  %v158_v24 = vmul.f32 %v426_v21, %v91_v11 }
  0x43   :  { %332 = vst.msk [vmem:[%s1005_s5 + $0xd8] sm:$0xff] %vm304_vm3, %v267_v27  ;;  %v172_v26 = vmul.f32 %v426_v21, %v105_v12  ;;  %v282_v27 = vmax.f32 %v218_v9, 0.0  ;;  %v222_v28 = vadd.f32 %v452_v35, %v155_v10  ;;  %v159_v29 = vmul.f32 %v426_v21, %v92_v16 }
  0x44   :  { %333 = vst.msk [vmem:[%s1005_s5 + $0xe0] sm:$0xff] %vm304_vm3, %v268_v31  ;;  %v283_v31 = vmax.f32 %v219_v14, 0.0  ;;  %v223_v32 = vadd.f32 %v452_v35, %v156_v15  ;;  %v160_v33 = vmul.f32 %v426_v21, %v93_v20  ;;  %v284_v37 = vmax.f32 %v220_v18, 0.0 }
  0x45   :  { %334 = vst.msk [vmem:[%s1005_s5 + $0xe8] sm:$0xff] %vm304_vm3, %v269_v36  ;;  %v851_v36 = vadd.f32 %v452_v35, %v172_v26  ;;  %v224_v38 = vadd.f32 %v452_v35, %v157_v19  ;;  %v161_v39 = vmul.f32 %v426_v21, %v94_v25  ;;  %v285_v41 = vmax.f32 %v221_v23, 0.0 }
  0x46   :  { %335 = vst.msk [vmem:[%s1005_s5 + $0xf0] sm:$0xff] %vm304_vm3, %v270_v40  ;;  %v97_v40 = vld [vmem:[%s1004_s0 + $0x1b8] sm:$0xff]  ;;  %v225_v42 = vadd.f32 %v452_v35, %v158_v24  ;;  %v162_v43 = vmul.f32 %v426_v21, %v95_v30  ;;  %v286_v45 = vmax.f32 %v222_v28, 0.0  ;;  %v226_v46 = vadd.f32 %v452_v35, %v159_v29 }
  0x47   :  { %336 = vst.msk [vmem:[%s1005_s5 + $0xf8] sm:$0xff] %vm304_vm3, %v271_v44  ;;  %v98_v44 = vld [vmem:[%s1004_s0 + $0x1c0] sm:$0xff]  ;;  %v163_v47 = vmul.f32 %v426_v21, %v96_v34  ;;  %v287_v49 = vmax.f32 %v223_v32, 0.0  ;;  %v227_v50 = vadd.f32 %v452_v35, %v160_v33  ;;  %v164_v51 = vmul.f32 %v426_v21, %v97_v40 }
  0x48   :  { %337 = vst.msk [vmem:[%s1005_s5 + $0x100] sm:$0xff] %vm304_vm3, %v272_v48  ;;  %v99_v48 = vld [vmem:[%s1004_s0 + $0x1c8] sm:$0xff]  ;;  %v288_v53 = vmax.f32 %v224_v38, 0.0  ;;  %v228_v54 = vadd.f32 %v452_v35, %v161_v39  ;;  %v165_v55 = vmul.f32 %v426_v21, %v98_v44  ;;  %v289_v57 = vmax.f32 %v225_v42, 0.0 }
  0x49   :  { %338 = vst.msk [vmem:[%s1005_s5 + $0x108] sm:$0xff] %vm304_vm3, %v273_v52  ;;  %v100_v52 = vld [vmem:[%s1004_s0 + $0x1d0] sm:$0xff]  ;;  %v229_v58 = vadd.f32 %v452_v35, %v162_v43  ;;  %v166_v59 = vmul.f32 %v426_v21, %v99_v48  ;;  %v290_v61 = vmax.f32 %v226_v46, 0.0  ;;  %v230_v62 = vadd.f32 %v452_v35, %v163_v47 }
  0x4a   :  { %339 = vst.msk [vmem:[%s1005_s5 + $0x110] sm:$0xff] %vm304_vm3, %v274_v56  ;;  %v101_v56 = vld [vmem:[%s1004_s0 + $0x1d8] sm:$0xff]  ;;  %v167_v63 = vmul.f32 %v426_v21, %v100_v52  ;;  %v291_v1 = vmax.f32 %v227_v50, 0.0  ;;  %v231_v2 = vadd.f32 %v452_v35, %v164_v51  ;;  %v292_v5 = vmax.f32 %v228_v54, 0.0 }
  0x4b   :  { %340 = vst.msk [vmem:[%s1005_s5 + $0x118] sm:$0xff] %vm304_vm3, %v275_v60  ;;  %v102_v60 = vld [vmem:[%s1004_s0 + $0x1e0] sm:$0xff]  ;;  %v168_v3 = vmul.f32 %v426_v21, %v101_v56  ;;  %v232_v6 = vadd.f32 %v452_v35, %v165_v55  ;;  %v233_v9 = vadd.f32 %v452_v35, %v166_v59  ;;  %v294_v11 = vmax.f32 %v230_v62, 0.0 }
  0x4c   :  { %341 = vst.msk [vmem:[%s1005_s5 + $0x120] sm:$0xff] %vm304_vm3, %v276_v0  ;;  %v103_v0 = vld [vmem:[%s1004_s0 + $0x1e8] sm:$0xff]  ;;  %v169_v7 = vmul.f32 %v426_v21, %v102_v60  ;;  %v234_v12 = vadd.f32 %v452_v35, %v167_v63  ;;  %v295_v14 = vmax.f32 %v231_v2, 0.0  ;;  %v303_v25 = vmax.f32 %v851_v36, 0.0 }
  0x4d   :  { %342 = vst.msk [vmem:[%s1005_s5 + $0x128] sm:$0xff] %vm304_vm3, %v277_v4  ;;  %v104_v4 = vld [vmem:[%s1004_s0 + $0x1f0] sm:$0xff]  ;;  %v170_v10 = vmul.f32 %v426_v21, %v103_v0  ;;  %v235_v15 = vadd.f32 %v452_v35, %v168_v3  ;;  %v296_v16 = vmax.f32 %v232_v6, 0.0 }
  0x4e   :  { %343 = vst.msk [vmem:[%s1005_s5 + $0x130] sm:$0xff] %vm304_vm3, %v278_v8  ;;  %v293_v8 = vmax.f32 %v229_v58, 0.0  ;;  %v298_v19 = vmax.f32 %v234_v12, 0.0 }
  0x4f   :  { %344 = vst.msk [vmem:[%s1005_s5 + $0x138] sm:$0xff] %vm304_vm3, %v279_v13  ;;  %v171_v13 = vmul.f32 %v426_v21, %v104_v4  ;;  %v297_v21 = vmax.f32 %v233_v9, 0.0  ;;  %v237_v18 = vadd.f32 %v452_v35, %v170_v10 }
  0x50   :  { %345 = vst.msk [vmem:[%s1005_s5 + $0x140] sm:$0xff] %vm304_vm3, %v280_v17  ;;  %v236_v17 = vadd.f32 %v452_v35, %v169_v7 }
  0x51   :  { %346 = vst.msk [vmem:[%s1005_s5 + $0x148] sm:$0xff] %vm304_vm3, %v281_v22  ;;  %v238_v20 = vadd.f32 %v452_v35, %v171_v13  ;;  %v299_v22 = vmax.f32 %v235_v15, 0.0  ;;  %v301_v24 = vmax.f32 %v237_v18, 0.0 }
  0x52   :  { %347 = vst.msk [vmem:[%s1005_s5 + $0x150] sm:$0xff] %vm304_vm3, %v282_v27  ;;  %v300_v23 = vmax.f32 %v236_v17, 0.0 }
  0x53   :  { %348 = vst.msk [vmem:[%s1005_s5 + $0x158] sm:$0xff] %vm304_vm3, %v283_v31  ;;  %v302_v35 = vmax.f32 %v238_v20, 0.0 }
  0x54   :  { %349 = vst.msk [vmem:[%s1005_s5 + $0x160] sm:$0xff] %vm304_vm3, %v284_v37 }
  0x55   :  { %350 = vst.msk [vmem:[%s1005_s5 + $0x168] sm:$0xff] %vm304_vm3, %v285_v41 }
  0x56   :  { %351 = vst.msk [vmem:[%s1005_s5 + $0x170] sm:$0xff] %vm304_vm3, %v286_v45 }
  0x57   :  { %352 = vst.msk [vmem:[%s1005_s5 + $0x178] sm:$0xff] %vm304_vm3, %v287_v49 }
  0x58   :  { %353 = vst.msk [vmem:[%s1005_s5 + $0x180] sm:$0xff] %vm304_vm3, %v288_v53 }
  0x59   :  { %354 = vst.msk [vmem:[%s1005_s5 + $0x188] sm:$0xff] %vm304_vm3, %v289_v57 }
  0x5a   :  { %355 = vst.msk [vmem:[%s1005_s5 + $0x190] sm:$0xff] %vm304_vm3, %v290_v61 }
  0x5b   :  { %356 = vst.msk [vmem:[%s1005_s5 + $0x198] sm:$0xff] %vm304_vm3, %v291_v1 }
  0x5c   :  { %357 = vst.msk [vmem:[%s1005_s5 + $0x1a0] sm:$0xff] %vm304_vm3, %v292_v5 }
  0x5d   :  { %358 = vst.msk [vmem:[%s1005_s5 + $0x1a8] sm:$0xff] %vm304_vm3, %v293_v8 }
  0x5e   :  { %359 = vst.msk [vmem:[%s1005_s5 + $0x1b0] sm:$0xff] %vm304_vm3, %v294_v11 }
  0x5f   :  { %360 = vst.msk [vmem:[%s1005_s5 + $0x1b8] sm:$0xff] %vm304_vm3, %v295_v14 }
  0x60   :  { %361 = vst.msk [vmem:[%s1005_s5 + $0x1c0] sm:$0xff] %vm304_vm3, %v296_v16 }
  0x61   :  { %362 = vst.msk [vmem:[%s1005_s5 + $0x1c8] sm:$0xff] %vm304_vm3, %v297_v21 }
  0x62   :  { %363 = vst.msk [vmem:[%s1005_s5 + $0x1d0] sm:$0xff] %vm304_vm3, %v298_v19 }
  0x63   :  { %364 = vst.msk [vmem:[%s1005_s5 + $0x1d8] sm:$0xff] %vm304_vm3, %v299_v22 }
  0x64   :  { %365 = vst.msk [vmem:[%s1005_s5 + $0x1e0] sm:$0xff] %vm304_vm3, %v300_v23 }
  0x65   :  { %366 = vst.msk [vmem:[%s1005_s5 + $0x1e8] sm:$0xff] %vm304_vm3, %v301_v24 }
  0x66   :  { %367 = vst.msk [vmem:[%s1005_s5 + $0x1f0] sm:$0xff] %vm304_vm3, %v302_v35 }
  0x67   :  { %368 = vst.msk [vmem:[%s1005_s5 + $0x1f8] sm:$0xff] %vm304_vm3, %v303_v25 }

// kernel: double_convolution.4
= control target key start
LH: loop header
LB: loop body
LE: loop exit
PB: predicated region body
PF: predicated region fallthrough
CT: control target
= control target key end

     0   :  { %s4180_s15 = smov 0   ;;  %s5680_s0 = inlined_call_operand.vmem [shape: f32[2,20,20,4], index: 0, kind: input, shape index: {}]   ;;  %s5681_s1 = inlined_call_operand.vmem [shape: f32[3,3,4,8], index: 1, kind: input, shape index: {}]   ;;  %s5682_s2 = inlined_call_operand.vmem [shape: f32[2,256,8], index: 2, kind: output, shape index: {0}]   ;;  %s5683_s3 = inlined_call_operand.vmem [shape: f32[1,8], index: 3, kind: output, shape index: {1}]   ;;  %s5684_s4 = inlined_call_operand.vmem [shape: f32[1,8], index: 4, kind: output, shape index: {2}]  }
   0x1 LB: > { %s3622_s16 = sadd.s32 4294967295, %s4151_s15   ;;  %p3626_p0 = scmp.ge.s32.totalorder %s4151_s15, 1  ;;  %s4151_s15 = sphi %s4180_s15, %s15_s15  }
   0x2   : > { %p157_p1 = scmp.lt.s32.totalorder %s4151_s15, 3 }
   0x4   : > { %p158_p2 = pnand %p3626_p0, %p157_p1 }
   0x5   : > { %p183_p3 = scmp.lt.s32.totalorder (!%p158_p2), %s3622_s16, 1  ;;  %p3630_p4 = scmp.ne.s32.totalorder (!%p158_p2), %s3622_s16, 0 }
   0x6   : > { %161 = sbr.rel (%p158_p2) target bundleno = 777 (0x309), region = 28 }
   0xb   : > { %s184_s17 = scalar_select %p183_p3, %s3622_s16, 1 }
   0xc   : > { %196 = sbr.rel (%p3630_p4) target bundleno = 20 (0x14), region = 32 }
   0xd   : > { %s4134_s18 = smul.u32 480, %s184_s17  ;;  %s4130_s19 = sshll.u32 %s184_s17, 8 }
   0xe   : > { %s4191_s22 = scalar_lea.vmem %s5682_s2, %s4130_s19 }
   0xf   : > { %s4196_s25 = scalar_lea.vmem %s5680_s0, %s4134_s18 }
  0x11   : > { %vm197_vm0 = vcmask 57344   ;;  %v4153_v0 = vmov 0.0  }
  0x12   : > { %198 = vst.msk [vmem:[%s5683_s3] sm:$0x1] %vm197_vm0, %v4153_v0 }
  0x13   : > { %199 = vst.msk [vmem:[%s5684_s4] sm:$0x1] %vm197_vm0, %v4153_v0 }
  0x14 PF: > { %v297_v1 = vld [vmem:[%s5681_s1] sm:$0xf]  ;;  %vm395_vm1 = vcmask 1043456   ;;  %vm298_vm2 = vcmask 31744   ;;  %v3664_v4 = vld [vmem:[%s5681_s1 + $0x4] sm:$0xf] }
  0x15   : > { %v4208_v2 = vld [vmem:[%s4196_s25 + $0x60] sm:$0xff]  ;;  %4131 = vmatpush.msk.msra.mxu1 %vm395_vm1, %v297_v1  ;;  %4132 = vmatpush.msk.msra.mxu2 %vm395_vm1, %v297_v1  ;;  %v3698_v5 = vld [vmem:[%s5681_s1 + $0x8] sm:$0xf]  ;;  %v3764_v7 = vld [vmem:[%s5681_s1 + $0xc] sm:$0xf]  ;;  %vm200_vm3 = vcmask 64512  }
  0x16   : > { %v4211_v3 = vld [vmem:[%s4196_s25 + $0xc0] sm:$0xff]  ;;  %3640 = vmatmul.msk.f32.vlgmr.msra.gmra.mxu1 %vm298_vm2, %v4208_v2  ;;  %4133 = vmatpush.msk.msra.mxu3 %vm395_vm1, %v297_v1  ;;  %v3830_v9 = vld [vmem:[%s5681_s1 + $0x10] sm:$0xf]  ;;  %v4245_v10 = vld [vmem:[%s4196_s25 + $0x68] sm:$0xff]  ;;  %v4154_v53 = vmov 0.0   ;;  %vm3417_vm4 = vcmask 57344  }
  0x17   : > { %3648 = vmatmul.msk.f32.vlgmr.msra.gmra.mxu2 %vm298_vm2, %v4211_v3  ;;  %v4226_v6 = vld [vmem:[%s4196_s25 + $0x120] sm:$0xff]  ;;  %3665 = vmatpush.msk.msrb.mxu1 %vm395_vm1, %v3664_v4  ;;  %v4248_v11 = vld [vmem:[%s4196_s25 + $0xc8] sm:$0xff]  ;;  %v4262_v14 = vld [vmem:[%s4196_s25 + $0x78] sm:$0xff]  ;;  %209 = vst.msk [vmem:[#allocation2 + $0x40] sm:$0xff] %vm200_vm3, %v4154_v53 }
  0x18   : > { %3699 = vmatpush.msk.msrb.mxu2 %vm395_vm1, %v3698_v5  ;;  %3631 = vmatpush.msk.msra.mxu0 %vm395_vm1, %v297_v1  ;;  %v233_v8 = vld [vmem:[%s4196_s25] sm:$0xff]  ;;  %v4255_v12 = vld [vmem:[%s4196_s25 + $0x128] sm:$0xff]  ;;  %v4265_v15 = vld [vmem:[%s4196_s25 + $0xd8] sm:$0xff]  ;;  %201 = vst.msk [vmem:[#allocation2] sm:$0xff] %vm200_vm3, %v4154_v53 }
  0x19   : > { %3656 = vmatmul.msk.f32.vlgmr.msra.gmra.mxu3 %vm298_vm2, %v4226_v6  ;;  %3632 = vmatmul.msk.f32.vlgmr.msra.gmra.mxu0 %vm298_vm2, %v233_v8  ;;  %v234_v13 = vld [vmem:[%s4196_s25 + $0x8] sm:$0xff]  ;;  %v4272_v16 = vld [vmem:[%s4196_s25 + $0x138] sm:$0xff]  ;;  %v4279_v18 = vld [vmem:[%s4196_s25 + $0x80] sm:$0xff]  ;;  %202 = vst.msk [vmem:[#allocation2 + $0x8] sm:$0xff] %vm200_vm3, %v4154_v53 }
  0x1a   : > { %3765 = vmatpush.msk.msrb.mxu3 %vm395_vm1, %v3764_v7  ;;  %3831 = vmatpush.msk.msrb.mxu0 %vm395_vm1, %v3830_v9  ;;  %v235_v17 = vld [vmem:[%s4196_s25 + $0x18] sm:$0xff]  ;;  %v4282_v19 = vld [vmem:[%s4196_s25 + $0xe0] sm:$0xff]  ;;  %v4293_v22 = vld [vmem:[%s4196_s25 + $0x90] sm:$0xff]  ;;  %203 = vst.msk [vmem:[#allocation2 + $0x10] sm:$0xff] %vm200_vm3, %v4154_v53 }
  0x1b   : > { %v260_v20 = vld [vmem:[%s4196_s25 + $0x140] sm:$0xff]  ;;  %v4296_v23 = vld [vmem:[%s4196_s25 + $0xf0] sm:$0xff]  ;;  %v3962_v27 = vld [vmem:[%s5681_s1 + $0x18] sm:$0xf]  ;;  %204 = vst.msk [vmem:[#allocation2 + $0x18] sm:$0xff] %vm200_vm3, %v4154_v53 }
  0x1c   : > { %v236_v21 = vld [vmem:[%s4196_s25 + $0x20] sm:$0xff]  ;;  %v261_v24 = vld [vmem:[%s4196_s25 + $0x150] sm:$0xff]  ;;  %3963 = vmatpush.msk.msra.mxu2 %vm395_vm1, %v3962_v27  ;;  %v4315_v28 = vld [vmem:[%s4196_s25 + $0x98] sm:$0xff]  ;;  %205 = vst.msk [vmem:[#allocation2 + $0x20] sm:$0xff] %vm200_vm3, %v4154_v53 }
  0x1d   : > { %v237_v25 = vld [vmem:[%s4196_s25 + $0x30] sm:$0xff]  ;;  %v4318_v29 = vld [vmem:[%s4196_s25 + $0xf8] sm:$0xff]  ;;  %v4333_v33 = vld [vmem:[%s4196_s25 + $0xa8] sm:$0xff]  ;;  %206 = vst.msk [vmem:[#allocation2 + $0x28] sm:$0xff] %vm200_vm3, %v4154_v53 }
  0x1e   : > { %3641 = vmatmul.msk.f32.gmra.mxu1 %vm298_vm2, %v4245_v10  ;;  %v3896_v26 = vld [vmem:[%s5681_s1 + $0x14] sm:$0xf]  ;;  %v262_v30 = vld [vmem:[%s4196_s25 + $0x158] sm:$0xff]  ;;  %v4336_v34 = vld [vmem:[%s4196_s25 + $0x108] sm:$0xff]  ;;  %207 = vst.msk [vmem:[#allocation2 + $0x30] sm:$0xff] %vm200_vm3, %v4154_v53 }
  0x1f   : > { %3649 = vmatmul.msk.f32.gmra.mxu2 %vm298_vm2, %v4248_v11  ;;  %3897 = vmatpush.msk.msra.mxu1 %vm395_vm1, %v3896_v26  ;;  %v238_v31 = vld [vmem:[%s4196_s25 + $0x38] sm:$0xff]  ;;  %v263_v35 = vld [vmem:[%s4196_s25 + $0x168] sm:$0xff]  ;;  %v4347_v37 = vld [vmem:[%s4196_s25 + $0xb0] sm:$0xff]  ;;  %208 = vst.msk [vmem:[#allocation2 + $0x38] sm:$0xff] %vm200_vm3, %v4154_v53 }
  0x20   : > { %v4028_v32 = vld [vmem:[%s5681_s1 + $0x1c] sm:$0xf]  ;;  %v239_v36 = vld [vmem:[%s4196_s25 + $0x48] sm:$0xff]  ;;  %v4350_v38 = vld [vmem:[%s4196_s25 + $0x110] sm:$0xff]  ;;  %210 = vst.msk [vmem:[#allocation2 + $0x48] sm:$0xff] %vm200_vm3, %v4154_v53 }
  0x21   : > { %3657 = vmatmul.msk.f32.gmra.mxu3 %vm298_vm2, %v4255_v12  ;;  %3633 = vmatmul.msk.f32.gmra.mxu0 %vm298_vm2, %v234_v13  ;;  %v264_v39 = vld [vmem:[%s4196_s25 + $0x170] sm:$0xff]  ;;  %v4094_v41 = vld [vmem:[%s5681_s1 + $0x20] sm:$0xf]  ;;  %v918_v43 = vld [vmem:[%s4196_s25 + $0x4] sm:$0xff]  ;;  %211 = vst.msk [vmem:[#allocation2 + $0x50] sm:$0xff] %vm200_vm3, %v4154_v53 }
  0x22   : > { %4029 = vmatpush.msk.msra.mxu3 %vm395_vm1, %v4028_v32  ;;  %v240_v40 = vld [vmem:[%s4196_s25 + $0x50] sm:$0xff]  ;;  %4095 = vmatpush.msk.msra.mxu0 %vm395_vm1, %v4094_v41  ;;  %v576_v42 = vld [vmem:[%s4196_s25 + $0x2] sm:$0xff]  ;;  %v3799_v47 = vld [vmem:[%s4196_s25 + $0x3a] sm:$0xff]  ;;  %212 = vst.msk [vmem:[#allocation2 + $0x58] sm:$0xff] %vm200_vm3, %v4154_v53 }
  0x23   : > { %v3798_v44 = vld [vmem:[%s4196_s25 + $0x32] sm:$0xff]  ;;  %v577_v45 = vld [vmem:[%s4196_s25 + $0xa] sm:$0xff]  ;;  %v578_v48 = vld [vmem:[%s4196_s25 + $0x1a] sm:$0xff]  ;;  %213 = vst.msk [vmem:[#allocation2 + $0x60] sm:$0xff] %vm200_vm3, %v4154_v53 }
  0x24   : > { %v919_v46 = vld [vmem:[%s4196_s25 + $0xc] sm:$0xff]  ;;  %v920_v49 = vld [vmem:[%s4196_s25 + $0x1c] sm:$0xff]  ;;  %v921_v52 = vld [vmem:[%s4196_s25 + $0x24] sm:$0xff]  ;;  %214 = vst.msk [vmem:[#allocation2 + $0x68] sm:$0xff] %vm200_vm3, %v4154_v53 }
  0x25   : > { %v3800_v50 = vld [vmem:[%s4196_s25 + $0x4a] sm:$0xff]  ;;  %v579_v51 = vld [vmem:[%s4196_s25 + $0x22] sm:$0xff]  ;;  %v3801_v54 = vld [vmem:[%s4196_s25 + $0x52] sm:$0xff]  ;;  %215 = vst.msk [vmem:[#allocation2 + $0x70] sm:$0xff] %vm200_vm3, %v4154_v53 }
  0x26   : > { %3642 = vmatmul.msk.f32.gmra.mxu1 %vm298_vm2, %v4262_v14  ;;  %v922_v55 = vld [vmem:[%s4196_s25 + $0x34] sm:$0xff]  ;;  %v3802_v56 = vld [vmem:[%s4196_s25 + $0x62] sm:$0xff]  ;;  %216 = vst.msk [vmem:[#allocation2 + $0x78] sm:$0xff] %vm200_vm3, %v4154_v53  ;;  %v3803_v58 = vld [vmem:[%s4196_s25 + $0x6a] sm:$0xff] }
  0x27   : > { %3650 = vmatmul.msk.f32.gmra.mxu2 %vm298_vm2, %v4265_v15  ;;  %v923_v57 = vld [vmem:[%s4196_s25 + $0x3c] sm:$0xff]  ;;  %217 = vst.msk [vmem:[#allocation2 + $0x80] sm:$0xff] %vm200_vm3, %v4154_v53  ;;  %v924_v59 = vld [vmem:[%s4196_s25 + $0x4c] sm:$0xff]  ;;  %v925_v61 = vld [vmem:[%s4196_s25 + $0x54] sm:$0xff] }
  0x28   : > { %218 = vst.msk [vmem:[#allocation2 + $0x88] sm:$0xff] %vm200_vm3, %v4154_v53  ;;  %v4437_v60 = vld [vmem:[%s4196_s25 + $0x7a] sm:$0xff]  ;;  %v4452_v62 = vld [vmem:[%s4196_s25 + $0x82] sm:$0xff]  ;;  %v4463_v7 = vld [vmem:[%s4196_s25 + $0x92] sm:$0xff] }
  0x29   : > { %3658 = vmatmul.msk.f32.gmra.mxu3 %vm298_vm2, %v4272_v16  ;;  %3634 = vmatmul.msk.f32.gmra.mxu0 %vm298_vm2, %v235_v17  ;;  %219 = vst.msk [vmem:[#allocation2 + $0x90] sm:$0xff] %vm200_vm3, %v4154_v53  ;;  %v273_v63 = vld [vmem:[#allocation2 + $0x40] sm:$0xff]  ;;  %v275_v32 = vld [vmem:[#allocation2 + $0x50] sm:$0xff] }
  0x2a   : > { %220 = vst.msk [vmem:[#allocation2 + $0x98] sm:$0xff] %vm200_vm3, %v4154_v53  ;;  %v926_v1 = vld [vmem:[%s4196_s25 + $0x64] sm:$0xff]  ;;  %v4476_v27 = vld [vmem:[%s4196_s25 + $0x9a] sm:$0xff] }
  0x2b   : > { %221 = vst.msk [vmem:[#allocation2 + $0xa0] sm:$0xff] %vm200_vm3, %v4154_v53  ;;  %v265_v4 = vld [vmem:[#allocation2] sm:$0xff] }
  0x2c   : > { %222 = vst.msk [vmem:[#allocation2 + $0xa8] sm:$0xff] %vm200_vm3, %v4154_v53  ;;  %v928_v41 = vld [vmem:[%s4196_s25 + $0x7c] sm:$0xff] }
  0x2d   : > { %223 = vst.msk [vmem:[#allocation2 + $0xb0] sm:$0xff] %vm200_vm3, %v4154_v53 }
  0x2e   : > { %3643 = vmatmul.msk.f32.gmra.mxu1 %vm298_vm2, %v4279_v18  ;;  %224 = vst.msk [vmem:[#allocation2 + $0xb8] sm:$0xff] %vm200_vm3, %v4154_v53  ;;  %v281_v8 = vld [vmem:[#allocation2 + $0x80] sm:$0xff] }
  0x2f   : > { %3651 = vmatmul.msk.f32.gmra.mxu2 %vm298_vm2, %v4282_v19  ;;  %225 = vst.msk [vmem:[#allocation2 + $0xc0] sm:$0xff] %vm200_vm3, %v4154_v53 }
  0x30   : > { %226 = vst.msk [vmem:[#allocation2 + $0xc8] sm:$0xff] %vm200_vm3, %v4154_v53 }
  0x31   : > { %3659 = vmatmul.msk.f32.gmra.mxu3 %vm298_vm2, %v260_v20  ;;  %3635 = vmatmul.msk.f32.gmra.mxu0 %vm298_vm2, %v236_v21  ;;  %227 = vst.msk [vmem:[#allocation2 + $0xd0] sm:$0xff] %vm200_vm3, %v4154_v53  ;;  %v927_v20 = vld [vmem:[%s4196_s25 + $0x6c] sm:$0xff] }
  0x32   : > { %228 = vst.msk [vmem:[#allocation2 + $0xd8] sm:$0xff] %vm200_vm3, %v4154_v53 }
  0x33   : > { %229 = vst.msk [vmem:[#allocation2 + $0xe0] sm:$0xff] %vm200_vm3, %v4154_v53 }
  0x34   : > { %230 = vst.msk [vmem:[#allocation2 + $0xe8] sm:$0xff] %vm200_vm3, %v4154_v53 }
  0x35   : > { %231 = vst.msk [vmem:[#allocation2 + $0xf0] sm:$0xff] %vm200_vm3, %v4154_v53 }
  0x36   : > { %3644 = vmatmul.msk.f32.gmra.mxu1 %vm298_vm2, %v4293_v22  ;;  %232 = vst.msk [vmem:[#allocation2 + $0xf8] sm:$0xff] %vm200_vm3, %v4154_v53  ;;  %v289_v17 = vld [vmem:[#allocation2 + $0xc0] sm:$0xff] }
  0x37   : > { %3652 = vmatmul.msk.f32.gmra.mxu2 %vm298_vm2, %v4296_v23 }
  0x39   : > { %3660 = vmatmul.msk.f32.gmra.mxu3 %vm298_vm2, %v261_v24  ;;  %3636 = vmatmul.msk.f32.gmra.mxu0 %vm298_vm2, %v237_v25 }
  0x3e   : > { %3645 = vmatmul.msk.f32.gmra.mxu1 %vm298_vm2, %v4315_v28 }
  0x3f   : > { %3653 = vmatmul.msk.f32.gmra.mxu2 %vm298_vm2, %v4318_v29 }
  0x41   : > { %3661 = vmatmul.msk.f32.gmra.mxu3 %vm298_vm2, %v262_v30  ;;  %3637 = vmatmul.msk.f32.gmra.mxu0 %vm298_vm2, %v238_v31  ;;  %v282_v30 = vld [vmem:[#allocation2 + $0x88] sm:$0xff] }
  0x46   : > { %3646 = vmatmul.msk.f32.gmra.mxu1 %vm298_vm2, %v4333_v33 }
  0x47   : > { %3654 = vmatmul.msk.f32.gmra.mxu2 %vm298_vm2, %v4336_v34 }
  0x49   : > { %3662 = vmatmul.msk.f32.gmra.mxu3 %vm298_vm2, %v263_v35  ;;  %3638 = vmatmul.msk.f32.gmra.mxu0 %vm298_vm2, %v239_v36 }
  0x4e   : > { %3647 = vmatmul.msk.f32.gmra.mxu1 %vm298_vm2, %v4347_v37 }
  0x4f   : > { %3655 = vmatmul.msk.f32.gmra.mxu2 %vm298_vm2, %v4350_v38 }
  0x51   : > { %3663 = vmatmul.msk.f32.gmra.mxu3 %vm298_vm2, %v264_v39  ;;  %3639 = vmatmul.msk.f32.gmra.mxu0 %vm298_vm2, %v240_v40  ;;  %v290_v39 = vld [vmem:[#allocation2 + $0xc8] sm:$0xff] }
  0x56   : > { %3666 = vmatmul.msk.f32.vlgmr.msrb.gmra.mxu1 %vm298_vm2, %v576_v42 }
  0x57   : > { %3700 = vmatmul.msk.f32.vlgmr.msrb.gmra.mxu2 %vm298_vm2, %v918_v43 }
  0x59   : > { %3766 = vmatmul.msk.f32.vlgmr.msrb.gmra.mxu3 %vm298_vm2, %v237_v25  ;;  %3832 = vmatmul.msk.f32.vlgmr.msrb.gmra.mxu0 %vm298_vm2, %v3798_v44  ;;  %v266_v25 = vld [vmem:[#allocation2 + $0x8] sm:$0xff] }
  0x5e   : > { %3667 = vmatmul.msk.f32.gmra.mxu1 %vm298_vm2, %v577_v45 }
  0x5f   : > { %3701 = vmatmul.msk.f32.gmra.mxu2 %vm298_vm2, %v919_v46  ;;  %v4491_v46 = vld [vmem:[%s4196_s25 + $0xaa] sm:$0xff] }
  0x61   : > { %3767 = vmatmul.msk.f32.gmra.mxu3 %vm298_vm2, %v238_v31  ;;  %3833 = vmatmul.msk.f32.gmra.mxu0 %vm298_vm2, %v3799_v47 }
  0x66   : > { %3668 = vmatmul.msk.f32.gmra.mxu1 %vm298_vm2, %v578_v48 }
  0x67   : > { %3702 = vmatmul.msk.f32.gmra.mxu2 %vm298_vm2, %v920_v49  ;;  %v276_v49 = vld [vmem:[#allocation2 + $0x58] sm:$0xff] }
  0x69   : > { %3768 = vmatmul.msk.f32.gmra.mxu3 %vm298_vm2, %v239_v36  ;;  %3834 = vmatmul.msk.f32.gmra.mxu0 %vm298_vm2, %v3800_v50 }
  0x6e   : > { %3669 = vmatmul.msk.f32.gmra.mxu1 %vm298_vm2, %v579_v51 }
  0x6f   : > { %3703 = vmatmul.msk.f32.gmra.mxu2 %vm298_vm2, %v921_v52  ;;  %v291_v52 = vld [vmem:[#allocation2 + $0xd0] sm:$0xff] }
  0x71   : > { %3769 = vmatmul.msk.f32.gmra.mxu3 %vm298_vm2, %v240_v40  ;;  %3835 = vmatmul.msk.f32.gmra.mxu0 %vm298_vm2, %v3801_v54 }
  0x76   : > { %3670 = vmatmul.msk.f32.gmra.mxu1 %vm298_vm2, %v3798_v44  ;;  %v267_v44 = vld [vmem:[#allocation2 + $0x10] sm:$0xff] }
  0x77   : > { %3704 = vmatmul.msk.f32.gmra.mxu2 %vm298_vm2, %v922_v55 }
  0x79   : > { %3770 = vmatmul.msk.f32.gmra.mxu3 %vm298_vm2, %v4208_v2  ;;  %3836 = vmatmul.msk.f32.gmra.mxu0 %vm298_vm2, %v3802_v56 }
  0x7e   : > { %3671 = vmatmul.msk.f32.gmra.mxu1 %vm298_vm2, %v3799_v47  ;;  %v283_v47 = vld [vmem:[#allocation2 + $0x90] sm:$0xff] }
  0x7f   : > { %3705 = vmatmul.msk.f32.gmra.mxu2 %vm298_vm2, %v923_v57  ;;  %v268_v57 = vld [vmem:[#allocation2 + $0x18] sm:$0xff] }
  0x81   : > { %3771 = vmatmul.msk.f32.gmra.mxu3 %vm298_vm2, %v4245_v10  ;;  %3837 = vmatmul.msk.f32.gmra.mxu0 %vm298_vm2, %v3803_v58  ;;  %v274_v10 = vld [vmem:[#allocation2 + $0x48] sm:$0xff] }
  0x86   : > { %3672 = vmatmul.msk.f32.gmra.mxu1 %vm298_vm2, %v3800_v50 }
  0x87   : > { %3706 = vmatmul.msk.f32.gmra.mxu2 %vm298_vm2, %v924_v59  ;;  %v4506_v59 = vld [vmem:[%s4196_s25 + $0xb2] sm:$0xff] }
  0x89   : > { %3772 = vmatmul.msk.f32.gmra.mxu3 %vm298_vm2, %v4262_v14  ;;  %3838 = vmatmul.msk.f32.gmra.mxu0 %vm298_vm2, %v4437_v60 }
  0x8e   : > { %3673 = vmatmul.msk.f32.gmra.mxu1 %vm298_vm2, %v3801_v54  ;;  %v929_v54 = vld [vmem:[%s4196_s25 + $0x84] sm:$0xff] }
  0x8f   : > { %3707 = vmatmul.msk.f32.gmra.mxu2 %vm298_vm2, %v925_v61 }
  0x91   : > { %3773 = vmatmul.msk.f32.gmra.mxu3 %vm298_vm2, %v4279_v18  ;;  %3839 = vmatmul.msk.f32.gmra.mxu0 %vm298_vm2, %v4452_v62 }
  0x93   : > { %v440_v0 = vpop.f32.mrf.mxu1 }
  0x94   : > { %v520_v2 = vadd.f32 %v440_v0, %v273_v63  ;;  %v277_v63 = vld [vmem:[#allocation2 + $0x60] sm:$0xff] }
  0x96   : > { %552 = vst.msk [vmem:[#allocation2 + $0x40] sm:$0xff] %vm200_vm3, %v520_v2  ;;  %3674 = vmatmul.msk.f32.gmra.mxu1 %vm298_vm2, %v3802_v56  ;;  %v416_v5 = vpop.f32.mrf.mxu0 }
  0x97   : > { %3708 = vmatmul.msk.f32.gmra.mxu2 %vm298_vm2, %v926_v1  ;;  %v512_v9 = vadd.f32 %v416_v5, %v265_v4  ;;  %v292_v1 = vld [vmem:[#allocation2 + $0xd8] sm:$0xff] }
  0x98   : > { %v930_v4 = vld [vmem:[%s4196_s25 + $0x94] sm:$0xff] }
  0x99   : > { %3774 = vmatmul.msk.f32.gmra.mxu3 %vm298_vm2, %v4293_v22  ;;  %544 = vst.msk [vmem:[#allocation2] sm:$0xff] %vm200_vm3, %v512_v9  ;;  %3840 = vmatmul.msk.f32.gmra.mxu0 %vm298_vm2, %v4463_v7  ;;  %v269_v9 = vld [vmem:[#allocation2 + $0x20] sm:$0xff] }
  0x9a   : > { %v464_v13 = vpop.f32.mrf.mxu2 }
  0x9b   : > { %v528_v14 = vadd.f32 %v464_v13, %v281_v8  ;;  %v443_v18 = vpop.f32.mrf.mxu1  ;;  %v4521_v13 = vld [vmem:[%s4196_s25 + $0xc2] sm:$0xff] }
  0x9c   : > { %v521_v21 = vadd.f32 %v443_v18, %v274_v10  ;;  %v488_v24 = vpop.f32.mrf.mxu3  ;;  %v278_v18 = vld [vmem:[#allocation2 + $0x68] sm:$0xff] }
  0x9d   : > { %560 = vst.msk [vmem:[#allocation2 + $0x80] sm:$0xff] %vm200_vm3, %v528_v14  ;;  %v536_v26 = vadd.f32 %v488_v24, %v289_v17  ;;  %v285_v14 = vld [vmem:[#allocation2 + $0xa0] sm:$0xff] }
  0x9e   : > { %553 = vst.msk [vmem:[#allocation2 + $0x48] sm:$0xff] %vm200_vm3, %v521_v21  ;;  %3675 = vmatmul.msk.f32.gmra.mxu1 %vm298_vm2, %v3803_v58  ;;  %v419_v22 = vpop.f32.mrf.mxu0  ;;  %v293_v21 = vld [vmem:[#allocation2 + $0xe0] sm:$0xff] }
  0x9f   : > { %3709 = vmatmul.msk.f32.gmra.mxu2 %vm298_vm2, %v927_v20  ;;  %568 = vst.msk [vmem:[#allocation2 + $0xc0] sm:$0xff] %vm200_vm3, %v536_v26  ;;  %v513_v31 = vadd.f32 %v419_v22, %v266_v25  ;;  %v931_v25 = vld [vmem:[%s4196_s25 + $0x9c] sm:$0xff] }
  0xa1   : > { %3775 = vmatmul.msk.f32.gmra.mxu3 %vm298_vm2, %v4315_v28  ;;  %545 = vst.msk [vmem:[#allocation2 + $0x8] sm:$0xff] %vm200_vm3, %v513_v31  ;;  %3841 = vmatmul.msk.f32.gmra.mxu0 %vm298_vm2, %v4476_v27 }
  0xa2   : > { %v467_v35 = vpop.f32.mrf.mxu2 }
  0xa3   : > { %v529_v36 = vadd.f32 %v467_v35, %v282_v30  ;;  %v446_v40 = vpop.f32.mrf.mxu1  ;;  %v270_v30 = vld [vmem:[#allocation2 + $0x28] sm:$0xff] }
  0xa4   : > { %v522_v42 = vadd.f32 %v446_v40, %v275_v32  ;;  %v491_v43 = vpop.f32.mrf.mxu3  ;;  %v4536_v32 = vld [vmem:[%s4196_s25 + $0xca] sm:$0xff] }
  0xa5   : > { %561 = vst.msk [vmem:[#allocation2 + $0x88] sm:$0xff] %vm200_vm3, %v529_v36  ;;  %v537_v45 = vadd.f32 %v491_v43, %v290_v39  ;;  %v286_v35 = vld [vmem:[#allocation2 + $0xa8] sm:$0xff]  ;;  %v279_v39 = vld [vmem:[#allocation2 + $0x70] sm:$0xff] }
  0xa6   : > { %554 = vst.msk [vmem:[#allocation2 + $0x50] sm:$0xff] %vm200_vm3, %v522_v42  ;;  %3676 = vmatmul.msk.f32.gmra.mxu1 %vm298_vm2, %v4437_v60  ;;  %v422_v28 = vpop.f32.mrf.mxu0  ;;  %v284_v60 = vld [vmem:[#allocation2 + $0x98] sm:$0xff]  ;;  %v932_v43 = vld [vmem:[%s4196_s25 + $0xac] sm:$0xff] }
  0xa7   : > { %3710 = vmatmul.msk.f32.gmra.mxu2 %vm298_vm2, %v928_v41  ;;  %569 = vst.msk [vmem:[#allocation2 + $0xc8] sm:$0xff] %vm200_vm3, %v537_v45  ;;  %v514_v48 = vadd.f32 %v422_v28, %v267_v44  ;;  %v294_v41 = vld [vmem:[#allocation2 + $0xe8] sm:$0xff]  ;;  %v271_v28 = vld [vmem:[#allocation2 + $0x30] sm:$0xff] }
  0xa9   : > { %3776 = vmatmul.msk.f32.gmra.mxu3 %vm298_vm2, %v4333_v33  ;;  %546 = vst.msk [vmem:[#allocation2 + $0x10] sm:$0xff] %vm200_vm3, %v514_v48  ;;  %3842 = vmatmul.msk.f32.gmra.mxu0 %vm298_vm2, %v4491_v46  ;;  %v4551_v48 = vld [vmem:[%s4196_s25 + $0xda] sm:$0xff] }
  0xaa   : > { %v470_v50 = vpop.f32.mrf.mxu2 }
  0xab   : > { %v530_v51 = vadd.f32 %v470_v50, %v283_v47  ;;  %v449_v53 = vpop.f32.mrf.mxu1 }
  0xac   : > { %v523_v55 = vadd.f32 %v449_v53, %v276_v49  ;;  %v494_v56 = vpop.f32.mrf.mxu3  ;;  %v287_v49 = vld [vmem:[#allocation2 + $0xb0] sm:$0xff] }
  0xad   : > { %562 = vst.msk [vmem:[#allocation2 + $0x90] sm:$0xff] %vm200_vm3, %v530_v51  ;;  %v538_v58 = vadd.f32 %v494_v56, %v291_v52  ;;  %v280_v51 = vld [vmem:[#allocation2 + $0x78] sm:$0xff]  ;;  %v295_v53 = vld [vmem:[#allocation2 + $0xf0] sm:$0xff] }
  0xae   : > { %555 = vst.msk [vmem:[#allocation2 + $0x58] sm:$0xff] %vm200_vm3, %v523_v55  ;;  %3677 = vmatmul.msk.f32.gmra.mxu1 %vm298_vm2, %v4452_v62  ;;  %v425_v33 = vpop.f32.mrf.mxu0  ;;  %v933_v55 = vld [vmem:[%s4196_s25 + $0xb4] sm:$0xff] }
  0xaf   : > { %3711 = vmatmul.msk.f32.gmra.mxu2 %vm298_vm2, %v929_v54  ;;  %570 = vst.msk [vmem:[#allocation2 + $0xd0] sm:$0xff] %vm200_vm3, %v538_v58  ;;  %v515_v61 = vadd.f32 %v425_v33, %v268_v57  ;;  %v272_v58 = vld [vmem:[#allocation2 + $0x38] sm:$0xff] }
  0xb1   : > { %3777 = vmatmul.msk.f32.gmra.mxu3 %vm298_vm2, %v4347_v37  ;;  %547 = vst.msk [vmem:[#allocation2 + $0x18] sm:$0xff] %vm200_vm3, %v515_v61  ;;  %3843 = vmatmul.msk.f32.gmra.mxu0 %vm298_vm2, %v4506_v59  ;;  %v288_v61 = vld [vmem:[#allocation2 + $0xb8] sm:$0xff] }
  0xb2   : > { %v473_v0 = vpop.f32.mrf.mxu2 }
  0xb3   : > { %v531_v62 = vadd.f32 %v473_v0, %v284_v60  ;;  %v452_v2 = vpop.f32.mrf.mxu1  ;;  %v4566_v60 = vld [vmem:[%s4196_s25 + $0xe2] sm:$0xff] }
  0xb4   : > { %v524_v5 = vadd.f32 %v452_v2, %v277_v63  ;;  %v497_v8 = vpop.f32.mrf.mxu3 }
  0xb5   : > { %563 = vst.msk [vmem:[#allocation2 + $0x98] sm:$0xff] %vm200_vm3, %v531_v62  ;;  %v539_v10 = vadd.f32 %v497_v8, %v292_v1  ;;  %v296_v62 = vld [vmem:[#allocation2 + $0xf8] sm:$0xff]  ;;  %v608_v1 = vld [vmem:[#allocation2] sm:$0xff] }
  0xb6   : > { %556 = vst.msk [vmem:[#allocation2 + $0x60] sm:$0xff] %vm200_vm3, %v524_v5  ;;  %3678 = vmatmul.msk.f32.gmra.mxu1 %vm298_vm2, %v4463_v7  ;;  %v428_v37 = vpop.f32.mrf.mxu0 }
  0xb7   : > { %3712 = vmatmul.msk.f32.gmra.mxu2 %vm298_vm2, %v930_v4  ;;  %571 = vst.msk [vmem:[#allocation2 + $0xd8] sm:$0xff] %vm200_vm3, %v539_v10  ;;  %v516_v17 = vadd.f32 %v428_v37, %v269_v9  ;;  %v934_v4 = vld [vmem:[%s4196_s25 + $0xc4] sm:$0xff]  ;;  %v4581_v10 = vld [vmem:[%s4196_s25 + $0xf2] sm:$0xff] }
  0xb9   : > { %3778 = vmatmul.msk.f32.gmra.mxu3 %vm298_vm2, %v4211_v3  ;;  %548 = vst.msk [vmem:[#allocation2 + $0x20] sm:$0xff] %vm200_vm3, %v516_v17  ;;  %3844 = vmatmul.msk.f32.gmra.mxu0 %vm298_vm2, %v4521_v13 }
  0xba   : > { %v476_v20 = vpop.f32.mrf.mxu2 }
  0xbb   : > { %v532_v7 = vadd.f32 %v476_v20, %v285_v14  ;;  %v455_v24 = vpop.f32.mrf.mxu1  ;;  %v609_v14 = vld [vmem:[#allocation2 + $0x8] sm:$0xff] }
  0xbc   : > { %v525_v26 = vadd.f32 %v455_v24, %v278_v18  ;;  %v500_v22 = vpop.f32.mrf.mxu3  ;;  %v935_v18 = vld [vmem:[%s4196_s25 + $0xcc] sm:$0xff] }
  0xbd   : > { %564 = vst.msk [vmem:[#allocation2 + $0xa0] sm:$0xff] %vm200_vm3, %v532_v7  ;;  %v540_v31 = vadd.f32 %v500_v22, %v293_v21 }
  0xbe   : > { %557 = vst.msk [vmem:[#allocation2 + $0x68] sm:$0xff] %vm200_vm3, %v525_v26  ;;  %3679 = vmatmul.msk.f32.gmra.mxu1 %vm298_vm2, %v4476_v27  ;;  %v431_v3 = vpop.f32.mrf.mxu0  ;;  %v610_v26 = vld [vmem:[#allocation2 + $0x10] sm:$0xff] }
  0xbf   : > { %3713 = vmatmul.msk.f32.gmra.mxu2 %vm298_vm2, %v931_v25  ;;  %572 = vst.msk [vmem:[#allocation2 + $0xe0] sm:$0xff] %vm200_vm3, %v540_v31  ;;  %v517_v36 = vadd.f32 %v431_v3, %v270_v30  ;;  %v936_v30 = vld [vmem:[%s4196_s25 + $0xdc] sm:$0xff] }
  0xc1   : > { %3779 = vmatmul.msk.f32.gmra.mxu3 %vm298_vm2, %v4248_v11  ;;  %549 = vst.msk [vmem:[#allocation2 + $0x28] sm:$0xff] %vm200_vm3, %v517_v36  ;;  %3845 = vmatmul.msk.f32.gmra.mxu0 %vm298_vm2, %v4536_v32 }
  0xc2   : > { %v479_v40 = vpop.f32.mrf.mxu2 }
  0xc3   : > { %v533_v27 = vadd.f32 %v479_v40, %v286_v35  ;;  %v458_v42 = vpop.f32.mrf.mxu1 }
  0xc4   : > { %v526_v44 = vadd.f32 %v458_v42, %v279_v39  ;;  %v503_v45 = vpop.f32.mrf.mxu3 }
  0xc5   : > { %565 = vst.msk [vmem:[#allocation2 + $0xa8] sm:$0xff] %vm200_vm3, %v533_v27  ;;  %v541_v47 = vadd.f32 %v503_v45, %v294_v41  ;;  %v611_v41 = vld [vmem:[#allocation2 + $0x18] sm:$0xff] }
  0xc6   : > { %558 = vst.msk [vmem:[#allocation2 + $0x70] sm:$0xff] %vm200_vm3, %v526_v44  ;;  %3680 = vmatmul.msk.f32.gmra.mxu1 %vm298_vm2, %v4491_v46  ;;  %v434_v11 = vpop.f32.mrf.mxu0 }
  0xc7   : > { %3714 = vmatmul.msk.f32.gmra.mxu2 %vm298_vm2, %v932_v43  ;;  %573 = vst.msk [vmem:[#allocation2 + $0xe8] sm:$0xff] %vm200_vm3, %v541_v47  ;;  %v518_v50 = vadd.f32 %v434_v11, %v271_v28  ;;  %v937_v43 = vld [vmem:[%s4196_s25 + $0xe4] sm:$0xff]  ;;  %v4627_v11 = vld [vmem:[%s4196_s25 + $0x112] sm:$0xff] }
  0xc9   : > { %3780 = vmatmul.msk.f32.gmra.mxu3 %vm298_vm2, %v4265_v15  ;;  %550 = vst.msk [vmem:[#allocation2 + $0x30] sm:$0xff] %vm200_vm3, %v518_v50  ;;  %3846 = vmatmul.msk.f32.gmra.mxu0 %vm298_vm2, %v4551_v48 }
  0xca   : > { %v482_v52 = vpop.f32.mrf.mxu2 }
  0xcb   : > { %v534_v46 = vadd.f32 %v482_v52, %v287_v49  ;;  %v461_v54 = vpop.f32.mrf.mxu1 }
  0xcc   : > { %v527_v56 = vadd.f32 %v461_v54, %v280_v51  ;;  %v506_v57 = vpop.f32.mrf.mxu3  ;;  %v938_v54 = vld [vmem:[%s4196_s25 + $0xf4] sm:$0xff] }
  0xcd   : > { %566 = vst.msk [vmem:[#allocation2 + $0xb0] sm:$0xff] %vm200_vm3, %v534_v46  ;;  %v542_v33 = vadd.f32 %v506_v57, %v295_v53  ;;  %v612_v46 = vld [vmem:[#allocation2 + $0x20] sm:$0xff] }
  0xce   : > { %559 = vst.msk [vmem:[#allocation2 + $0x78] sm:$0xff] %vm200_vm3, %v527_v56  ;;  %3681 = vmatmul.msk.f32.gmra.mxu1 %vm298_vm2, %v4506_v59  ;;  %v437_v15 = vpop.f32.mrf.mxu0 }
  0xcf   : > { %3715 = vmatmul.msk.f32.gmra.mxu2 %vm298_vm2, %v933_v55  ;;  %574 = vst.msk [vmem:[#allocation2 + $0xf0] sm:$0xff] %vm200_vm3, %v542_v33  ;;  %v519_v63 = vadd.f32 %v437_v15, %v272_v58  ;;  %v4644_v33 = vld [vmem:[%s4196_s25 + $0x122] sm:$0xff] }
  0xd1   : > { %3781 = vmatmul.msk.f32.gmra.mxu3 %vm298_vm2, %v4282_v19  ;;  %551 = vst.msk [vmem:[#allocation2 + $0x38] sm:$0xff] %vm200_vm3, %v519_v63  ;;  %3847 = vmatmul.msk.f32.gmra.mxu0 %vm298_vm2, %v4566_v60 }
  0xd2   : > { %v485_v0 = vpop.f32.mrf.mxu2 }
  0xd3   : > { %v535_v59 = vadd.f32 %v485_v0, %v288_v61  ;;  %v758_v2 = vpop.f32.mrf.mxu1 }
  0xd4   : > { %v854_v5 = vadd.f32 %v758_v2, %v608_v1  ;;  %v509_v8 = vpop.f32.mrf.mxu3  ;;  %v939_v1 = vld [vmem:[%s4196_s25 + $0xfc] sm:$0xff] }
  0xd5   : > { %567 = vst.msk [vmem:[#allocation2 + $0xb8] sm:$0xff] %vm200_vm3, %v535_v59  ;;  %v543_v9 = vadd.f32 %v509_v8, %v296_v62  ;;  %v613_v59 = vld [vmem:[#allocation2 + $0x28] sm:$0xff] }
  0xd6   : > { %886 = vst.msk [vmem:[#allocation2] sm:$0xff] %vm200_vm3, %v854_v5  ;;  %3682 = vmatmul.msk.f32.gmra.mxu1 %vm298_vm2, %v4521_v13  ;;  %v1785_v19 = vpop.f32.mrf.mxu0 }
  0xd7   : > { %3716 = vmatmul.msk.f32.gmra.mxu2 %vm298_vm2, %v934_v4  ;;  %575 = vst.msk [vmem:[#allocation2 + $0xf8] sm:$0xff] %vm200_vm3, %v543_v9  ;;  %v4662_v9 = vld [vmem:[%s4196_s25 + $0x12a] sm:$0xff] }
  0xd9   : > { %3782 = vmatmul.msk.f32.gmra.mxu3 %vm298_vm2, %v4296_v23  ;;  %3848 = vmatmul.msk.f32.gmra.mxu0 %vm298_vm2, %v4581_v10  ;;  %v4596_v23 = vld [vmem:[%s4196_s25 + $0xfa] sm:$0xff] }
  0xda   : > { %v1100_v37 = vpop.f32.mrf.mxu2 }
  0xdb   : > { %v761_v17 = vpop.f32.mrf.mxu1 }
  0xdc   : > { %v855_v13 = vadd.f32 %v761_v17, %v609_v14  ;;  %v1443_v20 = vpop.f32.mrf.mxu3 }
  0xdd   : > { %v950_v7 = vld [vmem:[#allocation2] sm:$0xff] }
  0xde   : > { %887 = vst.msk [vmem:[#allocation2 + $0x8] sm:$0xff] %vm200_vm3, %v855_v13  ;;  %v1196_v21 = vadd.f32 %v1100_v37, %v950_v7  ;;  %3683 = vmatmul.msk.f32.gmra.mxu1 %vm298_vm2, %v4536_v32  ;;  %v4593_v24 = vpop.f32.mrf.mxu0 }
  0xdf   : > { %3717 = vmatmul.msk.f32.gmra.mxu2 %vm298_vm2, %v935_v18  ;;  %v614_v18 = vld [vmem:[#allocation2 + $0x30] sm:$0xff] }
  0xe0   : > { %1228 = vst.msk [vmem:[#allocation2] sm:$0xff] %vm200_vm3, %v1196_v21 }
  0xe1   : > { %3783 = vmatmul.msk.f32.gmra.mxu3 %vm298_vm2, %v4318_v29  ;;  %3849 = vmatmul.msk.f32.gmra.mxu0 %vm298_vm2, %v4596_v23  ;;  %v4611_v29 = vld [vmem:[%s4196_s25 + $0x10a] sm:$0xff] }
  0xe2   : > { %v1103_v25 = vpop.f32.mrf.mxu2 }
  0xe3   : > { %v764_v22 = vpop.f32.mrf.mxu1 }
  0xe4   : > { %v856_v31 = vadd.f32 %v764_v22, %v610_v26  ;;  %v1446_v3 = vpop.f32.mrf.mxu3 }
  0xe5   : > { %v951_v32 = vld [vmem:[#allocation2 + $0x8] sm:$0xff] }
  0xe6   : > { %888 = vst.msk [vmem:[#allocation2 + $0x10] sm:$0xff] %vm200_vm3, %v856_v31  ;;  %v1197_v35 = vadd.f32 %v1103_v25, %v951_v32  ;;  %3684 = vmatmul.msk.f32.gmra.mxu1 %vm298_vm2, %v4551_v48  ;;  %v4608_v36 = vpop.f32.mrf.mxu0  ;;  %v4680_v25 = vld [vmem:[%s4196_s25 + $0x13a] sm:$0xff] }
  0xe7   : > { %3718 = vmatmul.msk.f32.gmra.mxu2 %vm298_vm2, %v936_v30  ;;  %v1293_v39 = vld [vmem:[#allocation2] sm:$0xff]  ;;  %v615_v32 = vld [vmem:[#allocation2 + $0x38] sm:$0xff] }
  0xe8   : > { %1229 = vst.msk [vmem:[#allocation2 + $0x8] sm:$0xff] %vm200_vm3, %v1197_v35  ;;  %v1539_v40 = vadd.f32 %v1443_v20, %v1293_v39  ;;  %v940_v20 = vld [vmem:[%s4196_s25 + $0x10c] sm:$0xff] }
  0xe9   : > { %3784 = vmatmul.msk.f32.gmra.mxu3 %vm298_vm2, %v4336_v34  ;;  %3850 = vmatmul.msk.f32.gmra.mxu0 %vm298_vm2, %v4611_v29 }
  0xea   : > { %v1106_v27 = vpop.f32.mrf.mxu2  ;;  %1571 = vst.msk [vmem:[#allocation2] sm:$0xff] %vm200_vm3, %v1539_v40 }
  0xeb   : > { %v767_v42 = vpop.f32.mrf.mxu1 }
  0xec   : > { %v857_v44 = vadd.f32 %v767_v42, %v611_v41  ;;  %v1449_v45 = vpop.f32.mrf.mxu3  ;;  %v4699_v42 = vld [vmem:[%s4196_s25 + $0x142] sm:$0xff] }
  0xed   : > { %v952_v28 = vld [vmem:[#allocation2 + $0x10] sm:$0xff] }
  0xee   : > { %889 = vst.msk [vmem:[#allocation2 + $0x18] sm:$0xff] %vm200_vm3, %v857_v44  ;;  %v1198_v47 = vadd.f32 %v1106_v27, %v952_v28  ;;  %3685 = vmatmul.msk.f32.gmra.mxu1 %vm298_vm2, %v4566_v60  ;;  %v4624_v34 = vpop.f32.mrf.mxu0 }
  0xef   : > { %3719 = vmatmul.msk.f32.gmra.mxu2 %vm298_vm2, %v937_v43  ;;  %v1294_v48 = vld [vmem:[#allocation2 + $0x8] sm:$0xff] }
  0xf0   : > { %1230 = vst.msk [vmem:[#allocation2 + $0x10] sm:$0xff] %vm200_vm3, %v1198_v47  ;;  %v1540_v49 = vadd.f32 %v1446_v3, %v1294_v48  ;;  %v942_v48 = vld [vmem:[%s4196_s25 + $0x124] sm:$0xff] }
  0xf1   : > { %v1635_v50 = vld [vmem:[#allocation2] sm:$0xff]  ;;  %3785 = vmatmul.msk.f32.gmra.mxu3 %vm298_vm2, %v4350_v38  ;;  %3851 = vmatmul.msk.f32.gmra.mxu0 %vm298_vm2, %v4627_v11 }
  0xf2   : > { %v1109_v51 = vpop.f32.mrf.mxu2  ;;  %1572 = vst.msk [vmem:[#allocation2 + $0x8] sm:$0xff] %vm200_vm3, %v1540_v49  ;;  %v1881_v52 = vadd.f32 %v1785_v19, %v1635_v50 }
  0xf3   : > { %v770_v53 = vpop.f32.mrf.mxu1 }
  0xf4   : > { %1913 = vst.msk [vmem:[#allocation2] sm:$0xff] %vm200_vm3, %v1881_v52  ;;  %v858_v55 = vadd.f32 %v770_v53, %v612_v46  ;;  %v1452_v56 = vpop.f32.mrf.mxu3  ;;  %v3756_v46 = vld [vmem:[%s4196_s25 + $0x150] sm:$0xff] }
  0xf5   : > { %v953_v57 = vld [vmem:[#allocation2 + $0x18] sm:$0xff] }
  0xf6   : > { %890 = vst.msk [vmem:[#allocation2 + $0x20] sm:$0xff] %vm200_vm3, %v858_v55  ;;  %v1199_v58 = vadd.f32 %v1109_v51, %v953_v57  ;;  %3686 = vmatmul.msk.f32.gmra.mxu1 %vm298_vm2, %v4581_v10  ;;  %v4641_v38 = vpop.f32.mrf.mxu0 }
  0xf7   : > { %3720 = vmatmul.msk.f32.gmra.mxu2 %vm298_vm2, %v938_v54  ;;  %v1295_v15 = vld [vmem:[#allocation2 + $0x10] sm:$0xff] }
  0xf8   : > { %1231 = vst.msk [vmem:[#allocation2 + $0x18] sm:$0xff] %vm200_vm3, %v1199_v58  ;;  %v1541_v60 = vadd.f32 %v1449_v45, %v1295_v15  ;;  %v4717_v54 = vld [vmem:[%s4196_s25 + $0x152] sm:$0xff] }
  0xf9   : > { %v1636_v61 = vld [vmem:[#allocation2 + $0x8] sm:$0xff]  ;;  %3786 = vmatmul.msk.f32.gmra.mxu3 %vm298_vm2, %v4226_v6  ;;  %3852 = vmatmul.msk.f32.gmra.mxu0 %vm298_vm2, %v4644_v33 }
  0xfa   : > { %v1112_v63 = vpop.f32.mrf.mxu2  ;;  %1573 = vst.msk [vmem:[#allocation2 + $0x10] sm:$0xff] %vm200_vm3, %v1541_v60  ;;  %v1882_v0 = vadd.f32 %v4593_v24, %v1636_v61  ;;  %v943_v60 = vld [vmem:[%s4196_s25 + $0x12c] sm:$0xff] }
  0xfb   : > { %v773_v62 = vpop.f32.mrf.mxu1 }
  0xfc   : > { %1914 = vst.msk [vmem:[#allocation2 + $0x8] sm:$0xff] %vm200_vm3, %v1882_v0  ;;  %v859_v2 = vadd.f32 %v773_v62, %v613_v59  ;;  %v1455_v4 = vpop.f32.mrf.mxu3  ;;  %v3757_v62 = vld [vmem:[%s4196_s25 + $0x158] sm:$0xff] }
  0xfd   : > { %v954_v5 = vld [vmem:[#allocation2 + $0x20] sm:$0xff] }
  0xfe   : > { %891 = vst.msk [vmem:[#allocation2 + $0x28] sm:$0xff] %vm200_vm3, %v859_v2  ;;  %v1200_v8 = vadd.f32 %v1112_v63, %v954_v5  ;;  %3687 = vmatmul.msk.f32.gmra.mxu1 %vm298_vm2, %v4596_v23  ;;  %v4659_v6 = vpop.f32.mrf.mxu0  ;;  %v4735_v2 = vld [vmem:[%s4196_s25 + $0x15a] sm:$0xff] }
  0xff   : > { %3721 = vmatmul.msk.f32.gmra.mxu2 %vm298_vm2, %v939_v1  ;;  %v1296_v19 = vld [vmem:[#allocation2 + $0x18] sm:$0xff] }
 0x100   : > { %1232 = vst.msk [vmem:[#allocation2 + $0x20] sm:$0xff] %vm200_vm3, %v1200_v8  ;;  %v1542_v10 = vadd.f32 %v1452_v56, %v1296_v19  ;;  %v618_v19 = vld [vmem:[#allocation2 + $0x50] sm:$0xff] }
 0x101   : > { %v1637_v37 = vld [vmem:[#allocation2 + $0x10] sm:$0xff]  ;;  %3787 = vmatmul.msk.f32.gmra.mxu3 %vm298_vm2, %v4255_v12  ;;  %3853 = vmatmul.msk.f32.gmra.mxu0 %vm298_vm2, %v4662_v9 }
 0x102   : > { %v1115_v14 = vpop.f32.mrf.mxu2  ;;  %1574 = vst.msk [vmem:[#allocation2 + $0x18] sm:$0xff] %vm200_vm3, %v1542_v10  ;;  %v1883_v17 = vadd.f32 %v4608_v36, %v1637_v37  ;;  %v941_v36 = vld [vmem:[%s4196_s25 + $0x114] sm:$0xff]  ;;  %v944_v37 = vld [vmem:[%s4196_s25 + $0x13c] sm:$0xff] }
 0x103   : > { %v776_v13 = vpop.f32.mrf.mxu1 }
 0x104   : > { %1915 = vst.msk [vmem:[#allocation2 + $0x10] sm:$0xff] %vm200_vm3, %v1883_v17  ;;  %v860_v7 = vadd.f32 %v776_v13, %v614_v18  ;;  %v1458_v21 = vpop.f32.mrf.mxu3 }
 0x105   : > { %v955_v24 = vld [vmem:[#allocation2 + $0x28] sm:$0xff] }
 0x106   : > { %892 = vst.msk [vmem:[#allocation2 + $0x30] sm:$0xff] %vm200_vm3, %v860_v7  ;;  %v1201_v23 = vadd.f32 %v1115_v14, %v955_v24  ;;  %3688 = vmatmul.msk.f32.gmra.mxu1 %vm298_vm2, %v4611_v29  ;;  %v4677_v12 = vpop.f32.mrf.mxu0 }
 0x107   : > { %3722 = vmatmul.msk.f32.gmra.mxu2 %vm298_vm2, %v940_v20  ;;  %v1297_v26 = vld [vmem:[#allocation2 + $0x20] sm:$0xff]  ;;  %v3758_v20 = vld [vmem:[%s4196_s25 + $0x168] sm:$0xff] }
 0x108   : > { %1233 = vst.msk [vmem:[#allocation2 + $0x28] sm:$0xff] %vm200_vm3, %v1201_v23  ;;  %v1543_v22 = vadd.f32 %v1455_v4, %v1297_v26 }
 0x109   : > { %v1638_v30 = vld [vmem:[#allocation2 + $0x18] sm:$0xff]  ;;  %3788 = vmatmul.msk.f32.gmra.mxu3 %vm298_vm2, %v4272_v16  ;;  %3854 = vmatmul.msk.f32.gmra.mxu0 %vm298_vm2, %v4680_v25  ;;  %v3755_v16 = vld [vmem:[%s4196_s25 + $0x140] sm:$0xff] }
 0x10a   : > { %v1118_v31 = vpop.f32.mrf.mxu2  ;;  %1575 = vst.msk [vmem:[#allocation2 + $0x20] sm:$0xff] %vm200_vm3, %v1543_v22  ;;  %v1884_v3 = vadd.f32 %v4624_v34, %v1638_v30  ;;  %v616_v34 = vld [vmem:[#allocation2 + $0x40] sm:$0xff]  ;;  %v619_v22 = vld [vmem:[#allocation2 + $0x58] sm:$0xff] }
 0x10b   : > { %v779_v35 = vpop.f32.mrf.mxu1 }
 0x10c   : > { %1916 = vst.msk [vmem:[#allocation2 + $0x18] sm:$0xff] %vm200_vm3, %v1884_v3  ;;  %v861_v29 = vadd.f32 %v779_v35, %v615_v32  ;;  %v1461_v39 = vpop.f32.mrf.mxu3 }
 0x10d   : > { %v956_v40 = vld [vmem:[#allocation2 + $0x30] sm:$0xff] }
 0x10e   : > { %893 = vst.msk [vmem:[#allocation2 + $0x38] sm:$0xff] %vm200_vm3, %v861_v29  ;;  %v1202_v27 = vadd.f32 %v1118_v31, %v956_v40  ;;  %3689 = vmatmul.msk.f32.gmra.mxu1 %vm298_vm2, %v4627_v11  ;;  %v4696_v41 = vpop.f32.mrf.mxu0  ;;  %v945_v31 = vld [vmem:[%s4196_s25 + $0x144] sm:$0xff]  ;;  %v3759_v29 = vld [vmem:[%s4196_s25 + $0x170] sm:$0xff] }
 0x10f   : > { %3723 = vmatmul.msk.f32.gmra.mxu2 %vm298_vm2, %v941_v36  ;;  %v1298_v43 = vld [vmem:[#allocation2 + $0x28] sm:$0xff]  ;;  %v4771_v40 = vld [vmem:[%s4196_s25 + $0x172] sm:$0xff] }
 0x110   : > { %1234 = vst.msk [vmem:[#allocation2 + $0x30] sm:$0xff] %vm200_vm3, %v1202_v27  ;;  %v1544_v44 = vadd.f32 %v1458_v21, %v1298_v43  ;;  %v4753_v21 = vld [vmem:[%s4196_s25 + $0x16a] sm:$0xff] }
 0x111   : > { %v1639_v45 = vld [vmem:[#allocation2 + $0x20] sm:$0xff]  ;;  %3789 = vmatmul.msk.f32.gmra.mxu3 %vm298_vm2, %v3755_v16  ;;  %3855 = vmatmul.msk.f32.gmra.mxu0 %vm298_vm2, %v4699_v42 }
 0x112   : > { %v1121_v28 = vpop.f32.mrf.mxu2  ;;  %1576 = vst.msk [vmem:[#allocation2 + $0x28] sm:$0xff] %vm200_vm3, %v1544_v44  ;;  %v1885_v47 = vadd.f32 %v4641_v38, %v1639_v45  ;;  %v620_v44 = vld [vmem:[#allocation2 + $0x60] sm:$0xff] }
 0x113   : > { %v782_v11 = vpop.f32.mrf.mxu1 }
 0x114   : > { %1917 = vst.msk [vmem:[#allocation2 + $0x20] sm:$0xff] %vm200_vm3, %v1885_v47  ;;  %v862_v49 = vadd.f32 %v782_v11, %v616_v34  ;;  %v1464_v50 = vpop.f32.mrf.mxu3 }
 0x115   : > { %v957_v51 = vld [vmem:[#allocation2 + $0x38] sm:$0xff] }
 0x116   : > { %894 = vst.msk [vmem:[#allocation2 + $0x40] sm:$0xff] %vm200_vm3, %v862_v49  ;;  %v1203_v52 = vadd.f32 %v1121_v28, %v957_v51  ;;  %3690 = vmatmul.msk.f32.gmra.mxu1 %vm298_vm2, %v4644_v33  ;;  %v4714_v53 = vpop.f32.mrf.mxu0  ;;  %v617_v33 = vld [vmem:[#allocation2 + $0x48] sm:$0xff]  ;;  %v946_v28 = vld [vmem:[%s4196_s25 + $0x154] sm:$0xff]  ;;  %v3760_v49 = vld [vmem:[%s4196_s25 + $0x180] sm:$0xff] }
 0x117   : > { %3724 = vmatmul.msk.f32.gmra.mxu2 %vm298_vm2, %v942_v48  ;;  %v1299_v55 = vld [vmem:[#allocation2 + $0x30] sm:$0xff]  ;;  %v3826_v51 = vld [vmem:[%s4196_s25 + $0x182] sm:$0xff] }
 0x118   : > { %1235 = vst.msk [vmem:[#allocation2 + $0x38] sm:$0xff] %vm200_vm3, %v1203_v52  ;;  %v1545_v56 = vadd.f32 %v1461_v39, %v1299_v55 }
 0x119   : > { %v1640_v57 = vld [vmem:[#allocation2 + $0x28] sm:$0xff]  ;;  %3790 = vmatmul.msk.f32.gmra.mxu3 %vm298_vm2, %v3756_v46  ;;  %3856 = vmatmul.msk.f32.gmra.mxu0 %vm298_vm2, %v4717_v54 }
 0x11a   : > { %v1124_v58 = vpop.f32.mrf.mxu2  ;;  %1577 = vst.msk [vmem:[#allocation2 + $0x30] sm:$0xff] %vm200_vm3, %v1545_v56  ;;  %v1886_v38 = vadd.f32 %v4659_v6, %v1640_v57  ;;  %v621_v56 = vld [vmem:[#allocation2 + $0x68] sm:$0xff] }
 0x11b   : > { %v785_v15 = vpop.f32.mrf.mxu1 }
 0x11c   : > { %1918 = vst.msk [vmem:[#allocation2 + $0x28] sm:$0xff] %vm200_vm3, %v1886_v38  ;;  %v863_v61 = vadd.f32 %v785_v15, %v617_v33  ;;  %v1467_v63 = vpop.f32.mrf.mxu3 }
 0x11d   : > { %v958_v0 = vld [vmem:[#allocation2 + $0x40] sm:$0xff] }
 0x11e   : > { %895 = vst.msk [vmem:[#allocation2 + $0x48] sm:$0xff] %vm200_vm3, %v863_v61  ;;  %v1204_v59 = vadd.f32 %v1124_v58, %v958_v0  ;;  %3691 = vmatmul.msk.f32.gmra.mxu1 %vm298_vm2, %v4662_v9  ;;  %v4732_v1 = vpop.f32.mrf.mxu0  ;;  %v947_v58 = vld [vmem:[%s4196_s25 + $0x15c] sm:$0xff]  ;;  %v3761_v61 = vld [vmem:[%s4196_s25 + $0x188] sm:$0xff] }
 0x11f   : > { %3725 = vmatmul.msk.f32.gmra.mxu2 %vm298_vm2, %v943_v60  ;;  %v1300_v4 = vld [vmem:[#allocation2 + $0x38] sm:$0xff]  ;;  %v3827_v0 = vld [vmem:[%s4196_s25 + $0x18a] sm:$0xff] }
 0x120   : > { %1236 = vst.msk [vmem:[#allocation2 + $0x40] sm:$0xff] %vm200_vm3, %v1204_v59  ;;  %v1546_v5 = vadd.f32 %v1464_v50, %v1300_v4 }
 0x121   : > { %v1641_v8 = vld [vmem:[#allocation2 + $0x30] sm:$0xff]  ;;  %3791 = vmatmul.msk.f32.gmra.mxu3 %vm298_vm2, %v3757_v62  ;;  %3857 = vmatmul.msk.f32.gmra.mxu0 %vm298_vm2, %v4735_v2 }
 0x122   : > { %v1127_v6 = vpop.f32.mrf.mxu2  ;;  %1578 = vst.msk [vmem:[#allocation2 + $0x38] sm:$0xff] %vm200_vm3, %v1546_v5  ;;  %v1887_v9 = vadd.f32 %v4677_v12, %v1641_v8  ;;  %v622_v5 = vld [vmem:[#allocation2 + $0x70] sm:$0xff] }
 0x123   : > { %v788_v10 = vpop.f32.mrf.mxu1 }
 0x124   : > { %1919 = vst.msk [vmem:[#allocation2 + $0x30] sm:$0xff] %vm200_vm3, %v1887_v9  ;;  %v864_v14 = vadd.f32 %v788_v10, %v618_v19  ;;  %v1470_v17 = vpop.f32.mrf.mxu3 }
 0x125   : > { %v959_v18 = vld [vmem:[#allocation2 + $0x48] sm:$0xff] }
 0x126   : > { %896 = vst.msk [vmem:[#allocation2 + $0x50] sm:$0xff] %vm200_vm3, %v864_v14  ;;  %v1205_v13 = vadd.f32 %v1127_v6, %v959_v18  ;;  %3692 = vmatmul.msk.f32.gmra.mxu1 %vm298_vm2, %v4680_v25  ;;  %v4750_v7 = vpop.f32.mrf.mxu0  ;;  %v948_v6 = vld [vmem:[%s4196_s25 + $0x16c] sm:$0xff]  ;;  %v3762_v14 = vld [vmem:[%s4196_s25 + $0x198] sm:$0xff] }
 0x127   : > { %3726 = vmatmul.msk.f32.gmra.mxu2 %vm298_vm2, %v944_v37  ;;  %v1301_v24 = vld [vmem:[#allocation2 + $0x40] sm:$0xff] }
 0x128   : > { %1237 = vst.msk [vmem:[#allocation2 + $0x48] sm:$0xff] %vm200_vm3, %v1205_v13  ;;  %v1547_v23 = vadd.f32 %v1467_v63, %v1301_v24  ;;  %v3828_v18 = vld [vmem:[%s4196_s25 + $0x19a] sm:$0xff] }
 0x129   : > { %v1642_v12 = vld [vmem:[#allocation2 + $0x38] sm:$0xff]  ;;  %3792 = vmatmul.msk.f32.gmra.mxu3 %vm298_vm2, %v3758_v20  ;;  %3858 = vmatmul.msk.f32.gmra.mxu0 %vm298_vm2, %v4753_v21 }
 0x12a   : > { %v1130_v26 = vpop.f32.mrf.mxu2  ;;  %1579 = vst.msk [vmem:[#allocation2 + $0x40] sm:$0xff] %vm200_vm3, %v1547_v23  ;;  %v1888_v25 = vadd.f32 %v4696_v41, %v1642_v12  ;;  %v623_v23 = vld [vmem:[#allocation2 + $0x78] sm:$0xff] }
 0x12b   : > { %v791_v30 = vpop.f32.mrf.mxu1 }
 0x12c   : > { %1920 = vst.msk [vmem:[#allocation2 + $0x38] sm:$0xff] %vm200_vm3, %v1888_v25  ;;  %v865_v3 = vadd.f32 %v791_v30, %v619_v22  ;;  %v1473_v32 = vpop.f32.mrf.mxu3 }
 0x12d   : > { %v960_v35 = vld [vmem:[#allocation2 + $0x50] sm:$0xff] }
 0x12e   : > { %897 = vst.msk [vmem:[#allocation2 + $0x58] sm:$0xff] %vm200_vm3, %v865_v3  ;;  %v1206_v36 = vadd.f32 %v1130_v26, %v960_v35  ;;  %3693 = vmatmul.msk.f32.gmra.mxu1 %vm298_vm2, %v4699_v42  ;;  %v4768_v39 = vpop.f32.mrf.mxu0  ;;  %v949_v26 = vld [vmem:[%s4196_s25 + $0x174] sm:$0xff]  ;;  %v3763_v3 = vld [vmem:[%s4196_s25 + $0x1a0] sm:$0xff] }
 0x12f   : > { %3727 = vmatmul.msk.f32.gmra.mxu2 %vm298_vm2, %v945_v31  ;;  %v1302_v27 = vld [vmem:[#allocation2 + $0x48] sm:$0xff] }
 0x130   : > { %1238 = vst.msk [vmem:[#allocation2 + $0x50] sm:$0xff] %vm200_vm3, %v1206_v36  ;;  %v1548_v16 = vadd.f32 %v1470_v17, %v1302_v27  ;;  %v3829_v35 = vld [vmem:[%s4196_s25 + $0x1a2] sm:$0xff] }
 0x131   : > { %v1643_v41 = vld [vmem:[#allocation2 + $0x40] sm:$0xff]  ;;  %3793 = vmatmul.msk.f32.gmra.mxu3 %vm298_vm2, %v3759_v29  ;;  %3859 = vmatmul.msk.f32.gmra.mxu0 %vm298_vm2, %v4771_v40 }
 0x132   : > { %v1133_v43 = vpop.f32.mrf.mxu2  ;;  %1580 = vst.msk [vmem:[#allocation2 + $0x48] sm:$0xff] %vm200_vm3, %v1548_v16  ;;  %v1889_v42 = vadd.f32 %v4714_v53, %v1643_v41  ;;  %v624_v16 = vld [vmem:[#allocation2 + $0x80] sm:$0xff] }
 0x133   : > { %v794_v45 = vpop.f32.mrf.mxu1 }
 0x134   : > { %1921 = vst.msk [vmem:[#allocation2 + $0x40] sm:$0xff] %vm200_vm3, %v1889_v42  ;;  %v866_v47 = vadd.f32 %v794_v45, %v620_v44  ;;  %v1476_v34 = vpop.f32.mrf.mxu3  ;;  %v3930_v42 = vld [vmem:[%s4196_s25 + $0x60] sm:$0xff] }
 0x135   : > { %v961_v11 = vld [vmem:[#allocation2 + $0x58] sm:$0xff] }
 0x136   : > { %898 = vst.msk [vmem:[#allocation2 + $0x60] sm:$0xff] %vm200_vm3, %v866_v47  ;;  %v1207_v48 = vadd.f32 %v1133_v43, %v961_v11  ;;  %3694 = vmatmul.msk.f32.gmra.mxu1 %vm298_vm2, %v4717_v54  ;;  %v4786_v50 = vpop.f32.mrf.mxu0  ;;  %v3864_v43 = vld [vmem:[%s4196_s25 + $0x34] sm:$0xff] }
 0x137   : > { %3728 = vmatmul.msk.f32.gmra.mxu2 %vm298_vm2, %v946_v28  ;;  %v1303_v52 = vld [vmem:[#allocation2 + $0x50] sm:$0xff] }
 0x138   : > { %1239 = vst.msk [vmem:[#allocation2 + $0x58] sm:$0xff] %vm200_vm3, %v1207_v48  ;;  %v1549_v46 = vadd.f32 %v1473_v32, %v1303_v52  ;;  %v4849_v48 = vld [vmem:[%s4196_s25 + $0x64] sm:$0xff] }
 0x139   : > { %v1644_v53 = vld [vmem:[#allocation2 + $0x48] sm:$0xff]  ;;  %3794 = vmatmul.msk.f32.gmra.mxu3 %vm298_vm2, %v3760_v49  ;;  %3860 = vmatmul.msk.f32.gmra.mxu0 %vm298_vm2, %v3826_v51 }
 0x13a   : > { %v1136_v55 = vpop.f32.mrf.mxu2  ;;  %1581 = vst.msk [vmem:[#allocation2 + $0x50] sm:$0xff] %vm200_vm3, %v1549_v46  ;;  %v1890_v54 = vadd.f32 %v4732_v1, %v1644_v53  ;;  %v625_v53 = vld [vmem:[#allocation2 + $0x88] sm:$0xff] }
 0x13b   : > { %v797_v57 = vpop.f32.mrf.mxu1 }
 0x13c   : > { %1922 = vst.msk [vmem:[#allocation2 + $0x48] sm:$0xff] %vm200_vm3, %v1890_v54  ;;  %v867_v38 = vadd.f32 %v797_v57, %v621_v56  ;;  %v1479_v33 = vpop.f32.mrf.mxu3  ;;  %v3865_v54 = vld [vmem:[%s4196_s25 + $0x3c] sm:$0xff]  ;;  %v3931_v56 = vld [vmem:[%s4196_s25 + $0x68] sm:$0xff] }
 0x13d   : > { %v962_v15 = vld [vmem:[#allocation2 + $0x60] sm:$0xff] }
 0x13e   : > { %899 = vst.msk [vmem:[#allocation2 + $0x68] sm:$0xff] %vm200_vm3, %v867_v38  ;;  %v1208_v60 = vadd.f32 %v1136_v55, %v962_v15  ;;  %3695 = vmatmul.msk.f32.gmra.mxu1 %vm298_vm2, %v4735_v2  ;;  %v4801_v63 = vpop.f32.mrf.mxu0  ;;  %v3997_v15 = vld [vmem:[%s4196_s25 + $0x6a] sm:$0xff] }
 0x13f   : > { %3729 = vmatmul.msk.f32.gmra.mxu2 %vm298_vm2, %v947_v58  ;;  %v1304_v59 = vld [vmem:[#allocation2 + $0x58] sm:$0xff] }
 0x140   : > { %1240 = vst.msk [vmem:[#allocation2 + $0x60] sm:$0xff] %vm200_vm3, %v1208_v60  ;;  %v1550_v62 = vadd.f32 %v1476_v34, %v1304_v59  ;;  %v3996_v34 = vld [vmem:[%s4196_s25 + $0x62] sm:$0xff] }
 0x141   : > { %v1645_v1 = vld [vmem:[#allocation2 + $0x50] sm:$0xff]  ;;  %3795 = vmatmul.msk.f32.gmra.mxu3 %vm298_vm2, %v3761_v61  ;;  %3861 = vmatmul.msk.f32.gmra.mxu0 %vm298_vm2, %v3827_v0 }
 0x142   : > { %v1139_v4 = vpop.f32.mrf.mxu2  ;;  %1582 = vst.msk [vmem:[#allocation2 + $0x58] sm:$0xff] %vm200_vm3, %v1550_v62  ;;  %v1891_v2 = vadd.f32 %v4750_v7, %v1645_v1  ;;  %v4867_v61 = vld [vmem:[%s4196_s25 + $0x6c] sm:$0xff] }
 0x143   : > { %v800_v8 = vpop.f32.mrf.mxu1 }
 0x144   : > { %1923 = vst.msk [vmem:[#allocation2 + $0x50] sm:$0xff] %vm200_vm3, %v1891_v2  ;;  %v868_v9 = vadd.f32 %v800_v8, %v622_v5  ;;  %v1482_v19 = vpop.f32.mrf.mxu3  ;;  %v3866_v5 = vld [vmem:[%s4196_s25 + $0x4c] sm:$0xff]  ;;  %v3932_v8 = vld [vmem:[%s4196_s25 + $0x78] sm:$0xff] }
 0x145   : > { %v963_v10 = vld [vmem:[#allocation2 + $0x68] sm:$0xff] }
 0x146   : > { %900 = vst.msk [vmem:[#allocation2 + $0x70] sm:$0xff] %vm200_vm3, %v868_v9  ;;  %v1209_v37 = vadd.f32 %v1139_v4, %v963_v10  ;;  %3696 = vmatmul.msk.f32.gmra.mxu1 %vm298_vm2, %v4753_v21  ;;  %v4816_v17 = vpop.f32.mrf.mxu0  ;;  %v626_v4 = vld [vmem:[#allocation2 + $0x90] sm:$0xff] }
 0x147   : > { %3730 = vmatmul.msk.f32.gmra.mxu2 %vm298_vm2, %v948_v6  ;;  %v1305_v13 = vld [vmem:[#allocation2 + $0x60] sm:$0xff] }
 0x148   : > { %1241 = vst.msk [vmem:[#allocation2 + $0x68] sm:$0xff] %vm200_vm3, %v1209_v37  ;;  %v1551_v20 = vadd.f32 %v1479_v33, %v1305_v13  ;;  %v3998_v37 = vld [vmem:[%s4196_s25 + $0x7a] sm:$0xff] }
 0x149   : > { %v1646_v7 = vld [vmem:[#allocation2 + $0x58] sm:$0xff]  ;;  %3796 = vmatmul.msk.f32.gmra.mxu3 %vm298_vm2, %v3762_v14  ;;  %3862 = vmatmul.msk.f32.gmra.mxu0 %vm298_vm2, %v3828_v18 }
 0x14a   : > { %v1142_v24 = vpop.f32.mrf.mxu2  ;;  %1583 = vst.msk [vmem:[#allocation2 + $0x60] sm:$0xff] %vm200_vm3, %v1551_v20  ;;  %v1892_v21 = vadd.f32 %v4768_v39, %v1646_v7 }
 0x14b   : > { %v803_v12 = vpop.f32.mrf.mxu1 }
 0x14c   : > { %1924 = vst.msk [vmem:[#allocation2 + $0x58] sm:$0xff] %vm200_vm3, %v1892_v21  ;;  %v869_v25 = vadd.f32 %v803_v12, %v623_v23  ;;  %v1485_v22 = vpop.f32.mrf.mxu3  ;;  %v627_v21 = vld [vmem:[#allocation2 + $0x98] sm:$0xff] }
 0x14d   : > { %v964_v30 = vld [vmem:[#allocation2 + $0x70] sm:$0xff] }
 0x14e   : > { %901 = vst.msk [vmem:[#allocation2 + $0x78] sm:$0xff] %vm200_vm3, %v869_v25  ;;  %v1210_v31 = vadd.f32 %v1142_v24, %v964_v30  ;;  %3697 = vmatmul.msk.f32.gmra.mxu1 %vm298_vm2, %v4771_v40  ;;  %v4831_v32 = vpop.f32.mrf.mxu0  ;;  %v3867_v12 = vld [vmem:[%s4196_s25 + $0x54] sm:$0xff] }
 0x14f   : > { %3731 = vmatmul.msk.f32.gmra.mxu2 %vm298_vm2, %v949_v26  ;;  %v1306_v36 = vld [vmem:[#allocation2 + $0x68] sm:$0xff]  ;;  %v3933_v26 = vld [vmem:[%s4196_s25 + $0x80] sm:$0xff] }
 0x150   : > { %1242 = vst.msk [vmem:[#allocation2 + $0x70] sm:$0xff] %vm200_vm3, %v1210_v31  ;;  %v1552_v29 = vadd.f32 %v1482_v19, %v1306_v36 }
 0x151   : > { %v1647_v39 = vld [vmem:[#allocation2 + $0x60] sm:$0xff]  ;;  %3797 = vmatmul.msk.f32.gmra.mxu3 %vm298_vm2, %v3763_v3  ;;  %3863 = vmatmul.msk.f32.gmra.mxu0 %vm298_vm2, %v3829_v35 }
 0x152   : > { %v1145_v27 = vpop.f32.mrf.mxu2  ;;  %1584 = vst.msk [vmem:[#allocation2 + $0x68] sm:$0xff] %vm200_vm3, %v1552_v29  ;;  %v1893_v40 = vadd.f32 %v4786_v50, %v1647_v39  ;;  %v3999_v3 = vld [vmem:[%s4196_s25 + $0x82] sm:$0xff] }
 0x153   : > { %v806_v41 = vpop.f32.mrf.mxu1 }
 0x154   : > { %1925 = vst.msk [vmem:[#allocation2 + $0x60] sm:$0xff] %vm200_vm3, %v1893_v40  ;;  %v870_v44 = vadd.f32 %v806_v41, %v624_v16  ;;  %v1488_v45 = vpop.f32.mrf.mxu3  ;;  %v628_v16 = vld [vmem:[#allocation2 + $0xa0] sm:$0xff] }
 0x155   : > { %v965_v28 = vld [vmem:[#allocation2 + $0x78] sm:$0xff] }
 0x156   : > { %902 = vst.msk [vmem:[#allocation2 + $0x80] sm:$0xff] %vm200_vm3, %v870_v44  ;;  %v1211_v47 = vadd.f32 %v1145_v27, %v965_v28  ;;  %3898 = vmatmul.msk.f32.vlgmr.msra.gmra.mxu1 %vm298_vm2, %v3864_v43  ;;  %v4846_v11 = vpop.f32.mrf.mxu0  ;;  %v3934_v43 = vld [vmem:[%s4196_s25 + $0x90] sm:$0xff] }
 0x157   : > { %3964 = vmatmul.msk.f32.vlgmr.msra.gmra.mxu2 %vm298_vm2, %v3930_v42  ;;  %v1307_v49 = vld [vmem:[#allocation2 + $0x70] sm:$0xff] }
 0x158   : > { %1243 = vst.msk [vmem:[#allocation2 + $0x78] sm:$0xff] %vm200_vm3, %v1211_v47  ;;  %v1553_v50 = vadd.f32 %v1485_v22, %v1307_v49  ;;  %v4000_v47 = vld [vmem:[%s4196_s25 + $0x92] sm:$0xff] }
 0x159   : > { %v1648_v51 = vld [vmem:[#allocation2 + $0x68] sm:$0xff]  ;;  %4030 = vmatmul.msk.f32.vlgmr.msra.gmra.mxu3 %vm298_vm2, %v3996_v34  ;;  %4096 = vmatmul.msk.f32.vlgmr.msra.gmra.mxu0 %vm298_vm2, %v4849_v48 }
 0x15a   : > { %v1148_v52 = vpop.f32.mrf.mxu2  ;;  %1585 = vst.msk [vmem:[#allocation2 + $0x70] sm:$0xff] %vm200_vm3, %v1553_v50  ;;  %v1894_v46 = vadd.f32 %v4801_v63, %v1648_v51 }
 0x15b   : > { %v809_v55 = vpop.f32.mrf.mxu1 }
 0x15c   : > { %1926 = vst.msk [vmem:[#allocation2 + $0x68] sm:$0xff] %vm200_vm3, %v1894_v46  ;;  %v871_v57 = vadd.f32 %v809_v55, %v625_v53  ;;  %v1491_v58 = vpop.f32.mrf.mxu3  ;;  %v629_v46 = vld [vmem:[#allocation2 + $0xa8] sm:$0xff]  ;;  %v3935_v55 = vld [vmem:[%s4196_s25 + $0x98] sm:$0xff] }
 0x15d   : > { %v966_v38 = vld [vmem:[#allocation2 + $0x80] sm:$0xff] }
 0x15e   : > { %903 = vst.msk [vmem:[#allocation2 + $0x88] sm:$0xff] %vm200_vm3, %v871_v57  ;;  %v1212_v33 = vadd.f32 %v1148_v52, %v966_v38  ;;  %3899 = vmatmul.msk.f32.gmra.mxu1 %vm298_vm2, %v3865_v54  ;;  %v4864_v60 = vpop.f32.mrf.mxu0  ;;  %v4001_v38 = vld [vmem:[%s4196_s25 + $0x9a] sm:$0xff] }
 0x15f   : > { %3965 = vmatmul.msk.f32.gmra.mxu2 %vm298_vm2, %v3931_v56  ;;  %v1308_v63 = vld [vmem:[#allocation2 + $0x78] sm:$0xff] }
 0x160   : > { %1244 = vst.msk [vmem:[#allocation2 + $0x80] sm:$0xff] %vm200_vm3, %v1212_v33  ;;  %v1554_v0 = vadd.f32 %v1488_v45, %v1308_v63 }
 0x161   : > { %v1649_v59 = vld [vmem:[#allocation2 + $0x70] sm:$0xff]  ;;  %4031 = vmatmul.msk.f32.gmra.mxu3 %vm298_vm2, %v3997_v15  ;;  %4097 = vmatmul.msk.f32.gmra.mxu0 %vm298_vm2, %v4867_v61  ;;  %v4939_v15 = vld [vmem:[%s4196_s25 + $0x9c] sm:$0xff] }
 0x162   : > { %v1151_v62 = vpop.f32.mrf.mxu2  ;;  %1586 = vst.msk [vmem:[#allocation2 + $0x78] sm:$0xff] %vm200_vm3, %v1554_v0  ;;  %v1895_v1 = vadd.f32 %v4816_v17, %v1649_v59  ;;  %v4885_v17 = vld [vmem:[%s4196_s25 + $0x7c] sm:$0xff] }
 0x163   : > { %v812_v2 = vpop.f32.mrf.mxu1 }
 0x164   : > { %1927 = vst.msk [vmem:[#allocation2 + $0x70] sm:$0xff] %vm200_vm3, %v1895_v1  ;;  %v872_v6 = vadd.f32 %v812_v2, %v626_v4  ;;  %v1494_v9 = vpop.f32.mrf.mxu3  ;;  %v3936_v4 = vld [vmem:[%s4196_s25 + $0xa8] sm:$0xff] }
 0x165   : > { %v967_v19 = vld [vmem:[#allocation2 + $0x88] sm:$0xff] }
 0x166   : > { %904 = vst.msk [vmem:[#allocation2 + $0x90] sm:$0xff] %vm200_vm3, %v872_v6  ;;  %v1213_v10 = vadd.f32 %v1151_v62, %v967_v19  ;;  %3900 = vmatmul.msk.f32.gmra.mxu1 %vm298_vm2, %v3866_v5  ;;  %v4882_v14 = vpop.f32.mrf.mxu0  ;;  %v630_v62 = vld [vmem:[#allocation2 + $0xb0] sm:$0xff] }
 0x167   : > { %3966 = vmatmul.msk.f32.gmra.mxu2 %vm298_vm2, %v3932_v8  ;;  %v1309_v18 = vld [vmem:[#allocation2 + $0x80] sm:$0xff] }
 0x168   : > { %1245 = vst.msk [vmem:[#allocation2 + $0x88] sm:$0xff] %vm200_vm3, %v1213_v10  ;;  %v1555_v13 = vadd.f32 %v1491_v58, %v1309_v18  ;;  %v4957_v10 = vld [vmem:[%s4196_s25 + $0xac] sm:$0xff] }
 0x169   : > { %v1650_v20 = vld [vmem:[#allocation2 + $0x78] sm:$0xff]  ;;  %4032 = vmatmul.msk.f32.gmra.mxu3 %vm298_vm2, %v3998_v37  ;;  %4098 = vmatmul.msk.f32.gmra.mxu0 %vm298_vm2, %v4885_v17 }
 0x16a   : > { %v1154_v7 = vpop.f32.mrf.mxu2  ;;  %1587 = vst.msk [vmem:[#allocation2 + $0x80] sm:$0xff] %vm200_vm3, %v1555_v13  ;;  %v1896_v24 = vadd.f32 %v4831_v32, %v1650_v20  ;;  %v4903_v32 = vld [vmem:[%s4196_s25 + $0x84] sm:$0xff]  ;;  %v631_v20 = vld [vmem:[#allocation2 + $0xb8] sm:$0xff] }
 0x16b   : > { %v815_v23 = vpop.f32.mrf.mxu1 }
 0x16c   : > { %1928 = vst.msk [vmem:[#allocation2 + $0x78] sm:$0xff] %vm200_vm3, %v1896_v24  ;;  %v873_v25 = vadd.f32 %v815_v23, %v627_v21  ;;  %v1497_v22 = vpop.f32.mrf.mxu3  ;;  %v3937_v24 = vld [vmem:[%s4196_s25 + $0xb0] sm:$0xff] }
 0x16d   : > { %v968_v30 = vld [vmem:[#allocation2 + $0x90] sm:$0xff] }
 0x16e   : > { %905 = vst.msk [vmem:[#allocation2 + $0x98] sm:$0xff] %vm200_vm3, %v873_v25  ;;  %v1214_v31 = vadd.f32 %v1154_v7, %v968_v30  ;;  %3901 = vmatmul.msk.f32.gmra.mxu1 %vm298_vm2, %v3867_v12  ;;  %v4900_v35 = vpop.f32.mrf.mxu0  ;;  %v4003_v25 = vld [vmem:[%s4196_s25 + $0xb2] sm:$0xff] }
 0x16f   : > { %3967 = vmatmul.msk.f32.gmra.mxu2 %vm298_vm2, %v3933_v26  ;;  %v1310_v36 = vld [vmem:[#allocation2 + $0x88] sm:$0xff]  ;;  %v4975_v30 = vld [vmem:[%s4196_s25 + $0xb4] sm:$0xff] }
 0x170   : > { %1246 = vst.msk [vmem:[#allocation2 + $0x90] sm:$0xff] %vm200_vm3, %v1214_v31  ;;  %v1556_v29 = vadd.f32 %v1494_v9, %v1310_v36  ;;  %v4002_v9 = vld [vmem:[%s4196_s25 + $0xaa] sm:$0xff] }
 0x171   : > { %v1651_v39 = vld [vmem:[#allocation2 + $0x80] sm:$0xff]  ;;  %4033 = vmatmul.msk.f32.gmra.mxu3 %vm298_vm2, %v3999_v3  ;;  %4099 = vmatmul.msk.f32.gmra.mxu0 %vm298_vm2, %v4903_v32 }
 0x172   : > { %v1157_v27 = vpop.f32.mrf.mxu2  ;;  %1588 = vst.msk [vmem:[#allocation2 + $0x88] sm:$0xff] %vm200_vm3, %v1556_v29  ;;  %v1897_v40 = vadd.f32 %v4846_v11, %v1651_v39  ;;  %v4921_v11 = vld [vmem:[%s4196_s25 + $0x94] sm:$0xff]  ;;  %v632_v29 = vld [vmem:[#allocation2 + $0xc0] sm:$0xff] }
 0x173   : > { %v818_v41 = vpop.f32.mrf.mxu1 }
 0x174   : > { %1929 = vst.msk [vmem:[#allocation2 + $0x80] sm:$0xff] %vm200_vm3, %v1897_v40  ;;  %v874_v42 = vadd.f32 %v818_v41, %v628_v16  ;;  %v1500_v44 = vpop.f32.mrf.mxu3 }
 0x175   : > { %v969_v45 = vld [vmem:[#allocation2 + $0x98] sm:$0xff] }
 0x176   : > { %906 = vst.msk [vmem:[#allocation2 + $0xa0] sm:$0xff] %vm200_vm3, %v874_v42  ;;  %v1215_v28 = vadd.f32 %v1157_v27, %v969_v45  ;;  %3902 = vmatmul.msk.f32.gmra.mxu1 %vm298_vm2, %v4849_v48  ;;  %v4918_v34 = vpop.f32.mrf.mxu0  ;;  %v3938_v27 = vld [vmem:[%s4196_s25 + $0xc0] sm:$0xff] }
 0x177   : > { %3968 = vmatmul.msk.f32.gmra.mxu2 %vm298_vm2, %v3934_v43  ;;  %v1311_v49 = vld [vmem:[#allocation2 + $0x90] sm:$0xff]  ;;  %v4004_v42 = vld [vmem:[%s4196_s25 + $0xc2] sm:$0xff] }
 0x178   : > { %1247 = vst.msk [vmem:[#allocation2 + $0x98] sm:$0xff] %vm200_vm3, %v1215_v28  ;;  %v1557_v50 = vadd.f32 %v1497_v22, %v1311_v49  ;;  %v4993_v45 = vld [vmem:[%s4196_s25 + $0xc4] sm:$0xff] }
 0x179   : > { %v1652_v51 = vld [vmem:[#allocation2 + $0x88] sm:$0xff]  ;;  %4034 = vmatmul.msk.f32.gmra.mxu3 %vm298_vm2, %v4000_v47  ;;  %4100 = vmatmul.msk.f32.gmra.mxu0 %vm298_vm2, %v4921_v11 }
 0x17a   : > { %v1160_v52 = vpop.f32.mrf.mxu2  ;;  %1589 = vst.msk [vmem:[#allocation2 + $0x90] sm:$0xff] %vm200_vm3, %v1557_v50  ;;  %v1898_v48 = vadd.f32 %v4864_v60, %v1652_v51  ;;  %v633_v50 = vld [vmem:[#allocation2 + $0xc8] sm:$0xff] }
 0x17b   : > { %v821_v53 = vpop.f32.mrf.mxu1 }
 0x17c   : > { %1930 = vst.msk [vmem:[#allocation2 + $0x88] sm:$0xff] %vm200_vm3, %v1898_v48  ;;  %v875_v54 = vadd.f32 %v821_v53, %v629_v46  ;;  %v1503_v56 = vpop.f32.mrf.mxu3 }
 0x17d   : > { %v970_v57 = vld [vmem:[#allocation2 + $0xa0] sm:$0xff] }
 0x17e   : > { %907 = vst.msk [vmem:[#allocation2 + $0xa8] sm:$0xff] %vm200_vm3, %v875_v54  ;;  %v1216_v58 = vadd.f32 %v1160_v52, %v970_v57  ;;  %3903 = vmatmul.msk.f32.gmra.mxu1 %vm298_vm2, %v4867_v61  ;;  %v4936_v33 = vpop.f32.mrf.mxu0  ;;  %v3939_v52 = vld [vmem:[%s4196_s25 + $0xc8] sm:$0xff] }
 0x17f   : > { %3969 = vmatmul.msk.f32.gmra.mxu2 %vm298_vm2, %v3935_v55  ;;  %v1312_v60 = vld [vmem:[#allocation2 + $0x98] sm:$0xff]  ;;  %v4005_v54 = vld [vmem:[%s4196_s25 + $0xca] sm:$0xff] }
 0x180   : > { %1248 = vst.msk [vmem:[#allocation2 + $0xa0] sm:$0xff] %vm200_vm3, %v1216_v58  ;;  %v1558_v63 = vadd.f32 %v1500_v44, %v1312_v60  ;;  %v5011_v57 = vld [vmem:[%s4196_s25 + $0xcc] sm:$0xff] }
 0x181   : > { %v1653_v0 = vld [vmem:[#allocation2 + $0x90] sm:$0xff]  ;;  %4035 = vmatmul.msk.f32.gmra.mxu3 %vm298_vm2, %v4001_v38  ;;  %4101 = vmatmul.msk.f32.gmra.mxu0 %vm298_vm2, %v4939_v15 }
 0x182   : > { %v1163_v59 = vpop.f32.mrf.mxu2  ;;  %1590 = vst.msk [vmem:[#allocation2 + $0x98] sm:$0xff] %vm200_vm3, %v1558_v63  ;;  %v1899_v61 = vadd.f32 %v4882_v14, %v1653_v0  ;;  %v634_v63 = vld [vmem:[#allocation2 + $0xd0] sm:$0xff] }
 0x183   : > { %v824_v1 = vpop.f32.mrf.mxu1 }
 0x184   : > { %1931 = vst.msk [vmem:[#allocation2 + $0x90] sm:$0xff] %vm200_vm3, %v1899_v61  ;;  %v876_v2 = vadd.f32 %v824_v1, %v630_v62  ;;  %v1506_v5 = vpop.f32.mrf.mxu3 }
 0x185   : > { %v971_v8 = vld [vmem:[#allocation2 + $0xa8] sm:$0xff] }
 0x186   : > { %908 = vst.msk [vmem:[#allocation2 + $0xb0] sm:$0xff] %vm200_vm3, %v876_v2  ;;  %v1217_v6 = vadd.f32 %v1163_v59, %v971_v8  ;;  %3904 = vmatmul.msk.f32.gmra.mxu1 %vm298_vm2, %v4885_v17  ;;  %v4954_v19 = vpop.f32.mrf.mxu0  ;;  %v3940_v59 = vld [vmem:[%s4196_s25 + $0xd8] sm:$0xff] }
 0x187   : > { %3970 = vmatmul.msk.f32.gmra.mxu2 %vm298_vm2, %v3936_v4  ;;  %v1313_v37 = vld [vmem:[#allocation2 + $0xa0] sm:$0xff] }
 0x188   : > { %1249 = vst.msk [vmem:[#allocation2 + $0xa8] sm:$0xff] %vm200_vm3, %v1217_v6  ;;  %v1559_v14 = vadd.f32 %v1503_v56, %v1313_v37  ;;  %v4006_v2 = vld [vmem:[%s4196_s25 + $0xda] sm:$0xff] }
 0x189   : > { %v1654_v18 = vld [vmem:[#allocation2 + $0x98] sm:$0xff]  ;;  %4036 = vmatmul.msk.f32.gmra.mxu3 %vm298_vm2, %v4002_v9  ;;  %4102 = vmatmul.msk.f32.gmra.mxu0 %vm298_vm2, %v4957_v10 }
 0x18a   : > { %v1166_v13 = vpop.f32.mrf.mxu2  ;;  %1591 = vst.msk [vmem:[#allocation2 + $0xa0] sm:$0xff] %vm200_vm3, %v1559_v14  ;;  %v1900_v17 = vadd.f32 %v4900_v35, %v1654_v18  ;;  %v5029_v8 = vld [vmem:[%s4196_s25 + $0xdc] sm:$0xff] }
 0x18b   : > { %v827_v7 = vpop.f32.mrf.mxu1  ;;  %v635_v14 = vld [vmem:[#allocation2 + $0xd8] sm:$0xff] }
 0x18c   : > { %1932 = vst.msk [vmem:[#allocation2 + $0x98] sm:$0xff] %vm200_vm3, %v1900_v17  ;;  %v877_v21 = vadd.f32 %v827_v7, %v631_v20  ;;  %v1509_v23 = vpop.f32.mrf.mxu3 }
 0x18d   : > { %v972_v12 = vld [vmem:[#allocation2 + $0xb0] sm:$0xff] }
 0x18e   : > { %909 = vst.msk [vmem:[#allocation2 + $0xb8] sm:$0xff] %vm200_vm3, %v877_v21  ;;  %v1218_v26 = vadd.f32 %v1166_v13, %v972_v12  ;;  %3905 = vmatmul.msk.f32.gmra.mxu1 %vm298_vm2, %v4903_v32  ;;  %v4972_v22 = vpop.f32.mrf.mxu0  ;;  %v3941_v13 = vld [vmem:[%s4196_s25 + $0xe0] sm:$0xff] }
 0x18f   : > { %3971 = vmatmul.msk.f32.gmra.mxu2 %vm298_vm2, %v3937_v24  ;;  %v1314_v31 = vld [vmem:[#allocation2 + $0xa8] sm:$0xff] }
 0x190   : > { %1250 = vst.msk [vmem:[#allocation2 + $0xb0] sm:$0xff] %vm200_vm3, %v1218_v26  ;;  %v1560_v3 = vadd.f32 %v1506_v5, %v1314_v31  ;;  %v4007_v21 = vld [vmem:[%s4196_s25 + $0xe2] sm:$0xff] }
 0x191   : > { %v1655_v35 = vld [vmem:[#allocation2 + $0xa0] sm:$0xff]  ;;  %4037 = vmatmul.msk.f32.gmra.mxu3 %vm298_vm2, %v4003_v25  ;;  %4103 = vmatmul.msk.f32.gmra.mxu0 %vm298_vm2, %v4975_v30 }
 0x192   : > { %v1169_v36 = vpop.f32.mrf.mxu2  ;;  %1592 = vst.msk [vmem:[#allocation2 + $0xa8] sm:$0xff] %vm200_vm3, %v1560_v3  ;;  %v1901_v32 = vadd.f32 %v4918_v34, %v1655_v35  ;;  %v5047_v12 = vld [vmem:[%s4196_s25 + $0xe4] sm:$0xff] }
 0x193   : > { %v830_v39 = vpop.f32.mrf.mxu1  ;;  %v636_v3 = vld [vmem:[#allocation2 + $0xe0] sm:$0xff] }
 0x194   : > { %1933 = vst.msk [vmem:[#allocation2 + $0xa0] sm:$0xff] %vm200_vm3, %v1901_v32  ;;  %v878_v40 = vadd.f32 %v830_v39, %v632_v29  ;;  %v1512_v16 = vpop.f32.mrf.mxu3 }
 0x195   : > { %v973_v41 = vld [vmem:[#allocation2 + $0xb8] sm:$0xff] }
 0x196   : > { %910 = vst.msk [vmem:[#allocation2 + $0xc0] sm:$0xff] %vm200_vm3, %v878_v40  ;;  %v1219_v43 = vadd.f32 %v1169_v36, %v973_v41  ;;  %3906 = vmatmul.msk.f32.gmra.mxu1 %vm298_vm2, %v4921_v11  ;;  %v4990_v44 = vpop.f32.mrf.mxu0  ;;  %v3942_v36 = vld [vmem:[%s4196_s25 + $0xf0] sm:$0xff] }
 0x197   : > { %3972 = vmatmul.msk.f32.gmra.mxu2 %vm298_vm2, %v3938_v27  ;;  %v1315_v28 = vld [vmem:[#allocation2 + $0xb0] sm:$0xff] }
 0x198   : > { %1251 = vst.msk [vmem:[#allocation2 + $0xb8] sm:$0xff] %vm200_vm3, %v1219_v43  ;;  %v1561_v47 = vadd.f32 %v1509_v23, %v1315_v28  ;;  %v4008_v40 = vld [vmem:[%s4196_s25 + $0xf2] sm:$0xff] }
 0x199   : > { %v1656_v34 = vld [vmem:[#allocation2 + $0xa8] sm:$0xff]  ;;  %4038 = vmatmul.msk.f32.gmra.mxu3 %vm298_vm2, %v4004_v42  ;;  %4104 = vmatmul.msk.f32.gmra.mxu0 %vm298_vm2, %v4993_v45  ;;  %v5065_v41 = vld [vmem:[%s4196_s25 + $0xf4] sm:$0xff] }
 0x19a   : > { %v1172_v49 = vpop.f32.mrf.mxu2  ;;  %1593 = vst.msk [vmem:[#allocation2 + $0xb0] sm:$0xff] %vm200_vm3, %v1561_v47  ;;  %v1902_v11 = vadd.f32 %v4936_v33, %v1656_v34  ;;  %v637_v47 = vld [vmem:[#allocation2 + $0xe8] sm:$0xff] }
 0x19b   : > { %v833_v51 = vpop.f32.mrf.mxu1 }
 0x19c   : > { %1934 = vst.msk [vmem:[#allocation2 + $0xa8] sm:$0xff] %vm200_vm3, %v1902_v11  ;;  %v879_v48 = vadd.f32 %v833_v51, %v633_v50  ;;  %v1515_v46 = vpop.f32.mrf.mxu3 }
 0x19d   : > { %v974_v53 = vld [vmem:[#allocation2 + $0xc0] sm:$0xff] }
 0x19e   : > { %911 = vst.msk [vmem:[#allocation2 + $0xc8] sm:$0xff] %vm200_vm3, %v879_v48  ;;  %v1220_v55 = vadd.f32 %v1172_v49, %v974_v53  ;;  %3907 = vmatmul.msk.f32.gmra.mxu1 %vm298_vm2, %v4939_v15  ;;  %v5008_v56 = vpop.f32.mrf.mxu0  ;;  %v3943_v49 = vld [vmem:[%s4196_s25 + $0xf8] sm:$0xff] }
 0x19f   : > { %3973 = vmatmul.msk.f32.gmra.mxu2 %vm298_vm2, %v3939_v52  ;;  %v1316_v58 = vld [vmem:[#allocation2 + $0xb8] sm:$0xff] }
 0x1a0   : > { %1252 = vst.msk [vmem:[#allocation2 + $0xc0] sm:$0xff] %vm200_vm3, %v1220_v55  ;;  %v1562_v38 = vadd.f32 %v1512_v16, %v1316_v58  ;;  %v4009_v48 = vld [vmem:[%s4196_s25 + $0xfa] sm:$0xff] }
 0x1a1   : > { %v1657_v33 = vld [vmem:[#allocation2 + $0xb0] sm:$0xff]  ;;  %4039 = vmatmul.msk.f32.gmra.mxu3 %vm298_vm2, %v4005_v54  ;;  %4105 = vmatmul.msk.f32.gmra.mxu0 %vm298_vm2, %v5011_v57  ;;  %v5083_v53 = vld [vmem:[%s4196_s25 + $0xfc] sm:$0xff] }
 0x1a2   : > { %v1175_v60 = vpop.f32.mrf.mxu2  ;;  %1594 = vst.msk [vmem:[#allocation2 + $0xb8] sm:$0xff] %vm200_vm3, %v1562_v38  ;;  %v1903_v15 = vadd.f32 %v4954_v19, %v1657_v33  ;;  %v638_v38 = vld [vmem:[#allocation2 + $0xf0] sm:$0xff] }
 0x1a3   : > { %v836_v0 = vpop.f32.mrf.mxu1 }
 0x1a4   : > { %1935 = vst.msk [vmem:[#allocation2 + $0xb0] sm:$0xff] %vm200_vm3, %v1903_v15  ;;  %v880_v61 = vadd.f32 %v836_v0, %v634_v63  ;;  %v1518_v62 = vpop.f32.mrf.mxu3 }
 0x1a5   : > { %v975_v1 = vld [vmem:[#allocation2 + $0xc8] sm:$0xff] }
 0x1a6   : > { %912 = vst.msk [vmem:[#allocation2 + $0xd0] sm:$0xff] %vm200_vm3, %v880_v61  ;;  %v1221_v4 = vadd.f32 %v1175_v60, %v975_v1  ;;  %3908 = vmatmul.msk.f32.gmra.mxu1 %vm298_vm2, %v4957_v10  ;;  %v5026_v5 = vpop.f32.mrf.mxu0  ;;  %v3944_v60 = vld [vmem:[%s4196_s25 + $0x108] sm:$0xff] }
 0x1a7   : > { %3974 = vmatmul.msk.f32.gmra.mxu2 %vm298_vm2, %v3940_v59  ;;  %v1317_v6 = vld [vmem:[#allocation2 + $0xc0] sm:$0xff]  ;;  %v4010_v61 = vld [vmem:[%s4196_s25 + $0x10a] sm:$0xff] }
 0x1a8   : > { %1253 = vst.msk [vmem:[#allocation2 + $0xc8] sm:$0xff] %vm200_vm3, %v1221_v4  ;;  %v1563_v9 = vadd.f32 %v1515_v46, %v1317_v6  ;;  %v5101_v1 = vld [vmem:[%s4196_s25 + $0x10c] sm:$0xff] }
 0x1a9   : > { %v1658_v19 = vld [vmem:[#allocation2 + $0xb8] sm:$0xff]  ;;  %4040 = vmatmul.msk.f32.gmra.mxu3 %vm298_vm2, %v4006_v2  ;;  %4106 = vmatmul.msk.f32.gmra.mxu0 %vm298_vm2, %v5029_v8 }
 0x1aa   : > { %v1178_v37 = vpop.f32.mrf.mxu2  ;;  %1595 = vst.msk [vmem:[#allocation2 + $0xc0] sm:$0xff] %vm200_vm3, %v1563_v9  ;;  %v1904_v10 = vadd.f32 %v4972_v22, %v1658_v19  ;;  %v639_v9 = vld [vmem:[#allocation2 + $0xf8] sm:$0xff] }
 0x1ab   : > { %v839_v18 = vpop.f32.mrf.mxu1 }
 0x1ac   : > { %1936 = vst.msk [vmem:[#allocation2 + $0xb8] sm:$0xff] %vm200_vm3, %v1904_v10  ;;  %v881_v17 = vadd.f32 %v839_v18, %v635_v14  ;;  %v1521_v20 = vpop.f32.mrf.mxu3 }
 0x1ad   : > { %v976_v7 = vld [vmem:[#allocation2 + $0xd0] sm:$0xff] }
 0x1ae   : > { %913 = vst.msk [vmem:[#allocation2 + $0xd8] sm:$0xff] %vm200_vm3, %v881_v17  ;;  %v1222_v24 = vadd.f32 %v1178_v37, %v976_v7  ;;  %3909 = vmatmul.msk.f32.gmra.mxu1 %vm298_vm2, %v4975_v30  ;;  %v5044_v23 = vpop.f32.mrf.mxu0  ;;  %v3945_v37 = vld [vmem:[%s4196_s25 + $0x110] sm:$0xff] }
 0x1af   : > { %3975 = vmatmul.msk.f32.gmra.mxu2 %vm298_vm2, %v3941_v13  ;;  %v1318_v26 = vld [vmem:[#allocation2 + $0xc8] sm:$0xff]  ;;  %v4011_v17 = vld [vmem:[%s4196_s25 + $0x112] sm:$0xff] }
 0x1b0   : > { %1254 = vst.msk [vmem:[#allocation2 + $0xd0] sm:$0xff] %vm200_vm3, %v1222_v24  ;;  %v1564_v25 = vadd.f32 %v1518_v62, %v1318_v26  ;;  %v5119_v7 = vld [vmem:[%s4196_s25 + $0x114] sm:$0xff] }
 0x1b1   : > { %v1659_v22 = vld [vmem:[#allocation2 + $0xc0] sm:$0xff]  ;;  %4041 = vmatmul.msk.f32.gmra.mxu3 %vm298_vm2, %v4007_v21  ;;  %4107 = vmatmul.msk.f32.gmra.mxu0 %vm298_vm2, %v5047_v12 }
 0x1b2   : > { %v1181_v31 = vpop.f32.mrf.mxu2  ;;  %1596 = vst.msk [vmem:[#allocation2 + $0xc8] sm:$0xff] %vm200_vm3, %v1564_v25  ;;  %v1905_v30 = vadd.f32 %v4990_v44, %v1659_v22  ;;  %v1977_v25 = vld [vmem:[#allocation2] sm:$0xff] }
 0x1b3   : > { %v842_v35 = vpop.f32.mrf.mxu1 }
 0x1b4   : > { %1937 = vst.msk [vmem:[#allocation2 + $0xc0] sm:$0xff] %vm200_vm3, %v1905_v30  ;;  %v882_v32 = vadd.f32 %v842_v35, %v636_v3  ;;  %v1524_v29 = vpop.f32.mrf.mxu3 }
 0x1b5   : > { %v977_v39 = vld [vmem:[#allocation2 + $0xd8] sm:$0xff] }
 0x1b6   : > { %914 = vst.msk [vmem:[#allocation2 + $0xe0] sm:$0xff] %vm200_vm3, %v882_v32  ;;  %v1223_v27 = vadd.f32 %v1181_v31, %v977_v39  ;;  %3910 = vmatmul.msk.f32.gmra.mxu1 %vm298_vm2, %v4993_v45  ;;  %v5062_v16 = vpop.f32.mrf.mxu0  ;;  %v3946_v31 = vld [vmem:[%s4196_s25 + $0x120] sm:$0xff] }
 0x1b7   : > { %3976 = vmatmul.msk.f32.gmra.mxu2 %vm298_vm2, %v3942_v36  ;;  %v1319_v43 = vld [vmem:[#allocation2 + $0xd0] sm:$0xff]  ;;  %v4012_v32 = vld [vmem:[%s4196_s25 + $0x122] sm:$0xff] }
 0x1b8   : > { %1255 = vst.msk [vmem:[#allocation2 + $0xd8] sm:$0xff] %vm200_vm3, %v1223_v27  ;;  %v1565_v42 = vadd.f32 %v1521_v20, %v1319_v43  ;;  %v5137_v39 = vld [vmem:[%s4196_s25 + $0x124] sm:$0xff] }
 0x1b9   : > { %v1660_v44 = vld [vmem:[#allocation2 + $0xc8] sm:$0xff]  ;;  %4042 = vmatmul.msk.f32.gmra.mxu3 %vm298_vm2, %v4008_v40  ;;  %4108 = vmatmul.msk.f32.gmra.mxu0 %vm298_vm2, %v5065_v41 }
 0x1ba   : > { %v1184_v28 = vpop.f32.mrf.mxu2  ;;  %1597 = vst.msk [vmem:[#allocation2 + $0xd0] sm:$0xff] %vm200_vm3, %v1565_v42  ;;  %v1906_v45 = vadd.f32 %v5008_v56, %v1660_v44  ;;  %v1978_v42 = vld [vmem:[#allocation2 + $0x8] sm:$0xff] }
 0x1bb   : > { %v845_v34 = vpop.f32.mrf.mxu1 }
 0x1bc   : > { %1938 = vst.msk [vmem:[#allocation2 + $0xc8] sm:$0xff] %vm200_vm3, %v1906_v45  ;;  %v883_v11 = vadd.f32 %v845_v34, %v637_v47  ;;  %v1527_v50 = vpop.f32.mrf.mxu3 }
 0x1bd   : > { %v978_v51 = vld [vmem:[#allocation2 + $0xe0] sm:$0xff] }
 0x1be   : > { %915 = vst.msk [vmem:[#allocation2 + $0xe8] sm:$0xff] %vm200_vm3, %v883_v11  ;;  %v1224_v52 = vadd.f32 %v1184_v28, %v978_v51  ;;  %3911 = vmatmul.msk.f32.gmra.mxu1 %vm298_vm2, %v5011_v57  ;;  %v5080_v46 = vpop.f32.mrf.mxu0  ;;  %v3947_v28 = vld [vmem:[%s4196_s25 + $0x128] sm:$0xff] }
 0x1bf   : > { %3977 = vmatmul.msk.f32.gmra.mxu2 %vm298_vm2, %v3943_v49  ;;  %v1320_v55 = vld [vmem:[#allocation2 + $0xd8] sm:$0xff]  ;;  %v4013_v11 = vld [vmem:[%s4196_s25 + $0x12a] sm:$0xff] }
 0x1c0   : > { %1256 = vst.msk [vmem:[#allocation2 + $0xe0] sm:$0xff] %vm200_vm3, %v1224_v52  ;;  %v1566_v54 = vadd.f32 %v1524_v29, %v1320_v55  ;;  %v5155_v51 = vld [vmem:[%s4196_s25 + $0x12c] sm:$0xff] }
 0x1c1   : > { %v1661_v56 = vld [vmem:[#allocation2 + $0xd0] sm:$0xff]  ;;  %4043 = vmatmul.msk.f32.gmra.mxu3 %vm298_vm2, %v4009_v48  ;;  %4109 = vmatmul.msk.f32.gmra.mxu0 %vm298_vm2, %v5083_v53 }
 0x1c2   : > { %v1187_v58 = vpop.f32.mrf.mxu2  ;;  %1598 = vst.msk [vmem:[#allocation2 + $0xd8] sm:$0xff] %vm200_vm3, %v1566_v54  ;;  %v1907_v57 = vadd.f32 %v5026_v5, %v1661_v56  ;;  %v1979_v54 = vld [vmem:[#allocation2 + $0x10] sm:$0xff] }
 0x1c3   : > { %v848_v33 = vpop.f32.mrf.mxu1 }
 0x1c4   : > { %1939 = vst.msk [vmem:[#allocation2 + $0xd0] sm:$0xff] %vm200_vm3, %v1907_v57  ;;  %v884_v15 = vadd.f32 %v848_v33, %v638_v38  ;;  %v1530_v63 = vpop.f32.mrf.mxu3 }
 0x1c5   : > { %v979_v0 = vld [vmem:[#allocation2 + $0xe8] sm:$0xff] }
 0x1c6   : > { %916 = vst.msk [vmem:[#allocation2 + $0xf0] sm:$0xff] %vm200_vm3, %v884_v15  ;;  %v1225_v59 = vadd.f32 %v1187_v58, %v979_v0  ;;  %3912 = vmatmul.msk.f32.gmra.mxu1 %vm298_vm2, %v5029_v8  ;;  %v5098_v62 = vpop.f32.mrf.mxu0  ;;  %v3948_v58 = vld [vmem:[%s4196_s25 + $0x138] sm:$0xff] }
 0x1c7   : > { %3978 = vmatmul.msk.f32.gmra.mxu2 %vm298_vm2, %v3944_v60  ;;  %v1321_v4 = vld [vmem:[#allocation2 + $0xe0] sm:$0xff] }
 0x1c8   : > { %1257 = vst.msk [vmem:[#allocation2 + $0xe8] sm:$0xff] %vm200_vm3, %v1225_v59  ;;  %v1567_v2 = vadd.f32 %v1527_v50, %v1321_v4  ;;  %v4014_v15 = vld [vmem:[%s4196_s25 + $0x13a] sm:$0xff] }
 0x1c9   : > { %v1662_v5 = vld [vmem:[#allocation2 + $0xd8] sm:$0xff]  ;;  %4044 = vmatmul.msk.f32.gmra.mxu3 %vm298_vm2, %v4010_v61  ;;  %4110 = vmatmul.msk.f32.gmra.mxu0 %vm298_vm2, %v5101_v1 }
 0x1ca   : > { %v1190_v6 = vpop.f32.mrf.mxu2  ;;  %1599 = vst.msk [vmem:[#allocation2 + $0xe0] sm:$0xff] %vm200_vm3, %v1567_v2  ;;  %v1908_v8 = vadd.f32 %v5044_v23, %v1662_v5  ;;  %v5173_v0 = vld [vmem:[%s4196_s25 + $0x13c] sm:$0xff] }
 0x1cb   : > { %v851_v19 = vpop.f32.mrf.mxu1  ;;  %v1980_v2 = vld [vmem:[#allocation2 + $0x18] sm:$0xff] }
 0x1cc   : > { %1940 = vst.msk [vmem:[#allocation2 + $0xd8] sm:$0xff] %vm200_vm3, %v1908_v8  ;;  %v885_v10 = vadd.f32 %v851_v19, %v639_v9  ;;  %v1533_v14 = vpop.f32.mrf.mxu3 }
 0x1cd   : > { %v980_v18 = vld [vmem:[#allocation2 + $0xf0] sm:$0xff] }
 0x1ce   : > { %917 = vst.msk [vmem:[#allocation2 + $0xf8] sm:$0xff] %vm200_vm3, %v885_v10  ;;  %v1226_v13 = vadd.f32 %v1190_v6, %v980_v18  ;;  %3913 = vmatmul.msk.f32.gmra.mxu1 %vm298_vm2, %v5047_v12  ;;  %v5116_v20 = vpop.f32.mrf.mxu0  ;;  %v3949_v6 = vld [vmem:[%s4196_s25 + $0x140] sm:$0xff] }
 0x1cf   : > { %3979 = vmatmul.msk.f32.gmra.mxu2 %vm298_vm2, %v3945_v37  ;;  %v1322_v24 = vld [vmem:[#allocation2 + $0xe8] sm:$0xff] }
 0x1d0   : > { %1258 = vst.msk [vmem:[#allocation2 + $0xf0] sm:$0xff] %vm200_vm3, %v1226_v13  ;;  %v1568_v21 = vadd.f32 %v1530_v63, %v1322_v24  ;;  %v4015_v10 = vld [vmem:[%s4196_s25 + $0x142] sm:$0xff] }
 0x1d1   : > { %v1663_v23 = vld [vmem:[#allocation2 + $0xe0] sm:$0xff]  ;;  %4045 = vmatmul.msk.f32.gmra.mxu3 %vm298_vm2, %v4011_v17  ;;  %4111 = vmatmul.msk.f32.gmra.mxu0 %vm298_vm2, %v5119_v7 }
 0x1d2   : > { %v1193_v26 = vpop.f32.mrf.mxu2  ;;  %1600 = vst.msk [vmem:[#allocation2 + $0xe8] sm:$0xff] %vm200_vm3, %v1568_v21  ;;  %v1909_v12 = vadd.f32 %v5062_v16, %v1663_v23  ;;  %v5191_v18 = vld [vmem:[%s4196_s25 + $0x144] sm:$0xff] }
 0x1d3   : > { %v2127_v22 = vpop.f32.mrf.mxu1  ;;  %v1981_v21 = vld [vmem:[#allocation2 + $0x20] sm:$0xff] }
 0x1d4   : > { %1941 = vst.msk [vmem:[#allocation2 + $0xe0] sm:$0xff] %vm200_vm3, %v1909_v12  ;;  %v2223_v30 = vadd.f32 %v2127_v22, %v1977_v25  ;;  %v1536_v3 = vpop.f32.mrf.mxu3 }
 0x1d5   : > { %v981_v35 = vld [vmem:[#allocation2 + $0xf8] sm:$0xff] }
 0x1d6   : > { %2255 = vst.msk [vmem:[#allocation2] sm:$0xff] %vm200_vm3, %v2223_v30  ;;  %v1227_v36 = vadd.f32 %v1193_v26, %v981_v35  ;;  %3914 = vmatmul.msk.f32.gmra.mxu1 %vm298_vm2, %v5065_v41  ;;  %v5134_v29 = vpop.f32.mrf.mxu0  ;;  %v3950_v26 = vld [vmem:[%s4196_s25 + $0x150] sm:$0xff] }
 0x1d7   : > { %3980 = vmatmul.msk.f32.gmra.mxu2 %vm298_vm2, %v3946_v31  ;;  %v1323_v27 = vld [vmem:[#allocation2 + $0xf0] sm:$0xff] }
 0x1d8   : > { %1259 = vst.msk [vmem:[#allocation2 + $0xf8] sm:$0xff] %vm200_vm3, %v1227_v36  ;;  %v1569_v40 = vadd.f32 %v1533_v14, %v1323_v27  ;;  %v4016_v30 = vld [vmem:[%s4196_s25 + $0x152] sm:$0xff] }
 0x1d9   : > { %v1664_v16 = vld [vmem:[#allocation2 + $0xe8] sm:$0xff]  ;;  %4046 = vmatmul.msk.f32.gmra.mxu3 %vm298_vm2, %v4012_v32  ;;  %4112 = vmatmul.msk.f32.gmra.mxu0 %vm298_vm2, %v5137_v39  ;;  %v5209_v35 = vld [vmem:[%s4196_s25 + $0x154] sm:$0xff] }
 0x1da   : > { %v2470_v43 = vpop.f32.mrf.mxu2  ;;  %1601 = vst.msk [vmem:[#allocation2 + $0xf0] sm:$0xff] %vm200_vm3, %v1569_v40  ;;  %v1910_v41 = vadd.f32 %v5080_v46, %v1664_v16  ;;  %v1982_v16 = vld [vmem:[#allocation2 + $0x28] sm:$0xff] }
 0x1db   : > { %v2130_v44 = vpop.f32.mrf.mxu1 }
 0x1dc   : > { %1942 = vst.msk [vmem:[#allocation2 + $0xe8] sm:$0xff] %vm200_vm3, %v1910_v41  ;;  %v2224_v45 = vadd.f32 %v2130_v44, %v1978_v42  ;;  %v2812_v47 = vpop.f32.mrf.mxu3  ;;  %v3951_v41 = vld [vmem:[%s4196_s25 + $0x158] sm:$0xff] }
 0x1dd   : > { %v2320_v34 = vld [vmem:[#allocation2] sm:$0xff] }
 0x1de   : > { %2256 = vst.msk [vmem:[#allocation2 + $0x8] sm:$0xff] %vm200_vm3, %v2224_v45  ;;  %v2566_v49 = vadd.f32 %v2470_v43, %v2320_v34  ;;  %3915 = vmatmul.msk.f32.gmra.mxu1 %vm298_vm2, %v5083_v53  ;;  %v5152_v50 = vpop.f32.mrf.mxu0 }
 0x1df   : > { %3981 = vmatmul.msk.f32.gmra.mxu2 %vm298_vm2, %v3947_v28  ;;  %v1324_v52 = vld [vmem:[#allocation2 + $0xf8] sm:$0xff] }
 0x1e0   : > { %2598 = vst.msk [vmem:[#allocation2] sm:$0xff] %vm200_vm3, %v2566_v49  ;;  %v1570_v48 = vadd.f32 %v1536_v3, %v1324_v52  ;;  %v5229_v49 = vld [vmem:[%s4196_s25 + $0x15c] sm:$0xff] }
 0x1e1   : > { %v1665_v46 = vld [vmem:[#allocation2 + $0xf0] sm:$0xff]  ;;  %4047 = vmatmul.msk.f32.gmra.mxu3 %vm298_vm2, %v4013_v11  ;;  %4113 = vmatmul.msk.f32.gmra.mxu0 %vm298_vm2, %v5155_v51 }
 0x1e2   : > { %v2473_v55 = vpop.f32.mrf.mxu2  ;;  %1602 = vst.msk [vmem:[#allocation2 + $0xf8] sm:$0xff] %vm200_vm3, %v1570_v48  ;;  %v1911_v53 = vadd.f32 %v5098_v62, %v1665_v46 }
 0x1e3   : > { %v2133_v56 = vpop.f32.mrf.mxu1 }
 0x1e4   : > { %1943 = vst.msk [vmem:[#allocation2 + $0xf0] sm:$0xff] %vm200_vm3, %v1911_v53  ;;  %v2225_v57 = vadd.f32 %v2133_v56, %v1979_v54  ;;  %v2815_v38 = vpop.f32.mrf.mxu3  ;;  %v3952_v54 = vld [vmem:[%s4196_s25 + $0x168] sm:$0xff] }
 0x1e5   : > { %v2321_v33 = vld [vmem:[#allocation2 + $0x8] sm:$0xff] }
 0x1e6   : > { %2257 = vst.msk [vmem:[#allocation2 + $0x10] sm:$0xff] %vm200_vm3, %v2225_v57  ;;  %v2567_v60 = vadd.f32 %v2473_v55, %v2321_v33  ;;  %3916 = vmatmul.msk.f32.gmra.mxu1 %vm298_vm2, %v5101_v1  ;;  %v5170_v63 = vpop.f32.mrf.mxu0  ;;  %v1983_v55 = vld [vmem:[#allocation2 + $0x30] sm:$0xff] }
 0x1e7   : > { %3982 = vmatmul.msk.f32.gmra.mxu2 %vm298_vm2, %v3948_v58  ;;  %v2662_v59 = vld [vmem:[#allocation2] sm:$0xff] }
 0x1e8   : > { %2599 = vst.msk [vmem:[#allocation2 + $0x8] sm:$0xff] %vm200_vm3, %v2567_v60  ;;  %v2908_v61 = vadd.f32 %v2812_v47, %v2662_v59  ;;  %v4017_v47 = vld [vmem:[%s4196_s25 + $0x15a] sm:$0xff] }
 0x1e9   : > { %v1666_v62 = vld [vmem:[#allocation2 + $0xf8] sm:$0xff]  ;;  %4048 = vmatmul.msk.f32.gmra.mxu3 %vm298_vm2, %v4014_v15  ;;  %4114 = vmatmul.msk.f32.gmra.mxu0 %vm298_vm2, %v5173_v0 }
 0x1ea   : > { %v2476_v4 = vpop.f32.mrf.mxu2  ;;  %2940 = vst.msk [vmem:[#allocation2] sm:$0xff] %vm200_vm3, %v2908_v61  ;;  %v1912_v1 = vadd.f32 %v5116_v20, %v1666_v62  ;;  %v4018_v61 = vld [vmem:[%s4196_s25 + $0x16a] sm:$0xff] }
 0x1eb   : > { %v2136_v5 = vpop.f32.mrf.mxu1 }
 0x1ec   : > { %1944 = vst.msk [vmem:[#allocation2 + $0xf8] sm:$0xff] %vm200_vm3, %v1912_v1  ;;  %v2226_v8 = vadd.f32 %v2136_v5, %v1980_v2  ;;  %v2818_v9 = vpop.f32.mrf.mxu3 }
 0x1ed   : > { %v2322_v19 = vld [vmem:[#allocation2 + $0x10] sm:$0xff] }
 0x1ee   : > { %2258 = vst.msk [vmem:[#allocation2 + $0x18] sm:$0xff] %vm200_vm3, %v2226_v8  ;;  %v2568_v37 = vadd.f32 %v2476_v4, %v2322_v19  ;;  %3917 = vmatmul.msk.f32.gmra.mxu1 %vm298_vm2, %v5119_v7  ;;  %v5188_v14 = vpop.f32.mrf.mxu0  ;;  %v5251_v4 = vld [vmem:[%s4196_s25 + $0x16c] sm:$0xff] }
 0x1ef   : > { %3983 = vmatmul.msk.f32.gmra.mxu2 %vm298_vm2, %v3949_v6  ;;  %v2663_v13 = vld [vmem:[#allocation2 + $0x8] sm:$0xff] }
 0x1f0   : > { %2600 = vst.msk [vmem:[#allocation2 + $0x10] sm:$0xff] %vm200_vm3, %v2568_v37  ;;  %v2909_v17 = vadd.f32 %v2815_v38, %v2663_v13 }
 0x1f1   : > { %v3004_v20 = vld [vmem:[#allocation2] sm:$0xff]  ;;  %4049 = vmatmul.msk.f32.gmra.mxu3 %vm298_vm2, %v4015_v10  ;;  %4115 = vmatmul.msk.f32.gmra.mxu0 %vm298_vm2, %v5191_v18  ;;  %v1984_v10 = vld [vmem:[#allocation2 + $0x38] sm:$0xff] }
 0x1f2   : > { %v2479_v24 = vpop.f32.mrf.mxu2  ;;  %2941 = vst.msk [vmem:[#allocation2 + $0x8] sm:$0xff] %vm200_vm3, %v2909_v17  ;;  %v3250_v7 = vadd.f32 %v5134_v29, %v3004_v20  ;;  %v3953_v17 = vld [vmem:[%s4196_s25 + $0x170] sm:$0xff] }
 0x1f3   : > { %v2139_v23 = vpop.f32.mrf.mxu1 }
 0x1f4   : > { %3282 = vst.msk [vmem:[#allocation2] sm:$0xff] %vm200_vm3, %v3250_v7  ;;  %v2227_v12 = vadd.f32 %v2139_v23, %v1981_v21  ;;  %v2821_v25 = vpop.f32.mrf.mxu3 }
 0x1f5   : > { %v2323_v22 = vld [vmem:[#allocation2 + $0x18] sm:$0xff] }
 0x1f6   : > { %2259 = vst.msk [vmem:[#allocation2 + $0x20] sm:$0xff] %vm200_vm3, %v2227_v12  ;;  %v2569_v31 = vadd.f32 %v2479_v24, %v2323_v22  ;;  %3918 = vmatmul.msk.f32.gmra.mxu1 %vm298_vm2, %v5137_v39  ;;  %v5206_v3 = vpop.f32.mrf.mxu0 }
 0x1f7   : > { %3984 = vmatmul.msk.f32.gmra.mxu2 %vm298_vm2, %v3950_v26  ;;  %v2664_v36 = vld [vmem:[#allocation2 + $0x10] sm:$0xff] }
 0x1f8   : > { %2601 = vst.msk [vmem:[#allocation2 + $0x18] sm:$0xff] %vm200_vm3, %v2569_v31  ;;  %v2910_v32 = vadd.f32 %v2818_v9, %v2664_v36  ;;  %v5275_v31 = vld [vmem:[%s4196_s25 + $0x174] sm:$0xff] }
 0x1f9   : > { %v3005_v29 = vld [vmem:[#allocation2 + $0x8] sm:$0xff]  ;;  %4050 = vmatmul.msk.f32.gmra.mxu3 %vm298_vm2, %v4016_v30  ;;  %4116 = vmatmul.msk.f32.gmra.mxu0 %vm298_vm2, %v5209_v35 }
 0x1fa   : > { %v2482_v27 = vpop.f32.mrf.mxu2  ;;  %2942 = vst.msk [vmem:[#allocation2 + $0x10] sm:$0xff] %vm200_vm3, %v2910_v32  ;;  %v3251_v39 = vadd.f32 %v5152_v50, %v3005_v29 }
 0x1fb   : > { %v3314_v40 = vld [vmem:[#allocation2] sm:$0xff]  ;;  %v2142_v43 = vpop.f32.mrf.mxu1 }
 0x1fc   : > { %3523 = vst.msk [vmem:[%s4191_s22] sm:$0xff] %vm200_vm3, %v3314_v40  ;;  %v2228_v42 = vadd.f32 %v2142_v43, %v1982_v16  ;;  %v2824_v44 = vpop.f32.mrf.mxu3  ;;  %v3420_v46 = vmul.f32 %v3314_v40, %v3314_v40  ;;  %v3347_v38 = vsel %vm200_vm3, %v3314_v40, 0.0  ;;  %v3954_v16 = vld [vmem:[%s4196_s25 + $0x180] sm:$0xff] }
 0x1fd   : > { %3283 = vst.msk [vmem:[#allocation2 + $0x8] sm:$0xff] %vm200_vm3, %v3251_v39  ;;  %v2324_v28 = vld [vmem:[#allocation2 + $0x20] sm:$0xff] }
 0x1fe   : > { %2260 = vst.msk [vmem:[#allocation2 + $0x28] sm:$0xff] %vm200_vm3, %v2228_v42  ;;  %v2570_v45 = vadd.f32 %v2482_v27, %v2324_v28  ;;  %3919 = vmatmul.msk.f32.gmra.mxu1 %vm298_vm2, %v5155_v51  ;;  %v5226_v34 = vpop.f32.mrf.mxu0  ;;  %v3452_v1 = vsel %vm200_vm3, %v3420_v46, 0.0  ;;  %v1985_v39 = vld [vmem:[#allocation2 + $0x40] sm:$0xff] }
 0x1ff   : > { %3985 = vmatmul.msk.f32.gmra.mxu2 %vm298_vm2, %v3951_v41  ;;  %v2665_v11 = vld [vmem:[#allocation2 + $0x18] sm:$0xff] }
 0x200   : > { %2602 = vst.msk [vmem:[#allocation2 + $0x20] sm:$0xff] %vm200_vm3, %v2570_v45  ;;  %v2911_v50 = vadd.f32 %v2821_v25, %v2665_v11  ;;  %v4019_v25 = vld [vmem:[%s4196_s25 + $0x172] sm:$0xff]  ;;  %v4020_v11 = vld [vmem:[%s4196_s25 + $0x182] sm:$0xff] }
 0x201   : > { %v3006_v52 = vld [vmem:[#allocation2 + $0x10] sm:$0xff]  ;;  %4051 = vmatmul.msk.f32.gmra.mxu3 %vm298_vm2, %v4017_v47  ;;  %4117 = vmatmul.msk.f32.gmra.mxu0 %vm298_vm2, %v5229_v49 }
 0x202   : > { %v2485_v48 = vpop.f32.mrf.mxu2  ;;  %2943 = vst.msk [vmem:[#allocation2 + $0x18] sm:$0xff] %vm200_vm3, %v2911_v50  ;;  %v3252_v51 = vadd.f32 %v5170_v63, %v3006_v52  ;;  %v5296_v52 = vld [vmem:[%s4196_s25 + $0x184] sm:$0xff] }
 0x203   : > { %v2145_v53 = vpop.f32.mrf.mxu1 }
 0x204   : > { %v3315_v56 = vld [vmem:[#allocation2 + $0x8] sm:$0xff]  ;;  %3284 = vst.msk [vmem:[#allocation2 + $0x10] sm:$0xff] %vm200_vm3, %v3252_v51  ;;  %v2229_v58 = vadd.f32 %v2145_v53, %v1983_v55  ;;  %v2827_v57 = vpop.f32.mrf.mxu3 }
 0x205   : > { %v3348_v33 = vsel %vm200_vm3, %v3315_v56, 0.0  ;;  %v3421_v60 = vmul.f32 %v3315_v56, %v3315_v56  ;;  %3524 = vst.msk [vmem:[%s4191_s22 + $0x8] sm:$0xff] %vm200_vm3, %v3315_v56  ;;  %v2325_v15 = vld [vmem:[#allocation2 + $0x28] sm:$0xff] }
 0x206   : > { %v3349_v63 = vadd.f32 %v3348_v33, %v3347_v38  ;;  %2261 = vst.msk [vmem:[#allocation2 + $0x30] sm:$0xff] %vm200_vm3, %v2229_v58  ;;  %v2571_v59 = vadd.f32 %v2485_v48, %v2325_v15  ;;  %3920 = vmatmul.msk.f32.gmra.mxu1 %vm298_vm2, %v5173_v0  ;;  %v5248_v62 = vpop.f32.mrf.mxu0  ;;  %v1986_v58 = vld [vmem:[#allocation2 + $0x48] sm:$0xff] }
 0x207   : > { %3986 = vmatmul.msk.f32.gmra.mxu2 %vm298_vm2, %v3952_v54  ;;  %v3453_v2 = vsel %vm200_vm3, %v3421_v60, 0.0  ;;  %v2666_v5 = vld [vmem:[#allocation2 + $0x20] sm:$0xff]  ;;  %v3955_v38 = vld [vmem:[%s4196_s25 + $0x188] sm:$0xff] }
 0x208   : > { %v3454_v6 = vadd.f32 %v3453_v2, %v3452_v1  ;;  %2603 = vst.msk [vmem:[#allocation2 + $0x28] sm:$0xff] %vm200_vm3, %v2571_v59  ;;  %v2912_v8 = vadd.f32 %v2824_v44, %v2666_v5  ;;  %v4021_v2 = vld [vmem:[%s4196_s25 + $0x18a] sm:$0xff] }
 0x209   : > { %v3007_v9 = vld [vmem:[#allocation2 + $0x18] sm:$0xff]  ;;  %4052 = vmatmul.msk.f32.gmra.mxu3 %vm298_vm2, %v4018_v61  ;;  %4118 = vmatmul.msk.f32.gmra.mxu0 %vm298_vm2, %v5251_v4 }
 0x20a   : > { %v2488_v0 = vpop.f32.mrf.mxu2  ;;  %2944 = vst.msk [vmem:[#allocation2 + $0x20] sm:$0xff] %vm200_vm3, %v2912_v8  ;;  %v3253_v19 = vadd.f32 %v5188_v14, %v3007_v9 }
 0x20b   : > { %v3316_v37 = vld [vmem:[#allocation2 + $0x10] sm:$0xff]  ;;  %v2148_v13 = vpop.f32.mrf.mxu1 }
 0x20c   : > { %v3350_v20 = vsel %vm200_vm3, %v3316_v37, 0.0  ;;  %v3422_v24 = vmul.f32 %v3316_v37, %v3316_v37  ;;  %3525 = vst.msk [vmem:[%s4191_s22 + $0x10] sm:$0xff] %vm200_vm3, %v3316_v37  ;;  %v2230_v7 = vadd.f32 %v2148_v13, %v1984_v10  ;;  %v2830_v21 = vpop.f32.mrf.mxu3  ;;  %v1987_v10 = vld [vmem:[#allocation2 + $0x50] sm:$0xff] }
 0x20d   : > { %v3351_v23 = vadd.f32 %v3350_v20, %v3349_v63  ;;  %3285 = vst.msk [vmem:[#allocation2 + $0x18] sm:$0xff] %vm200_vm3, %v3253_v19  ;;  %v2326_v26 = vld [vmem:[#allocation2 + $0x30] sm:$0xff] }
 0x20e   : > { %v3455_v12 = vsel %vm200_vm3, %v3422_v24, 0.0  ;;  %2262 = vst.msk [vmem:[#allocation2 + $0x38] sm:$0xff] %vm200_vm3, %v2230_v7  ;;  %v2572_v14 = vadd.f32 %v2488_v0, %v2326_v26  ;;  %3921 = vmatmul.msk.f32.gmra.mxu1 %vm298_vm2, %v5191_v18  ;;  %v5272_v22 = vpop.f32.mrf.mxu0 }
 0x20f   : > { %3987 = vmatmul.msk.f32.gmra.mxu2 %vm298_vm2, %v3953_v17  ;;  %v3456_v30 = vadd.f32 %v3455_v12, %v3454_v6  ;;  %v2667_v36 = vld [vmem:[#allocation2 + $0x28] sm:$0xff]  ;;  %v3956_v17 = vld [vmem:[%s4196_s25 + $0x198] sm:$0xff] }
 0x210   : > { %2604 = vst.msk [vmem:[#allocation2 + $0x30] sm:$0xff] %vm200_vm3, %v2572_v14  ;;  %v2913_v32 = vadd.f32 %v2827_v57, %v2667_v36  ;;  %v5319_v6 = vld [vmem:[%s4196_s25 + $0x18c] sm:$0xff]  ;;  %v4022_v14 = vld [vmem:[%s4196_s25 + $0x19a] sm:$0xff] }
 0x211   : > { %v3008_v29 = vld [vmem:[#allocation2 + $0x20] sm:$0xff]  ;;  %4053 = vmatmul.msk.f32.gmra.mxu3 %vm298_vm2, %v4019_v25  ;;  %4119 = vmatmul.msk.f32.gmra.mxu0 %vm298_vm2, %v5275_v31 }
 0x212   : > { %v2491_v27 = vpop.f32.mrf.mxu2  ;;  %2945 = vst.msk [vmem:[#allocation2 + $0x28] sm:$0xff] %vm200_vm3, %v2913_v32  ;;  %v3254_v18 = vadd.f32 %v5206_v3, %v3008_v29 }
 0x213   : > { %v2151_v40 = vpop.f32.mrf.mxu1 }
 0x214   : > { %v3317_v43 = vld [vmem:[#allocation2 + $0x18] sm:$0xff]  ;;  %3286 = vst.msk [vmem:[#allocation2 + $0x20] sm:$0xff] %vm200_vm3, %v3254_v18  ;;  %v2231_v41 = vadd.f32 %v2151_v40, %v1985_v39  ;;  %v2833_v42 = vpop.f32.mrf.mxu3 }
 0x215   : > { %v3352_v44 = vsel %vm200_vm3, %v3317_v43, 0.0  ;;  %v3423_v28 = vmul.f32 %v3317_v43, %v3317_v43  ;;  %3526 = vst.msk [vmem:[%s4191_s22 + $0x18] sm:$0xff] %vm200_vm3, %v3317_v43  ;;  %v2327_v45 = vld [vmem:[#allocation2 + $0x38] sm:$0xff] }
 0x216   : > { %v3353_v47 = vadd.f32 %v3352_v44, %v3351_v23  ;;  %2263 = vst.msk [vmem:[#allocation2 + $0x40] sm:$0xff] %vm200_vm3, %v2231_v41  ;;  %v2573_v3 = vadd.f32 %v2491_v27, %v2327_v45  ;;  %3922 = vmatmul.msk.f32.gmra.mxu1 %vm298_vm2, %v5209_v35  ;;  %v5293_v50 = vpop.f32.mrf.mxu0  ;;  %v3957_v41 = vld [vmem:[%s4196_s25 + $0x1a0] sm:$0xff] }
 0x217   : > { %3988 = vmatmul.msk.f32.gmra.mxu2 %vm298_vm2, %v3954_v16  ;;  %v3457_v48 = vsel %vm200_vm3, %v3423_v28, 0.0  ;;  %v2668_v51 = vld [vmem:[#allocation2 + $0x30] sm:$0xff]  ;;  %v1988_v16 = vld [vmem:[#allocation2 + $0x58] sm:$0xff] }
 0x218   : > { %v3458_v46 = vadd.f32 %v3457_v48, %v3456_v30  ;;  %2605 = vst.msk [vmem:[#allocation2 + $0x38] sm:$0xff] %vm200_vm3, %v2573_v3  ;;  %v2914_v55 = vadd.f32 %v2830_v21, %v2668_v51  ;;  %v5340_v30 = vld [vmem:[%s4196_s25 + $0x19c] sm:$0xff] }
 0x219   : > { %v3009_v53 = vld [vmem:[#allocation2 + $0x28] sm:$0xff]  ;;  %4054 = vmatmul.msk.f32.gmra.mxu3 %vm298_vm2, %v4020_v11  ;;  %4120 = vmatmul.msk.f32.gmra.mxu0 %vm298_vm2, %v5296_v52 }
 0x21a   : > { %v2494_v54 = vpop.f32.mrf.mxu2  ;;  %2946 = vst.msk [vmem:[#allocation2 + $0x30] sm:$0xff] %vm200_vm3, %v2914_v55  ;;  %v3255_v35 = vadd.f32 %v5226_v34, %v3009_v53  ;;  %v4023_v48 = vld [vmem:[%s4196_s25 + $0x1a2] sm:$0xff] }
 0x21b   : > { %v3318_v56 = vld [vmem:[#allocation2 + $0x20] sm:$0xff]  ;;  %v2154_v57 = vpop.f32.mrf.mxu1 }
 0x21c   : > { %v3354_v33 = vsel %vm200_vm3, %v3318_v56, 0.0  ;;  %v3424_v60 = vmul.f32 %v3318_v56, %v3318_v56  ;;  %3527 = vst.msk [vmem:[%s4191_s22 + $0x20] sm:$0xff] %vm200_vm3, %v3318_v56  ;;  %v2232_v15 = vadd.f32 %v2154_v57, %v1986_v58  ;;  %v2836_v63 = vpop.f32.mrf.mxu3  ;;  %v1989_v58 = vld [vmem:[#allocation2 + $0x60] sm:$0xff] }
 0x21d   : > { %v3355_v59 = vadd.f32 %v3354_v33, %v3353_v47  ;;  %3287 = vst.msk [vmem:[#allocation2 + $0x28] sm:$0xff] %vm200_vm3, %v3255_v35  ;;  %v2328_v61 = vld [vmem:[#allocation2 + $0x40] sm:$0xff] }
 0x21e   : > { %v3459_v1 = vsel %vm200_vm3, %v3424_v60, 0.0  ;;  %2264 = vst.msk [vmem:[#allocation2 + $0x48] sm:$0xff] %vm200_vm3, %v2232_v15  ;;  %v2574_v34 = vadd.f32 %v2494_v54, %v2328_v61  ;;  %3923 = vmatmul.msk.f32.gmra.mxu1 %vm298_vm2, %v5229_v49  ;;  %v5316_v5 = vpop.f32.mrf.mxu0 }
 0x21f   : > { %3989 = vmatmul.msk.f32.gmra.mxu2 %vm298_vm2, %v3955_v38  ;;  %v3460_v8 = vadd.f32 %v3459_v1, %v3458_v46  ;;  %v2669_v9 = vld [vmem:[#allocation2 + $0x38] sm:$0xff]  ;;  %v5363_v46 = vld [vmem:[%s4196_s25 + $0x1a4] sm:$0xff]  ;;  %v3958_v38 = vld [vmem:[%s4196_s25 + $0x1b0] sm:$0xff] }
 0x220   : > { %2606 = vst.msk [vmem:[#allocation2 + $0x40] sm:$0xff] %vm200_vm3, %v2574_v34  ;;  %v2915_v0 = vadd.f32 %v2833_v42, %v2669_v9  ;;  %v4024_v34 = vld [vmem:[%s4196_s25 + $0x1b2] sm:$0xff] }
 0x221   : > { %v3010_v19 = vld [vmem:[#allocation2 + $0x30] sm:$0xff]  ;;  %4055 = vmatmul.msk.f32.gmra.mxu3 %vm298_vm2, %v4021_v2  ;;  %4121 = vmatmul.msk.f32.gmra.mxu0 %vm298_vm2, %v5319_v6 }
 0x222   : > { %v2497_v37 = vpop.f32.mrf.mxu2  ;;  %2947 = vst.msk [vmem:[#allocation2 + $0x38] sm:$0xff] %vm200_vm3, %v2915_v0  ;;  %v3256_v49 = vadd.f32 %v5248_v62, %v3010_v19 }
 0x223   : > { %v2157_v13 = vpop.f32.mrf.mxu1 }
 0x224   : > { %v3319_v20 = vld [vmem:[#allocation2 + $0x28] sm:$0xff]  ;;  %3288 = vst.msk [vmem:[#allocation2 + $0x30] sm:$0xff] %vm200_vm3, %v3256_v49  ;;  %v2233_v24 = vadd.f32 %v2157_v13, %v1987_v10  ;;  %v2839_v7 = vpop.f32.mrf.mxu3 }
 0x225   : > { %v3356_v21 = vsel %vm200_vm3, %v3319_v20, 0.0  ;;  %v3425_v23 = vmul.f32 %v3319_v20, %v3319_v20  ;;  %3528 = vst.msk [vmem:[%s4191_s22 + $0x28] sm:$0xff] %vm200_vm3, %v3319_v20  ;;  %v2329_v26 = vld [vmem:[#allocation2 + $0x48] sm:$0xff] }
 0x226   : > { %v3357_v12 = vadd.f32 %v3356_v21, %v3355_v59  ;;  %2265 = vst.msk [vmem:[#allocation2 + $0x50] sm:$0xff] %vm200_vm3, %v2233_v24  ;;  %v2575_v62 = vadd.f32 %v2497_v37, %v2329_v26  ;;  %3924 = vmatmul.msk.f32.gmra.mxu1 %vm298_vm2, %v5251_v4  ;;  %v5337_v25 = vpop.f32.mrf.mxu0  ;;  %v3959_v24 = vld [vmem:[%s4196_s25 + $0x1b8] sm:$0xff] }
 0x227   : > { %3990 = vmatmul.msk.f32.gmra.mxu2 %vm298_vm2, %v3956_v17  ;;  %v3461_v36 = vsel %vm200_vm3, %v3425_v23, 0.0  ;;  %v2670_v32 = vld [vmem:[#allocation2 + $0x40] sm:$0xff]  ;;  %v1990_v17 = vld [vmem:[#allocation2 + $0x68] sm:$0xff] }
 0x228   : > { %v3462_v29 = vadd.f32 %v3461_v36, %v3460_v8  ;;  %2607 = vst.msk [vmem:[#allocation2 + $0x48] sm:$0xff] %vm200_vm3, %v2575_v62  ;;  %v2916_v27 = vadd.f32 %v2836_v63, %v2670_v32  ;;  %v4090_v8 = vld [vmem:[%s4196_s25 + $0x1b4] sm:$0xff] }
 0x229   : > { %v3011_v18 = vld [vmem:[#allocation2 + $0x38] sm:$0xff]  ;;  %4056 = vmatmul.msk.f32.gmra.mxu3 %vm298_vm2, %v4022_v14  ;;  %4122 = vmatmul.msk.f32.gmra.mxu0 %vm298_vm2, %v5340_v30 }
 0x22a   : > { %v2500_v39 = vpop.f32.mrf.mxu2  ;;  %2948 = vst.msk [vmem:[#allocation2 + $0x40] sm:$0xff] %vm200_vm3, %v2916_v27  ;;  %v3257_v4 = vadd.f32 %v5272_v22, %v3011_v18  ;;  %v4025_v36 = vld [vmem:[%s4196_s25 + $0x1ba] sm:$0xff] }
 0x22b   : > { %v3320_v40 = vld [vmem:[#allocation2 + $0x30] sm:$0xff]  ;;  %v2160_v43 = vpop.f32.mrf.mxu1 }
 0x22c   : > { %v3358_v42 = vsel %vm200_vm3, %v3320_v40, 0.0  ;;  %v3426_v44 = vmul.f32 %v3320_v40, %v3320_v40  ;;  %3529 = vst.msk [vmem:[%s4191_s22 + $0x30] sm:$0xff] %vm200_vm3, %v3320_v40  ;;  %v2234_v28 = vadd.f32 %v2160_v43, %v1988_v16  ;;  %v2842_v45 = vpop.f32.mrf.mxu3  ;;  %v1991_v16 = vld [vmem:[#allocation2 + $0x70] sm:$0xff] }
 0x22d   : > { %v3359_v47 = vadd.f32 %v3358_v42, %v3357_v12  ;;  %3289 = vst.msk [vmem:[#allocation2 + $0x38] sm:$0xff] %vm200_vm3, %v3257_v4  ;;  %v2330_v3 = vld [vmem:[#allocation2 + $0x50] sm:$0xff] }
 0x22e   : > { %v3463_v11 = vsel %vm200_vm3, %v3426_v44, 0.0  ;;  %2266 = vst.msk [vmem:[#allocation2 + $0x58] sm:$0xff] %vm200_vm3, %v2234_v28  ;;  %v2576_v22 = vadd.f32 %v2500_v39, %v2330_v3  ;;  %3925 = vmatmul.msk.f32.gmra.mxu1 %vm298_vm2, %v5275_v31  ;;  %v5360_v51 = vpop.f32.mrf.mxu0 }
 0x22f   : > { %3991 = vmatmul.msk.f32.gmra.mxu2 %vm298_vm2, %v3957_v41  ;;  %v3464_v55 = vadd.f32 %v3463_v11, %v3462_v29  ;;  %v2671_v53 = vld [vmem:[#allocation2 + $0x48] sm:$0xff]  ;;  %v4091_v29 = vld [vmem:[%s4196_s25 + $0x1bc] sm:$0xff] }
 0x230   : > { %2608 = vst.msk [vmem:[#allocation2 + $0x50] sm:$0xff] %vm200_vm3, %v2576_v22  ;;  %v2917_v54 = vadd.f32 %v2839_v7, %v2671_v53  ;;  %v3960_v41 = vld [vmem:[%s4196_s25 + $0x1c8] sm:$0xff] }
 0x231   : > { %v3012_v35 = vld [vmem:[#allocation2 + $0x40] sm:$0xff]  ;;  %4057 = vmatmul.msk.f32.gmra.mxu3 %vm298_vm2, %v4023_v48  ;;  %4123 = vmatmul.msk.f32.gmra.mxu0 %vm298_vm2, %v5363_v46  ;;  %v4026_v22 = vld [vmem:[%s4196_s25 + $0x1ca] sm:$0xff] }
 0x232   : > { %v2503_v56 = vpop.f32.mrf.mxu2  ;;  %2949 = vst.msk [vmem:[#allocation2 + $0x48] sm:$0xff] %vm200_vm3, %v2917_v54  ;;  %v3258_v31 = vadd.f32 %v5293_v50, %v3012_v35 }
 0x233   : > { %v2163_v57 = vpop.f32.mrf.mxu1 }
 0x234   : > { %v3321_v33 = vld [vmem:[#allocation2 + $0x38] sm:$0xff]  ;;  %3290 = vst.msk [vmem:[#allocation2 + $0x40] sm:$0xff] %vm200_vm3, %v3258_v31  ;;  %v2235_v60 = vadd.f32 %v2163_v57, %v1989_v58  ;;  %v2845_v15 = vpop.f32.mrf.mxu3 }
 0x235   : > { %v3360_v63 = vsel %vm200_vm3, %v3321_v33, 0.0  ;;  %v3427_v59 = vmul.f32 %v3321_v33, %v3321_v33  ;;  %3530 = vst.msk [vmem:[%s4191_s22 + $0x38] sm:$0xff] %vm200_vm3, %v3321_v33  ;;  %v2331_v61 = vld [vmem:[#allocation2 + $0x58] sm:$0xff] }
 0x236   : > { %v3361_v1 = vadd.f32 %v3360_v63, %v3359_v47  ;;  %2267 = vst.msk [vmem:[#allocation2 + $0x60] sm:$0xff] %vm200_vm3, %v2235_v60  ;;  %v2577_v50 = vadd.f32 %v2503_v56, %v2331_v61  ;;  %3926 = vmatmul.msk.f32.gmra.mxu1 %vm298_vm2, %v5296_v52  ;;  %v5381_v2 = vpop.f32.mrf.mxu0  ;;  %v3961_v60 = vld [vmem:[%s4196_s25 + $0x1d0] sm:$0xff] }
 0x237   : > { %3992 = vmatmul.msk.f32.gmra.mxu2 %vm298_vm2, %v3958_v38  ;;  %v3465_v9 = vsel %vm200_vm3, %v3427_v59, 0.0  ;;  %v2672_v0 = vld [vmem:[#allocation2 + $0x50] sm:$0xff]  ;;  %v1992_v38 = vld [vmem:[#allocation2 + $0x78] sm:$0xff] }
 0x238   : > { %v3466_v19 = vadd.f32 %v3465_v9, %v3464_v55  ;;  %2609 = vst.msk [vmem:[#allocation2 + $0x58] sm:$0xff] %vm200_vm3, %v2577_v50  ;;  %v2918_v37 = vadd.f32 %v2842_v45, %v2672_v0  ;;  %v4092_v55 = vld [vmem:[%s4196_s25 + $0x1cc] sm:$0xff]  ;;  %v4093_v0 = vld [vmem:[%s4196_s25 + $0x1d4] sm:$0xff] }
 0x239   : > { %v3013_v49 = vld [vmem:[#allocation2 + $0x48] sm:$0xff]  ;;  %4058 = vmatmul.msk.f32.gmra.mxu3 %vm298_vm2, %v4024_v34  ;;  %4124 = vmatmul.msk.f32.gmra.mxu0 %vm298_vm2, %v4090_v8  ;;  %v4027_v8 = vld [vmem:[%s4196_s25 + $0x1d2] sm:$0xff] }
 0x23a   : > { %v2506_v10 = vpop.f32.mrf.mxu2  ;;  %2950 = vst.msk [vmem:[#allocation2 + $0x50] sm:$0xff] %vm200_vm3, %v2918_v37  ;;  %v3259_v52 = vadd.f32 %v5316_v5, %v3013_v49 }
 0x23b   : > { %v3322_v13 = vld [vmem:[#allocation2 + $0x40] sm:$0xff]  ;;  %v2166_v20 = vpop.f32.mrf.mxu1 }
 0x23c   : > { %v3362_v7 = vsel %vm200_vm3, %v3322_v13, 0.0  ;;  %v3428_v21 = vmul.f32 %v3322_v13, %v3322_v13  ;;  %3531 = vst.msk [vmem:[%s4191_s22 + $0x40] sm:$0xff] %vm200_vm3, %v3322_v13  ;;  %v2236_v23 = vadd.f32 %v2166_v20, %v1990_v17  ;;  %v2848_v26 = vpop.f32.mrf.mxu3  ;;  %v1993_v13 = vld [vmem:[#allocation2 + $0x80] sm:$0xff] }
 0x23d   : > { %v3363_v12 = vadd.f32 %v3362_v7, %v3361_v1  ;;  %3291 = vst.msk [vmem:[#allocation2 + $0x48] sm:$0xff] %vm200_vm3, %v3259_v52  ;;  %v2332_v62 = vld [vmem:[#allocation2 + $0x60] sm:$0xff] }
 0x23e   : > { %v3467_v14 = vsel %vm200_vm3, %v3428_v21, 0.0  ;;  %2268 = vst.msk [vmem:[#allocation2 + $0x68] sm:$0xff] %vm200_vm3, %v2236_v23  ;;  %v2578_v5 = vadd.f32 %v2506_v10, %v2332_v62  ;;  %3927 = vmatmul.msk.f32.gmra.mxu1 %vm298_vm2, %v5319_v6  ;;  %v5401_v32 = vpop.f32.mrf.mxu0 }
 0x23f   : > { %3993 = vmatmul.msk.f32.gmra.mxu2 %vm298_vm2, %v3959_v24  ;;  %v3468_v27 = vadd.f32 %v3467_v14, %v3466_v19  ;;  %v2673_v18 = vld [vmem:[#allocation2 + $0x58] sm:$0xff] }
 0x240   : > { %2610 = vst.msk [vmem:[#allocation2 + $0x60] sm:$0xff] %vm200_vm3, %v2578_v5  ;;  %v2919_v39 = vadd.f32 %v2845_v15, %v2673_v18 }
 0x241   : > { %v3014_v4 = vld [vmem:[#allocation2 + $0x50] sm:$0xff]  ;;  %4059 = vmatmul.msk.f32.gmra.mxu3 %vm298_vm2, %v4025_v36  ;;  %4125 = vmatmul.msk.f32.gmra.mxu0 %vm298_vm2, %v4091_v29 }
 0x242   : > { %v2509_v40 = vpop.f32.mrf.mxu2  ;;  %2951 = vst.msk [vmem:[#allocation2 + $0x58] sm:$0xff] %vm200_vm3, %v2919_v39  ;;  %v3260_v6 = vadd.f32 %v5337_v25, %v3014_v4 }
 0x243   : > { %v2169_v43 = vpop.f32.mrf.mxu1 }
 0x244   : > { %v3323_v42 = vld [vmem:[#allocation2 + $0x48] sm:$0xff]  ;;  %3292 = vst.msk [vmem:[#allocation2 + $0x50] sm:$0xff] %vm200_vm3, %v3260_v6  ;;  %v2237_v44 = vadd.f32 %v2169_v43, %v1991_v16  ;;  %v2851_v28 = vpop.f32.mrf.mxu3 }
 0x245   : > { %v3364_v45 = vsel %vm200_vm3, %v3323_v42, 0.0  ;;  %v3429_v47 = vmul.f32 %v3323_v42, %v3323_v42  ;;  %3532 = vst.msk [vmem:[%s4191_s22 + $0x48] sm:$0xff] %vm200_vm3, %v3323_v42  ;;  %v2333_v3 = vld [vmem:[#allocation2 + $0x68] sm:$0xff] }
 0x246   : > { %v3365_v11 = vadd.f32 %v3364_v45, %v3363_v12  ;;  %2269 = vst.msk [vmem:[#allocation2 + $0x70] sm:$0xff] %vm200_vm3, %v2237_v44  ;;  %v2579_v25 = vadd.f32 %v2509_v40, %v2333_v3  ;;  %3928 = vmatmul.msk.f32.gmra.mxu1 %vm298_vm2, %v5340_v30  ;;  %v5419_v48 = vpop.f32.mrf.mxu0  ;;  %v1994_v40 = vld [vmem:[#allocation2 + $0x88] sm:$0xff] }
 0x247   : > { %3994 = vmatmul.msk.f32.gmra.mxu2 %vm298_vm2, %v3960_v41  ;;  %v3469_v53 = vsel %vm200_vm3, %v3429_v47, 0.0  ;;  %v2674_v54 = vld [vmem:[#allocation2 + $0x60] sm:$0xff] }
 0x248   : > { %v3470_v35 = vadd.f32 %v3469_v53, %v3468_v27  ;;  %2611 = vst.msk [vmem:[#allocation2 + $0x68] sm:$0xff] %vm200_vm3, %v2579_v25  ;;  %v2920_v56 = vadd.f32 %v2848_v26, %v2674_v54  ;;  %v1995_v54 = vld [vmem:[#allocation2 + $0x90] sm:$0xff] }
 0x249   : > { %v3015_v31 = vld [vmem:[#allocation2 + $0x58] sm:$0xff]  ;;  %4060 = vmatmul.msk.f32.gmra.mxu3 %vm298_vm2, %v4026_v22  ;;  %4126 = vmatmul.msk.f32.gmra.mxu0 %vm298_vm2, %v4092_v55 }
 0x24a   : > { %v2512_v58 = vpop.f32.mrf.mxu2  ;;  %2952 = vst.msk [vmem:[#allocation2 + $0x60] sm:$0xff] %vm200_vm3, %v2920_v56  ;;  %v3261_v30 = vadd.f32 %v5360_v51, %v3015_v31 }
 0x24b   : > { %v3324_v57 = vld [vmem:[#allocation2 + $0x50] sm:$0xff]  ;;  %v2172_v33 = vpop.f32.mrf.mxu1 }
 0x24c   : > { %v3366_v15 = vsel %vm200_vm3, %v3324_v57, 0.0  ;;  %v3430_v63 = vmul.f32 %v3324_v57, %v3324_v57  ;;  %3533 = vst.msk [vmem:[%s4191_s22 + $0x50] sm:$0xff] %vm200_vm3, %v3324_v57  ;;  %v2238_v59 = vadd.f32 %v2172_v33, %v1992_v38  ;;  %v2854_v61 = vpop.f32.mrf.mxu3 }
 0x24d   : > { %v3367_v1 = vadd.f32 %v3366_v15, %v3365_v11  ;;  %3293 = vst.msk [vmem:[#allocation2 + $0x58] sm:$0xff] %vm200_vm3, %v3261_v30  ;;  %v2334_v50 = vld [vmem:[#allocation2 + $0x70] sm:$0xff] }
 0x24e   : > { %v3471_v34 = vsel %vm200_vm3, %v3430_v63, 0.0  ;;  %2270 = vst.msk [vmem:[#allocation2 + $0x78] sm:$0xff] %vm200_vm3, %v2238_v59  ;;  %v2580_v51 = vadd.f32 %v2512_v58, %v2334_v50  ;;  %3929 = vmatmul.msk.f32.gmra.mxu1 %vm298_vm2, %v5363_v46  ;;  %v5439_v9 = vpop.f32.mrf.mxu0 }
 0x24f   : > { %3995 = vmatmul.msk.f32.gmra.mxu2 %vm298_vm2, %v3961_v60  ;;  %v3472_v19 = vadd.f32 %v3471_v34, %v3470_v35  ;;  %v2675_v37 = vld [vmem:[#allocation2 + $0x68] sm:$0xff] }
 0x250   : > { %2612 = vst.msk [vmem:[#allocation2 + $0x70] sm:$0xff] %vm200_vm3, %v2580_v51  ;;  %v2921_v49 = vadd.f32 %v2851_v28, %v2675_v37 }
 0x251   : > { %v3016_v10 = vld [vmem:[#allocation2 + $0x60] sm:$0xff]  ;;  %4061 = vmatmul.msk.f32.gmra.mxu3 %vm298_vm2, %v4027_v8  ;;  %4127 = vmatmul.msk.f32.gmra.mxu0 %vm298_vm2, %v4093_v0  ;;  %v1996_v8 = vld [vmem:[#allocation2 + $0x98] sm:$0xff] }
 0x252   : > { %v2515_v52 = vpop.f32.mrf.mxu2  ;;  %2953 = vst.msk [vmem:[#allocation2 + $0x68] sm:$0xff] %vm200_vm3, %v2921_v49  ;;  %v3262_v46 = vadd.f32 %v5381_v2, %v3016_v10 }
 0x253   : > { %v2175_v17 = vpop.f32.mrf.mxu1 }
 0x254   : > { %v3325_v20 = vld [vmem:[#allocation2 + $0x58] sm:$0xff]  ;;  %3294 = vst.msk [vmem:[#allocation2 + $0x60] sm:$0xff] %vm200_vm3, %v3262_v46  ;;  %v2239_v24 = vadd.f32 %v2175_v17, %v1993_v13  ;;  %v2857_v7 = vpop.f32.mrf.mxu3 }
 0x255   : > { %v3368_v21 = vsel %vm200_vm3, %v3325_v20, 0.0  ;;  %v3431_v23 = vmul.f32 %v3325_v20, %v3325_v20  ;;  %3534 = vst.msk [vmem:[%s4191_s22 + $0x58] sm:$0xff] %vm200_vm3, %v3325_v20  ;;  %v2335_v26 = vld [vmem:[#allocation2 + $0x78] sm:$0xff] }
 0x256   : > { %v3369_v12 = vadd.f32 %v3368_v21, %v3367_v1  ;;  %2271 = vst.msk [vmem:[#allocation2 + $0x80] sm:$0xff] %vm200_vm3, %v2239_v24  ;;  %v2581_v62 = vadd.f32 %v2515_v52, %v2335_v26  ;;  %v5452_v14 = vpop.f32.mrf.mxu0 }
 0x257   : > { %v3473_v2 = vsel %vm200_vm3, %v3431_v23, 0.0  ;;  %v2676_v5 = vld [vmem:[#allocation2 + $0x70] sm:$0xff] }
 0x258   : > { %v3474_v36 = vadd.f32 %v3473_v2, %v3472_v19  ;;  %2613 = vst.msk [vmem:[#allocation2 + $0x78] sm:$0xff] %vm200_vm3, %v2581_v62  ;;  %v2922_v29 = vadd.f32 %v2854_v61, %v2676_v5 }
 0x259   : > { %v3017_v27 = vld [vmem:[#allocation2 + $0x68] sm:$0xff] }
 0x25a   : > { %v2518_v18 = vpop.f32.mrf.mxu2  ;;  %2954 = vst.msk [vmem:[#allocation2 + $0x70] sm:$0xff] %vm200_vm3, %v2922_v29  ;;  %v3263_v39 = vadd.f32 %v5401_v32, %v3017_v27 }
 0x25b   : > { %v3326_v4 = vld [vmem:[#allocation2 + $0x60] sm:$0xff]  ;;  %v2178_v6 = vpop.f32.mrf.mxu1 }
 0x25c   : > { %v3370_v16 = vsel %vm200_vm3, %v3326_v4, 0.0  ;;  %v3432_v43 = vmul.f32 %v3326_v4, %v3326_v4  ;;  %3535 = vst.msk [vmem:[%s4191_s22 + $0x60] sm:$0xff] %vm200_vm3, %v3326_v4  ;;  %v2240_v41 = vadd.f32 %v2178_v6, %v1994_v40  ;;  %v2860_v42 = vpop.f32.mrf.mxu3 }
 0x25d   : > { %v3371_v44 = vadd.f32 %v3370_v16, %v3369_v12  ;;  %3295 = vst.msk [vmem:[#allocation2 + $0x68] sm:$0xff] %vm200_vm3, %v3263_v39  ;;  %v2336_v28 = vld [vmem:[#allocation2 + $0x80] sm:$0xff] }
 0x25e   : > { %v3475_v45 = vsel %vm200_vm3, %v3432_v43, 0.0  ;;  %2272 = vst.msk [vmem:[#allocation2 + $0x88] sm:$0xff] %vm200_vm3, %v2240_v41  ;;  %v2582_v47 = vadd.f32 %v2518_v18, %v2336_v28  ;;  %v5464_v32 = vpop.f32.mrf.mxu0  ;;  %v1997_v12 = vld [vmem:[#allocation2 + $0xa0] sm:$0xff] }
 0x25f   : > { %v3476_v3 = vadd.f32 %v3475_v45, %v3474_v36  ;;  %v2677_v11 = vld [vmem:[#allocation2 + $0x78] sm:$0xff]  ;;  %v1998_v45 = vld [vmem:[#allocation2 + $0xa8] sm:$0xff] }
 0x260   : > { %2614 = vst.msk [vmem:[#allocation2 + $0x80] sm:$0xff] %vm200_vm3, %v2582_v47  ;;  %v2923_v25 = vadd.f32 %v2857_v7, %v2677_v11 }
 0x261   : > { %v3018_v22 = vld [vmem:[#allocation2 + $0x70] sm:$0xff] }
 0x262   : > { %v2521_v55 = vpop.f32.mrf.mxu2  ;;  %2955 = vst.msk [vmem:[#allocation2 + $0x78] sm:$0xff] %vm200_vm3, %v2923_v25  ;;  %v3264_v53 = vadd.f32 %v5419_v48, %v3018_v22 }
 0x263   : > { %v2181_v35 = vpop.f32.mrf.mxu1 }
 0x264   : > { %v3327_v56 = vld [vmem:[#allocation2 + $0x68] sm:$0xff]  ;;  %3296 = vst.msk [vmem:[#allocation2 + $0x70] sm:$0xff] %vm200_vm3, %v3264_v53  ;;  %v2241_v31 = vadd.f32 %v2181_v35, %v1995_v54  ;;  %v2863_v58 = vpop.f32.mrf.mxu3 }
 0x265   : > { %v3372_v30 = vsel %vm200_vm3, %v3327_v56, 0.0  ;;  %v3433_v57 = vmul.f32 %v3327_v56, %v3327_v56  ;;  %3536 = vst.msk [vmem:[%s4191_s22 + $0x68] sm:$0xff] %vm200_vm3, %v3327_v56  ;;  %v2337_v38 = vld [vmem:[#allocation2 + $0x88] sm:$0xff] }
 0x266   : > { %v3373_v33 = vadd.f32 %v3372_v30, %v3371_v44  ;;  %2273 = vst.msk [vmem:[#allocation2 + $0x90] sm:$0xff] %vm200_vm3, %v2241_v31  ;;  %v2583_v60 = vadd.f32 %v2521_v55, %v2337_v38  ;;  %v5474_v15 = vpop.f32.mrf.mxu0 }
 0x267   : > { %v3477_v48 = vsel %vm200_vm3, %v3433_v57, 0.0  ;;  %v2678_v63 = vld [vmem:[#allocation2 + $0x80] sm:$0xff] }
 0x268   : > { %v3478_v59 = vadd.f32 %v3477_v48, %v3476_v3  ;;  %2615 = vst.msk [vmem:[#allocation2 + $0x88] sm:$0xff] %vm200_vm3, %v2583_v60  ;;  %v2924_v61 = vadd.f32 %v2860_v42, %v2678_v63 }
 0x269   : > { %v3019_v1 = vld [vmem:[#allocation2 + $0x78] sm:$0xff] }
 0x26a   : > { %v2524_v50 = vpop.f32.mrf.mxu2  ;;  %2956 = vst.msk [vmem:[#allocation2 + $0x80] sm:$0xff] %vm200_vm3, %v2924_v61  ;;  %v3265_v34 = vadd.f32 %v5439_v9, %v3019_v1 }
 0x26b   : > { %v3328_v51 = vld [vmem:[#allocation2 + $0x70] sm:$0xff]  ;;  %v2184_v0 = vpop.f32.mrf.mxu1 }
 0x26c   : > { %v3374_v19 = vsel %vm200_vm3, %v3328_v51, 0.0  ;;  %v3434_v37 = vmul.f32 %v3328_v51, %v3328_v51  ;;  %3537 = vst.msk [vmem:[%s4191_s22 + $0x70] sm:$0xff] %vm200_vm3, %v3328_v51  ;;  %v2242_v49 = vadd.f32 %v2184_v0, %v1996_v8  ;;  %v2866_v10 = vpop.f32.mrf.mxu3 }
 0x26d   : > { %v3375_v52 = vadd.f32 %v3374_v19, %v3373_v33  ;;  %3297 = vst.msk [vmem:[#allocation2 + $0x78] sm:$0xff] %vm200_vm3, %v3265_v34  ;;  %v2338_v46 = vld [vmem:[#allocation2 + $0x90] sm:$0xff] }
 0x26e   : > { %v3479_v13 = vsel %vm200_vm3, %v3434_v37, 0.0  ;;  %2274 = vst.msk [vmem:[#allocation2 + $0x98] sm:$0xff] %vm200_vm3, %v2242_v49  ;;  %v2584_v17 = vadd.f32 %v2524_v50, %v2338_v46  ;;  %v5486_v9 = vpop.f32.mrf.mxu0  ;;  %v1999_v33 = vld [vmem:[#allocation2 + $0xb0] sm:$0xff]  ;;  %v2000_v46 = vld [vmem:[#allocation2 + $0xb8] sm:$0xff] }
 0x26f   : > { %v3480_v20 = vadd.f32 %v3479_v13, %v3478_v59  ;;  %v2679_v24 = vld [vmem:[#allocation2 + $0x88] sm:$0xff] }
 0x270   : > { %2616 = vst.msk [vmem:[#allocation2 + $0x90] sm:$0xff] %vm200_vm3, %v2584_v17  ;;  %v2925_v7 = vadd.f32 %v2863_v58, %v2679_v24 }
 0x271   : > { %v3020_v21 = vld [vmem:[#allocation2 + $0x80] sm:$0xff] }
 0x272   : > { %v2527_v23 = vpop.f32.mrf.mxu2  ;;  %2957 = vst.msk [vmem:[#allocation2 + $0x88] sm:$0xff] %vm200_vm3, %v2925_v7  ;;  %v3266_v26 = vadd.f32 %v5452_v14, %v3020_v21 }
 0x273   : > { %v2187_v62 = vpop.f32.mrf.mxu1 }
 0x274   : > { %v3329_v2 = vld [vmem:[#allocation2 + $0x78] sm:$0xff]  ;;  %3298 = vst.msk [vmem:[#allocation2 + $0x80] sm:$0xff] %vm200_vm3, %v3266_v26  ;;  %v2243_v5 = vadd.f32 %v2187_v62, %v1997_v12  ;;  %v2869_v36 = vpop.f32.mrf.mxu3 }
 0x275   : > { %v3376_v29 = vsel %vm200_vm3, %v3329_v2, 0.0  ;;  %v3435_v27 = vmul.f32 %v3329_v2, %v3329_v2  ;;  %3538 = vst.msk [vmem:[%s4191_s22 + $0x78] sm:$0xff] %vm200_vm3, %v3329_v2  ;;  %v2339_v18 = vld [vmem:[#allocation2 + $0x98] sm:$0xff] }
 0x276   : > { %v3377_v39 = vadd.f32 %v3376_v29, %v3375_v52  ;;  %2275 = vst.msk [vmem:[#allocation2 + $0xa0] sm:$0xff] %vm200_vm3, %v2243_v5  ;;  %v2585_v4 = vadd.f32 %v2527_v23, %v2339_v18  ;;  %v5498_v43 = vpop.f32.mrf.mxu0  ;;  %v2001_v18 = vld [vmem:[#allocation2 + $0xc0] sm:$0xff] }
 0x277   : > { %v3481_v14 = vsel %vm200_vm3, %v3435_v27, 0.0  ;;  %v2680_v40 = vld [vmem:[#allocation2 + $0x90] sm:$0xff] }
 0x278   : > { %v3482_v6 = vadd.f32 %v3481_v14, %v3480_v20  ;;  %2617 = vst.msk [vmem:[#allocation2 + $0x98] sm:$0xff] %vm200_vm3, %v2585_v4  ;;  %v2926_v16 = vadd.f32 %v2866_v10, %v2680_v40 }
 0x279   : > { %v3021_v41 = vld [vmem:[#allocation2 + $0x88] sm:$0xff] }
 0x27a   : > { %v2530_v42 = vpop.f32.mrf.mxu2  ;;  %2958 = vst.msk [vmem:[#allocation2 + $0x90] sm:$0xff] %vm200_vm3, %v2926_v16  ;;  %v3267_v44 = vadd.f32 %v5464_v32, %v3021_v41 }
 0x27b   : > { %v3330_v28 = vld [vmem:[#allocation2 + $0x80] sm:$0xff]  ;;  %v2190_v47 = vpop.f32.mrf.mxu1 }
 0x27c   : > { %v3378_v3 = vsel %vm200_vm3, %v3330_v28, 0.0  ;;  %v3436_v11 = vmul.f32 %v3330_v28, %v3330_v28  ;;  %3539 = vst.msk [vmem:[%s4191_s22 + $0x80] sm:$0xff] %vm200_vm3, %v3330_v28  ;;  %v2244_v25 = vadd.f32 %v2190_v47, %v1998_v45  ;;  %v2872_v22 = vpop.f32.mrf.mxu3 }
 0x27d   : > { %v3379_v55 = vadd.f32 %v3378_v3, %v3377_v39  ;;  %3299 = vst.msk [vmem:[#allocation2 + $0x88] sm:$0xff] %vm200_vm3, %v3267_v44  ;;  %v2340_v53 = vld [vmem:[#allocation2 + $0xa0] sm:$0xff] }
 0x27e   : > { %v3483_v54 = vsel %vm200_vm3, %v3436_v11, 0.0  ;;  %2276 = vst.msk [vmem:[#allocation2 + $0xa8] sm:$0xff] %vm200_vm3, %v2244_v25  ;;  %v2586_v35 = vadd.f32 %v2530_v42, %v2340_v53  ;;  %v5511_v38 = vpop.f32.mrf.mxu0  ;;  %v2002_v53 = vld [vmem:[#allocation2 + $0xc8] sm:$0xff] }
 0x27f   : > { %v3484_v32 = vadd.f32 %v3483_v54, %v3482_v6  ;;  %v2681_v56 = vld [vmem:[#allocation2 + $0x98] sm:$0xff] }
 0x280   : > { %2618 = vst.msk [vmem:[#allocation2 + $0xa0] sm:$0xff] %vm200_vm3, %v2586_v35  ;;  %v2927_v31 = vadd.f32 %v2869_v36, %v2681_v56 }
 0x281   : > { %v3022_v58 = vld [vmem:[#allocation2 + $0x90] sm:$0xff] }
 0x282   : > { %v2533_v30 = vpop.f32.mrf.mxu2  ;;  %2959 = vst.msk [vmem:[#allocation2 + $0x98] sm:$0xff] %vm200_vm3, %v2927_v31  ;;  %v3268_v57 = vadd.f32 %v5474_v15, %v3022_v58 }
 0x283   : > { %v2193_v60 = vpop.f32.mrf.mxu1 }
 0x284   : > { %v3331_v48 = vld [vmem:[#allocation2 + $0x88] sm:$0xff]  ;;  %3300 = vst.msk [vmem:[#allocation2 + $0x90] sm:$0xff] %vm200_vm3, %v3268_v57  ;;  %v2245_v63 = vadd.f32 %v2193_v60, %v1999_v33  ;;  %v2875_v59 = vpop.f32.mrf.mxu3 }
 0x285   : > { %v3380_v61 = vsel %vm200_vm3, %v3331_v48, 0.0  ;;  %v3437_v1 = vmul.f32 %v3331_v48, %v3331_v48  ;;  %3540 = vst.msk [vmem:[%s4191_s22 + $0x88] sm:$0xff] %vm200_vm3, %v3331_v48  ;;  %v2341_v50 = vld [vmem:[#allocation2 + $0xa8] sm:$0xff] }
 0x286   : > { %v3381_v34 = vadd.f32 %v3380_v61, %v3379_v55  ;;  %2277 = vst.msk [vmem:[#allocation2 + $0xb0] sm:$0xff] %vm200_vm3, %v2245_v63  ;;  %v2587_v15 = vadd.f32 %v2533_v30, %v2341_v50  ;;  %v3220_v21 = vpop.f32.mrf.mxu0  ;;  %v2003_v50 = vld [vmem:[#allocation2 + $0xd0] sm:$0xff] }
 0x287   : > { %v3485_v51 = vsel %vm200_vm3, %v3437_v1, 0.0  ;;  %v2682_v8 = vld [vmem:[#allocation2 + $0xa0] sm:$0xff] }
 0x288   : > { %v3486_v0 = vadd.f32 %v3485_v51, %v3484_v32  ;;  %2619 = vst.msk [vmem:[#allocation2 + $0xa8] sm:$0xff] %vm200_vm3, %v2587_v15  ;;  %v2928_v19 = vadd.f32 %v2872_v22, %v2682_v8 }
 0x289   : > { %v3023_v37 = vld [vmem:[#allocation2 + $0x98] sm:$0xff] }
 0x28a   : > { %v2536_v49 = vpop.f32.mrf.mxu2  ;;  %2960 = vst.msk [vmem:[#allocation2 + $0xa0] sm:$0xff] %vm200_vm3, %v2928_v19  ;;  %v3269_v10 = vadd.f32 %v5486_v9, %v3023_v37 }
 0x28b   : > { %v3332_v52 = vld [vmem:[#allocation2 + $0x90] sm:$0xff]  ;;  %v2196_v13 = vpop.f32.mrf.mxu1 }
 0x28c   : > { %v3382_v17 = vsel %vm200_vm3, %v3332_v52, 0.0  ;;  %v3438_v20 = vmul.f32 %v3332_v52, %v3332_v52  ;;  %3541 = vst.msk [vmem:[%s4191_s22 + $0x90] sm:$0xff] %vm200_vm3, %v3332_v52  ;;  %v2246_v24 = vadd.f32 %v2196_v13, %v2000_v46  ;;  %v2878_v7 = vpop.f32.mrf.mxu3 }
 0x28d   : > { %v3383_v23 = vadd.f32 %v3382_v17, %v3381_v34  ;;  %3301 = vst.msk [vmem:[#allocation2 + $0x98] sm:$0xff] %vm200_vm3, %v3269_v10  ;;  %v2342_v26 = vld [vmem:[#allocation2 + $0xb0] sm:$0xff] }
 0x28e   : > { %v3487_v12 = vsel %vm200_vm3, %v3438_v20, 0.0  ;;  %2278 = vst.msk [vmem:[#allocation2 + $0xb8] sm:$0xff] %vm200_vm3, %v2246_v24  ;;  %v2588_v9 = vadd.f32 %v2536_v49, %v2342_v26  ;;  %v3223_v28 = vpop.f32.mrf.mxu0  ;;  %v2004_v20 = vld [vmem:[#allocation2 + $0xd8] sm:$0xff] }
 0x28f   : > { %v3488_v62 = vadd.f32 %v3487_v12, %v3486_v0  ;;  %v2683_v2 = vld [vmem:[#allocation2 + $0xa8] sm:$0xff] }
 0x290   : > { %2620 = vst.msk [vmem:[#allocation2 + $0xb0] sm:$0xff] %vm200_vm3, %v2588_v9  ;;  %v2929_v5 = vadd.f32 %v2875_v59, %v2683_v2 }
 0x291   : > { %v3024_v36 = vld [vmem:[#allocation2 + $0xa0] sm:$0xff] }
 0x292   : > { %v2539_v29 = vpop.f32.mrf.mxu2  ;;  %2961 = vst.msk [vmem:[#allocation2 + $0xa8] sm:$0xff] %vm200_vm3, %v2929_v5  ;;  %v3270_v27 = vadd.f32 %v5498_v43, %v3024_v36  ;;  %v2005_v36 = vld [vmem:[#allocation2 + $0xe0] sm:$0xff] }
 0x293   : > { %v2199_v39 = vpop.f32.mrf.mxu1 }
 0x294   : > { %v3333_v4 = vld [vmem:[#allocation2 + $0x98] sm:$0xff]  ;;  %3302 = vst.msk [vmem:[#allocation2 + $0xa0] sm:$0xff] %vm200_vm3, %v3270_v27  ;;  %v2247_v14 = vadd.f32 %v2199_v39, %v2001_v18  ;;  %v2881_v40 = vpop.f32.mrf.mxu3 }
 0x295   : > { %v3384_v6 = vsel %vm200_vm3, %v3333_v4, 0.0  ;;  %v3439_v16 = vmul.f32 %v3333_v4, %v3333_v4  ;;  %3542 = vst.msk [vmem:[%s4191_s22 + $0x98] sm:$0xff] %vm200_vm3, %v3333_v4  ;;  %v2343_v41 = vld [vmem:[#allocation2 + $0xb8] sm:$0xff] }
 0x296   : > { %v3385_v42 = vadd.f32 %v3384_v6, %v3383_v23  ;;  %2279 = vst.msk [vmem:[#allocation2 + $0xc0] sm:$0xff] %vm200_vm3, %v2247_v14  ;;  %v2589_v44 = vadd.f32 %v2539_v29, %v2343_v41  ;;  %v3226_v63 = vpop.f32.mrf.mxu0 }
 0x297   : > { %v3489_v43 = vsel %vm200_vm3, %v3439_v16, 0.0  ;;  %v2684_v45 = vld [vmem:[#allocation2 + $0xb0] sm:$0xff] }
 0x298   : > { %v3490_v47 = vadd.f32 %v3489_v43, %v3488_v62  ;;  %2621 = vst.msk [vmem:[#allocation2 + $0xb8] sm:$0xff] %vm200_vm3, %v2589_v44  ;;  %v2930_v3 = vadd.f32 %v2878_v7, %v2684_v45  ;;  %v2006_v43 = vld [vmem:[#allocation2 + $0xe8] sm:$0xff] }
 0x299   : > { %v3025_v11 = vld [vmem:[#allocation2 + $0xa8] sm:$0xff] }
 0x29a   : > { %v2542_v25 = vpop.f32.mrf.mxu2  ;;  %2962 = vst.msk [vmem:[#allocation2 + $0xb0] sm:$0xff] %vm200_vm3, %v2930_v3  ;;  %v3271_v22 = vadd.f32 %v5511_v38, %v3025_v11 }
 0x29b   : > { %v3334_v55 = vld [vmem:[#allocation2 + $0xa0] sm:$0xff]  ;;  %v2202_v54 = vpop.f32.mrf.mxu1 }
 0x29c   : > { %v3386_v35 = vsel %vm200_vm3, %v3334_v55, 0.0  ;;  %v3440_v32 = vmul.f32 %v3334_v55, %v3334_v55  ;;  %3543 = vst.msk [vmem:[%s4191_s22 + $0xa0] sm:$0xff] %vm200_vm3, %v3334_v55  ;;  %v2248_v56 = vadd.f32 %v2202_v54, %v2002_v53  ;;  %v2884_v31 = vpop.f32.mrf.mxu3 }
 0x29d   : > { %v5543_v58 = vadd.f32 %v3386_v35, %v3385_v42  ;;  %3303 = vst.msk [vmem:[#allocation2 + $0xa8] sm:$0xff] %vm200_vm3, %v3271_v22  ;;  %v2344_v30 = vld [vmem:[#allocation2 + $0xc0] sm:$0xff] }
 0x29e   : > { %v3491_v57 = vsel %vm200_vm3, %v3440_v32, 0.0  ;;  %2280 = vst.msk [vmem:[#allocation2 + $0xc8] sm:$0xff] %vm200_vm3, %v2248_v56  ;;  %v2590_v38 = vadd.f32 %v2542_v25, %v2344_v30  ;;  %v3229_v13 = vpop.f32.mrf.mxu0  ;;  %v2007_v56 = vld [vmem:[#allocation2 + $0xf0] sm:$0xff] }
 0x29f   : > { %v5548_v33 = vadd.f32 %v3491_v57, %v3490_v47  ;;  %v2685_v60 = vld [vmem:[#allocation2 + $0xb8] sm:$0xff] }
 0x2a0   : > { %2622 = vst.msk [vmem:[#allocation2 + $0xc0] sm:$0xff] %vm200_vm3, %v2590_v38  ;;  %v2931_v48 = vadd.f32 %v2881_v40, %v2685_v60 }
 0x2a1   : > { %v3026_v59 = vld [vmem:[#allocation2 + $0xb0] sm:$0xff] }
 0x2a2   : > { %v2545_v61 = vpop.f32.mrf.mxu2  ;;  %2963 = vst.msk [vmem:[#allocation2 + $0xb8] sm:$0xff] %vm200_vm3, %v2931_v48  ;;  %v3272_v1 = vadd.f32 %v3220_v21, %v3026_v59 }
 0x2a3   : > { %v2205_v34 = vpop.f32.mrf.mxu1 }
 0x2a4   : > { %v5552_v15 = vld [vmem:[#allocation2 + $0xa8] sm:$0xff]  ;;  %3304 = vst.msk [vmem:[#allocation2 + $0xb0] sm:$0xff] %vm200_vm3, %v3272_v1  ;;  %v2249_v51 = vadd.f32 %v2205_v34, %v2003_v50  ;;  %v2887_v8 = vpop.f32.mrf.mxu3 }
 0x2a5   : > { %3544 = vst.msk [vmem:[%s4191_s22 + $0xa8] sm:$0xff] %vm200_vm3, %v5552_v15  ;;  %v2345_v0 = vld [vmem:[#allocation2 + $0xc8] sm:$0xff] }
 0x2a6   : > { %2281 = vst.msk [vmem:[#allocation2 + $0xd0] sm:$0xff] %vm200_vm3, %v2249_v51  ;;  %v2591_v19 = vadd.f32 %v2545_v61, %v2345_v0  ;;  %v3232_v39 = vpop.f32.mrf.mxu0 }
 0x2a7   : > { %v2686_v37 = vld [vmem:[#allocation2 + $0xc0] sm:$0xff] }
 0x2a8   : > { %2623 = vst.msk [vmem:[#allocation2 + $0xc8] sm:$0xff] %vm200_vm3, %v2591_v19  ;;  %v2932_v49 = vadd.f32 %v2884_v31, %v2686_v37 }
 0x2a9   : > { %v3027_v10 = vld [vmem:[#allocation2 + $0xb8] sm:$0xff] }
 0x2aa   : > { %v2548_v52 = vpop.f32.mrf.mxu2  ;;  %2964 = vst.msk [vmem:[#allocation2 + $0xc0] sm:$0xff] %vm200_vm3, %v2932_v49  ;;  %v3273_v46 = vadd.f32 %v3223_v28, %v3027_v10 }
 0x2ab   : > { %v5561_v17 = vld [vmem:[#allocation2 + $0xb0] sm:$0xff]  ;;  %v2208_v24 = vpop.f32.mrf.mxu1 }
 0x2ac   : > { %3545 = vst.msk [vmem:[%s4191_s22 + $0xb0] sm:$0xff] %vm200_vm3, %v5561_v17  ;;  %v2250_v7 = vadd.f32 %v2208_v24, %v2004_v20  ;;  %v2890_v21 = vpop.f32.mrf.mxu3 }
 0x2ad   : > { %3305 = vst.msk [vmem:[#allocation2 + $0xb8] sm:$0xff] %vm200_vm3, %v3273_v46  ;;  %v2346_v23 = vld [vmem:[#allocation2 + $0xd0] sm:$0xff] }
 0x2ae   : > { %2282 = vst.msk [vmem:[#allocation2 + $0xd8] sm:$0xff] %vm200_vm3, %v2250_v7  ;;  %v2592_v26 = vadd.f32 %v2548_v52, %v2346_v23  ;;  %v3235_v25 = vpop.f32.mrf.mxu0 }
 0x2af   : > { %v2687_v12 = vld [vmem:[#allocation2 + $0xc8] sm:$0xff] }
 0x2b0   : > { %2624 = vst.msk [vmem:[#allocation2 + $0xd0] sm:$0xff] %vm200_vm3, %v2592_v26  ;;  %v2933_v9 = vadd.f32 %v2887_v8, %v2687_v12  ;;  %v2008_v8 = vld [vmem:[#allocation2 + $0xf8] sm:$0xff] }
 0x2b1   : > { %v3028_v62 = vld [vmem:[#allocation2 + $0xc0] sm:$0xff] }
 0x2b2   : > { %v2551_v2 = vpop.f32.mrf.mxu2  ;;  %2965 = vst.msk [vmem:[#allocation2 + $0xc8] sm:$0xff] %vm200_vm3, %v2933_v9  ;;  %v3274_v5 = vadd.f32 %v3226_v63, %v3028_v62 }
 0x2b3   : > { %v2211_v29 = vpop.f32.mrf.mxu1 }
 0x2b4   : > { %v5570_v27 = vld [vmem:[#allocation2 + $0xb8] sm:$0xff]  ;;  %3306 = vst.msk [vmem:[#allocation2 + $0xc0] sm:$0xff] %vm200_vm3, %v3274_v5  ;;  %v2251_v18 = vadd.f32 %v2211_v29, %v2005_v36  ;;  %v2893_v14 = vpop.f32.mrf.mxu3  ;;  %v3441_v36 = vmul.f32 %v5552_v15, %v5552_v15 }
 0x2b5   : > { %3546 = vst.msk [vmem:[%s4191_s22 + $0xb8] sm:$0xff] %vm200_vm3, %v5570_v27  ;;  %v2347_v4 = vld [vmem:[#allocation2 + $0xd8] sm:$0xff] }
 0x2b6   : > { %2283 = vst.msk [vmem:[#allocation2 + $0xe0] sm:$0xff] %vm200_vm3, %v2251_v18  ;;  %v2593_v40 = vadd.f32 %v2551_v2, %v2347_v4  ;;  %v3238_v59 = vpop.f32.mrf.mxu0  ;;  %v3442_v4 = vmul.f32 %v5561_v17, %v5561_v17 }
 0x2b7   : > { %v2688_v6 = vld [vmem:[#allocation2 + $0xd0] sm:$0xff] }
 0x2b8   : > { %2625 = vst.msk [vmem:[#allocation2 + $0xd8] sm:$0xff] %vm200_vm3, %v2593_v40  ;;  %v2934_v16 = vadd.f32 %v2890_v21, %v2688_v6  ;;  %v3493_v6 = vsel %vm200_vm3, %v3441_v36, 0.0 }
 0x2b9   : > { %v3029_v41 = vld [vmem:[#allocation2 + $0xc8] sm:$0xff] }
 0x2ba   : > { %v2554_v42 = vpop.f32.mrf.mxu2  ;;  %2966 = vst.msk [vmem:[#allocation2 + $0xd0] sm:$0xff] %vm200_vm3, %v2934_v16  ;;  %v3275_v44 = vadd.f32 %v3229_v13, %v3029_v41  ;;  %v3390_v16 = vsel %vm200_vm3, %v5561_v17, 0.0  ;;  %v3443_v41 = vmul.f32 %v5570_v27, %v5570_v27  ;;  %v3494_v17 = vadd.f32 %v3493_v6, %v5548_v33 }
 0x2bb   : > { %v5579_v28 = vld [vmem:[#allocation2 + $0xc0] sm:$0xff]  ;;  %v2214_v45 = vpop.f32.mrf.mxu1 }
 0x2bc   : > { %3547 = vst.msk [vmem:[%s4191_s22 + $0xc0] sm:$0xff] %vm200_vm3, %v5579_v28  ;;  %v2252_v47 = vadd.f32 %v2214_v45, %v2006_v43  ;;  %v2896_v55 = vpop.f32.mrf.mxu3  ;;  %v3495_v43 = vsel %vm200_vm3, %v3442_v4, 0.0  ;;  %v3392_v45 = vsel %vm200_vm3, %v5570_v27, 0.0 }
 0x2bd   : > { %3307 = vst.msk [vmem:[#allocation2 + $0xc8] sm:$0xff] %vm200_vm3, %v3275_v44  ;;  %v2348_v3 = vld [vmem:[#allocation2 + $0xe0] sm:$0xff]  ;;  %v3496_v27 = vadd.f32 %v3495_v43, %v3494_v17 }
 0x2be   : > { %2284 = vst.msk [vmem:[#allocation2 + $0xe8] sm:$0xff] %vm200_vm3, %v2252_v47  ;;  %v2594_v11 = vadd.f32 %v2554_v42, %v2348_v3  ;;  %v3241_v20 = vpop.f32.mrf.mxu0  ;;  %v3444_v47 = vmul.f32 %v5579_v28, %v5579_v28 }
 0x2bf   : > { %v2689_v22 = vld [vmem:[#allocation2 + $0xd8] sm:$0xff] }
 0x2c0   : > { %2626 = vst.msk [vmem:[#allocation2 + $0xe0] sm:$0xff] %vm200_vm3, %v2594_v11  ;;  %v2935_v53 = vadd.f32 %v2893_v14, %v2689_v22 }
 0x2c1   : > { %v3030_v54 = vld [vmem:[#allocation2 + $0xd0] sm:$0xff] }
 0x2c2   : > { %v2557_v35 = vpop.f32.mrf.mxu2  ;;  %2967 = vst.msk [vmem:[#allocation2 + $0xd8] sm:$0xff] %vm200_vm3, %v2935_v53  ;;  %v3276_v32 = vadd.f32 %v3232_v39, %v3030_v54  ;;  %v3388_v39 = vsel %vm200_vm3, %v5552_v15, 0.0  ;;  %v3499_v53 = vsel %vm200_vm3, %v3444_v47, 0.0  ;;  %v3419_v47 = vld [vmem:[%s5684_s4] sm:$0x1] }
 0x2c3   : > { %v2217_v31 = vpop.f32.mrf.mxu1  ;;  %v3389_v44 = vadd.f32 %v3388_v39, %v5543_v58  ;;  %v3394_v58 = vsel %vm200_vm3, %v5579_v28, 0.0 }
 0x2c4   : > { %v5588_v30 = vld [vmem:[#allocation2 + $0xc8] sm:$0xff]  ;;  %3308 = vst.msk [vmem:[#allocation2 + $0xd0] sm:$0xff] %vm200_vm3, %v3276_v32  ;;  %v2253_v57 = vadd.f32 %v2217_v31, %v2007_v56  ;;  %v2899_v50 = vpop.f32.mrf.mxu3 }
 0x2c5   : > { %3548 = vst.msk [vmem:[%s4191_s22 + $0xc8] sm:$0xff] %vm200_vm3, %v5588_v30  ;;  %v2349_v38 = vld [vmem:[#allocation2 + $0xe8] sm:$0xff]  ;;  %v3391_v3 = vadd.f32 %v3390_v16, %v3389_v44  ;;  %v3445_v22 = vmul.f32 %v5588_v30, %v5588_v30  ;;  %v3396_v33 = vsel %vm200_vm3, %v5588_v30, 0.0 }
 0x2c6   : > { %2285 = vst.msk [vmem:[#allocation2 + $0xf0] sm:$0xff] %vm200_vm3, %v2253_v57  ;;  %v2595_v60 = vadd.f32 %v2557_v35, %v2349_v38  ;;  %v3244_v18 = vpop.f32.mrf.mxu0 }
 0x2c7   : > { %v2690_v48 = vld [vmem:[#allocation2 + $0xe0] sm:$0xff]  ;;  %v3501_v28 = vsel %vm200_vm3, %v3445_v22, 0.0 }
 0x2c8   : > { %2627 = vst.msk [vmem:[#allocation2 + $0xe8] sm:$0xff] %vm200_vm3, %v2595_v60  ;;  %v2936_v63 = vadd.f32 %v2896_v55, %v2690_v48  ;;  %v3393_v55 = vadd.f32 %v3392_v45, %v3391_v3 }
 0x2c9   : > { %v3031_v61 = vld [vmem:[#allocation2 + $0xd8] sm:$0xff] }
 0x2ca   : > { %v2560_v1 = vpop.f32.mrf.mxu2  ;;  %2968 = vst.msk [vmem:[#allocation2 + $0xe0] sm:$0xff] %vm200_vm3, %v2936_v63  ;;  %v3277_v34 = vadd.f32 %v3235_v25, %v3031_v61  ;;  %v3497_v25 = vsel %vm200_vm3, %v3443_v41, 0.0  ;;  %v3395_v56 = vadd.f32 %v3394_v58, %v3393_v55 }
 0x2cb   : > { %v5597_v51 = vld [vmem:[#allocation2 + $0xd0] sm:$0xff]  ;;  %v2220_v0 = vpop.f32.mrf.mxu1  ;;  %v3498_v32 = vadd.f32 %v3497_v25, %v3496_v27 }
 0x2cc   : > { %3549 = vst.msk [vmem:[%s4191_s22 + $0xd0] sm:$0xff] %vm200_vm3, %v5597_v51  ;;  %v2254_v19 = vadd.f32 %v2220_v0, %v2008_v8  ;;  %v2902_v7 = vpop.f32.mrf.mxu3  ;;  %v3446_v54 = vmul.f32 %v5597_v51, %v5597_v51  ;;  %v3398_v31 = vsel %vm200_vm3, %v5597_v51, 0.0  ;;  %v3397_v48 = vadd.f32 %v3396_v33, %v3395_v56 }
 0x2cd   : > { %3309 = vst.msk [vmem:[#allocation2 + $0xd8] sm:$0xff] %vm200_vm3, %v3277_v34  ;;  %v2350_v37 = vld [vmem:[#allocation2 + $0xf0] sm:$0xff]  ;;  %v3500_v60 = vadd.f32 %v3499_v53, %v3498_v32 }
 0x2ce   : > { %2286 = vst.msk [vmem:[#allocation2 + $0xf8] sm:$0xff] %vm200_vm3, %v2254_v19  ;;  %v2596_v49 = vadd.f32 %v2560_v1, %v2350_v37  ;;  %v3247_v35 = vpop.f32.mrf.mxu0  ;;  %v3399_v34 = vadd.f32 %v3398_v31, %v3397_v48 }
 0x2cf   : > { %v2691_v10 = vld [vmem:[#allocation2 + $0xe8] sm:$0xff] }
 0x2d0   : > { %2628 = vst.msk [vmem:[#allocation2 + $0xf0] sm:$0xff] %vm200_vm3, %v2596_v49  ;;  %v2937_v52 = vadd.f32 %v2899_v50, %v2691_v10  ;;  %v3502_v50 = vadd.f32 %v3501_v28, %v3500_v60 }
 0x2d1   : > { %v3032_v46 = vld [vmem:[#allocation2 + $0xe0] sm:$0xff] }
 0x2d2   : > { %2969 = vst.msk [vmem:[#allocation2 + $0xe8] sm:$0xff] %vm200_vm3, %v2937_v52  ;;  %v3278_v13 = vadd.f32 %v3238_v59, %v3032_v46  ;;  %v2563_v24 = vpop.f32.mrf.mxu2  ;;  %v3503_v59 = vsel %vm200_vm3, %v3446_v54, 0.0 }
 0x2d3   : > { %v3504_v19 = vadd.f32 %v3503_v59, %v3502_v50 }
 0x2d4   : > { %v3341_v21 = vld [vmem:[#allocation2 + $0xd8] sm:$0xff]  ;;  %3310 = vst.msk [vmem:[#allocation2 + $0xe0] sm:$0xff] %vm200_vm3, %v3278_v13  ;;  %v2905_v29 = vpop.f32.mrf.mxu3 }
 0x2d5   : > { %3550 = vst.msk [vmem:[%s4191_s22 + $0xd8] sm:$0xff] %vm200_vm3, %v3341_v21  ;;  %v2351_v23 = vld [vmem:[#allocation2 + $0xf8] sm:$0xff]  ;;  %v3447_v57 = vmul.f32 %v3341_v21, %v3341_v21  ;;  %v3400_v30 = vsel %vm200_vm3, %v3341_v21, 0.0 }
 0x2d6   : > { %v2597_v26 = vadd.f32 %v2563_v24, %v2351_v23  ;;  %v3401_v37 = vadd.f32 %v3400_v30, %v3399_v34 }
 0x2d7   : > { %v2692_v12 = vld [vmem:[#allocation2 + $0xf0] sm:$0xff]  ;;  %v3505_v8 = vsel %vm200_vm3, %v3447_v57, 0.0 }
 0x2d8   : > { %2629 = vst.msk [vmem:[#allocation2 + $0xf8] sm:$0xff] %vm200_vm3, %v2597_v26  ;;  %v2938_v9 = vadd.f32 %v2902_v7, %v2692_v12  ;;  %v3506_v46 = vadd.f32 %v3505_v8, %v3504_v19 }
 0x2d9   : > { %v3033_v62 = vld [vmem:[#allocation2 + $0xe8] sm:$0xff] }
 0x2da   : > { %2970 = vst.msk [vmem:[#allocation2 + $0xf0] sm:$0xff] %vm200_vm3, %v2938_v9  ;;  %v3279_v2 = vadd.f32 %v3241_v20, %v3033_v62 }
 0x2db   : > { %v3342_v5 = vld [vmem:[#allocation2 + $0xe0] sm:$0xff] }
 0x2dc   : > { %3551 = vst.msk [vmem:[%s4191_s22 + $0xe0] sm:$0xff] %vm200_vm3, %v3342_v5  ;;  %v3448_v61 = vmul.f32 %v3342_v5, %v3342_v5  ;;  %v3402_v0 = vsel %vm200_vm3, %v3342_v5, 0.0 }
 0x2dd   : > { %3311 = vst.msk [vmem:[#allocation2 + $0xe8] sm:$0xff] %vm200_vm3, %v3279_v2  ;;  %v3403_v13 = vadd.f32 %v3402_v0, %v3401_v37 }
 0x2de   : > { %v3507_v49 = vsel %vm200_vm3, %v3448_v61, 0.0 }
 0x2df   : > { %v2693_v14 = vld [vmem:[#allocation2 + $0xf8] sm:$0xff]  ;;  %v3508_v7 = vadd.f32 %v3507_v49, %v3506_v46 }
 0x2e0   : > { %v2939_v40 = vadd.f32 %v2905_v29, %v2693_v14 }
 0x2e1   : > { %v3034_v42 = vld [vmem:[#allocation2 + $0xf0] sm:$0xff] }
 0x2e2   : > { %2971 = vst.msk [vmem:[#allocation2 + $0xf8] sm:$0xff] %vm200_vm3, %v2939_v40  ;;  %v3280_v15 = vadd.f32 %v3244_v18, %v3034_v42 }
 0x2e4   : > { %v3343_v11 = vld [vmem:[#allocation2 + $0xe8] sm:$0xff]  ;;  %3312 = vst.msk [vmem:[#allocation2 + $0xf0] sm:$0xff] %vm200_vm3, %v3280_v15  ;;  %v3346_v15 = vld [vmem:[%s5683_s3] sm:$0x1] }
 0x2e5   : > { %3552 = vst.msk [vmem:[%s4191_s22 + $0xe8] sm:$0xff] %vm200_vm3, %v3343_v11  ;;  %v3449_v51 = vmul.f32 %v3343_v11, %v3343_v11  ;;  %v3404_v10 = vsel %vm200_vm3, %v3343_v11, 0.0 }
 0x2e6   : > { %v3405_v21 = vadd.f32 %v3404_v10, %v3403_v13 }
 0x2e7   : > { %v3509_v20 = vsel %vm200_vm3, %v3449_v51, 0.0 }
 0x2e8   : > { %v3510_v26 = vadd.f32 %v3509_v20, %v3508_v7 }
 0x2e9   : > { %v3035_v38 = vld [vmem:[#allocation2 + $0xf8] sm:$0xff] }
 0x2ea   : > { %v3281_v63 = vadd.f32 %v3247_v35, %v3035_v38 }
 0x2eb   : > { %v3344_v1 = vld [vmem:[#allocation2 + $0xf0] sm:$0xff] }
 0x2ec   : > { %3553 = vst.msk [vmem:[%s4191_s22 + $0xf0] sm:$0xff] %vm200_vm3, %v3344_v1  ;;  %v3450_v52 = vmul.f32 %v3344_v1, %v3344_v1  ;;  %v3406_v24 = vsel %vm200_vm3, %v3344_v1, 0.0 }
 0x2ed   : > { %3313 = vst.msk [vmem:[#allocation2 + $0xf8] sm:$0xff] %vm200_vm3, %v3281_v63  ;;  %v3407_v12 = vadd.f32 %v3406_v24, %v3405_v21 }
 0x2ee   : > { %v3511_v23 = vsel %vm200_vm3, %v3450_v52, 0.0 }
 0x2ef   : > { %v3512_v5 = vadd.f32 %v3511_v23, %v3510_v26 }
 0x2f4   : > { %v3345_v9 = vld [vmem:[#allocation2 + $0xf8] sm:$0xff] }
 0x2f5   : > { %v3408_v62 = vsel %vm200_vm3, %v3345_v9, 0.0  ;;  %v3451_v2 = vmul.f32 %v3345_v9, %v3345_v9  ;;  %3554 = vst.msk [vmem:[%s4191_s22 + $0xf8] sm:$0xff] %vm200_vm3, %v3345_v9 }
 0x2f6   : > { %v3409_v36 = vadd.f32 %v3408_v62, %v3407_v12 }
 0x2f7   : > { %v3513_v29 = vsel %vm200_vm3, %v3451_v2, 0.0 }
 0x2f8   : > { %v3410_v18 = vrot.slane %v3409_v36, 4  ;;  %v3514_v39 = vadd.f32 %v3513_v29, %v3512_v5 }
 0x2fa   : > { %v3411_v4 = vadd.f32 %v3410_v18, %v3409_v36  ;;  %v3515_v14 = vrot.slane %v3514_v39, 4 }
 0x2fc   : > { %v3412_v40 = vrot.slane %v3411_v4, 2  ;;  %v3516_v6 = vadd.f32 %v3515_v14, %v3514_v39 }
 0x2fe   : > { %v3413_v16 = vadd.f32 %v3412_v40, %v3411_v4  ;;  %v3517_v41 = vrot.slane %v3516_v6, 2 }
 0x300   : > { %v3414_v42 = vrot.slane %v3413_v16, 1  ;;  %v3518_v44 = vadd.f32 %v3517_v41, %v3516_v6 }
 0x302   : > { %v3415_v43 = vadd.f32 %v3414_v42, %v3413_v16  ;;  %v3519_v45 = vrot.slane %v3518_v44, 1 }
 0x304   : > { %v3416_v17 = vadd.f32 %v3415_v43, %v3346_v15  ;;  %v3520_v3 = vadd.f32 %v3519_v45, %v3518_v44 }
 0x306   : > { %3418 = vst.msk [vmem:[%s5683_s3] sm:$0x1] %vm3417_vm4, %v3416_v17  ;;  %v3521_v11 = vadd.f32 %v3520_v3, %v3419_v47 }
 0x308   : > { %3522 = vst.msk [vmem:[%s5684_s4] sm:$0x1] %vm3417_vm4, %v3521_v11 }
 0x309 PF: > { %s15_s15 = sadd.s32 1, %s4151_s15  }
 0x30a   : > { %p12_p5 = scmp.ge.s32.totalorder %s15_s15, 4  }
 0x30c   :  { %14 = sbr.rel (!%p12_p5) target bundleno = 1 (0x1), region = 88 }

// kernel: double_convolution.6
= control target key start
LH: loop header
LB: loop body
LE: loop exit
PB: predicated region body
PF: predicated region fallthrough
CT: control target
= control target key end

     0   :  { %s4142_s15 = smov 0   ;;  %s5419_s0 = inlined_call_operand.vmem [shape: f32[2,18,18,8], index: 0, kind: input, shape index: {}]   ;;  %s5420_s1 = inlined_call_operand.vmem [shape: f32[3,3,8,8], index: 1, kind: input, shape index: {}]   ;;  %s5421_s2 = inlined_call_operand.vmem [shape: f32[2,256,8], index: 2, kind: output, shape index: {0}]   ;;  %s5422_s3 = inlined_call_operand.vmem [shape: f32[1,8], index: 3, kind: output, shape index: {1}]   ;;  %s5423_s4 = inlined_call_operand.vmem [shape: f32[1,8], index: 4, kind: output, shape index: {2}]  }
   0x1 LB: > { %s3593_s16 = sadd.s32 4294967295, %s4113_s15   ;;  %p3597_p0 = scmp.ge.s32.totalorder %s4113_s15, 1  ;;  %s4113_s15 = sphi %s4142_s15, %s15_s15  }
   0x2   : > { %p157_p1 = scmp.lt.s32.totalorder %s4113_s15, 3 }
   0x4   : > { %p158_p2 = pnand %p3597_p0, %p157_p1 }
   0x5   : > { %p183_p3 = scmp.lt.s32.totalorder (!%p158_p2), %s3593_s16, 1  ;;  %p3601_p4 = scmp.ne.s32.totalorder (!%p158_p2), %s3593_s16, 0 }
   0x6   : > { %161 = sbr.rel (%p158_p2) target bundleno = 777 (0x309), region = 28 }
   0xb   : > { %s184_s17 = scalar_select %p183_p3, %s3593_s16, 1 }
   0xc   : > { %196 = sbr.rel (%p3601_p4) target bundleno = 20 (0x14), region = 32 }
   0xd   : > { %s4096_s18 = smul.u32 432, %s184_s17  ;;  %s4092_s19 = sshll.u32 %s184_s17, 8 }
   0xe   : > { %s4153_s22 = scalar_lea.vmem %s5421_s2, %s4092_s19 }
   0xf   : > { %s4158_s25 = scalar_lea.vmem %s5419_s0, %s4096_s18 }
  0x11   : > { %vm197_vm0 = vcmask 57344   ;;  %v4115_v0 = vmov 0.0  }
  0x12   : > { %198 = vst.msk [vmem:[%s5422_s3] sm:$0x1] %vm197_vm0, %v4115_v0 }
  0x13   : > { %199 = vst.msk [vmem:[%s5423_s4] sm:$0x1] %vm197_vm0, %v4115_v0 }
  0x14 PF: > { %v297_v1 = vld [vmem:[%s5420_s1] sm:$0xff]  ;;  %vm200_vm1 = vcmask 64512   ;;  %v3634_v3 = vld [vmem:[%s5420_s1 + $0x8] sm:$0xff]  ;;  %v3667_v5 = vld [vmem:[%s5420_s1 + $0x10] sm:$0xff]  ;;  %v4116_v51 = vmov 0.0   ;;  %vm3388_vm2 = vcmask 57344  }
  0x15   : > { %v4170_v2 = vld [vmem:[%s4158_s25 + $0x60] sm:$0xff]  ;;  %4093 = vmatpush.msra.mxu1 %v297_v1  ;;  %4094 = vmatpush.msra.mxu2 %v297_v1  ;;  %v3732_v7 = vld [vmem:[%s5420_s1 + $0x18] sm:$0xff]  ;;  %v4196_v10 = vld [vmem:[%s4158_s25 + $0x68] sm:$0xff]  ;;  %209 = vst.msk [vmem:[#allocation2 + $0x40] sm:$0xff] %vm200_vm1, %v4116_v51 }
  0x16   : > { %v4176_v4 = vld [vmem:[%s4158_s25 + $0xc0] sm:$0xff]  ;;  %3610 = vmatmul.msk.f32.vlgmr.msra.gmra.mxu1 %vm200_vm1, %v4170_v2  ;;  %4095 = vmatpush.msra.mxu3 %v297_v1  ;;  %v4199_v11 = vld [vmem:[%s4158_s25 + $0xc8] sm:$0xff]  ;;  %v4210_v14 = vld [vmem:[%s4158_s25 + $0x78] sm:$0xff]  ;;  %201 = vst.msk [vmem:[#allocation2] sm:$0xff] %vm200_vm1, %v4116_v51 }
  0x17   : > { %3618 = vmatmul.msk.f32.vlgmr.msra.gmra.mxu2 %vm200_vm1, %v4176_v4  ;;  %v257_v6 = vld [vmem:[%s4158_s25 + $0x120] sm:$0xff]  ;;  %748 = vmatpush.msrb.mxu1 %v3634_v3  ;;  %v258_v12 = vld [vmem:[%s4158_s25 + $0x128] sm:$0xff]  ;;  %v4213_v15 = vld [vmem:[%s4158_s25 + $0xd8] sm:$0xff]  ;;  %202 = vst.msk [vmem:[#allocation2 + $0x8] sm:$0xff] %vm200_vm1, %v4116_v51 }
  0x18   : > { %1087 = vmatpush.msrb.mxu2 %v3667_v5  ;;  %409 = vmatpush.msra.mxu0 %v297_v1  ;;  %v233_v8 = vld [vmem:[%s4158_s25] sm:$0xff]  ;;  %v234_v13 = vld [vmem:[%s4158_s25 + $0x8] sm:$0xff]  ;;  %v259_v16 = vld [vmem:[%s4158_s25 + $0x138] sm:$0xff]  ;;  %203 = vst.msk [vmem:[#allocation2 + $0x10] sm:$0xff] %vm200_vm1, %v4116_v51 }
  0x19   : > { %3626 = vmatmul.msk.f32.vlgmr.msra.gmra.mxu3 %vm200_vm1, %v257_v6  ;;  %3602 = vmatmul.msk.f32.vlgmr.msra.gmra.mxu0 %vm200_vm1, %v233_v8  ;;  %v3797_v9 = vld [vmem:[%s5420_s1 + $0x20] sm:$0xff]  ;;  %v235_v17 = vld [vmem:[%s4158_s25 + $0x18] sm:$0xff]  ;;  %v4238_v22 = vld [vmem:[%s4158_s25 + $0x90] sm:$0xff]  ;;  %204 = vst.msk [vmem:[#allocation2 + $0x18] sm:$0xff] %vm200_vm1, %v4116_v51 }
  0x1a   : > { %1427 = vmatpush.msrb.mxu3 %v3732_v7  ;;  %1766 = vmatpush.msrb.mxu0 %v3797_v9  ;;  %v4224_v18 = vld [vmem:[%s4158_s25 + $0x80] sm:$0xff]  ;;  %v4241_v23 = vld [vmem:[%s4158_s25 + $0xf0] sm:$0xff]  ;;  %v3862_v26 = vld [vmem:[%s5420_s1 + $0x28] sm:$0xff]  ;;  %205 = vst.msk [vmem:[#allocation2 + $0x20] sm:$0xff] %vm200_vm1, %v4116_v51 }
  0x1b   : > { %v4227_v19 = vld [vmem:[%s4158_s25 + $0xe0] sm:$0xff]  ;;  %v261_v24 = vld [vmem:[%s4158_s25 + $0x150] sm:$0xff]  ;;  %2105 = vmatpush.msra.mxu1 %v3862_v26  ;;  %v4258_v28 = vld [vmem:[%s4158_s25 + $0x98] sm:$0xff]  ;;  %206 = vst.msk [vmem:[#allocation2 + $0x28] sm:$0xff] %vm200_vm1, %v4116_v51 }
  0x1c   : > { %v260_v20 = vld [vmem:[%s4158_s25 + $0x140] sm:$0xff]  ;;  %v237_v25 = vld [vmem:[%s4158_s25 + $0x30] sm:$0xff]  ;;  %v4261_v29 = vld [vmem:[%s4158_s25 + $0xf8] sm:$0xff]  ;;  %207 = vst.msk [vmem:[#allocation2 + $0x30] sm:$0xff] %vm200_vm1, %v4116_v51 }
  0x1d   : > { %v236_v21 = vld [vmem:[%s4158_s25 + $0x20] sm:$0xff]  ;;  %v3927_v27 = vld [vmem:[%s5420_s1 + $0x30] sm:$0xff]  ;;  %v262_v30 = vld [vmem:[%s4158_s25 + $0x158] sm:$0xff]  ;;  %208 = vst.msk [vmem:[#allocation2 + $0x38] sm:$0xff] %vm200_vm1, %v4116_v51 }
  0x1e   : > { %3611 = vmatmul.msk.f32.gmra.mxu1 %vm200_vm1, %v4196_v10  ;;  %2445 = vmatpush.msra.mxu2 %v3927_v27  ;;  %v238_v31 = vld [vmem:[%s4158_s25 + $0x38] sm:$0xff]  ;;  %v4275_v33 = vld [vmem:[%s4158_s25 + $0xa8] sm:$0xff]  ;;  %v4289_v37 = vld [vmem:[%s4158_s25 + $0xb0] sm:$0xff]  ;;  %210 = vst.msk [vmem:[#allocation2 + $0x48] sm:$0xff] %vm200_vm1, %v4116_v51 }
  0x1f   : > { %3619 = vmatmul.msk.f32.gmra.mxu2 %vm200_vm1, %v4199_v11  ;;  %v3992_v32 = vld [vmem:[%s5420_s1 + $0x38] sm:$0xff]  ;;  %v4278_v34 = vld [vmem:[%s4158_s25 + $0x108] sm:$0xff]  ;;  %v4292_v38 = vld [vmem:[%s4158_s25 + $0x110] sm:$0xff]  ;;  %211 = vst.msk [vmem:[#allocation2 + $0x50] sm:$0xff] %vm200_vm1, %v4116_v51 }
  0x20   : > { %2784 = vmatpush.msra.mxu3 %v3992_v32  ;;  %v263_v35 = vld [vmem:[%s4158_s25 + $0x168] sm:$0xff]  ;;  %v264_v39 = vld [vmem:[%s4158_s25 + $0x170] sm:$0xff]  ;;  %v4057_v41 = vld [vmem:[%s5420_s1 + $0x40] sm:$0xff]  ;;  %212 = vst.msk [vmem:[#allocation2 + $0x58] sm:$0xff] %vm200_vm1, %v4116_v51 }
  0x21   : > { %3627 = vmatmul.msk.f32.gmra.mxu3 %vm200_vm1, %v258_v12  ;;  %3603 = vmatmul.msk.f32.gmra.mxu0 %vm200_vm1, %v234_v13  ;;  %v239_v36 = vld [vmem:[%s4158_s25 + $0x48] sm:$0xff]  ;;  %v4300_v40 = vld [vmem:[%s4158_s25 + $0x50] sm:$0xff]  ;;  %v573_v44 = vld [vmem:[%s4158_s25 + $0x19] sm:$0xff]  ;;  %213 = vst.msk [vmem:[#allocation2 + $0x60] sm:$0xff] %vm200_vm1, %v4116_v51 }
  0x22   : > { %3123 = vmatpush.msra.mxu0 %v4057_v41  ;;  %v571_v42 = vld [vmem:[%s4158_s25 + $0x1] sm:$0xff]  ;;  %v572_v45 = vld [vmem:[%s4158_s25 + $0x9] sm:$0xff]  ;;  %v575_v49 = vld [vmem:[%s4158_s25 + $0x31] sm:$0xff]  ;;  %214 = vst.msk [vmem:[#allocation2 + $0x68] sm:$0xff] %vm200_vm1, %v4116_v51 }
  0x23   : > { %v910_v43 = vld [vmem:[%s4158_s25 + $0x2] sm:$0xff]  ;;  %v911_v46 = vld [vmem:[%s4158_s25 + $0xa] sm:$0xff]  ;;  %v912_v48 = vld [vmem:[%s4158_s25 + $0x1a] sm:$0xff]  ;;  %215 = vst.msk [vmem:[#allocation2 + $0x70] sm:$0xff] %vm200_vm1, %v4116_v51 }
  0x24   : > { %v574_v47 = vld [vmem:[%s4158_s25 + $0x21] sm:$0xff]  ;;  %v576_v52 = vld [vmem:[%s4158_s25 + $0x39] sm:$0xff]  ;;  %v577_v54 = vld [vmem:[%s4158_s25 + $0x49] sm:$0xff]  ;;  %216 = vst.msk [vmem:[#allocation2 + $0x78] sm:$0xff] %vm200_vm1, %v4116_v51 }
  0x25   : > { %v913_v50 = vld [vmem:[%s4158_s25 + $0x22] sm:$0xff]  ;;  %v914_v53 = vld [vmem:[%s4158_s25 + $0x32] sm:$0xff]  ;;  %v915_v55 = vld [vmem:[%s4158_s25 + $0x3a] sm:$0xff]  ;;  %217 = vst.msk [vmem:[#allocation2 + $0x80] sm:$0xff] %vm200_vm1, %v4116_v51 }
  0x26   : > { %3612 = vmatmul.msk.f32.gmra.mxu1 %vm200_vm1, %v4210_v14  ;;  %218 = vst.msk [vmem:[#allocation2 + $0x88] sm:$0xff] %vm200_vm1, %v4116_v51  ;;  %v578_v56 = vld [vmem:[%s4158_s25 + $0x51] sm:$0xff]  ;;  %v579_v58 = vld [vmem:[%s4158_s25 + $0x61] sm:$0xff]  ;;  %v580_v60 = vld [vmem:[%s4158_s25 + $0x69] sm:$0xff] }
  0x27   : > { %3620 = vmatmul.msk.f32.gmra.mxu2 %vm200_vm1, %v4213_v15  ;;  %219 = vst.msk [vmem:[#allocation2 + $0x90] sm:$0xff] %vm200_vm1, %v4116_v51  ;;  %v916_v57 = vld [vmem:[%s4158_s25 + $0x4a] sm:$0xff]  ;;  %v917_v59 = vld [vmem:[%s4158_s25 + $0x52] sm:$0xff]  ;;  %v273_v61 = vld [vmem:[#allocation2 + $0x40] sm:$0xff] }
  0x28   : > { %220 = vst.msk [vmem:[#allocation2 + $0x98] sm:$0xff] %vm200_vm1, %v4116_v51  ;;  %v918_v63 = vld [vmem:[%s4158_s25 + $0x62] sm:$0xff]  ;;  %v581_v6 = vld [vmem:[%s4158_s25 + $0x79] sm:$0xff]  ;;  %v919_v13 = vld [vmem:[%s4158_s25 + $0x6a] sm:$0xff] }
  0x29   : > { %3628 = vmatmul.msk.f32.gmra.mxu3 %vm200_vm1, %v259_v16  ;;  %3604 = vmatmul.msk.f32.gmra.mxu0 %vm200_vm1, %v235_v17  ;;  %221 = vst.msk [vmem:[#allocation2 + $0xa0] sm:$0xff] %vm200_vm1, %v4116_v51  ;;  %v265_v1 = vld [vmem:[#allocation2] sm:$0xff]  ;;  %v274_v7 = vld [vmem:[#allocation2 + $0x48] sm:$0xff]  ;;  %v275_v27 = vld [vmem:[#allocation2 + $0x50] sm:$0xff] }
  0x2a   : > { %222 = vst.msk [vmem:[#allocation2 + $0xa8] sm:$0xff] %vm200_vm1, %v4116_v51  ;;  %v582_v26 = vld [vmem:[%s4158_s25 + $0x81] sm:$0xff]  ;;  %v267_v41 = vld [vmem:[#allocation2 + $0x10] sm:$0xff] }
  0x2b   : > { %223 = vst.msk [vmem:[#allocation2 + $0xb0] sm:$0xff] %vm200_vm1, %v4116_v51 }
  0x2c   : > { %224 = vst.msk [vmem:[#allocation2 + $0xb8] sm:$0xff] %vm200_vm1, %v4116_v51  ;;  %v281_v3 = vld [vmem:[#allocation2 + $0x80] sm:$0xff] }
  0x2d   : > { %225 = vst.msk [vmem:[#allocation2 + $0xc0] sm:$0xff] %vm200_vm1, %v4116_v51 }
  0x2e   : > { %3613 = vmatmul.msk.f32.gmra.mxu1 %vm200_vm1, %v4224_v18  ;;  %226 = vst.msk [vmem:[#allocation2 + $0xc8] sm:$0xff] %vm200_vm1, %v4116_v51 }
  0x2f   : > { %3621 = vmatmul.msk.f32.gmra.mxu2 %vm200_vm1, %v4227_v19  ;;  %227 = vst.msk [vmem:[#allocation2 + $0xd0] sm:$0xff] %vm200_vm1, %v4116_v51 }
  0x30   : > { %228 = vst.msk [vmem:[#allocation2 + $0xd8] sm:$0xff] %vm200_vm1, %v4116_v51 }
  0x31   : > { %3629 = vmatmul.msk.f32.gmra.mxu3 %vm200_vm1, %v260_v20  ;;  %3605 = vmatmul.msk.f32.gmra.mxu0 %vm200_vm1, %v236_v21  ;;  %229 = vst.msk [vmem:[#allocation2 + $0xe0] sm:$0xff] %vm200_vm1, %v4116_v51  ;;  %v266_v20 = vld [vmem:[#allocation2 + $0x8] sm:$0xff] }
  0x32   : > { %230 = vst.msk [vmem:[#allocation2 + $0xe8] sm:$0xff] %vm200_vm1, %v4116_v51 }
  0x33   : > { %231 = vst.msk [vmem:[#allocation2 + $0xf0] sm:$0xff] %vm200_vm1, %v4116_v51 }
  0x34   : > { %232 = vst.msk [vmem:[#allocation2 + $0xf8] sm:$0xff] %vm200_vm1, %v4116_v51  ;;  %v921_v51 = vld [vmem:[%s4158_s25 + $0x82] sm:$0xff] }
  0x35   : > { %v290_v32 = vld [vmem:[#allocation2 + $0xc8] sm:$0xff] }
  0x36   : > { %3614 = vmatmul.msk.f32.gmra.mxu1 %vm200_vm1, %v4238_v22 }
  0x37   : > { %3622 = vmatmul.msk.f32.gmra.mxu2 %vm200_vm1, %v4241_v23 }
  0x39   : > { %3630 = vmatmul.msk.f32.gmra.mxu3 %vm200_vm1, %v261_v24  ;;  %3606 = vmatmul.msk.f32.gmra.mxu0 %vm200_vm1, %v237_v25  ;;  %v282_v24 = vld [vmem:[#allocation2 + $0x88] sm:$0xff] }
  0x3e   : > { %3615 = vmatmul.msk.f32.gmra.mxu1 %vm200_vm1, %v4258_v28 }
  0x3f   : > { %3623 = vmatmul.msk.f32.gmra.mxu2 %vm200_vm1, %v4261_v29 }
  0x41   : > { %3631 = vmatmul.msk.f32.gmra.mxu3 %vm200_vm1, %v262_v30  ;;  %3607 = vmatmul.msk.f32.gmra.mxu0 %vm200_vm1, %v238_v31 }
  0x46   : > { %3616 = vmatmul.msk.f32.gmra.mxu1 %vm200_vm1, %v4275_v33 }
  0x47   : > { %3624 = vmatmul.msk.f32.gmra.mxu2 %vm200_vm1, %v4278_v34 }
  0x49   : > { %3632 = vmatmul.msk.f32.gmra.mxu3 %vm200_vm1, %v263_v35  ;;  %3608 = vmatmul.msk.f32.gmra.mxu0 %vm200_vm1, %v239_v36 }
  0x4e   : > { %3617 = vmatmul.msk.f32.gmra.mxu1 %vm200_vm1, %v4289_v37 }
  0x4f   : > { %3625 = vmatmul.msk.f32.gmra.mxu2 %vm200_vm1, %v4292_v38 }
  0x51   : > { %3633 = vmatmul.msk.f32.gmra.mxu3 %vm200_vm1, %v264_v39  ;;  %3609 = vmatmul.msk.f32.gmra.mxu0 %vm200_vm1, %v4300_v40 }
  0x56   : > { %3635 = vmatmul.msk.f32.vlgmr.msrb.gmra.mxu1 %vm200_vm1, %v571_v42 }
  0x57   : > { %3668 = vmatmul.msk.f32.vlgmr.msrb.gmra.mxu2 %vm200_vm1, %v910_v43  ;;  %v283_v43 = vld [vmem:[#allocation2 + $0x90] sm:$0xff] }
  0x59   : > { %3733 = vmatmul.msk.f32.vlgmr.msrb.gmra.mxu3 %vm200_vm1, %v235_v17  ;;  %3798 = vmatmul.msk.f32.vlgmr.msrb.gmra.mxu0 %vm200_vm1, %v573_v44 }
  0x5e   : > { %3636 = vmatmul.msk.f32.gmra.mxu1 %vm200_vm1, %v572_v45  ;;  %v583_v45 = vld [vmem:[%s4158_s25 + $0x91] sm:$0xff] }
  0x5f   : > { %3669 = vmatmul.msk.f32.gmra.mxu2 %vm200_vm1, %v911_v46  ;;  %v276_v46 = vld [vmem:[#allocation2 + $0x58] sm:$0xff] }
  0x61   : > { %3734 = vmatmul.msk.f32.gmra.mxu3 %vm200_vm1, %v236_v21  ;;  %3799 = vmatmul.msk.f32.gmra.mxu0 %vm200_vm1, %v574_v47 }
  0x66   : > { %3637 = vmatmul.msk.f32.gmra.mxu1 %vm200_vm1, %v573_v44 }
  0x67   : > { %3670 = vmatmul.msk.f32.gmra.mxu2 %vm200_vm1, %v912_v48 }
  0x69   : > { %3735 = vmatmul.msk.f32.gmra.mxu3 %vm200_vm1, %v237_v25  ;;  %3800 = vmatmul.msk.f32.gmra.mxu0 %vm200_vm1, %v575_v49 }
  0x6e   : > { %3638 = vmatmul.msk.f32.gmra.mxu1 %vm200_vm1, %v574_v47 }
  0x6f   : > { %3671 = vmatmul.msk.f32.gmra.mxu2 %vm200_vm1, %v913_v50 }
  0x71   : > { %3736 = vmatmul.msk.f32.gmra.mxu3 %vm200_vm1, %v238_v31  ;;  %3801 = vmatmul.msk.f32.gmra.mxu0 %vm200_vm1, %v576_v52 }
  0x76   : > { %3639 = vmatmul.msk.f32.gmra.mxu1 %vm200_vm1, %v575_v49  ;;  %v291_v49 = vld [vmem:[#allocation2 + $0xd0] sm:$0xff] }
  0x77   : > { %3672 = vmatmul.msk.f32.gmra.mxu2 %vm200_vm1, %v914_v53 }
  0x79   : > { %3737 = vmatmul.msk.f32.gmra.mxu3 %vm200_vm1, %v239_v36  ;;  %3802 = vmatmul.msk.f32.gmra.mxu0 %vm200_vm1, %v577_v54  ;;  %v920_v36 = vld [vmem:[%s4158_s25 + $0x7a] sm:$0xff] }
  0x7e   : > { %3640 = vmatmul.msk.f32.gmra.mxu1 %vm200_vm1, %v576_v52 }
  0x7f   : > { %3673 = vmatmul.msk.f32.gmra.mxu2 %vm200_vm1, %v915_v55 }
  0x81   : > { %3738 = vmatmul.msk.f32.gmra.mxu3 %vm200_vm1, %v4300_v40  ;;  %3803 = vmatmul.msk.f32.gmra.mxu0 %vm200_vm1, %v578_v56 }
  0x86   : > { %3641 = vmatmul.msk.f32.gmra.mxu1 %vm200_vm1, %v577_v54  ;;  %v268_v54 = vld [vmem:[#allocation2 + $0x18] sm:$0xff] }
  0x87   : > { %3674 = vmatmul.msk.f32.gmra.mxu2 %vm200_vm1, %v916_v57 }
  0x89   : > { %3739 = vmatmul.msk.f32.gmra.mxu3 %vm200_vm1, %v4170_v2  ;;  %3804 = vmatmul.msk.f32.gmra.mxu0 %vm200_vm1, %v579_v58 }
  0x8e   : > { %3642 = vmatmul.msk.f32.gmra.mxu1 %vm200_vm1, %v578_v56  ;;  %v284_v56 = vld [vmem:[#allocation2 + $0x98] sm:$0xff] }
  0x8f   : > { %3675 = vmatmul.msk.f32.gmra.mxu2 %vm200_vm1, %v917_v59  ;;  %v277_v59 = vld [vmem:[#allocation2 + $0x60] sm:$0xff] }
  0x91   : > { %3740 = vmatmul.msk.f32.gmra.mxu3 %vm200_vm1, %v4196_v10  ;;  %3805 = vmatmul.msk.f32.gmra.mxu0 %vm200_vm1, %v580_v60  ;;  %v289_v10 = vld [vmem:[#allocation2 + $0xc0] sm:$0xff] }
  0x93   : > { %v435_v62 = vpop.f32.mrf.mxu1 }
  0x94   : > { %v515_v0 = vadd.f32 %v435_v62, %v273_v61  ;;  %v292_v62 = vld [vmem:[#allocation2 + $0xd8] sm:$0xff] }
  0x96   : > { %547 = vst.msk [vmem:[#allocation2 + $0x40] sm:$0xff] %vm200_vm1, %v515_v0  ;;  %3643 = vmatmul.msk.f32.gmra.mxu1 %vm200_vm1, %v579_v58  ;;  %v411_v2 = vpop.f32.mrf.mxu0  ;;  %v584_v58 = vld [vmem:[%s4158_s25 + $0x99] sm:$0xff] }
  0x97   : > { %3676 = vmatmul.msk.f32.gmra.mxu2 %vm200_vm1, %v918_v63  ;;  %v507_v5 = vadd.f32 %v411_v2, %v265_v1  ;;  %v922_v0 = vld [vmem:[%s4158_s25 + $0x92] sm:$0xff] }
  0x99   : > { %3741 = vmatmul.msk.f32.gmra.mxu3 %vm200_vm1, %v4210_v14  ;;  %539 = vst.msk [vmem:[#allocation2] sm:$0xff] %vm200_vm1, %v507_v5  ;;  %3806 = vmatmul.msk.f32.gmra.mxu0 %vm200_vm1, %v581_v6 }
  0x9a   : > { %v459_v8 = vpop.f32.mrf.mxu2 }
  0x9b   : > { %v523_v9 = vadd.f32 %v459_v8, %v281_v3  ;;  %v438_v12 = vpop.f32.mrf.mxu1  ;;  %v269_v3 = vld [vmem:[#allocation2 + $0x20] sm:$0xff]  ;;  %v585_v8 = vld [vmem:[%s4158_s25 + $0xa9] sm:$0xff] }
  0x9c   : > { %v516_v16 = vadd.f32 %v438_v12, %v274_v7  ;;  %v483_v17 = vpop.f32.mrf.mxu3 }
  0x9d   : > { %555 = vst.msk [vmem:[#allocation2 + $0x80] sm:$0xff] %vm200_vm1, %v523_v9  ;;  %v531_v21 = vadd.f32 %v483_v17, %v289_v10  ;;  %v278_v9 = vld [vmem:[#allocation2 + $0x68] sm:$0xff]  ;;  %v923_v17 = vld [vmem:[%s4158_s25 + $0x9a] sm:$0xff] }
  0x9e   : > { %548 = vst.msk [vmem:[#allocation2 + $0x48] sm:$0xff] %vm200_vm1, %v516_v16  ;;  %3644 = vmatmul.msk.f32.gmra.mxu1 %vm200_vm1, %v580_v60  ;;  %v414_v14 = vpop.f32.mrf.mxu0 }
  0x9f   : > { %3677 = vmatmul.msk.f32.gmra.mxu2 %vm200_vm1, %v919_v13  ;;  %563 = vst.msk [vmem:[#allocation2 + $0xc0] sm:$0xff] %vm200_vm1, %v531_v21  ;;  %v508_v25 = vadd.f32 %v414_v14, %v266_v20  ;;  %v293_v13 = vld [vmem:[#allocation2 + $0xe0] sm:$0xff]  ;;  %v270_v14 = vld [vmem:[#allocation2 + $0x28] sm:$0xff] }
  0xa1   : > { %3742 = vmatmul.msk.f32.gmra.mxu3 %vm200_vm1, %v4224_v18  ;;  %540 = vst.msk [vmem:[#allocation2 + $0x8] sm:$0xff] %vm200_vm1, %v508_v25  ;;  %3807 = vmatmul.msk.f32.gmra.mxu0 %vm200_vm1, %v582_v26  ;;  %v286_v25 = vld [vmem:[#allocation2 + $0xa8] sm:$0xff] }
  0xa2   : > { %v462_v30 = vpop.f32.mrf.mxu2 }
  0xa3   : > { %v524_v31 = vadd.f32 %v462_v30, %v282_v24  ;;  %v441_v35 = vpop.f32.mrf.mxu1  ;;  %v279_v30 = vld [vmem:[#allocation2 + $0x70] sm:$0xff] }
  0xa4   : > { %v517_v39 = vadd.f32 %v441_v35, %v275_v27  ;;  %v486_v40 = vpop.f32.mrf.mxu3  ;;  %v586_v27 = vld [vmem:[%s4158_s25 + $0xb1] sm:$0xff]  ;;  %v294_v35 = vld [vmem:[#allocation2 + $0xe8] sm:$0xff] }
  0xa5   : > { %556 = vst.msk [vmem:[#allocation2 + $0x88] sm:$0xff] %vm200_vm1, %v524_v31  ;;  %v532_v42 = vadd.f32 %v486_v40, %v290_v32 }
  0xa6   : > { %549 = vst.msk [vmem:[#allocation2 + $0x50] sm:$0xff] %vm200_vm1, %v517_v39  ;;  %3645 = vmatmul.msk.f32.gmra.mxu1 %vm200_vm1, %v581_v6  ;;  %v417_v18 = vpop.f32.mrf.mxu0  ;;  %v285_v6 = vld [vmem:[#allocation2 + $0xa0] sm:$0xff]  ;;  %v924_v39 = vld [vmem:[%s4158_s25 + $0xaa] sm:$0xff] }
  0xa7   : > { %3678 = vmatmul.msk.f32.gmra.mxu2 %vm200_vm1, %v920_v36  ;;  %564 = vst.msk [vmem:[#allocation2 + $0xc8] sm:$0xff] %vm200_vm1, %v532_v42  ;;  %v509_v44 = vadd.f32 %v417_v18, %v267_v41  ;;  %v271_v42 = vld [vmem:[#allocation2 + $0x30] sm:$0xff] }
  0xa9   : > { %3743 = vmatmul.msk.f32.gmra.mxu3 %vm200_vm1, %v4238_v22  ;;  %541 = vst.msk [vmem:[#allocation2 + $0x10] sm:$0xff] %vm200_vm1, %v509_v44  ;;  %3808 = vmatmul.msk.f32.gmra.mxu0 %vm200_vm1, %v583_v45 }
  0xaa   : > { %v465_v47 = vpop.f32.mrf.mxu2 }
  0xab   : > { %v525_v48 = vadd.f32 %v465_v47, %v283_v43  ;;  %v444_v50 = vpop.f32.mrf.mxu1  ;;  %v287_v43 = vld [vmem:[#allocation2 + $0xb0] sm:$0xff] }
  0xac   : > { %v518_v52 = vadd.f32 %v444_v50, %v276_v46  ;;  %v489_v53 = vpop.f32.mrf.mxu3  ;;  %v280_v46 = vld [vmem:[#allocation2 + $0x78] sm:$0xff] }
  0xad   : > { %557 = vst.msk [vmem:[#allocation2 + $0x90] sm:$0xff] %vm200_vm1, %v525_v48  ;;  %v533_v55 = vadd.f32 %v489_v53, %v291_v49  ;;  %v295_v49 = vld [vmem:[#allocation2 + $0xf0] sm:$0xff] }
  0xae   : > { %550 = vst.msk [vmem:[#allocation2 + $0x58] sm:$0xff] %vm200_vm1, %v518_v52  ;;  %3646 = vmatmul.msk.f32.gmra.mxu1 %vm200_vm1, %v582_v26  ;;  %v420_v22 = vpop.f32.mrf.mxu0 }
  0xaf   : > { %3679 = vmatmul.msk.f32.gmra.mxu2 %vm200_vm1, %v921_v51  ;;  %565 = vst.msk [vmem:[#allocation2 + $0xd0] sm:$0xff] %vm200_vm1, %v533_v55  ;;  %v510_v57 = vadd.f32 %v420_v22, %v268_v54  ;;  %v925_v51 = vld [vmem:[%s4158_s25 + $0xb2] sm:$0xff] }
  0xb0   : > { %v272_v54 = vld [vmem:[#allocation2 + $0x38] sm:$0xff] }
  0xb1   : > { %3744 = vmatmul.msk.f32.gmra.mxu3 %vm200_vm1, %v4258_v28  ;;  %542 = vst.msk [vmem:[#allocation2 + $0x18] sm:$0xff] %vm200_vm1, %v510_v57  ;;  %3809 = vmatmul.msk.f32.gmra.mxu0 %vm200_vm1, %v584_v58  ;;  %v288_v22 = vld [vmem:[#allocation2 + $0xb8] sm:$0xff]  ;;  %v588_v57 = vld [vmem:[%s4158_s25 + $0xc9] sm:$0xff] }
  0xb2   : > { %v468_v60 = vpop.f32.mrf.mxu2 }
  0xb3   : > { %v526_v61 = vadd.f32 %v468_v60, %v284_v56  ;;  %v447_v63 = vpop.f32.mrf.mxu1  ;;  %v296_v60 = vld [vmem:[#allocation2 + $0xf8] sm:$0xff] }
  0xb4   : > { %v519_v1 = vadd.f32 %v447_v63, %v277_v59  ;;  %v492_v2 = vpop.f32.mrf.mxu3  ;;  %v926_v63 = vld [vmem:[%s4158_s25 + $0xc2] sm:$0xff] }
  0xb5   : > { %558 = vst.msk [vmem:[#allocation2 + $0x98] sm:$0xff] %vm200_vm1, %v526_v61  ;;  %v534_v5 = vadd.f32 %v492_v2, %v292_v62  ;;  %v603_v61 = vld [vmem:[#allocation2] sm:$0xff] }
  0xb6   : > { %551 = vst.msk [vmem:[#allocation2 + $0x60] sm:$0xff] %vm200_vm1, %v519_v1  ;;  %3647 = vmatmul.msk.f32.gmra.mxu1 %vm200_vm1, %v583_v45  ;;  %v423_v28 = vpop.f32.mrf.mxu0  ;;  %v587_v45 = vld [vmem:[%s4158_s25 + $0xc1] sm:$0xff] }
  0xb7   : > { %3680 = vmatmul.msk.f32.gmra.mxu2 %vm200_vm1, %v922_v0  ;;  %566 = vst.msk [vmem:[#allocation2 + $0xd8] sm:$0xff] %vm200_vm1, %v534_v5  ;;  %v511_v7 = vadd.f32 %v423_v28, %v269_v3  ;;  %v589_v3 = vld [vmem:[%s4158_s25 + $0xd9] sm:$0xff]  ;;  %v604_v28 = vld [vmem:[#allocation2 + $0x8] sm:$0xff] }
  0xb9   : > { %3745 = vmatmul.msk.f32.gmra.mxu3 %vm200_vm1, %v4275_v33  ;;  %543 = vst.msk [vmem:[#allocation2 + $0x20] sm:$0xff] %vm200_vm1, %v511_v7  ;;  %3810 = vmatmul.msk.f32.gmra.mxu0 %vm200_vm1, %v585_v8  ;;  %v927_v7 = vld [vmem:[%s4158_s25 + $0xca] sm:$0xff] }
  0xba   : > { %v471_v10 = vpop.f32.mrf.mxu2 }
  0xbb   : > { %v527_v12 = vadd.f32 %v471_v10, %v285_v6  ;;  %v450_v16 = vpop.f32.mrf.mxu1 }
  0xbc   : > { %v520_v20 = vadd.f32 %v450_v16, %v278_v9  ;;  %v495_v21 = vpop.f32.mrf.mxu3 }
  0xbd   : > { %559 = vst.msk [vmem:[#allocation2 + $0xa0] sm:$0xff] %vm200_vm1, %v527_v12  ;;  %v535_v24 = vadd.f32 %v495_v21, %v293_v13  ;;  %v928_v21 = vld [vmem:[%s4158_s25 + $0xda] sm:$0xff] }
  0xbe   : > { %552 = vst.msk [vmem:[#allocation2 + $0x68] sm:$0xff] %vm200_vm1, %v520_v20  ;;  %3648 = vmatmul.msk.f32.gmra.mxu1 %vm200_vm1, %v584_v58  ;;  %v426_v33 = vpop.f32.mrf.mxu0 }
  0xbf   : > { %3681 = vmatmul.msk.f32.gmra.mxu2 %vm200_vm1, %v923_v17  ;;  %567 = vst.msk [vmem:[#allocation2 + $0xe0] sm:$0xff] %vm200_vm1, %v535_v24  ;;  %v512_v26 = vadd.f32 %v426_v33, %v270_v14  ;;  %v605_v17 = vld [vmem:[#allocation2 + $0x10] sm:$0xff] }
  0xc1   : > { %3746 = vmatmul.msk.f32.gmra.mxu3 %vm200_vm1, %v4289_v37  ;;  %544 = vst.msk [vmem:[#allocation2 + $0x28] sm:$0xff] %vm200_vm1, %v512_v26  ;;  %3811 = vmatmul.msk.f32.gmra.mxu0 %vm200_vm1, %v586_v27 }
  0xc2   : > { %v474_v31 = vpop.f32.mrf.mxu2 }
  0xc3   : > { %v528_v32 = vadd.f32 %v474_v31, %v286_v25  ;;  %v453_v36 = vpop.f32.mrf.mxu1 }
  0xc4   : > { %v521_v40 = vadd.f32 %v453_v36, %v279_v30  ;;  %v498_v41 = vpop.f32.mrf.mxu3  ;;  %v591_v30 = vld [vmem:[%s4158_s25 + $0xf1] sm:$0xff]  ;;  %v929_v36 = vld [vmem:[%s4158_s25 + $0xe2] sm:$0xff] }
  0xc5   : > { %560 = vst.msk [vmem:[#allocation2 + $0xa8] sm:$0xff] %vm200_vm1, %v528_v32  ;;  %v536_v18 = vadd.f32 %v498_v41, %v294_v35  ;;  %v606_v32 = vld [vmem:[#allocation2 + $0x18] sm:$0xff] }
  0xc6   : > { %553 = vst.msk [vmem:[#allocation2 + $0x70] sm:$0xff] %vm200_vm1, %v521_v40  ;;  %3649 = vmatmul.msk.f32.gmra.mxu1 %vm200_vm1, %v585_v8  ;;  %v429_v37 = vpop.f32.mrf.mxu0 }
  0xc7   : > { %3682 = vmatmul.msk.f32.gmra.mxu2 %vm200_vm1, %v924_v39  ;;  %568 = vst.msk [vmem:[#allocation2 + $0xe8] sm:$0xff] %vm200_vm1, %v536_v18  ;;  %v513_v44 = vadd.f32 %v429_v37, %v271_v42 }
  0xc9   : > { %3747 = vmatmul.msk.f32.gmra.mxu3 %vm200_vm1, %v4176_v4  ;;  %545 = vst.msk [vmem:[#allocation2 + $0x30] sm:$0xff] %vm200_vm1, %v513_v44  ;;  %3812 = vmatmul.msk.f32.gmra.mxu0 %vm200_vm1, %v587_v45 }
  0xca   : > { %v477_v47 = vpop.f32.mrf.mxu2 }
  0xcb   : > { %v529_v48 = vadd.f32 %v477_v47, %v287_v43  ;;  %v456_v50 = vpop.f32.mrf.mxu1  ;;  %v592_v43 = vld [vmem:[%s4158_s25 + $0xf9] sm:$0xff] }
  0xcc   : > { %v522_v52 = vadd.f32 %v456_v50, %v280_v46  ;;  %v501_v53 = vpop.f32.mrf.mxu3  ;;  %v607_v47 = vld [vmem:[#allocation2 + $0x20] sm:$0xff] }
  0xcd   : > { %561 = vst.msk [vmem:[#allocation2 + $0xb0] sm:$0xff] %vm200_vm1, %v529_v48  ;;  %v537_v55 = vadd.f32 %v501_v53, %v295_v49  ;;  %v930_v49 = vld [vmem:[%s4158_s25 + $0xf2] sm:$0xff] }
  0xce   : > { %554 = vst.msk [vmem:[#allocation2 + $0x78] sm:$0xff] %vm200_vm1, %v522_v52  ;;  %3650 = vmatmul.msk.f32.gmra.mxu1 %vm200_vm1, %v586_v27  ;;  %v432_v4 = vpop.f32.mrf.mxu0 }
  0xcf   : > { %3683 = vmatmul.msk.f32.gmra.mxu2 %vm200_vm1, %v925_v51  ;;  %569 = vst.msk [vmem:[#allocation2 + $0xf0] sm:$0xff] %vm200_vm1, %v537_v55  ;;  %v514_v56 = vadd.f32 %v432_v4, %v272_v54  ;;  %v593_v4 = vld [vmem:[%s4158_s25 + $0x109] sm:$0xff] }
  0xd1   : > { %3748 = vmatmul.msk.f32.gmra.mxu3 %vm200_vm1, %v4199_v11  ;;  %546 = vst.msk [vmem:[#allocation2 + $0x38] sm:$0xff] %vm200_vm1, %v514_v56  ;;  %3813 = vmatmul.msk.f32.gmra.mxu0 %vm200_vm1, %v588_v57 }
  0xd2   : > { %v480_v58 = vpop.f32.mrf.mxu2 }
  0xd3   : > { %v530_v59 = vadd.f32 %v480_v58, %v288_v22  ;;  %v750_v62 = vpop.f32.mrf.mxu1  ;;  %v608_v58 = vld [vmem:[#allocation2 + $0x28] sm:$0xff] }
  0xd4   : > { %v846_v0 = vadd.f32 %v750_v62, %v603_v61  ;;  %v504_v1 = vpop.f32.mrf.mxu3 }
  0xd5   : > { %562 = vst.msk [vmem:[#allocation2 + $0xb8] sm:$0xff] %vm200_vm1, %v530_v59  ;;  %v538_v2 = vadd.f32 %v504_v1, %v296_v60  ;;  %v931_v60 = vld [vmem:[%s4158_s25 + $0xfa] sm:$0xff] }
  0xd6   : > { %878 = vst.msk [vmem:[#allocation2] sm:$0xff] %vm200_vm1, %v846_v0  ;;  %3651 = vmatmul.msk.f32.gmra.mxu1 %vm200_vm1, %v587_v45  ;;  %v1768_v11 = vpop.f32.mrf.mxu0 }
  0xd7   : > { %3684 = vmatmul.msk.f32.gmra.mxu2 %vm200_vm1, %v926_v63  ;;  %570 = vst.msk [vmem:[#allocation2 + $0xf8] sm:$0xff] %vm200_vm1, %v538_v2 }
  0xd9   : > { %3749 = vmatmul.msk.f32.gmra.mxu3 %vm200_vm1, %v4213_v15  ;;  %3814 = vmatmul.msk.f32.gmra.mxu0 %vm200_vm1, %v589_v3  ;;  %v590_v15 = vld [vmem:[%s4158_s25 + $0xe1] sm:$0xff] }
  0xda   : > { %v1089_v5 = vpop.f32.mrf.mxu2 }
  0xdb   : > { %v753_v6 = vpop.f32.mrf.mxu1 }
  0xdc   : > { %v847_v8 = vadd.f32 %v753_v6, %v604_v28  ;;  %v1429_v9 = vpop.f32.mrf.mxu3  ;;  %v609_v6 = vld [vmem:[#allocation2 + $0x30] sm:$0xff] }
  0xdd   : > { %v942_v10 = vld [vmem:[#allocation2] sm:$0xff] }
  0xde   : > { %879 = vst.msk [vmem:[#allocation2 + $0x8] sm:$0xff] %vm200_vm1, %v847_v8  ;;  %v1185_v12 = vadd.f32 %v1089_v5, %v942_v10  ;;  %3652 = vmatmul.msk.f32.gmra.mxu1 %vm200_vm1, %v588_v57  ;;  %v4493_v13 = vpop.f32.mrf.mxu0  ;;  %v932_v8 = vld [vmem:[%s4158_s25 + $0x10a] sm:$0xff] }
  0xdf   : > { %3685 = vmatmul.msk.f32.gmra.mxu2 %vm200_vm1, %v927_v7 }
  0xe0   : > { %1217 = vst.msk [vmem:[#allocation2] sm:$0xff] %vm200_vm1, %v1185_v12 }
  0xe1   : > { %3750 = vmatmul.msk.f32.gmra.mxu3 %vm200_vm1, %v4227_v19  ;;  %3815 = vmatmul.msk.f32.gmra.mxu0 %vm200_vm1, %v590_v15 }
  0xe2   : > { %v1092_v16 = vpop.f32.mrf.mxu2 }
  0xe3   : > { %v756_v20 = vpop.f32.mrf.mxu1 }
  0xe4   : > { %v848_v14 = vadd.f32 %v756_v20, %v605_v17  ;;  %v1432_v24 = vpop.f32.mrf.mxu3  ;;  %v595_v20 = vld [vmem:[%s4158_s25 + $0x121] sm:$0xff] }
  0xe5   : > { %v943_v33 = vld [vmem:[#allocation2 + $0x8] sm:$0xff] }
  0xe6   : > { %880 = vst.msk [vmem:[#allocation2 + $0x10] sm:$0xff] %vm200_vm1, %v848_v14  ;;  %v1186_v25 = vadd.f32 %v1092_v16, %v943_v33  ;;  %3653 = vmatmul.msk.f32.gmra.mxu1 %vm200_vm1, %v589_v3  ;;  %v4504_v26 = vpop.f32.mrf.mxu0  ;;  %v610_v33 = vld [vmem:[#allocation2 + $0x38] sm:$0xff] }
  0xe7   : > { %3686 = vmatmul.msk.f32.gmra.mxu2 %vm200_vm1, %v928_v21  ;;  %v1282_v19 = vld [vmem:[#allocation2] sm:$0xff] }
  0xe8   : > { %1218 = vst.msk [vmem:[#allocation2 + $0x8] sm:$0xff] %vm200_vm1, %v1186_v25  ;;  %v1525_v27 = vadd.f32 %v1429_v9, %v1282_v19 }
  0xe9   : > { %3751 = vmatmul.msk.f32.gmra.mxu3 %vm200_vm1, %v4241_v23  ;;  %3816 = vmatmul.msk.f32.gmra.mxu0 %vm200_vm1, %v591_v30 }
  0xea   : > { %v1095_v31 = vpop.f32.mrf.mxu2  ;;  %1557 = vst.msk [vmem:[#allocation2] sm:$0xff] %vm200_vm1, %v1525_v27 }
  0xeb   : > { %v759_v35 = vpop.f32.mrf.mxu1 }
  0xec   : > { %v849_v39 = vadd.f32 %v759_v35, %v606_v32  ;;  %v1435_v40 = vpop.f32.mrf.mxu3  ;;  %v3723_v32 = vld [vmem:[%s4158_s25 + $0x128] sm:$0xff] }
  0xed   : > { %v944_v41 = vld [vmem:[#allocation2 + $0x10] sm:$0xff] }
  0xee   : > { %881 = vst.msk [vmem:[#allocation2 + $0x18] sm:$0xff] %vm200_vm1, %v849_v39  ;;  %v1187_v42 = vadd.f32 %v1095_v31, %v944_v41  ;;  %3654 = vmatmul.msk.f32.gmra.mxu1 %vm200_vm1, %v590_v15  ;;  %v4516_v23 = vpop.f32.mrf.mxu0 }
  0xef   : > { %3687 = vmatmul.msk.f32.gmra.mxu2 %vm200_vm1, %v929_v36  ;;  %v1283_v18 = vld [vmem:[#allocation2 + $0x8] sm:$0xff] }
  0xf0   : > { %1219 = vst.msk [vmem:[#allocation2 + $0x10] sm:$0xff] %vm200_vm1, %v1187_v42  ;;  %v1526_v37 = vadd.f32 %v1432_v24, %v1283_v18  ;;  %v611_v18 = vld [vmem:[#allocation2 + $0x40] sm:$0xff] }
  0xf1   : > { %v1621_v44 = vld [vmem:[#allocation2] sm:$0xff]  ;;  %3752 = vmatmul.msk.f32.gmra.mxu3 %vm200_vm1, %v4261_v29  ;;  %3817 = vmatmul.msk.f32.gmra.mxu0 %vm200_vm1, %v592_v43 }
  0xf2   : > { %v1098_v45 = vpop.f32.mrf.mxu2  ;;  %1558 = vst.msk [vmem:[#allocation2 + $0x8] sm:$0xff] %vm200_vm1, %v1526_v37  ;;  %v1864_v46 = vadd.f32 %v1768_v11, %v1621_v44  ;;  %v594_v11 = vld [vmem:[%s4158_s25 + $0x111] sm:$0xff] }
  0xf3   : > { %v762_v48 = vpop.f32.mrf.mxu1 }
  0xf4   : > { %1896 = vst.msk [vmem:[#allocation2] sm:$0xff] %vm200_vm1, %v1864_v46  ;;  %v850_v50 = vadd.f32 %v762_v48, %v607_v47  ;;  %v1438_v51 = vpop.f32.mrf.mxu3  ;;  %v3724_v48 = vld [vmem:[%s4158_s25 + $0x138] sm:$0xff] }
  0xf5   : > { %v945_v52 = vld [vmem:[#allocation2 + $0x18] sm:$0xff] }
  0xf6   : > { %882 = vst.msk [vmem:[#allocation2 + $0x20] sm:$0xff] %vm200_vm1, %v850_v50  ;;  %v1188_v53 = vadd.f32 %v1098_v45, %v945_v52  ;;  %3655 = vmatmul.msk.f32.gmra.mxu1 %vm200_vm1, %v591_v30  ;;  %v4529_v29 = vpop.f32.mrf.mxu0  ;;  %v597_v52 = vld [vmem:[%s4158_s25 + $0x139] sm:$0xff] }
  0xf7   : > { %3688 = vmatmul.msk.f32.gmra.mxu2 %vm200_vm1, %v930_v49  ;;  %v1284_v54 = vld [vmem:[#allocation2 + $0x10] sm:$0xff] }
  0xf8   : > { %1220 = vst.msk [vmem:[#allocation2 + $0x18] sm:$0xff] %vm200_vm1, %v1188_v53  ;;  %v1527_v55 = vadd.f32 %v1435_v40, %v1284_v54  ;;  %v596_v40 = vld [vmem:[%s4158_s25 + $0x129] sm:$0xff] }
  0xf9   : > { %v1622_v22 = vld [vmem:[#allocation2 + $0x8] sm:$0xff]  ;;  %3753 = vmatmul.msk.f32.gmra.mxu3 %vm200_vm1, %v4278_v34  ;;  %3818 = vmatmul.msk.f32.gmra.mxu0 %vm200_vm1, %v593_v4 }
  0xfa   : > { %v1101_v56 = vpop.f32.mrf.mxu2  ;;  %1559 = vst.msk [vmem:[#allocation2 + $0x10] sm:$0xff] %vm200_vm1, %v1527_v55  ;;  %v1865_v57 = vadd.f32 %v4493_v13, %v1622_v22  ;;  %v612_v55 = vld [vmem:[#allocation2 + $0x48] sm:$0xff] }
  0xfb   : > { %v765_v59 = vpop.f32.mrf.mxu1  ;;  %v935_v22 = vld [vmem:[%s4158_s25 + $0x12a] sm:$0xff] }
  0xfc   : > { %1897 = vst.msk [vmem:[#allocation2 + $0x8] sm:$0xff] %vm200_vm1, %v1865_v57  ;;  %v851_v61 = vadd.f32 %v765_v59, %v608_v58  ;;  %v1441_v62 = vpop.f32.mrf.mxu3 }
  0xfd   : > { %v946_v63 = vld [vmem:[#allocation2 + $0x20] sm:$0xff] }
  0xfe   : > { %883 = vst.msk [vmem:[#allocation2 + $0x28] sm:$0xff] %vm200_vm1, %v851_v61  ;;  %v1189_v0 = vadd.f32 %v1101_v56, %v946_v63  ;;  %3656 = vmatmul.msk.f32.gmra.mxu1 %vm200_vm1, %v592_v43  ;;  %v4543_v34 = vpop.f32.mrf.mxu0  ;;  %v934_v43 = vld [vmem:[%s4158_s25 + $0x122] sm:$0xff] }
  0xff   : > { %3689 = vmatmul.msk.f32.gmra.mxu2 %vm200_vm1, %v931_v60  ;;  %v1285_v1 = vld [vmem:[#allocation2 + $0x18] sm:$0xff]  ;;  %v3725_v60 = vld [vmem:[%s4158_s25 + $0x140] sm:$0xff] }
 0x100   : > { %1221 = vst.msk [vmem:[#allocation2 + $0x20] sm:$0xff] %vm200_vm1, %v1189_v0  ;;  %v1528_v2 = vadd.f32 %v1438_v51, %v1285_v1  ;;  %v598_v0 = vld [vmem:[%s4158_s25 + $0x141] sm:$0xff] }
 0x101   : > { %v1623_v3 = vld [vmem:[#allocation2 + $0x10] sm:$0xff]  ;;  %3754 = vmatmul.msk.f32.gmra.mxu3 %vm200_vm1, %v4292_v38  ;;  %3819 = vmatmul.msk.f32.gmra.mxu0 %vm200_vm1, %v594_v11  ;;  %v3722_v38 = vld [vmem:[%s4158_s25 + $0x120] sm:$0xff] }
 0x102   : > { %v1104_v5 = vpop.f32.mrf.mxu2  ;;  %1560 = vst.msk [vmem:[#allocation2 + $0x18] sm:$0xff] %vm200_vm1, %v1528_v2  ;;  %v1866_v28 = vadd.f32 %v4504_v26, %v1623_v3  ;;  %v933_v26 = vld [vmem:[%s4158_s25 + $0x112] sm:$0xff] }
 0x103   : > { %v768_v7 = vpop.f32.mrf.mxu1 }
 0x104   : > { %1898 = vst.msk [vmem:[#allocation2 + $0x10] sm:$0xff] %vm200_vm1, %v1866_v28  ;;  %v852_v9 = vadd.f32 %v768_v7, %v609_v6  ;;  %v1444_v10 = vpop.f32.mrf.mxu3 }
 0x105   : > { %v947_v12 = vld [vmem:[#allocation2 + $0x28] sm:$0xff] }
 0x106   : > { %884 = vst.msk [vmem:[#allocation2 + $0x30] sm:$0xff] %vm200_vm1, %v852_v9  ;;  %v1190_v13 = vadd.f32 %v1104_v5, %v947_v12  ;;  %3657 = vmatmul.msk.f32.gmra.mxu1 %vm200_vm1, %v593_v4  ;;  %v4558_v15 = vpop.f32.mrf.mxu0  ;;  %v936_v5 = vld [vmem:[%s4158_s25 + $0x13a] sm:$0xff]  ;;  %v3726_v9 = vld [vmem:[%s4158_s25 + $0x150] sm:$0xff] }
 0x107   : > { %3690 = vmatmul.msk.f32.gmra.mxu2 %vm200_vm1, %v932_v8  ;;  %v1286_v16 = vld [vmem:[#allocation2 + $0x20] sm:$0xff] }
 0x108   : > { %1222 = vst.msk [vmem:[#allocation2 + $0x28] sm:$0xff] %vm200_vm1, %v1190_v13  ;;  %v1529_v17 = vadd.f32 %v1441_v62, %v1286_v16 }
 0x109   : > { %v1624_v21 = vld [vmem:[#allocation2 + $0x18] sm:$0xff]  ;;  %3755 = vmatmul.msk.f32.gmra.mxu3 %vm200_vm1, %v3722_v38  ;;  %3820 = vmatmul.msk.f32.gmra.mxu0 %vm200_vm1, %v595_v20 }
 0x10a   : > { %v1107_v14 = vpop.f32.mrf.mxu2  ;;  %1561 = vst.msk [vmem:[#allocation2 + $0x20] sm:$0xff] %vm200_vm1, %v1529_v17  ;;  %v1867_v24 = vadd.f32 %v4516_v23, %v1624_v21  ;;  %v599_v38 = vld [vmem:[%s4158_s25 + $0x151] sm:$0xff] }
 0x10b   : > { %v771_v25 = vpop.f32.mrf.mxu1 }
 0x10c   : > { %1899 = vst.msk [vmem:[#allocation2 + $0x18] sm:$0xff] %vm200_vm1, %v1867_v24  ;;  %v853_v19 = vadd.f32 %v771_v25, %v610_v33  ;;  %v1447_v27 = vpop.f32.mrf.mxu3 }
 0x10d   : > { %v948_v30 = vld [vmem:[#allocation2 + $0x30] sm:$0xff] }
 0x10e   : > { %885 = vst.msk [vmem:[#allocation2 + $0x38] sm:$0xff] %vm200_vm1, %v853_v19  ;;  %v1191_v31 = vadd.f32 %v1107_v14, %v948_v30  ;;  %3658 = vmatmul.msk.f32.gmra.mxu1 %vm200_vm1, %v594_v11  ;;  %v4572_v35 = vpop.f32.mrf.mxu0  ;;  %v613_v11 = vld [vmem:[#allocation2 + $0x50] sm:$0xff]  ;;  %v937_v14 = vld [vmem:[%s4158_s25 + $0x142] sm:$0xff]  ;;  %v3727_v19 = vld [vmem:[%s4158_s25 + $0x158] sm:$0xff] }
 0x10f   : > { %3691 = vmatmul.msk.f32.gmra.mxu2 %vm200_vm1, %v933_v26  ;;  %v1287_v36 = vld [vmem:[#allocation2 + $0x28] sm:$0xff] }
 0x110   : > { %1223 = vst.msk [vmem:[#allocation2 + $0x30] sm:$0xff] %vm200_vm1, %v1191_v31  ;;  %v1530_v39 = vadd.f32 %v1444_v10, %v1287_v36 }
 0x111   : > { %v1625_v41 = vld [vmem:[#allocation2 + $0x20] sm:$0xff]  ;;  %3756 = vmatmul.msk.f32.gmra.mxu3 %vm200_vm1, %v3723_v32  ;;  %3821 = vmatmul.msk.f32.gmra.mxu0 %vm200_vm1, %v596_v40 }
 0x112   : > { %v1110_v42 = vpop.f32.mrf.mxu2  ;;  %1562 = vst.msk [vmem:[#allocation2 + $0x28] sm:$0xff] %vm200_vm1, %v1530_v39  ;;  %v1868_v23 = vadd.f32 %v4529_v29, %v1625_v41  ;;  %v600_v32 = vld [vmem:[%s4158_s25 + $0x159] sm:$0xff] }
 0x113   : > { %v774_v37 = vpop.f32.mrf.mxu1 }
 0x114   : > { %1900 = vst.msk [vmem:[#allocation2 + $0x20] sm:$0xff] %vm200_vm1, %v1868_v23  ;;  %v854_v44 = vadd.f32 %v774_v37, %v611_v18  ;;  %v1450_v45 = vpop.f32.mrf.mxu3 }
 0x115   : > { %v949_v46 = vld [vmem:[#allocation2 + $0x38] sm:$0xff] }
 0x116   : > { %886 = vst.msk [vmem:[#allocation2 + $0x40] sm:$0xff] %vm200_vm1, %v854_v44  ;;  %v1192_v47 = vadd.f32 %v1110_v42, %v949_v46  ;;  %3659 = vmatmul.msk.f32.gmra.mxu1 %vm200_vm1, %v595_v20  ;;  %v4586_v49 = vpop.f32.mrf.mxu0  ;;  %v614_v20 = vld [vmem:[#allocation2 + $0x58] sm:$0xff]  ;;  %v3728_v44 = vld [vmem:[%s4158_s25 + $0x168] sm:$0xff] }
 0x117   : > { %3692 = vmatmul.msk.f32.gmra.mxu2 %vm200_vm1, %v934_v43  ;;  %v1288_v50 = vld [vmem:[#allocation2 + $0x30] sm:$0xff] }
 0x118   : > { %1224 = vst.msk [vmem:[#allocation2 + $0x38] sm:$0xff] %vm200_vm1, %v1192_v47  ;;  %v1531_v51 = vadd.f32 %v1447_v27, %v1288_v50  ;;  %v938_v42 = vld [vmem:[%s4158_s25 + $0x152] sm:$0xff] }
 0x119   : > { %v1626_v53 = vld [vmem:[#allocation2 + $0x28] sm:$0xff]  ;;  %3757 = vmatmul.msk.f32.gmra.mxu3 %vm200_vm1, %v3724_v48  ;;  %3822 = vmatmul.msk.f32.gmra.mxu0 %vm200_vm1, %v597_v52 }
 0x11a   : > { %v1113_v29 = vpop.f32.mrf.mxu2  ;;  %1563 = vst.msk [vmem:[#allocation2 + $0x30] sm:$0xff] %vm200_vm1, %v1531_v51  ;;  %v1869_v54 = vadd.f32 %v4543_v34, %v1626_v53  ;;  %v601_v48 = vld [vmem:[%s4158_s25 + $0x169] sm:$0xff] }
 0x11b   : > { %v777_v4 = vpop.f32.mrf.mxu1 }
 0x11c   : > { %1901 = vst.msk [vmem:[#allocation2 + $0x28] sm:$0xff] %vm200_vm1, %v1869_v54  ;;  %v855_v56 = vadd.f32 %v777_v4, %v612_v55  ;;  %v1453_v57 = vpop.f32.mrf.mxu3 }
 0x11d   : > { %v950_v58 = vld [vmem:[#allocation2 + $0x40] sm:$0xff] }
 0x11e   : > { %887 = vst.msk [vmem:[#allocation2 + $0x48] sm:$0xff] %vm200_vm1, %v855_v56  ;;  %v1193_v59 = vadd.f32 %v1113_v29, %v950_v58  ;;  %3660 = vmatmul.msk.f32.gmra.mxu1 %vm200_vm1, %v596_v40  ;;  %v4600_v61 = vpop.f32.mrf.mxu0  ;;  %v615_v40 = vld [vmem:[#allocation2 + $0x60] sm:$0xff]  ;;  %v3729_v56 = vld [vmem:[%s4158_s25 + $0x170] sm:$0xff] }
 0x11f   : > { %3693 = vmatmul.msk.f32.gmra.mxu2 %vm200_vm1, %v935_v22  ;;  %v1289_v62 = vld [vmem:[#allocation2 + $0x38] sm:$0xff] }
 0x120   : > { %1225 = vst.msk [vmem:[#allocation2 + $0x40] sm:$0xff] %vm200_vm1, %v1193_v59  ;;  %v1532_v63 = vadd.f32 %v1450_v45, %v1289_v62  ;;  %v939_v29 = vld [vmem:[%s4158_s25 + $0x15a] sm:$0xff] }
 0x121   : > { %v1627_v34 = vld [vmem:[#allocation2 + $0x30] sm:$0xff]  ;;  %3758 = vmatmul.msk.f32.gmra.mxu3 %vm200_vm1, %v3725_v60  ;;  %3823 = vmatmul.msk.f32.gmra.mxu0 %vm200_vm1, %v598_v0 }
 0x122   : > { %v1116_v1 = vpop.f32.mrf.mxu2  ;;  %1564 = vst.msk [vmem:[#allocation2 + $0x38] sm:$0xff] %vm200_vm1, %v1532_v63  ;;  %v1870_v2 = vadd.f32 %v4558_v15, %v1627_v34  ;;  %v602_v60 = vld [vmem:[%s4158_s25 + $0x171] sm:$0xff] }
 0x123   : > { %v780_v3 = vpop.f32.mrf.mxu1 }
 0x124   : > { %1902 = vst.msk [vmem:[#allocation2 + $0x30] sm:$0xff] %vm200_vm1, %v1870_v2  ;;  %v856_v28 = vadd.f32 %v780_v3, %v613_v11  ;;  %v1456_v6 = vpop.f32.mrf.mxu3 }
 0x125   : > { %v951_v7 = vld [vmem:[#allocation2 + $0x48] sm:$0xff] }
 0x126   : > { %888 = vst.msk [vmem:[#allocation2 + $0x50] sm:$0xff] %vm200_vm1, %v856_v28  ;;  %v1194_v8 = vadd.f32 %v1116_v1, %v951_v7  ;;  %3661 = vmatmul.msk.f32.gmra.mxu1 %vm200_vm1, %v597_v52  ;;  %v4614_v10 = vpop.f32.mrf.mxu0  ;;  %v616_v52 = vld [vmem:[#allocation2 + $0x68] sm:$0xff]  ;;  %v3730_v28 = vld [vmem:[%s4158_s25 + $0x180] sm:$0xff] }
 0x127   : > { %3694 = vmatmul.msk.f32.gmra.mxu2 %vm200_vm1, %v936_v5  ;;  %v1290_v12 = vld [vmem:[#allocation2 + $0x40] sm:$0xff]  ;;  %v940_v1 = vld [vmem:[%s4158_s25 + $0x16a] sm:$0xff] }
 0x128   : > { %1226 = vst.msk [vmem:[#allocation2 + $0x48] sm:$0xff] %vm200_vm1, %v1194_v8  ;;  %v1533_v13 = vadd.f32 %v1453_v57, %v1290_v12  ;;  %v3795_v7 = vld [vmem:[%s4158_s25 + $0x181] sm:$0xff] }
 0x129   : > { %v1628_v15 = vld [vmem:[#allocation2 + $0x38] sm:$0xff]  ;;  %3759 = vmatmul.msk.f32.gmra.mxu3 %vm200_vm1, %v3726_v9  ;;  %3824 = vmatmul.msk.f32.gmra.mxu0 %vm200_vm1, %v599_v38 }
 0x12a   : > { %v1119_v16 = vpop.f32.mrf.mxu2  ;;  %1565 = vst.msk [vmem:[#allocation2 + $0x40] sm:$0xff] %vm200_vm1, %v1533_v13  ;;  %v1871_v17 = vadd.f32 %v4572_v35, %v1628_v15 }
 0x12b   : > { %v783_v21 = vpop.f32.mrf.mxu1 }
 0x12c   : > { %1903 = vst.msk [vmem:[#allocation2 + $0x38] sm:$0xff] %vm200_vm1, %v1871_v17  ;;  %v857_v24 = vadd.f32 %v783_v21, %v614_v20  ;;  %v1459_v33 = vpop.f32.mrf.mxu3 }
 0x12d   : > { %v952_v25 = vld [vmem:[#allocation2 + $0x50] sm:$0xff] }
 0x12e   : > { %889 = vst.msk [vmem:[#allocation2 + $0x58] sm:$0xff] %vm200_vm1, %v857_v24  ;;  %v1195_v26 = vadd.f32 %v1119_v16, %v952_v25  ;;  %3662 = vmatmul.msk.f32.gmra.mxu1 %vm200_vm1, %v598_v0  ;;  %v4628_v27 = vpop.f32.mrf.mxu0  ;;  %v617_v0 = vld [vmem:[#allocation2 + $0x70] sm:$0xff]  ;;  %v3731_v24 = vld [vmem:[%s4158_s25 + $0x188] sm:$0xff] }
 0x12f   : > { %3695 = vmatmul.msk.f32.gmra.mxu2 %vm200_vm1, %v937_v14  ;;  %v1291_v30 = vld [vmem:[#allocation2 + $0x48] sm:$0xff]  ;;  %v941_v16 = vld [vmem:[%s4158_s25 + $0x172] sm:$0xff] }
 0x130   : > { %1227 = vst.msk [vmem:[#allocation2 + $0x50] sm:$0xff] %vm200_vm1, %v1195_v26  ;;  %v1534_v31 = vadd.f32 %v1456_v6, %v1291_v30  ;;  %v3796_v25 = vld [vmem:[%s4158_s25 + $0x189] sm:$0xff] }
 0x131   : > { %v1629_v35 = vld [vmem:[#allocation2 + $0x40] sm:$0xff]  ;;  %3760 = vmatmul.msk.f32.gmra.mxu3 %vm200_vm1, %v3727_v19  ;;  %3825 = vmatmul.msk.f32.gmra.mxu0 %vm200_vm1, %v600_v32 }
 0x132   : > { %v1122_v36 = vpop.f32.mrf.mxu2  ;;  %1566 = vst.msk [vmem:[#allocation2 + $0x48] sm:$0xff] %vm200_vm1, %v1534_v31  ;;  %v1872_v39 = vadd.f32 %v4586_v49, %v1629_v35 }
 0x133   : > { %v786_v41 = vpop.f32.mrf.mxu1 }
 0x134   : > { %1904 = vst.msk [vmem:[#allocation2 + $0x40] sm:$0xff] %vm200_vm1, %v1872_v39  ;;  %v858_v23 = vadd.f32 %v786_v41, %v615_v40  ;;  %v1462_v18 = vpop.f32.mrf.mxu3  ;;  %v3895_v39 = vld [vmem:[%s4158_s25 + $0x30] sm:$0xff] }
 0x135   : > { %v953_v37 = vld [vmem:[#allocation2 + $0x58] sm:$0xff] }
 0x136   : > { %890 = vst.msk [vmem:[#allocation2 + $0x60] sm:$0xff] %vm200_vm1, %v858_v23  ;;  %v1196_v43 = vadd.f32 %v1122_v36, %v953_v37  ;;  %3663 = vmatmul.msk.f32.gmra.mxu1 %vm200_vm1, %v599_v38  ;;  %v4642_v45 = vpop.f32.mrf.mxu0  ;;  %v618_v38 = vld [vmem:[#allocation2 + $0x78] sm:$0xff] }
 0x137   : > { %3696 = vmatmul.msk.f32.gmra.mxu2 %vm200_vm1, %v938_v42  ;;  %v1292_v46 = vld [vmem:[#allocation2 + $0x50] sm:$0xff]  ;;  %v3830_v36 = vld [vmem:[%s4158_s25 + $0x1a] sm:$0xff] }
 0x138   : > { %1228 = vst.msk [vmem:[#allocation2 + $0x58] sm:$0xff] %vm200_vm1, %v1196_v43  ;;  %v1535_v47 = vadd.f32 %v1459_v33, %v1292_v46 }
 0x139   : > { %v1630_v49 = vld [vmem:[#allocation2 + $0x48] sm:$0xff]  ;;  %3761 = vmatmul.msk.f32.gmra.mxu3 %vm200_vm1, %v3728_v44  ;;  %3826 = vmatmul.msk.f32.gmra.mxu0 %vm200_vm1, %v601_v48 }
 0x13a   : > { %v1125_v50 = vpop.f32.mrf.mxu2  ;;  %1567 = vst.msk [vmem:[#allocation2 + $0x50] sm:$0xff] %vm200_vm1, %v1535_v47  ;;  %v1873_v51 = vadd.f32 %v4600_v61, %v1630_v49  ;;  %v620_v49 = vld [vmem:[#allocation2 + $0x88] sm:$0xff] }
 0x13b   : > { %v789_v53 = vpop.f32.mrf.mxu1 }
 0x13c   : > { %1905 = vst.msk [vmem:[#allocation2 + $0x48] sm:$0xff] %vm200_vm1, %v1873_v51  ;;  %v859_v54 = vadd.f32 %v789_v53, %v616_v52  ;;  %v1465_v55 = vpop.f32.mrf.mxu3  ;;  %v3831_v51 = vld [vmem:[%s4158_s25 + $0x22] sm:$0xff]  ;;  %v3896_v52 = vld [vmem:[%s4158_s25 + $0x38] sm:$0xff] }
 0x13d   : > { %v954_v4 = vld [vmem:[#allocation2 + $0x60] sm:$0xff] }
 0x13e   : > { %891 = vst.msk [vmem:[#allocation2 + $0x68] sm:$0xff] %vm200_vm1, %v859_v54  ;;  %v1197_v22 = vadd.f32 %v1125_v50, %v954_v4  ;;  %3664 = vmatmul.msk.f32.gmra.mxu1 %vm200_vm1, %v600_v32  ;;  %v4656_v57 = vpop.f32.mrf.mxu0  ;;  %v619_v32 = vld [vmem:[#allocation2 + $0x80] sm:$0xff] }
 0x13f   : > { %3697 = vmatmul.msk.f32.gmra.mxu2 %vm200_vm1, %v939_v29  ;;  %v1293_v58 = vld [vmem:[#allocation2 + $0x58] sm:$0xff] }
 0x140   : > { %1229 = vst.msk [vmem:[#allocation2 + $0x60] sm:$0xff] %vm200_vm1, %v1197_v22  ;;  %v1536_v59 = vadd.f32 %v1462_v18, %v1293_v58  ;;  %v3960_v18 = vld [vmem:[%s4158_s25 + $0x31] sm:$0xff]  ;;  %v3961_v4 = vld [vmem:[%s4158_s25 + $0x39] sm:$0xff] }
 0x141   : > { %v1631_v61 = vld [vmem:[#allocation2 + $0x50] sm:$0xff]  ;;  %3762 = vmatmul.msk.f32.gmra.mxu3 %vm200_vm1, %v3729_v56  ;;  %3827 = vmatmul.msk.f32.gmra.mxu0 %vm200_vm1, %v602_v60  ;;  %v3833_v58 = vld [vmem:[%s4158_s25 + $0x3a] sm:$0xff] }
 0x142   : > { %v1128_v62 = vpop.f32.mrf.mxu2  ;;  %1568 = vst.msk [vmem:[#allocation2 + $0x58] sm:$0xff] %vm200_vm1, %v1536_v59  ;;  %v1874_v63 = vadd.f32 %v4614_v10, %v1631_v61 }
 0x143   : > { %v792_v34 = vpop.f32.mrf.mxu1 }
 0x144   : > { %1906 = vst.msk [vmem:[#allocation2 + $0x50] sm:$0xff] %vm200_vm1, %v1874_v63  ;;  %v860_v2 = vadd.f32 %v792_v34, %v617_v0  ;;  %v1468_v11 = vpop.f32.mrf.mxu3  ;;  %v3897_v0 = vld [vmem:[%s4158_s25 + $0x48] sm:$0xff] }
 0x145   : > { %v955_v3 = vld [vmem:[#allocation2 + $0x68] sm:$0xff] }
 0x146   : > { %892 = vst.msk [vmem:[#allocation2 + $0x70] sm:$0xff] %vm200_vm1, %v860_v2  ;;  %v1198_v5 = vadd.f32 %v1128_v62, %v955_v3  ;;  %3665 = vmatmul.msk.f32.gmra.mxu1 %vm200_vm1, %v601_v48  ;;  %v4670_v6 = vpop.f32.mrf.mxu0  ;;  %v621_v62 = vld [vmem:[#allocation2 + $0x90] sm:$0xff] }
 0x147   : > { %3698 = vmatmul.msk.f32.gmra.mxu2 %vm200_vm1, %v940_v1  ;;  %v1294_v8 = vld [vmem:[#allocation2 + $0x60] sm:$0xff]  ;;  %v3962_v3 = vld [vmem:[%s4158_s25 + $0x49] sm:$0xff] }
 0x148   : > { %1230 = vst.msk [vmem:[#allocation2 + $0x68] sm:$0xff] %vm200_vm1, %v1198_v5  ;;  %v1537_v9 = vadd.f32 %v1465_v55, %v1294_v8 }
 0x149   : > { %v1632_v10 = vld [vmem:[#allocation2 + $0x58] sm:$0xff]  ;;  %3763 = vmatmul.msk.f32.gmra.mxu3 %vm200_vm1, %v3730_v28  ;;  %3828 = vmatmul.msk.f32.gmra.mxu0 %vm200_vm1, %v3795_v7  ;;  %v3834_v7 = vld [vmem:[%s4158_s25 + $0x4a] sm:$0xff] }
 0x14a   : > { %v1131_v12 = vpop.f32.mrf.mxu2  ;;  %1569 = vst.msk [vmem:[#allocation2 + $0x60] sm:$0xff] %vm200_vm1, %v1537_v9  ;;  %v1875_v13 = vadd.f32 %v4628_v27, %v1632_v10 }
 0x14b   : > { %v795_v15 = vpop.f32.mrf.mxu1 }
 0x14c   : > { %1907 = vst.msk [vmem:[#allocation2 + $0x58] sm:$0xff] %vm200_vm1, %v1875_v13  ;;  %v861_v17 = vadd.f32 %v795_v15, %v618_v38  ;;  %v1471_v20 = vpop.f32.mrf.mxu3  ;;  %v3898_v38 = vld [vmem:[%s4158_s25 + $0x50] sm:$0xff] }
 0x14d   : > { %v956_v21 = vld [vmem:[#allocation2 + $0x70] sm:$0xff] }
 0x14e   : > { %893 = vst.msk [vmem:[#allocation2 + $0x78] sm:$0xff] %vm200_vm1, %v861_v17  ;;  %v1199_v14 = vadd.f32 %v1131_v12, %v956_v21  ;;  %3666 = vmatmul.msk.f32.gmra.mxu1 %vm200_vm1, %v602_v60  ;;  %v4684_v33 = vpop.f32.mrf.mxu0  ;;  %v622_v12 = vld [vmem:[#allocation2 + $0x98] sm:$0xff] }
 0x14f   : > { %3699 = vmatmul.msk.f32.gmra.mxu2 %vm200_vm1, %v941_v16  ;;  %v1295_v26 = vld [vmem:[#allocation2 + $0x68] sm:$0xff]  ;;  %v3963_v21 = vld [vmem:[%s4158_s25 + $0x51] sm:$0xff] }
 0x150   : > { %1231 = vst.msk [vmem:[#allocation2 + $0x70] sm:$0xff] %vm200_vm1, %v1199_v14  ;;  %v1538_v19 = vadd.f32 %v1468_v11, %v1295_v26 }
 0x151   : > { %v1633_v27 = vld [vmem:[#allocation2 + $0x60] sm:$0xff]  ;;  %3764 = vmatmul.msk.f32.gmra.mxu3 %vm200_vm1, %v3731_v24  ;;  %3829 = vmatmul.msk.f32.gmra.mxu0 %vm200_vm1, %v3796_v25  ;;  %v3835_v25 = vld [vmem:[%s4158_s25 + $0x52] sm:$0xff] }
 0x152   : > { %v1134_v30 = vpop.f32.mrf.mxu2  ;;  %1570 = vst.msk [vmem:[#allocation2 + $0x68] sm:$0xff] %vm200_vm1, %v1538_v19  ;;  %v1876_v31 = vadd.f32 %v4642_v45, %v1633_v27  ;;  %v3832_v45 = vld [vmem:[%s4158_s25 + $0x32] sm:$0xff] }
 0x153   : > { %v798_v35 = vpop.f32.mrf.mxu1 }
 0x154   : > { %1908 = vst.msk [vmem:[#allocation2 + $0x60] sm:$0xff] %vm200_vm1, %v1876_v31  ;;  %v862_v40 = vadd.f32 %v798_v35, %v619_v32  ;;  %v1474_v41 = vpop.f32.mrf.mxu3  ;;  %v3899_v32 = vld [vmem:[%s4158_s25 + $0x60] sm:$0xff] }
 0x155   : > { %v957_v42 = vld [vmem:[#allocation2 + $0x78] sm:$0xff] }
 0x156   : > { %894 = vst.msk [vmem:[#allocation2 + $0x80] sm:$0xff] %vm200_vm1, %v862_v40  ;;  %v1200_v23 = vadd.f32 %v1134_v30, %v957_v42  ;;  %3863 = vmatmul.msk.f32.vlgmr.msra.gmra.mxu1 %vm200_vm1, %v3830_v36  ;;  %v4699_v37 = vpop.f32.mrf.mxu0  ;;  %v623_v30 = vld [vmem:[#allocation2 + $0xa0] sm:$0xff] }
 0x157   : > { %3928 = vmatmul.msk.f32.vlgmr.msra.gmra.mxu2 %vm200_vm1, %v3895_v39  ;;  %v1296_v43 = vld [vmem:[#allocation2 + $0x70] sm:$0xff] }
 0x158   : > { %1232 = vst.msk [vmem:[#allocation2 + $0x78] sm:$0xff] %vm200_vm1, %v1200_v23  ;;  %v1539_v44 = vadd.f32 %v1471_v20, %v1296_v43 }
 0x159   : > { %v1634_v46 = vld [vmem:[#allocation2 + $0x68] sm:$0xff]  ;;  %3993 = vmatmul.msk.f32.vlgmr.msra.gmra.mxu3 %vm200_vm1, %v3960_v18  ;;  %4058 = vmatmul.msk.f32.vlgmr.msra.gmra.mxu0 %vm200_vm1, %v3832_v45 }
 0x15a   : > { %v1137_v47 = vpop.f32.mrf.mxu2  ;;  %1571 = vst.msk [vmem:[#allocation2 + $0x70] sm:$0xff] %vm200_vm1, %v1539_v44  ;;  %v1877_v48 = vadd.f32 %v4656_v57, %v1634_v46  ;;  %v624_v46 = vld [vmem:[#allocation2 + $0xa8] sm:$0xff] }
 0x15b   : > { %v801_v50 = vpop.f32.mrf.mxu1 }
 0x15c   : > { %1909 = vst.msk [vmem:[#allocation2 + $0x68] sm:$0xff] %vm200_vm1, %v1877_v48  ;;  %v863_v53 = vadd.f32 %v801_v50, %v620_v49  ;;  %v1477_v29 = vpop.f32.mrf.mxu3  ;;  %v3900_v48 = vld [vmem:[%s4158_s25 + $0x68] sm:$0xff] }
 0x15d   : > { %v958_v54 = vld [vmem:[#allocation2 + $0x80] sm:$0xff] }
 0x15e   : > { %895 = vst.msk [vmem:[#allocation2 + $0x88] sm:$0xff] %vm200_vm1, %v863_v53  ;;  %v1201_v55 = vadd.f32 %v1137_v47, %v958_v54  ;;  %3864 = vmatmul.msk.f32.gmra.mxu1 %vm200_vm1, %v3831_v51  ;;  %v4714_v22 = vpop.f32.mrf.mxu0  ;;  %v3965_v53 = vld [vmem:[%s4158_s25 + $0x69] sm:$0xff] }
 0x15f   : > { %3929 = vmatmul.msk.f32.gmra.mxu2 %vm200_vm1, %v3896_v52  ;;  %v1297_v56 = vld [vmem:[#allocation2 + $0x78] sm:$0xff] }
 0x160   : > { %1233 = vst.msk [vmem:[#allocation2 + $0x80] sm:$0xff] %vm200_vm1, %v1201_v55  ;;  %v1540_v57 = vadd.f32 %v1474_v41, %v1297_v56  ;;  %v3964_v41 = vld [vmem:[%s4158_s25 + $0x61] sm:$0xff] }
 0x161   : > { %v1635_v59 = vld [vmem:[#allocation2 + $0x70] sm:$0xff]  ;;  %3994 = vmatmul.msk.f32.gmra.mxu3 %vm200_vm1, %v3961_v4  ;;  %4059 = vmatmul.msk.f32.gmra.mxu0 %vm200_vm1, %v3833_v58 }
 0x162   : > { %v1140_v60 = vpop.f32.mrf.mxu2  ;;  %1572 = vst.msk [vmem:[#allocation2 + $0x78] sm:$0xff] %vm200_vm1, %v1540_v57  ;;  %v1878_v61 = vadd.f32 %v4670_v6, %v1635_v59  ;;  %v3837_v4 = vld [vmem:[%s4158_s25 + $0x6a] sm:$0xff] }
 0x163   : > { %v804_v63 = vpop.f32.mrf.mxu1 }
 0x164   : > { %1910 = vst.msk [vmem:[#allocation2 + $0x70] sm:$0xff] %vm200_vm1, %v1878_v61  ;;  %v864_v34 = vadd.f32 %v804_v63, %v621_v62  ;;  %v1480_v1 = vpop.f32.mrf.mxu3 }
 0x165   : > { %v959_v2 = vld [vmem:[#allocation2 + $0x88] sm:$0xff] }
 0x166   : > { %896 = vst.msk [vmem:[#allocation2 + $0x90] sm:$0xff] %vm200_vm1, %v864_v34  ;;  %v1202_v11 = vadd.f32 %v1140_v60, %v959_v2  ;;  %3865 = vmatmul.msk.f32.gmra.mxu1 %vm200_vm1, %v3832_v45  ;;  %v4728_v5 = vpop.f32.mrf.mxu0  ;;  %v3901_v60 = vld [vmem:[%s4158_s25 + $0x78] sm:$0xff] }
 0x167   : > { %3930 = vmatmul.msk.f32.gmra.mxu2 %vm200_vm1, %v3897_v0  ;;  %v1298_v28 = vld [vmem:[#allocation2 + $0x80] sm:$0xff] }
 0x168   : > { %1234 = vst.msk [vmem:[#allocation2 + $0x88] sm:$0xff] %vm200_vm1, %v1202_v11  ;;  %v1541_v6 = vadd.f32 %v1477_v29, %v1298_v28  ;;  %v3966_v34 = vld [vmem:[%s4158_s25 + $0x79] sm:$0xff] }
 0x169   : > { %v1636_v8 = vld [vmem:[#allocation2 + $0x78] sm:$0xff]  ;;  %3995 = vmatmul.msk.f32.gmra.mxu3 %vm200_vm1, %v3962_v3  ;;  %4060 = vmatmul.msk.f32.gmra.mxu0 %vm200_vm1, %v3834_v7 }
 0x16a   : > { %v1143_v9 = vpop.f32.mrf.mxu2  ;;  %1573 = vst.msk [vmem:[#allocation2 + $0x80] sm:$0xff] %vm200_vm1, %v1541_v6  ;;  %v1879_v10 = vadd.f32 %v4684_v33, %v1636_v8  ;;  %v3838_v3 = vld [vmem:[%s4158_s25 + $0x7a] sm:$0xff] }
 0x16b   : > { %v807_v13 = vpop.f32.mrf.mxu1 }
 0x16c   : > { %1911 = vst.msk [vmem:[#allocation2 + $0x78] sm:$0xff] %vm200_vm1, %v1879_v10  ;;  %v865_v15 = vadd.f32 %v807_v13, %v622_v12  ;;  %v1483_v16 = vpop.f32.mrf.mxu3 }
 0x16d   : > { %v960_v17 = vld [vmem:[#allocation2 + $0x90] sm:$0xff] }
 0x16e   : > { %897 = vst.msk [vmem:[#allocation2 + $0x98] sm:$0xff] %vm200_vm1, %v865_v15  ;;  %v1203_v20 = vadd.f32 %v1143_v9, %v960_v17  ;;  %3866 = vmatmul.msk.f32.gmra.mxu1 %vm200_vm1, %v3833_v58  ;;  %v4742_v14 = vpop.f32.mrf.mxu0  ;;  %v625_v58 = vld [vmem:[#allocation2 + $0xb0] sm:$0xff]  ;;  %v3902_v9 = vld [vmem:[%s4158_s25 + $0x80] sm:$0xff] }
 0x16f   : > { %3931 = vmatmul.msk.f32.gmra.mxu2 %vm200_vm1, %v3898_v38  ;;  %v1299_v24 = vld [vmem:[#allocation2 + $0x88] sm:$0xff] }
 0x170   : > { %1235 = vst.msk [vmem:[#allocation2 + $0x90] sm:$0xff] %vm200_vm1, %v1203_v20  ;;  %v1542_v33 = vadd.f32 %v1480_v1, %v1299_v24  ;;  %v3967_v15 = vld [vmem:[%s4158_s25 + $0x81] sm:$0xff] }
 0x171   : > { %v1637_v26 = vld [vmem:[#allocation2 + $0x80] sm:$0xff]  ;;  %3996 = vmatmul.msk.f32.gmra.mxu3 %vm200_vm1, %v3963_v21  ;;  %4061 = vmatmul.msk.f32.gmra.mxu0 %vm200_vm1, %v3835_v25 }
 0x172   : > { %v1146_v19 = vpop.f32.mrf.mxu2  ;;  %1574 = vst.msk [vmem:[#allocation2 + $0x88] sm:$0xff] %vm200_vm1, %v1542_v33  ;;  %v1880_v27 = vadd.f32 %v4699_v37, %v1637_v26  ;;  %v3836_v37 = vld [vmem:[%s4158_s25 + $0x62] sm:$0xff] }
 0x173   : > { %v810_v31 = vpop.f32.mrf.mxu1  ;;  %v3839_v21 = vld [vmem:[%s4158_s25 + $0x82] sm:$0xff] }
 0x174   : > { %1912 = vst.msk [vmem:[#allocation2 + $0x80] sm:$0xff] %vm200_vm1, %v1880_v27  ;;  %v866_v35 = vadd.f32 %v810_v31, %v623_v30  ;;  %v1486_v36 = vpop.f32.mrf.mxu3 }
 0x175   : > { %v961_v39 = vld [vmem:[#allocation2 + $0x98] sm:$0xff] }
 0x176   : > { %898 = vst.msk [vmem:[#allocation2 + $0xa0] sm:$0xff] %vm200_vm1, %v866_v35  ;;  %v1204_v40 = vadd.f32 %v1146_v19, %v961_v39  ;;  %3867 = vmatmul.msk.f32.gmra.mxu1 %vm200_vm1, %v3834_v7  ;;  %v4756_v42 = vpop.f32.mrf.mxu0  ;;  %v626_v7 = vld [vmem:[#allocation2 + $0xb8] sm:$0xff]  ;;  %v3903_v19 = vld [vmem:[%s4158_s25 + $0x90] sm:$0xff] }
 0x177   : > { %3932 = vmatmul.msk.f32.gmra.mxu2 %vm200_vm1, %v3899_v32  ;;  %v1300_v23 = vld [vmem:[#allocation2 + $0x90] sm:$0xff] }
 0x178   : > { %1236 = vst.msk [vmem:[#allocation2 + $0x98] sm:$0xff] %vm200_vm1, %v1204_v40  ;;  %v1543_v18 = vadd.f32 %v1483_v16, %v1300_v23  ;;  %v3968_v35 = vld [vmem:[%s4158_s25 + $0x91] sm:$0xff] }
 0x179   : > { %v1638_v43 = vld [vmem:[#allocation2 + $0x88] sm:$0xff]  ;;  %3997 = vmatmul.msk.f32.gmra.mxu3 %vm200_vm1, %v3964_v41  ;;  %4062 = vmatmul.msk.f32.gmra.mxu0 %vm200_vm1, %v3836_v37  ;;  %v3840_v41 = vld [vmem:[%s4158_s25 + $0x92] sm:$0xff] }
 0x17a   : > { %v1149_v44 = vpop.f32.mrf.mxu2  ;;  %1575 = vst.msk [vmem:[#allocation2 + $0x90] sm:$0xff] %vm200_vm1, %v1543_v18  ;;  %v1881_v45 = vadd.f32 %v4714_v22, %v1638_v43 }
 0x17b   : > { %v813_v47 = vpop.f32.mrf.mxu1 }
 0x17c   : > { %1913 = vst.msk [vmem:[#allocation2 + $0x88] sm:$0xff] %vm200_vm1, %v1881_v45  ;;  %v867_v49 = vadd.f32 %v813_v47, %v624_v46  ;;  %v1489_v50 = vpop.f32.mrf.mxu3 }
 0x17d   : > { %v962_v51 = vld [vmem:[#allocation2 + $0xa0] sm:$0xff] }
 0x17e   : > { %899 = vst.msk [vmem:[#allocation2 + $0xa8] sm:$0xff] %vm200_vm1, %v867_v49  ;;  %v1205_v52 = vadd.f32 %v1149_v44, %v962_v51  ;;  %3868 = vmatmul.msk.f32.gmra.mxu1 %vm200_vm1, %v3835_v25  ;;  %v4770_v29 = vpop.f32.mrf.mxu0  ;;  %v627_v25 = vld [vmem:[#allocation2 + $0xc0] sm:$0xff]  ;;  %v3904_v44 = vld [vmem:[%s4158_s25 + $0x98] sm:$0xff] }
 0x17f   : > { %3933 = vmatmul.msk.f32.gmra.mxu2 %vm200_vm1, %v3900_v48  ;;  %v1301_v54 = vld [vmem:[#allocation2 + $0x98] sm:$0xff] }
 0x180   : > { %1237 = vst.msk [vmem:[#allocation2 + $0xa0] sm:$0xff] %vm200_vm1, %v1205_v52  ;;  %v1544_v55 = vadd.f32 %v1486_v36, %v1301_v54  ;;  %v3969_v49 = vld [vmem:[%s4158_s25 + $0x99] sm:$0xff] }
 0x181   : > { %v1639_v22 = vld [vmem:[#allocation2 + $0x90] sm:$0xff]  ;;  %3998 = vmatmul.msk.f32.gmra.mxu3 %vm200_vm1, %v3965_v53  ;;  %4063 = vmatmul.msk.f32.gmra.mxu0 %vm200_vm1, %v3837_v4  ;;  %v3841_v53 = vld [vmem:[%s4158_s25 + $0x9a] sm:$0xff] }
 0x182   : > { %v1152_v56 = vpop.f32.mrf.mxu2  ;;  %1576 = vst.msk [vmem:[#allocation2 + $0x98] sm:$0xff] %vm200_vm1, %v1544_v55  ;;  %v1882_v57 = vadd.f32 %v4728_v5, %v1639_v22 }
 0x183   : > { %v816_v59 = vpop.f32.mrf.mxu1 }
 0x184   : > { %1914 = vst.msk [vmem:[#allocation2 + $0x90] sm:$0xff] %vm200_vm1, %v1882_v57  ;;  %v868_v61 = vadd.f32 %v816_v59, %v625_v58  ;;  %v1492_v62 = vpop.f32.mrf.mxu3 }
 0x185   : > { %v963_v63 = vld [vmem:[#allocation2 + $0xa8] sm:$0xff] }
 0x186   : > { %900 = vst.msk [vmem:[#allocation2 + $0xb0] sm:$0xff] %vm200_vm1, %v868_v61  ;;  %v1206_v0 = vadd.f32 %v1152_v56, %v963_v63  ;;  %3869 = vmatmul.msk.f32.gmra.mxu1 %vm200_vm1, %v3836_v37  ;;  %v4784_v1 = vpop.f32.mrf.mxu0  ;;  %v628_v37 = vld [vmem:[#allocation2 + $0xc8] sm:$0xff] }
 0x187   : > { %3934 = vmatmul.msk.f32.gmra.mxu2 %vm200_vm1, %v3901_v60  ;;  %v1302_v2 = vld [vmem:[#allocation2 + $0xa0] sm:$0xff]  ;;  %v3905_v56 = vld [vmem:[%s4158_s25 + $0xa8] sm:$0xff] }
 0x188   : > { %1238 = vst.msk [vmem:[#allocation2 + $0xa8] sm:$0xff] %vm200_vm1, %v1206_v0  ;;  %v1545_v11 = vadd.f32 %v1489_v50, %v1302_v2  ;;  %v3970_v61 = vld [vmem:[%s4158_s25 + $0xa9] sm:$0xff] }
 0x189   : > { %v1640_v5 = vld [vmem:[#allocation2 + $0x98] sm:$0xff]  ;;  %3999 = vmatmul.msk.f32.gmra.mxu3 %vm200_vm1, %v3966_v34  ;;  %4064 = vmatmul.msk.f32.gmra.mxu0 %vm200_vm1, %v3838_v3  ;;  %v3842_v34 = vld [vmem:[%s4158_s25 + $0xaa] sm:$0xff] }
 0x18a   : > { %v1155_v28 = vpop.f32.mrf.mxu2  ;;  %1577 = vst.msk [vmem:[#allocation2 + $0xa0] sm:$0xff] %vm200_vm1, %v1545_v11  ;;  %v1883_v6 = vadd.f32 %v4742_v14, %v1640_v5 }
 0x18b   : > { %v819_v8 = vpop.f32.mrf.mxu1 }
 0x18c   : > { %1915 = vst.msk [vmem:[#allocation2 + $0x98] sm:$0xff] %vm200_vm1, %v1883_v6  ;;  %v869_v10 = vadd.f32 %v819_v8, %v626_v7  ;;  %v1495_v12 = vpop.f32.mrf.mxu3 }
 0x18d   : > { %v964_v13 = vld [vmem:[#allocation2 + $0xb0] sm:$0xff] }
 0x18e   : > { %901 = vst.msk [vmem:[#allocation2 + $0xb8] sm:$0xff] %vm200_vm1, %v869_v10  ;;  %v1207_v38 = vadd.f32 %v1155_v28, %v964_v13  ;;  %3870 = vmatmul.msk.f32.gmra.mxu1 %vm200_vm1, %v3837_v4  ;;  %v4798_v16 = vpop.f32.mrf.mxu0  ;;  %v629_v4 = vld [vmem:[#allocation2 + $0xd0] sm:$0xff] }
 0x18f   : > { %3935 = vmatmul.msk.f32.gmra.mxu2 %vm200_vm1, %v3902_v9  ;;  %v1303_v17 = vld [vmem:[#allocation2 + $0xa8] sm:$0xff]  ;;  %v3906_v28 = vld [vmem:[%s4158_s25 + $0xb0] sm:$0xff] }
 0x190   : > { %1239 = vst.msk [vmem:[#allocation2 + $0xb0] sm:$0xff] %vm200_vm1, %v1207_v38  ;;  %v1546_v20 = vadd.f32 %v1492_v62, %v1303_v17  ;;  %v3971_v10 = vld [vmem:[%s4158_s25 + $0xb1] sm:$0xff] }
 0x191   : > { %v1641_v14 = vld [vmem:[#allocation2 + $0xa0] sm:$0xff]  ;;  %4000 = vmatmul.msk.f32.gmra.mxu3 %vm200_vm1, %v3967_v15  ;;  %4065 = vmatmul.msk.f32.gmra.mxu0 %vm200_vm1, %v3839_v21  ;;  %v3843_v15 = vld [vmem:[%s4158_s25 + $0xb2] sm:$0xff] }
 0x192   : > { %v1158_v24 = vpop.f32.mrf.mxu2  ;;  %1578 = vst.msk [vmem:[#allocation2 + $0xa8] sm:$0xff] %vm200_vm1, %v1546_v20  ;;  %v1884_v33 = vadd.f32 %v4756_v42, %v1641_v14 }
 0x193   : > { %v822_v26 = vpop.f32.mrf.mxu1 }
 0x194   : > { %1916 = vst.msk [vmem:[#allocation2 + $0xa0] sm:$0xff] %vm200_vm1, %v1884_v33  ;;  %v870_v27 = vadd.f32 %v822_v26, %v627_v25  ;;  %v1498_v30 = vpop.f32.mrf.mxu3 }
 0x195   : > { %v965_v31 = vld [vmem:[#allocation2 + $0xb8] sm:$0xff] }
 0x196   : > { %902 = vst.msk [vmem:[#allocation2 + $0xc0] sm:$0xff] %vm200_vm1, %v870_v27  ;;  %v1208_v32 = vadd.f32 %v1158_v24, %v965_v31  ;;  %3871 = vmatmul.msk.f32.gmra.mxu1 %vm200_vm1, %v3838_v3  ;;  %v4812_v36 = vpop.f32.mrf.mxu0  ;;  %v630_v3 = vld [vmem:[#allocation2 + $0xd8] sm:$0xff]  ;;  %v3907_v24 = vld [vmem:[%s4158_s25 + $0xc0] sm:$0xff] }
 0x197   : > { %3936 = vmatmul.msk.f32.gmra.mxu2 %vm200_vm1, %v3903_v19  ;;  %v1304_v39 = vld [vmem:[#allocation2 + $0xb0] sm:$0xff]  ;;  %v3972_v27 = vld [vmem:[%s4158_s25 + $0xc1] sm:$0xff] }
 0x198   : > { %1240 = vst.msk [vmem:[#allocation2 + $0xb8] sm:$0xff] %vm200_vm1, %v1208_v32  ;;  %v1547_v40 = vadd.f32 %v1495_v12, %v1304_v39 }
 0x199   : > { %v1642_v42 = vld [vmem:[#allocation2 + $0xa8] sm:$0xff]  ;;  %4001 = vmatmul.msk.f32.gmra.mxu3 %vm200_vm1, %v3968_v35  ;;  %4066 = vmatmul.msk.f32.gmra.mxu0 %vm200_vm1, %v3840_v41 }
 0x19a   : > { %v1161_v23 = vpop.f32.mrf.mxu2  ;;  %1579 = vst.msk [vmem:[#allocation2 + $0xb0] sm:$0xff] %vm200_vm1, %v1547_v40  ;;  %v1885_v18 = vadd.f32 %v4770_v29, %v1642_v42  ;;  %v3844_v35 = vld [vmem:[%s4158_s25 + $0xc2] sm:$0xff] }
 0x19b   : > { %v825_v43 = vpop.f32.mrf.mxu1 }
 0x19c   : > { %1917 = vst.msk [vmem:[#allocation2 + $0xa8] sm:$0xff] %vm200_vm1, %v1885_v18  ;;  %v871_v45 = vadd.f32 %v825_v43, %v628_v37  ;;  %v1501_v46 = vpop.f32.mrf.mxu3 }
 0x19d   : > { %v966_v47 = vld [vmem:[#allocation2 + $0xc0] sm:$0xff] }
 0x19e   : > { %903 = vst.msk [vmem:[#allocation2 + $0xc8] sm:$0xff] %vm200_vm1, %v871_v45  ;;  %v1209_v48 = vadd.f32 %v1161_v23, %v966_v47  ;;  %3872 = vmatmul.msk.f32.gmra.mxu1 %vm200_vm1, %v3839_v21  ;;  %v4826_v50 = vpop.f32.mrf.mxu0  ;;  %v631_v21 = vld [vmem:[#allocation2 + $0xe0] sm:$0xff]  ;;  %v3908_v23 = vld [vmem:[%s4158_s25 + $0xc8] sm:$0xff] }
 0x19f   : > { %3937 = vmatmul.msk.f32.gmra.mxu2 %vm200_vm1, %v3904_v44  ;;  %v1305_v51 = vld [vmem:[#allocation2 + $0xb8] sm:$0xff]  ;;  %v3973_v45 = vld [vmem:[%s4158_s25 + $0xc9] sm:$0xff] }
 0x1a0   : > { %1241 = vst.msk [vmem:[#allocation2 + $0xc0] sm:$0xff] %vm200_vm1, %v1209_v48  ;;  %v1548_v52 = vadd.f32 %v1498_v30, %v1305_v51 }
 0x1a1   : > { %v1643_v29 = vld [vmem:[#allocation2 + $0xb0] sm:$0xff]  ;;  %4002 = vmatmul.msk.f32.gmra.mxu3 %vm200_vm1, %v3969_v49  ;;  %4067 = vmatmul.msk.f32.gmra.mxu0 %vm200_vm1, %v3841_v53 }
 0x1a2   : > { %v1164_v54 = vpop.f32.mrf.mxu2  ;;  %1580 = vst.msk [vmem:[#allocation2 + $0xb8] sm:$0xff] %vm200_vm1, %v1548_v52  ;;  %v1886_v55 = vadd.f32 %v4784_v1, %v1643_v29  ;;  %v3845_v49 = vld [vmem:[%s4158_s25 + $0xca] sm:$0xff] }
 0x1a3   : > { %v828_v22 = vpop.f32.mrf.mxu1 }
 0x1a4   : > { %1918 = vst.msk [vmem:[#allocation2 + $0xb0] sm:$0xff] %vm200_vm1, %v1886_v55  ;;  %v872_v57 = vadd.f32 %v828_v22, %v629_v4  ;;  %v1504_v58 = vpop.f32.mrf.mxu3 }
 0x1a5   : > { %v967_v59 = vld [vmem:[#allocation2 + $0xc8] sm:$0xff] }
 0x1a6   : > { %904 = vst.msk [vmem:[#allocation2 + $0xd0] sm:$0xff] %vm200_vm1, %v872_v57  ;;  %v1210_v60 = vadd.f32 %v1164_v54, %v967_v59  ;;  %3873 = vmatmul.msk.f32.gmra.mxu1 %vm200_vm1, %v3840_v41  ;;  %v4840_v62 = vpop.f32.mrf.mxu0  ;;  %v632_v41 = vld [vmem:[#allocation2 + $0xe8] sm:$0xff]  ;;  %v3909_v54 = vld [vmem:[%s4158_s25 + $0xd8] sm:$0xff] }
 0x1a7   : > { %3938 = vmatmul.msk.f32.gmra.mxu2 %vm200_vm1, %v3905_v56  ;;  %v1306_v63 = vld [vmem:[#allocation2 + $0xc0] sm:$0xff] }
 0x1a8   : > { %1242 = vst.msk [vmem:[#allocation2 + $0xc8] sm:$0xff] %vm200_vm1, %v1210_v60  ;;  %v1549_v0 = vadd.f32 %v1501_v46, %v1306_v63  ;;  %v3974_v57 = vld [vmem:[%s4158_s25 + $0xd9] sm:$0xff] }
 0x1a9   : > { %v1644_v1 = vld [vmem:[#allocation2 + $0xb8] sm:$0xff]  ;;  %4003 = vmatmul.msk.f32.gmra.mxu3 %vm200_vm1, %v3970_v61  ;;  %4068 = vmatmul.msk.f32.gmra.mxu0 %vm200_vm1, %v3842_v34 }
 0x1aa   : > { %v1167_v2 = vpop.f32.mrf.mxu2  ;;  %1581 = vst.msk [vmem:[#allocation2 + $0xc0] sm:$0xff] %vm200_vm1, %v1549_v0  ;;  %v1887_v11 = vadd.f32 %v4798_v16, %v1644_v1  ;;  %v3846_v61 = vld [vmem:[%s4158_s25 + $0xda] sm:$0xff] }
 0x1ab   : > { %v831_v5 = vpop.f32.mrf.mxu1 }
 0x1ac   : > { %1919 = vst.msk [vmem:[#allocation2 + $0xb8] sm:$0xff] %vm200_vm1, %v1887_v11  ;;  %v873_v6 = vadd.f32 %v831_v5, %v630_v3  ;;  %v1507_v7 = vpop.f32.mrf.mxu3 }
 0x1ad   : > { %v968_v8 = vld [vmem:[#allocation2 + $0xd0] sm:$0xff] }
 0x1ae   : > { %905 = vst.msk [vmem:[#allocation2 + $0xd8] sm:$0xff] %vm200_vm1, %v873_v6  ;;  %v1211_v9 = vadd.f32 %v1167_v2, %v968_v8  ;;  %3874 = vmatmul.msk.f32.gmra.mxu1 %vm200_vm1, %v3841_v53  ;;  %v4854_v12 = vpop.f32.mrf.mxu0  ;;  %v633_v53 = vld [vmem:[#allocation2 + $0xf0] sm:$0xff]  ;;  %v3910_v2 = vld [vmem:[%s4158_s25 + $0xe0] sm:$0xff] }
 0x1af   : > { %3939 = vmatmul.msk.f32.gmra.mxu2 %vm200_vm1, %v3906_v28  ;;  %v1307_v13 = vld [vmem:[#allocation2 + $0xc8] sm:$0xff] }
 0x1b0   : > { %1243 = vst.msk [vmem:[#allocation2 + $0xd0] sm:$0xff] %vm200_vm1, %v1211_v9  ;;  %v1550_v38 = vadd.f32 %v1504_v58, %v1307_v13  ;;  %v3975_v6 = vld [vmem:[%s4158_s25 + $0xe1] sm:$0xff] }
 0x1b1   : > { %v1645_v16 = vld [vmem:[#allocation2 + $0xc0] sm:$0xff]  ;;  %4004 = vmatmul.msk.f32.gmra.mxu3 %vm200_vm1, %v3971_v10  ;;  %4069 = vmatmul.msk.f32.gmra.mxu0 %vm200_vm1, %v3843_v15 }
 0x1b2   : > { %v1170_v17 = vpop.f32.mrf.mxu2  ;;  %1582 = vst.msk [vmem:[#allocation2 + $0xc8] sm:$0xff] %vm200_vm1, %v1550_v38  ;;  %v1888_v20 = vadd.f32 %v4812_v36, %v1645_v16  ;;  %v3847_v10 = vld [vmem:[%s4158_s25 + $0xe2] sm:$0xff] }
 0x1b3   : > { %v834_v14 = vpop.f32.mrf.mxu1 }
 0x1b4   : > { %1920 = vst.msk [vmem:[#allocation2 + $0xc0] sm:$0xff] %vm200_vm1, %v1888_v20  ;;  %v874_v33 = vadd.f32 %v834_v14, %v631_v21  ;;  %v1510_v25 = vpop.f32.mrf.mxu3 }
 0x1b5   : > { %v969_v26 = vld [vmem:[#allocation2 + $0xd8] sm:$0xff] }
 0x1b6   : > { %906 = vst.msk [vmem:[#allocation2 + $0xe0] sm:$0xff] %vm200_vm1, %v874_v33  ;;  %v1212_v19 = vadd.f32 %v1170_v17, %v969_v26  ;;  %3875 = vmatmul.msk.f32.gmra.mxu1 %vm200_vm1, %v3842_v34  ;;  %v4868_v30 = vpop.f32.mrf.mxu0  ;;  %v634_v34 = vld [vmem:[#allocation2 + $0xf8] sm:$0xff]  ;;  %v3911_v17 = vld [vmem:[%s4158_s25 + $0xf0] sm:$0xff] }
 0x1b7   : > { %3940 = vmatmul.msk.f32.gmra.mxu2 %vm200_vm1, %v3907_v24  ;;  %v1308_v31 = vld [vmem:[#allocation2 + $0xd0] sm:$0xff] }
 0x1b8   : > { %1244 = vst.msk [vmem:[#allocation2 + $0xd8] sm:$0xff] %vm200_vm1, %v1212_v19  ;;  %v1551_v32 = vadd.f32 %v1507_v7, %v1308_v31  ;;  %v3976_v33 = vld [vmem:[%s4158_s25 + $0xf1] sm:$0xff] }
 0x1b9   : > { %v1646_v36 = vld [vmem:[#allocation2 + $0xc8] sm:$0xff]  ;;  %4005 = vmatmul.msk.f32.gmra.mxu3 %vm200_vm1, %v3972_v27  ;;  %4070 = vmatmul.msk.f32.gmra.mxu0 %vm200_vm1, %v3844_v35  ;;  %v3848_v27 = vld [vmem:[%s4158_s25 + $0xf2] sm:$0xff] }
 0x1ba   : > { %v1173_v39 = vpop.f32.mrf.mxu2  ;;  %1583 = vst.msk [vmem:[#allocation2 + $0xd0] sm:$0xff] %vm200_vm1, %v1551_v32  ;;  %v1889_v40 = vadd.f32 %v4826_v50, %v1646_v36 }
 0x1bb   : > { %v837_v42 = vpop.f32.mrf.mxu1 }
 0x1bc   : > { %1921 = vst.msk [vmem:[#allocation2 + $0xc8] sm:$0xff] %vm200_vm1, %v1889_v40  ;;  %v875_v18 = vadd.f32 %v837_v42, %v632_v41  ;;  %v1513_v37 = vpop.f32.mrf.mxu3 }
 0x1bd   : > { %v970_v43 = vld [vmem:[#allocation2 + $0xe0] sm:$0xff] }
 0x1be   : > { %907 = vst.msk [vmem:[#allocation2 + $0xe8] sm:$0xff] %vm200_vm1, %v875_v18  ;;  %v1213_v44 = vadd.f32 %v1173_v39, %v970_v43  ;;  %3876 = vmatmul.msk.f32.gmra.mxu1 %vm200_vm1, %v3843_v15  ;;  %v4882_v46 = vpop.f32.mrf.mxu0  ;;  %v1960_v15 = vld [vmem:[#allocation2] sm:$0xff]  ;;  %v3912_v39 = vld [vmem:[%s4158_s25 + $0xf8] sm:$0xff] }
 0x1bf   : > { %3941 = vmatmul.msk.f32.gmra.mxu2 %vm200_vm1, %v3908_v23  ;;  %v1309_v47 = vld [vmem:[#allocation2 + $0xd8] sm:$0xff] }
 0x1c0   : > { %1245 = vst.msk [vmem:[#allocation2 + $0xe0] sm:$0xff] %vm200_vm1, %v1213_v44  ;;  %v1552_v48 = vadd.f32 %v1510_v25, %v1309_v47  ;;  %v3977_v18 = vld [vmem:[%s4158_s25 + $0xf9] sm:$0xff] }
 0x1c1   : > { %v1647_v50 = vld [vmem:[#allocation2 + $0xd0] sm:$0xff]  ;;  %4006 = vmatmul.msk.f32.gmra.mxu3 %vm200_vm1, %v3973_v45  ;;  %4071 = vmatmul.msk.f32.gmra.mxu0 %vm200_vm1, %v3845_v49  ;;  %v3849_v45 = vld [vmem:[%s4158_s25 + $0xfa] sm:$0xff] }
 0x1c2   : > { %v1176_v51 = vpop.f32.mrf.mxu2  ;;  %1584 = vst.msk [vmem:[#allocation2 + $0xd8] sm:$0xff] %vm200_vm1, %v1552_v48  ;;  %v1890_v52 = vadd.f32 %v4840_v62, %v1647_v50 }
 0x1c3   : > { %v840_v29 = vpop.f32.mrf.mxu1 }
 0x1c4   : > { %1922 = vst.msk [vmem:[#allocation2 + $0xd0] sm:$0xff] %vm200_vm1, %v1890_v52  ;;  %v876_v55 = vadd.f32 %v840_v29, %v633_v53  ;;  %v1516_v4 = vpop.f32.mrf.mxu3 }
 0x1c5   : > { %v971_v22 = vld [vmem:[#allocation2 + $0xe8] sm:$0xff] }
 0x1c6   : > { %908 = vst.msk [vmem:[#allocation2 + $0xf0] sm:$0xff] %vm200_vm1, %v876_v55  ;;  %v1214_v56 = vadd.f32 %v1176_v51, %v971_v22  ;;  %3877 = vmatmul.msk.f32.gmra.mxu1 %vm200_vm1, %v3844_v35  ;;  %v4896_v58 = vpop.f32.mrf.mxu0  ;;  %v1961_v35 = vld [vmem:[#allocation2 + $0x8] sm:$0xff] }
 0x1c7   : > { %3942 = vmatmul.msk.f32.gmra.mxu2 %vm200_vm1, %v3909_v54  ;;  %v1310_v59 = vld [vmem:[#allocation2 + $0xe0] sm:$0xff]  ;;  %v3913_v51 = vld [vmem:[%s4158_s25 + $0x108] sm:$0xff] }
 0x1c8   : > { %1246 = vst.msk [vmem:[#allocation2 + $0xe8] sm:$0xff] %vm200_vm1, %v1214_v56  ;;  %v1553_v60 = vadd.f32 %v1513_v37, %v1310_v59  ;;  %v3978_v55 = vld [vmem:[%s4158_s25 + $0x109] sm:$0xff] }
 0x1c9   : > { %v1648_v62 = vld [vmem:[#allocation2 + $0xd8] sm:$0xff]  ;;  %4007 = vmatmul.msk.f32.gmra.mxu3 %vm200_vm1, %v3974_v57  ;;  %4072 = vmatmul.msk.f32.gmra.mxu0 %vm200_vm1, %v3846_v61  ;;  %v3850_v57 = vld [vmem:[%s4158_s25 + $0x10a] sm:$0xff] }
 0x1ca   : > { %v1179_v63 = vpop.f32.mrf.mxu2  ;;  %1585 = vst.msk [vmem:[#allocation2 + $0xe0] sm:$0xff] %vm200_vm1, %v1553_v60  ;;  %v1891_v0 = vadd.f32 %v4854_v12, %v1648_v62 }
 0x1cb   : > { %v843_v1 = vpop.f32.mrf.mxu1 }
 0x1cc   : > { %1923 = vst.msk [vmem:[#allocation2 + $0xd8] sm:$0xff] %vm200_vm1, %v1891_v0  ;;  %v877_v11 = vadd.f32 %v843_v1, %v634_v34  ;;  %v1519_v3 = vpop.f32.mrf.mxu3 }
 0x1cd   : > { %v972_v5 = vld [vmem:[#allocation2 + $0xf0] sm:$0xff] }
 0x1ce   : > { %909 = vst.msk [vmem:[#allocation2 + $0xf8] sm:$0xff] %vm200_vm1, %v877_v11  ;;  %v1215_v28 = vadd.f32 %v1179_v63, %v972_v5  ;;  %3878 = vmatmul.msk.f32.gmra.mxu1 %vm200_vm1, %v3845_v49  ;;  %v4910_v7 = vpop.f32.mrf.mxu0  ;;  %v1962_v49 = vld [vmem:[#allocation2 + $0x10] sm:$0xff] }
 0x1cf   : > { %3943 = vmatmul.msk.f32.gmra.mxu2 %vm200_vm1, %v3910_v2  ;;  %v1311_v8 = vld [vmem:[#allocation2 + $0xe8] sm:$0xff]  ;;  %v3914_v63 = vld [vmem:[%s4158_s25 + $0x110] sm:$0xff] }
 0x1d0   : > { %1247 = vst.msk [vmem:[#allocation2 + $0xf0] sm:$0xff] %vm200_vm1, %v1215_v28  ;;  %v1554_v9 = vadd.f32 %v1516_v4, %v1311_v8  ;;  %v3979_v11 = vld [vmem:[%s4158_s25 + $0x111] sm:$0xff] }
 0x1d1   : > { %v1649_v12 = vld [vmem:[#allocation2 + $0xe0] sm:$0xff]  ;;  %4008 = vmatmul.msk.f32.gmra.mxu3 %vm200_vm1, %v3975_v6  ;;  %4073 = vmatmul.msk.f32.gmra.mxu0 %vm200_vm1, %v3847_v10  ;;  %v3851_v6 = vld [vmem:[%s4158_s25 + $0x112] sm:$0xff] }
 0x1d2   : > { %v1182_v13 = vpop.f32.mrf.mxu2  ;;  %1586 = vst.msk [vmem:[#allocation2 + $0xe8] sm:$0xff] %vm200_vm1, %v1554_v9  ;;  %v1892_v38 = vadd.f32 %v4868_v30, %v1649_v12 }
 0x1d3   : > { %v2107_v16 = vpop.f32.mrf.mxu1 }
 0x1d4   : > { %1924 = vst.msk [vmem:[#allocation2 + $0xe0] sm:$0xff] %vm200_vm1, %v1892_v38  ;;  %v2203_v20 = vadd.f32 %v2107_v16, %v1960_v15  ;;  %v1522_v21 = vpop.f32.mrf.mxu3 }
 0x1d5   : > { %v973_v14 = vld [vmem:[#allocation2 + $0xf8] sm:$0xff] }
 0x1d6   : > { %2235 = vst.msk [vmem:[#allocation2] sm:$0xff] %vm200_vm1, %v2203_v20  ;;  %v1216_v24 = vadd.f32 %v1182_v13, %v973_v14  ;;  %3879 = vmatmul.msk.f32.gmra.mxu1 %vm200_vm1, %v3846_v61  ;;  %v4924_v25 = vpop.f32.mrf.mxu0  ;;  %v1963_v61 = vld [vmem:[#allocation2 + $0x18] sm:$0xff]  ;;  %v3915_v13 = vld [vmem:[%s4158_s25 + $0x120] sm:$0xff] }
 0x1d7   : > { %3944 = vmatmul.msk.f32.gmra.mxu2 %vm200_vm1, %v3911_v17  ;;  %v1312_v26 = vld [vmem:[#allocation2 + $0xf0] sm:$0xff]  ;;  %v3980_v20 = vld [vmem:[%s4158_s25 + $0x121] sm:$0xff] }
 0x1d8   : > { %1248 = vst.msk [vmem:[#allocation2 + $0xf8] sm:$0xff] %vm200_vm1, %v1216_v24  ;;  %v1555_v19 = vadd.f32 %v1519_v3, %v1312_v26 }
 0x1d9   : > { %v1650_v30 = vld [vmem:[#allocation2 + $0xe8] sm:$0xff]  ;;  %4009 = vmatmul.msk.f32.gmra.mxu3 %vm200_vm1, %v3976_v33  ;;  %4074 = vmatmul.msk.f32.gmra.mxu0 %vm200_vm1, %v3848_v27 }
 0x1da   : > { %v2447_v31 = vpop.f32.mrf.mxu2  ;;  %1587 = vst.msk [vmem:[#allocation2 + $0xf0] sm:$0xff] %vm200_vm1, %v1555_v19  ;;  %v1893_v32 = vadd.f32 %v4882_v46, %v1650_v30  ;;  %v3852_v33 = vld [vmem:[%s4158_s25 + $0x122] sm:$0xff] }
 0x1db   : > { %v2110_v36 = vpop.f32.mrf.mxu1  ;;  %v1965_v30 = vld [vmem:[#allocation2 + $0x28] sm:$0xff] }
 0x1dc   : > { %1925 = vst.msk [vmem:[#allocation2 + $0xe8] sm:$0xff] %vm200_vm1, %v1893_v32  ;;  %v2204_v40 = vadd.f32 %v2110_v36, %v1961_v35  ;;  %v2786_v41 = vpop.f32.mrf.mxu3  ;;  %v3916_v32 = vld [vmem:[%s4158_s25 + $0x128] sm:$0xff] }
 0x1dd   : > { %v2300_v42 = vld [vmem:[#allocation2] sm:$0xff] }
 0x1de   : > { %2236 = vst.msk [vmem:[#allocation2 + $0x8] sm:$0xff] %vm200_vm1, %v2204_v40  ;;  %v2543_v23 = vadd.f32 %v2447_v31, %v2300_v42  ;;  %3880 = vmatmul.msk.f32.gmra.mxu1 %vm200_vm1, %v3847_v10  ;;  %v4938_v37 = vpop.f32.mrf.mxu0  ;;  %v1964_v10 = vld [vmem:[#allocation2 + $0x20] sm:$0xff] }
 0x1df   : > { %3945 = vmatmul.msk.f32.gmra.mxu2 %vm200_vm1, %v3912_v39  ;;  %v1313_v43 = vld [vmem:[#allocation2 + $0xf8] sm:$0xff] }
 0x1e0   : > { %2575 = vst.msk [vmem:[#allocation2] sm:$0xff] %vm200_vm1, %v2543_v23  ;;  %v1556_v44 = vadd.f32 %v1522_v21, %v1313_v43 }
 0x1e1   : > { %v1651_v46 = vld [vmem:[#allocation2 + $0xf0] sm:$0xff]  ;;  %4010 = vmatmul.msk.f32.gmra.mxu3 %vm200_vm1, %v3977_v18  ;;  %4075 = vmatmul.msk.f32.gmra.mxu0 %vm200_vm1, %v3849_v45 }
 0x1e2   : > { %v2450_v47 = vpop.f32.mrf.mxu2  ;;  %1588 = vst.msk [vmem:[#allocation2 + $0xf8] sm:$0xff] %vm200_vm1, %v1556_v44  ;;  %v1894_v48 = vadd.f32 %v4896_v58, %v1651_v46 }
 0x1e3   : > { %v2113_v50 = vpop.f32.mrf.mxu1 }
 0x1e4   : > { %1926 = vst.msk [vmem:[#allocation2 + $0xf0] sm:$0xff] %vm200_vm1, %v1894_v48  ;;  %v2205_v52 = vadd.f32 %v2113_v50, %v1962_v49  ;;  %v2789_v53 = vpop.f32.mrf.mxu3  ;;  %v3917_v49 = vld [vmem:[%s4158_s25 + $0x138] sm:$0xff] }
 0x1e5   : > { %v2301_v29 = vld [vmem:[#allocation2 + $0x8] sm:$0xff] }
 0x1e6   : > { %2237 = vst.msk [vmem:[#allocation2 + $0x10] sm:$0xff] %vm200_vm1, %v2205_v52  ;;  %v2544_v54 = vadd.f32 %v2450_v47, %v2301_v29  ;;  %3881 = vmatmul.msk.f32.gmra.mxu1 %vm200_vm1, %v3848_v27  ;;  %v4952_v4 = vpop.f32.mrf.mxu0  ;;  %v1966_v47 = vld [vmem:[#allocation2 + $0x30] sm:$0xff] }
 0x1e7   : > { %3946 = vmatmul.msk.f32.gmra.mxu2 %vm200_vm1, %v3913_v51  ;;  %v2639_v22 = vld [vmem:[#allocation2] sm:$0xff] }
 0x1e8   : > { %2576 = vst.msk [vmem:[#allocation2 + $0x8] sm:$0xff] %vm200_vm1, %v2544_v54  ;;  %v2882_v56 = vadd.f32 %v2786_v41, %v2639_v22  ;;  %v3981_v41 = vld [vmem:[%s4158_s25 + $0x129] sm:$0xff] }
 0x1e9   : > { %v1652_v58 = vld [vmem:[#allocation2 + $0xf8] sm:$0xff]  ;;  %4011 = vmatmul.msk.f32.gmra.mxu3 %vm200_vm1, %v3978_v55  ;;  %4076 = vmatmul.msk.f32.gmra.mxu0 %vm200_vm1, %v3850_v57 }
 0x1ea   : > { %v2453_v59 = vpop.f32.mrf.mxu2  ;;  %2914 = vst.msk [vmem:[#allocation2] sm:$0xff] %vm200_vm1, %v2882_v56  ;;  %v1895_v60 = vadd.f32 %v4910_v7, %v1652_v58  ;;  %v3982_v56 = vld [vmem:[%s4158_s25 + $0x139] sm:$0xff] }
 0x1eb   : > { %v2116_v62 = vpop.f32.mrf.mxu1 }
 0x1ec   : > { %1927 = vst.msk [vmem:[#allocation2 + $0xf8] sm:$0xff] %vm200_vm1, %v1895_v60  ;;  %v2206_v0 = vadd.f32 %v2116_v62, %v1963_v61  ;;  %v2792_v34 = vpop.f32.mrf.mxu3 }
 0x1ed   : > { %v2302_v1 = vld [vmem:[#allocation2 + $0x10] sm:$0xff] }
 0x1ee   : > { %2238 = vst.msk [vmem:[#allocation2 + $0x18] sm:$0xff] %vm200_vm1, %v2206_v0  ;;  %v2545_v2 = vadd.f32 %v2453_v59, %v2302_v1  ;;  %3882 = vmatmul.msk.f32.gmra.mxu1 %vm200_vm1, %v3849_v45  ;;  %v4966_v3 = vpop.f32.mrf.mxu0 }
 0x1ef   : > { %3947 = vmatmul.msk.f32.gmra.mxu2 %vm200_vm1, %v3914_v63  ;;  %v2640_v5 = vld [vmem:[#allocation2 + $0x8] sm:$0xff]  ;;  %v3854_v63 = vld [vmem:[%s4158_s25 + $0x13a] sm:$0xff] }
 0x1f0   : > { %2577 = vst.msk [vmem:[#allocation2 + $0x10] sm:$0xff] %vm200_vm1, %v2545_v2  ;;  %v2883_v28 = vadd.f32 %v2789_v53, %v2640_v5 }
 0x1f1   : > { %v2978_v7 = vld [vmem:[#allocation2] sm:$0xff]  ;;  %4012 = vmatmul.msk.f32.gmra.mxu3 %vm200_vm1, %v3979_v11  ;;  %4077 = vmatmul.msk.f32.gmra.mxu0 %vm200_vm1, %v3851_v6  ;;  %v1967_v11 = vld [vmem:[#allocation2 + $0x38] sm:$0xff] }
 0x1f2   : > { %v2456_v8 = vpop.f32.mrf.mxu2  ;;  %2915 = vst.msk [vmem:[#allocation2 + $0x8] sm:$0xff] %vm200_vm1, %v2883_v28  ;;  %v3221_v9 = vadd.f32 %v4924_v25, %v2978_v7  ;;  %v3918_v28 = vld [vmem:[%s4158_s25 + $0x140] sm:$0xff] }
 0x1f3   : > { %v2119_v12 = vpop.f32.mrf.mxu1 }
 0x1f4   : > { %3253 = vst.msk [vmem:[#allocation2] sm:$0xff] %vm200_vm1, %v3221_v9  ;;  %v2207_v38 = vadd.f32 %v2119_v12, %v1964_v10  ;;  %v2795_v15 = vpop.f32.mrf.mxu3 }
 0x1f5   : > { %v2303_v16 = vld [vmem:[#allocation2 + $0x18] sm:$0xff] }
 0x1f6   : > { %2239 = vst.msk [vmem:[#allocation2 + $0x20] sm:$0xff] %vm200_vm1, %v2207_v38  ;;  %v2546_v17 = vadd.f32 %v2456_v8, %v2303_v16  ;;  %3883 = vmatmul.msk.f32.gmra.mxu1 %vm200_vm1, %v3850_v57  ;;  %v4980_v21 = vpop.f32.mrf.mxu0  ;;  %v3983_v38 = vld [vmem:[%s4158_s25 + $0x141] sm:$0xff] }
 0x1f7   : > { %3948 = vmatmul.msk.f32.gmra.mxu2 %vm200_vm1, %v3915_v13  ;;  %v2641_v14 = vld [vmem:[#allocation2 + $0x10] sm:$0xff] }
 0x1f8   : > { %2578 = vst.msk [vmem:[#allocation2 + $0x18] sm:$0xff] %vm200_vm1, %v2546_v17  ;;  %v2884_v24 = vadd.f32 %v2792_v34, %v2641_v14  ;;  %v3855_v14 = vld [vmem:[%s4158_s25 + $0x142] sm:$0xff] }
 0x1f9   : > { %v2979_v25 = vld [vmem:[#allocation2 + $0x8] sm:$0xff]  ;;  %4013 = vmatmul.msk.f32.gmra.mxu3 %vm200_vm1, %v3980_v20  ;;  %4078 = vmatmul.msk.f32.gmra.mxu0 %vm200_vm1, %v3852_v33 }
 0x1fa   : > { %v2459_v26 = vpop.f32.mrf.mxu2  ;;  %2916 = vst.msk [vmem:[#allocation2 + $0x10] sm:$0xff] %vm200_vm1, %v2884_v24  ;;  %v3222_v19 = vadd.f32 %v4938_v37, %v2979_v25  ;;  %v3853_v37 = vld [vmem:[%s4158_s25 + $0x12a] sm:$0xff] }
 0x1fb   : > { %v3285_v27 = vld [vmem:[#allocation2] sm:$0xff]  ;;  %v2122_v31 = vpop.f32.mrf.mxu1 }
 0x1fc   : > { %3494 = vst.msk [vmem:[%s4153_s22] sm:$0xff] %vm200_vm1, %v3285_v27  ;;  %v2208_v35 = vadd.f32 %v2122_v31, %v1965_v30  ;;  %v2798_v36 = vpop.f32.mrf.mxu3  ;;  %v3391_v46 = vmul.f32 %v3285_v27, %v3285_v27  ;;  %v3318_v53 = vsel %vm200_vm1, %v3285_v27, 0.0  ;;  %v3919_v27 = vld [vmem:[%s4158_s25 + $0x150] sm:$0xff] }
 0x1fd   : > { %3254 = vst.msk [vmem:[#allocation2 + $0x8] sm:$0xff] %vm200_vm1, %v3222_v19  ;;  %v2304_v39 = vld [vmem:[#allocation2 + $0x20] sm:$0xff] }
 0x1fe   : > { %2240 = vst.msk [vmem:[#allocation2 + $0x28] sm:$0xff] %vm200_vm1, %v2208_v35  ;;  %v2547_v40 = vadd.f32 %v2459_v26, %v2304_v39  ;;  %3884 = vmatmul.msk.f32.gmra.mxu1 %vm200_vm1, %v3851_v6  ;;  %v4996_v42 = vpop.f32.mrf.mxu0  ;;  %v3423_v58 = vsel %vm200_vm1, %v3391_v46, 0.0  ;;  %v1968_v26 = vld [vmem:[#allocation2 + $0x40] sm:$0xff] }
 0x1ff   : > { %3949 = vmatmul.msk.f32.gmra.mxu2 %vm200_vm1, %v3916_v32  ;;  %v2642_v23 = vld [vmem:[#allocation2 + $0x18] sm:$0xff] }
 0x200   : > { %2579 = vst.msk [vmem:[#allocation2 + $0x20] sm:$0xff] %vm200_vm1, %v2547_v40  ;;  %v2885_v18 = vadd.f32 %v2795_v15, %v2642_v23 }
 0x201   : > { %v2980_v43 = vld [vmem:[#allocation2 + $0x10] sm:$0xff]  ;;  %4014 = vmatmul.msk.f32.gmra.mxu3 %vm200_vm1, %v3981_v41  ;;  %4079 = vmatmul.msk.f32.gmra.mxu0 %vm200_vm1, %v3853_v37 }
 0x202   : > { %v2462_v44 = vpop.f32.mrf.mxu2  ;;  %2917 = vst.msk [vmem:[#allocation2 + $0x18] sm:$0xff] %vm200_vm1, %v2885_v18  ;;  %v3223_v45 = vadd.f32 %v4952_v4, %v2980_v43  ;;  %v3984_v41 = vld [vmem:[%s4158_s25 + $0x151] sm:$0xff] }
 0x203   : > { %v2125_v48 = vpop.f32.mrf.mxu1 }
 0x204   : > { %v3286_v50 = vld [vmem:[#allocation2 + $0x8] sm:$0xff]  ;;  %3255 = vst.msk [vmem:[#allocation2 + $0x10] sm:$0xff] %vm200_vm1, %v3223_v45  ;;  %v2209_v51 = vadd.f32 %v2125_v48, %v1966_v47  ;;  %v2801_v52 = vpop.f32.mrf.mxu3  ;;  %v3856_v45 = vld [vmem:[%s4158_s25 + $0x152] sm:$0xff] }
 0x205   : > { %v3319_v29 = vsel %vm200_vm1, %v3286_v50, 0.0  ;;  %v3392_v54 = vmul.f32 %v3286_v50, %v3286_v50  ;;  %3495 = vst.msk [vmem:[%s4153_s22 + $0x8] sm:$0xff] %vm200_vm1, %v3286_v50  ;;  %v2305_v55 = vld [vmem:[#allocation2 + $0x28] sm:$0xff] }
 0x206   : > { %v3320_v4 = vadd.f32 %v3319_v29, %v3318_v53  ;;  %2241 = vst.msk [vmem:[#allocation2 + $0x30] sm:$0xff] %vm200_vm1, %v2209_v51  ;;  %v2548_v22 = vadd.f32 %v2462_v44, %v2305_v55  ;;  %3885 = vmatmul.msk.f32.gmra.mxu1 %vm200_vm1, %v3852_v33  ;;  %v5014_v57 = vpop.f32.mrf.mxu0  ;;  %v1969_v50 = vld [vmem:[#allocation2 + $0x48] sm:$0xff] }
 0x207   : > { %3950 = vmatmul.msk.f32.gmra.mxu2 %vm200_vm1, %v3917_v49  ;;  %v3424_v59 = vsel %vm200_vm1, %v3392_v54, 0.0  ;;  %v2643_v60 = vld [vmem:[#allocation2 + $0x20] sm:$0xff] }
 0x208   : > { %v3425_v61 = vadd.f32 %v3424_v59, %v3423_v58  ;;  %2580 = vst.msk [vmem:[#allocation2 + $0x28] sm:$0xff] %vm200_vm1, %v2548_v22  ;;  %v2886_v62 = vadd.f32 %v2798_v36, %v2643_v60  ;;  %v3985_v58 = vld [vmem:[%s4158_s25 + $0x159] sm:$0xff] }
 0x209   : > { %v2981_v0 = vld [vmem:[#allocation2 + $0x18] sm:$0xff]  ;;  %4015 = vmatmul.msk.f32.gmra.mxu3 %vm200_vm1, %v3982_v56  ;;  %4080 = vmatmul.msk.f32.gmra.mxu0 %vm200_vm1, %v3854_v63 }
 0x20a   : > { %v2465_v34 = vpop.f32.mrf.mxu2  ;;  %2918 = vst.msk [vmem:[#allocation2 + $0x20] sm:$0xff] %vm200_vm1, %v2886_v62  ;;  %v3224_v1 = vadd.f32 %v4966_v3, %v2981_v0 }
 0x20b   : > { %v3287_v2 = vld [vmem:[#allocation2 + $0x10] sm:$0xff]  ;;  %v2128_v5 = vpop.f32.mrf.mxu1 }
 0x20c   : > { %v3321_v6 = vsel %vm200_vm1, %v3287_v2, 0.0  ;;  %v3393_v7 = vmul.f32 %v3287_v2, %v3287_v2  ;;  %3496 = vst.msk [vmem:[%s4153_s22 + $0x10] sm:$0xff] %vm200_vm1, %v3287_v2  ;;  %v2210_v8 = vadd.f32 %v2128_v5, %v1967_v11  ;;  %v2804_v9 = vpop.f32.mrf.mxu3  ;;  %v1970_v2 = vld [vmem:[#allocation2 + $0x50] sm:$0xff]  ;;  %v3921_v5 = vld [vmem:[%s4158_s25 + $0x168] sm:$0xff] }
 0x20d   : > { %v3322_v10 = vadd.f32 %v3321_v6, %v3320_v4  ;;  %3256 = vst.msk [vmem:[#allocation2 + $0x18] sm:$0xff] %vm200_vm1, %v3224_v1  ;;  %v2306_v12 = vld [vmem:[#allocation2 + $0x30] sm:$0xff] }
 0x20e   : > { %v3426_v13 = vsel %vm200_vm1, %v3393_v7, 0.0  ;;  %2242 = vst.msk [vmem:[#allocation2 + $0x38] sm:$0xff] %vm200_vm1, %v2210_v8  ;;  %v2549_v3 = vadd.f32 %v2465_v34, %v2306_v12  ;;  %3886 = vmatmul.msk.f32.gmra.mxu1 %vm200_vm1, %v3853_v37  ;;  %v5034_v15 = vpop.f32.mrf.mxu0 }
 0x20f   : > { %3951 = vmatmul.msk.f32.gmra.mxu2 %vm200_vm1, %v3918_v28  ;;  %v3427_v16 = vadd.f32 %v3426_v13, %v3425_v61  ;;  %v2644_v17 = vld [vmem:[#allocation2 + $0x28] sm:$0xff] }
 0x210   : > { %2581 = vst.msk [vmem:[#allocation2 + $0x30] sm:$0xff] %vm200_vm1, %v2549_v3  ;;  %v2887_v20 = vadd.f32 %v2801_v52, %v2644_v17  ;;  %v3920_v52 = vld [vmem:[%s4158_s25 + $0x158] sm:$0xff]  ;;  %v3986_v13 = vld [vmem:[%s4158_s25 + $0x169] sm:$0xff] }
 0x211   : > { %v2982_v24 = vld [vmem:[#allocation2 + $0x20] sm:$0xff]  ;;  %4016 = vmatmul.msk.f32.gmra.mxu3 %vm200_vm1, %v3983_v38  ;;  %4081 = vmatmul.msk.f32.gmra.mxu0 %vm200_vm1, %v3855_v14 }
 0x212   : > { %v2468_v33 = vpop.f32.mrf.mxu2  ;;  %2919 = vst.msk [vmem:[#allocation2 + $0x28] sm:$0xff] %vm200_vm1, %v2887_v20  ;;  %v3225_v25 = vadd.f32 %v4980_v21, %v2982_v24 }
 0x213   : > { %v2131_v19 = vpop.f32.mrf.mxu1 }
 0x214   : > { %v3288_v30 = vld [vmem:[#allocation2 + $0x18] sm:$0xff]  ;;  %3257 = vst.msk [vmem:[#allocation2 + $0x20] sm:$0xff] %vm200_vm1, %v3225_v25  ;;  %v2211_v31 = vadd.f32 %v2131_v19, %v1968_v26  ;;  %v2807_v32 = vpop.f32.mrf.mxu3 }
 0x215   : > { %v3323_v35 = vsel %vm200_vm1, %v3288_v30, 0.0  ;;  %v3394_v36 = vmul.f32 %v3288_v30, %v3288_v30  ;;  %3497 = vst.msk [vmem:[%s4153_s22 + $0x18] sm:$0xff] %vm200_vm1, %v3288_v30  ;;  %v2307_v39 = vld [vmem:[#allocation2 + $0x38] sm:$0xff]  ;;  %v3922_v30 = vld [vmem:[%s4158_s25 + $0x170] sm:$0xff] }
 0x216   : > { %v3324_v40 = vadd.f32 %v3323_v35, %v3322_v10  ;;  %2243 = vst.msk [vmem:[#allocation2 + $0x40] sm:$0xff] %vm200_vm1, %v2211_v31  ;;  %v2550_v21 = vadd.f32 %v2468_v33, %v2307_v39  ;;  %3887 = vmatmul.msk.f32.gmra.mxu1 %vm200_vm1, %v3854_v63  ;;  %v5051_v23 = vpop.f32.mrf.mxu0  ;;  %v3857_v63 = vld [vmem:[%s4158_s25 + $0x15a] sm:$0xff] }
 0x217   : > { %3952 = vmatmul.msk.f32.gmra.mxu2 %vm200_vm1, %v3919_v27  ;;  %v3428_v18 = vsel %vm200_vm1, %v3394_v36, 0.0  ;;  %v2645_v37 = vld [vmem:[#allocation2 + $0x30] sm:$0xff]  ;;  %v1971_v19 = vld [vmem:[#allocation2 + $0x58] sm:$0xff] }
 0x218   : > { %v3429_v43 = vadd.f32 %v3428_v18, %v3427_v16  ;;  %2582 = vst.msk [vmem:[#allocation2 + $0x38] sm:$0xff] %vm200_vm1, %v2550_v21  ;;  %v2888_v44 = vadd.f32 %v2804_v9, %v2645_v37 }
 0x219   : > { %v2983_v46 = vld [vmem:[#allocation2 + $0x28] sm:$0xff]  ;;  %4017 = vmatmul.msk.f32.gmra.mxu3 %vm200_vm1, %v3984_v41  ;;  %4082 = vmatmul.msk.f32.gmra.mxu0 %vm200_vm1, %v3856_v45  ;;  %v3987_v41 = vld [vmem:[%s4158_s25 + $0x171] sm:$0xff] }
 0x21a   : > { %v2471_v47 = vpop.f32.mrf.mxu2  ;;  %2920 = vst.msk [vmem:[#allocation2 + $0x30] sm:$0xff] %vm200_vm1, %v2888_v44  ;;  %v3226_v48 = vadd.f32 %v4996_v42, %v2983_v46 }
 0x21b   : > { %v3289_v49 = vld [vmem:[#allocation2 + $0x20] sm:$0xff]  ;;  %v2134_v51 = vpop.f32.mrf.mxu1 }
 0x21c   : > { %v3325_v53 = vsel %vm200_vm1, %v3289_v49, 0.0  ;;  %v3395_v29 = vmul.f32 %v3289_v49, %v3289_v49  ;;  %3498 = vst.msk [vmem:[%s4153_s22 + $0x20] sm:$0xff] %vm200_vm1, %v3289_v49  ;;  %v2212_v54 = vadd.f32 %v2134_v51, %v1969_v50  ;;  %v2810_v55 = vpop.f32.mrf.mxu3  ;;  %v1972_v49 = vld [vmem:[#allocation2 + $0x60] sm:$0xff] }
 0x21d   : > { %v3326_v4 = vadd.f32 %v3325_v53, %v3324_v40  ;;  %3258 = vst.msk [vmem:[#allocation2 + $0x28] sm:$0xff] %vm200_vm1, %v3226_v48  ;;  %v2308_v22 = vld [vmem:[#allocation2 + $0x40] sm:$0xff] }
 0x21e   : > { %v3430_v56 = vsel %vm200_vm1, %v3395_v29, 0.0  ;;  %2244 = vst.msk [vmem:[#allocation2 + $0x48] sm:$0xff] %vm200_vm1, %v2212_v54  ;;  %v2551_v42 = vadd.f32 %v2471_v47, %v2308_v22  ;;  %3888 = vmatmul.msk.f32.gmra.mxu1 %vm200_vm1, %v3855_v14  ;;  %v5070_v59 = vpop.f32.mrf.mxu0  ;;  %v3858_v14 = vld [vmem:[%s4158_s25 + $0x16a] sm:$0xff]  ;;  %v3923_v51 = vld [vmem:[%s4158_s25 + $0x180] sm:$0xff] }
 0x21f   : > { %3953 = vmatmul.msk.f32.gmra.mxu2 %vm200_vm1, %v3920_v52  ;;  %v3431_v60 = vadd.f32 %v3430_v56, %v3429_v43  ;;  %v2646_v61 = vld [vmem:[#allocation2 + $0x38] sm:$0xff]  ;;  %v3988_v56 = vld [vmem:[%s4158_s25 + $0x181] sm:$0xff] }
 0x220   : > { %2583 = vst.msk [vmem:[#allocation2 + $0x40] sm:$0xff] %vm200_vm1, %v2551_v42  ;;  %v2889_v62 = vadd.f32 %v2807_v32, %v2646_v61 }
 0x221   : > { %v2984_v0 = vld [vmem:[#allocation2 + $0x30] sm:$0xff]  ;;  %4018 = vmatmul.msk.f32.gmra.mxu3 %vm200_vm1, %v3985_v58  ;;  %4083 = vmatmul.msk.f32.gmra.mxu0 %vm200_vm1, %v3857_v63 }
 0x222   : > { %v2474_v34 = vpop.f32.mrf.mxu2  ;;  %2921 = vst.msk [vmem:[#allocation2 + $0x38] sm:$0xff] %vm200_vm1, %v2889_v62  ;;  %v3227_v1 = vadd.f32 %v5014_v57, %v2984_v0 }
 0x223   : > { %v2137_v11 = vpop.f32.mrf.mxu1 }
 0x224   : > { %v3290_v28 = vld [vmem:[#allocation2 + $0x28] sm:$0xff]  ;;  %3259 = vst.msk [vmem:[#allocation2 + $0x30] sm:$0xff] %vm200_vm1, %v3227_v1  ;;  %v2213_v6 = vadd.f32 %v2137_v11, %v1970_v2  ;;  %v2813_v7 = vpop.f32.mrf.mxu3 }
 0x225   : > { %v3327_v8 = vsel %vm200_vm1, %v3290_v28, 0.0  ;;  %v3396_v9 = vmul.f32 %v3290_v28, %v3290_v28  ;;  %3499 = vst.msk [vmem:[%s4153_s22 + $0x28] sm:$0xff] %vm200_vm1, %v3290_v28  ;;  %v2309_v10 = vld [vmem:[#allocation2 + $0x48] sm:$0xff] }
 0x226   : > { %v3328_v12 = vadd.f32 %v3327_v8, %v3326_v4  ;;  %2245 = vst.msk [vmem:[#allocation2 + $0x50] sm:$0xff] %vm200_vm1, %v2213_v6  ;;  %v2552_v57 = vadd.f32 %v2474_v34, %v2309_v10  ;;  %3889 = vmatmul.msk.f32.gmra.mxu1 %vm200_vm1, %v3856_v45  ;;  %v5087_v3 = vpop.f32.mrf.mxu0  ;;  %v3859_v45 = vld [vmem:[%s4158_s25 + $0x172] sm:$0xff]  ;;  %v1973_v11 = vld [vmem:[#allocation2 + $0x68] sm:$0xff] }
 0x227   : > { %3954 = vmatmul.msk.f32.gmra.mxu2 %vm200_vm1, %v3921_v5  ;;  %v3432_v38 = vsel %vm200_vm1, %v3396_v9, 0.0  ;;  %v2647_v16 = vld [vmem:[#allocation2 + $0x40] sm:$0xff]  ;;  %v3924_v28 = vld [vmem:[%s4158_s25 + $0x188] sm:$0xff] }
 0x228   : > { %v3433_v17 = vadd.f32 %v3432_v38, %v3431_v60  ;;  %2584 = vst.msk [vmem:[#allocation2 + $0x48] sm:$0xff] %vm200_vm1, %v2552_v57  ;;  %v2890_v20 = vadd.f32 %v2810_v55, %v2647_v16 }
 0x229   : > { %v2985_v24 = vld [vmem:[#allocation2 + $0x38] sm:$0xff]  ;;  %4019 = vmatmul.msk.f32.gmra.mxu3 %vm200_vm1, %v3986_v13  ;;  %4084 = vmatmul.msk.f32.gmra.mxu0 %vm200_vm1, %v3858_v14  ;;  %v3989_v13 = vld [vmem:[%s4158_s25 + $0x189] sm:$0xff] }
 0x22a   : > { %v2477_v33 = vpop.f32.mrf.mxu2  ;;  %2922 = vst.msk [vmem:[#allocation2 + $0x40] sm:$0xff] %vm200_vm1, %v2890_v20  ;;  %v3228_v25 = vadd.f32 %v5034_v15, %v2985_v24 }
 0x22b   : > { %v3291_v26 = vld [vmem:[#allocation2 + $0x30] sm:$0xff]  ;;  %v2140_v27 = vpop.f32.mrf.mxu1 }
 0x22c   : > { %v3329_v31 = vsel %vm200_vm1, %v3291_v26, 0.0  ;;  %v3397_v32 = vmul.f32 %v3291_v26, %v3291_v26  ;;  %3500 = vst.msk [vmem:[%s4153_s22 + $0x30] sm:$0xff] %vm200_vm1, %v3291_v26  ;;  %v2214_v35 = vadd.f32 %v2140_v27, %v1971_v19  ;;  %v2816_v36 = vpop.f32.mrf.mxu3  ;;  %v1974_v26 = vld [vmem:[#allocation2 + $0x70] sm:$0xff]  ;;  %v3925_v27 = vld [vmem:[%s4158_s25 + $0x198] sm:$0xff] }
 0x22d   : > { %v3330_v39 = vadd.f32 %v3329_v31, %v3328_v12  ;;  %3260 = vst.msk [vmem:[#allocation2 + $0x38] sm:$0xff] %vm200_vm1, %v3228_v25  ;;  %v2310_v40 = vld [vmem:[#allocation2 + $0x50] sm:$0xff] }
 0x22e   : > { %v3434_v21 = vsel %vm200_vm1, %v3397_v32, 0.0  ;;  %2246 = vst.msk [vmem:[#allocation2 + $0x58] sm:$0xff] %vm200_vm1, %v2214_v35  ;;  %v2553_v15 = vadd.f32 %v2477_v33, %v2310_v40  ;;  %3890 = vmatmul.msk.f32.gmra.mxu1 %vm200_vm1, %v3857_v63  ;;  %v5106_v18 = vpop.f32.mrf.mxu0  ;;  %v3860_v63 = vld [vmem:[%s4158_s25 + $0x182] sm:$0xff] }
 0x22f   : > { %3955 = vmatmul.msk.f32.gmra.mxu2 %vm200_vm1, %v3922_v30  ;;  %v3435_v37 = vadd.f32 %v3434_v21, %v3433_v17  ;;  %v2648_v43 = vld [vmem:[#allocation2 + $0x48] sm:$0xff]  ;;  %v3990_v21 = vld [vmem:[%s4158_s25 + $0x199] sm:$0xff] }
 0x230   : > { %2585 = vst.msk [vmem:[#allocation2 + $0x50] sm:$0xff] %vm200_vm1, %v2553_v15  ;;  %v2891_v44 = vadd.f32 %v2813_v7, %v2648_v43 }
 0x231   : > { %v2986_v46 = vld [vmem:[#allocation2 + $0x40] sm:$0xff]  ;;  %4020 = vmatmul.msk.f32.gmra.mxu3 %vm200_vm1, %v3987_v41  ;;  %4085 = vmatmul.msk.f32.gmra.mxu0 %vm200_vm1, %v3859_v45 }
 0x232   : > { %v2480_v47 = vpop.f32.mrf.mxu2  ;;  %2923 = vst.msk [vmem:[#allocation2 + $0x48] sm:$0xff] %vm200_vm1, %v2891_v44  ;;  %v3229_v48 = vadd.f32 %v5051_v23, %v2986_v46  ;;  %v4055_v41 = vld [vmem:[%s4158_s25 + $0x19a] sm:$0xff] }
 0x233   : > { %v2143_v50 = vpop.f32.mrf.mxu1 }
 0x234   : > { %v3292_v52 = vld [vmem:[#allocation2 + $0x38] sm:$0xff]  ;;  %3261 = vst.msk [vmem:[#allocation2 + $0x40] sm:$0xff] %vm200_vm1, %v3229_v48  ;;  %v2215_v53 = vadd.f32 %v2143_v50, %v1972_v49  ;;  %v2819_v29 = vpop.f32.mrf.mxu3 }
 0x235   : > { %v3331_v54 = vsel %vm200_vm1, %v3292_v52, 0.0  ;;  %v3398_v55 = vmul.f32 %v3292_v52, %v3292_v52  ;;  %3501 = vst.msk [vmem:[%s4153_s22 + $0x38] sm:$0xff] %vm200_vm1, %v3292_v52  ;;  %v2311_v4 = vld [vmem:[#allocation2 + $0x58] sm:$0xff]  ;;  %v3926_v52 = vld [vmem:[%s4158_s25 + $0x1a0] sm:$0xff] }
 0x236   : > { %v3332_v22 = vadd.f32 %v3331_v54, %v3330_v39  ;;  %2247 = vst.msk [vmem:[#allocation2 + $0x60] sm:$0xff] %vm200_vm1, %v2215_v53  ;;  %v2554_v23 = vadd.f32 %v2480_v47, %v2311_v4  ;;  %3891 = vmatmul.msk.f32.gmra.mxu1 %vm200_vm1, %v3858_v14  ;;  %v5123_v42 = vpop.f32.mrf.mxu0  ;;  %v3861_v14 = vld [vmem:[%s4158_s25 + $0x18a] sm:$0xff]  ;;  %v1975_v50 = vld [vmem:[#allocation2 + $0x78] sm:$0xff] }
 0x237   : > { %3956 = vmatmul.msk.f32.gmra.mxu2 %vm200_vm1, %v3923_v51  ;;  %v3436_v58 = vsel %vm200_vm1, %v3398_v55, 0.0  ;;  %v2649_v60 = vld [vmem:[#allocation2 + $0x50] sm:$0xff] }
 0x238   : > { %v3437_v61 = vadd.f32 %v3436_v58, %v3435_v37  ;;  %2586 = vst.msk [vmem:[#allocation2 + $0x58] sm:$0xff] %vm200_vm1, %v2554_v23  ;;  %v2892_v62 = vadd.f32 %v2816_v36, %v2649_v60  ;;  %v4056_v60 = vld [vmem:[%s4158_s25 + $0x1a2] sm:$0xff] }
 0x239   : > { %v2987_v0 = vld [vmem:[#allocation2 + $0x48] sm:$0xff]  ;;  %4021 = vmatmul.msk.f32.gmra.mxu3 %vm200_vm1, %v3988_v56  ;;  %4086 = vmatmul.msk.f32.gmra.mxu0 %vm200_vm1, %v3860_v63 }
 0x23a   : > { %v2483_v34 = vpop.f32.mrf.mxu2  ;;  %2924 = vst.msk [vmem:[#allocation2 + $0x50] sm:$0xff] %vm200_vm1, %v2892_v62  ;;  %v3230_v1 = vadd.f32 %v5070_v59, %v2987_v0  ;;  %v3991_v56 = vld [vmem:[%s4158_s25 + $0x1a1] sm:$0xff] }
 0x23b   : > { %v3293_v2 = vld [vmem:[#allocation2 + $0x40] sm:$0xff]  ;;  %v2146_v5 = vpop.f32.mrf.mxu1 }
 0x23c   : > { %v3333_v6 = vsel %vm200_vm1, %v3293_v2, 0.0  ;;  %v3399_v7 = vmul.f32 %v3293_v2, %v3293_v2  ;;  %3502 = vst.msk [vmem:[%s4153_s22 + $0x40] sm:$0xff] %vm200_vm1, %v3293_v2  ;;  %v2216_v8 = vadd.f32 %v2146_v5, %v1973_v11  ;;  %v2822_v9 = vpop.f32.mrf.mxu3  ;;  %v1976_v2 = vld [vmem:[#allocation2 + $0x80] sm:$0xff] }
 0x23d   : > { %v3334_v10 = vadd.f32 %v3333_v6, %v3332_v22  ;;  %3262 = vst.msk [vmem:[#allocation2 + $0x48] sm:$0xff] %vm200_vm1, %v3230_v1  ;;  %v2312_v12 = vld [vmem:[#allocation2 + $0x60] sm:$0xff] }
 0x23e   : > { %v3438_v57 = vsel %vm200_vm1, %v3399_v7, 0.0  ;;  %2248 = vst.msk [vmem:[#allocation2 + $0x68] sm:$0xff] %vm200_vm1, %v2216_v8  ;;  %v2555_v59 = vadd.f32 %v2483_v34, %v2312_v12  ;;  %3892 = vmatmul.msk.f32.gmra.mxu1 %vm200_vm1, %v3859_v45  ;;  %v5142_v38 = vpop.f32.mrf.mxu0 }
 0x23f   : > { %3957 = vmatmul.msk.f32.gmra.mxu2 %vm200_vm1, %v3924_v28  ;;  %v3439_v16 = vadd.f32 %v3438_v57, %v3437_v61  ;;  %v2650_v17 = vld [vmem:[#allocation2 + $0x58] sm:$0xff] }
 0x240   : > { %2587 = vst.msk [vmem:[#allocation2 + $0x60] sm:$0xff] %vm200_vm1, %v2555_v59  ;;  %v2893_v20 = vadd.f32 %v2819_v29, %v2650_v17 }
 0x241   : > { %v2988_v24 = vld [vmem:[#allocation2 + $0x50] sm:$0xff]  ;;  %4022 = vmatmul.msk.f32.gmra.mxu3 %vm200_vm1, %v3989_v13  ;;  %4087 = vmatmul.msk.f32.gmra.mxu0 %vm200_vm1, %v3861_v14 }
 0x242   : > { %v2486_v33 = vpop.f32.mrf.mxu2  ;;  %2925 = vst.msk [vmem:[#allocation2 + $0x58] sm:$0xff] %vm200_vm1, %v2893_v20  ;;  %v3231_v25 = vadd.f32 %v5087_v3, %v2988_v24 }
 0x243   : > { %v2149_v19 = vpop.f32.mrf.mxu1 }
 0x244   : > { %v3294_v30 = vld [vmem:[#allocation2 + $0x48] sm:$0xff]  ;;  %3263 = vst.msk [vmem:[#allocation2 + $0x50] sm:$0xff] %vm200_vm1, %v3231_v25  ;;  %v2217_v31 = vadd.f32 %v2149_v19, %v1974_v26  ;;  %v2825_v32 = vpop.f32.mrf.mxu3 }
 0x245   : > { %v3335_v35 = vsel %vm200_vm1, %v3294_v30, 0.0  ;;  %v3400_v36 = vmul.f32 %v3294_v30, %v3294_v30  ;;  %3503 = vst.msk [vmem:[%s4153_s22 + $0x48] sm:$0xff] %vm200_vm1, %v3294_v30  ;;  %v2313_v39 = vld [vmem:[#allocation2 + $0x68] sm:$0xff] }
 0x246   : > { %v3336_v40 = vadd.f32 %v3335_v35, %v3334_v10  ;;  %2249 = vst.msk [vmem:[#allocation2 + $0x70] sm:$0xff] %vm200_vm1, %v2217_v31  ;;  %v2556_v3 = vadd.f32 %v2486_v33, %v2313_v39  ;;  %3893 = vmatmul.msk.f32.gmra.mxu1 %vm200_vm1, %v3860_v63  ;;  %v5159_v15 = vpop.f32.mrf.mxu0  ;;  %v1977_v33 = vld [vmem:[#allocation2 + $0x88] sm:$0xff] }
 0x247   : > { %3958 = vmatmul.msk.f32.gmra.mxu2 %vm200_vm1, %v3925_v27  ;;  %v3440_v37 = vsel %vm200_vm1, %v3400_v36, 0.0  ;;  %v2651_v43 = vld [vmem:[#allocation2 + $0x60] sm:$0xff] }
 0x248   : > { %v3441_v44 = vadd.f32 %v3440_v37, %v3439_v16  ;;  %2588 = vst.msk [vmem:[#allocation2 + $0x68] sm:$0xff] %vm200_vm1, %v2556_v3  ;;  %v2894_v45 = vadd.f32 %v2822_v9, %v2651_v43  ;;  %v1978_v43 = vld [vmem:[#allocation2 + $0x90] sm:$0xff] }
 0x249   : > { %v2989_v46 = vld [vmem:[#allocation2 + $0x58] sm:$0xff]  ;;  %4023 = vmatmul.msk.f32.gmra.mxu3 %vm200_vm1, %v3990_v21  ;;  %4088 = vmatmul.msk.f32.gmra.mxu0 %vm200_vm1, %v4055_v41 }
 0x24a   : > { %v2489_v47 = vpop.f32.mrf.mxu2  ;;  %2926 = vst.msk [vmem:[#allocation2 + $0x60] sm:$0xff] %vm200_vm1, %v2894_v45  ;;  %v3232_v48 = vadd.f32 %v5106_v18, %v2989_v46 }
 0x24b   : > { %v3295_v49 = vld [vmem:[#allocation2 + $0x50] sm:$0xff]  ;;  %v2152_v51 = vpop.f32.mrf.mxu1 }
 0x24c   : > { %v3337_v53 = vsel %vm200_vm1, %v3295_v49, 0.0  ;;  %v3401_v29 = vmul.f32 %v3295_v49, %v3295_v49  ;;  %3504 = vst.msk [vmem:[%s4153_s22 + $0x50] sm:$0xff] %vm200_vm1, %v3295_v49  ;;  %v2218_v54 = vadd.f32 %v2152_v51, %v1975_v50  ;;  %v2828_v55 = vpop.f32.mrf.mxu3 }
 0x24d   : > { %v3338_v4 = vadd.f32 %v3337_v53, %v3336_v40  ;;  %3264 = vst.msk [vmem:[#allocation2 + $0x58] sm:$0xff] %vm200_vm1, %v3232_v48  ;;  %v2314_v22 = vld [vmem:[#allocation2 + $0x70] sm:$0xff] }
 0x24e   : > { %v3442_v23 = vsel %vm200_vm1, %v3401_v29, 0.0  ;;  %2250 = vst.msk [vmem:[#allocation2 + $0x78] sm:$0xff] %vm200_vm1, %v2218_v54  ;;  %v2557_v18 = vadd.f32 %v2489_v47, %v2314_v22  ;;  %3894 = vmatmul.msk.f32.gmra.mxu1 %vm200_vm1, %v3861_v14  ;;  %v5178_v58 = vpop.f32.mrf.mxu0 }
 0x24f   : > { %3959 = vmatmul.msk.f32.gmra.mxu2 %vm200_vm1, %v3926_v52  ;;  %v3443_v61 = vadd.f32 %v3442_v23, %v3441_v44  ;;  %v2652_v62 = vld [vmem:[#allocation2 + $0x68] sm:$0xff] }
 0x250   : > { %2589 = vst.msk [vmem:[#allocation2 + $0x70] sm:$0xff] %vm200_vm1, %v2557_v18  ;;  %v2895_v63 = vadd.f32 %v2825_v32, %v2652_v62 }
 0x251   : > { %v2990_v0 = vld [vmem:[#allocation2 + $0x60] sm:$0xff]  ;;  %4024 = vmatmul.msk.f32.gmra.mxu3 %vm200_vm1, %v3991_v56  ;;  %4089 = vmatmul.msk.f32.gmra.mxu0 %vm200_vm1, %v4056_v60  ;;  %v1979_v56 = vld [vmem:[#allocation2 + $0x98] sm:$0xff] }
 0x252   : > { %v2492_v34 = vpop.f32.mrf.mxu2  ;;  %2927 = vst.msk [vmem:[#allocation2 + $0x68] sm:$0xff] %vm200_vm1, %v2895_v63  ;;  %v3233_v1 = vadd.f32 %v5123_v42, %v2990_v0 }
 0x253   : > { %v2155_v11 = vpop.f32.mrf.mxu1 }
 0x254   : > { %v3296_v5 = vld [vmem:[#allocation2 + $0x58] sm:$0xff]  ;;  %3265 = vst.msk [vmem:[#allocation2 + $0x60] sm:$0xff] %vm200_vm1, %v3233_v1  ;;  %v2219_v28 = vadd.f32 %v2155_v11, %v1976_v2  ;;  %v2831_v6 = vpop.f32.mrf.mxu3 }
 0x255   : > { %v3339_v7 = vsel %vm200_vm1, %v3296_v5, 0.0  ;;  %v3402_v8 = vmul.f32 %v3296_v5, %v3296_v5  ;;  %3505 = vst.msk [vmem:[%s4153_s22 + $0x58] sm:$0xff] %vm200_vm1, %v3296_v5  ;;  %v2315_v9 = vld [vmem:[#allocation2 + $0x78] sm:$0xff] }
 0x256   : > { %v3340_v10 = vadd.f32 %v3339_v7, %v3338_v4  ;;  %2251 = vst.msk [vmem:[#allocation2 + $0x80] sm:$0xff] %vm200_vm1, %v2219_v28  ;;  %v2558_v12 = vadd.f32 %v2492_v34, %v2315_v9  ;;  %v5191_v57 = vpop.f32.mrf.mxu0 }
 0x257   : > { %v3444_v42 = vsel %vm200_vm1, %v3402_v8, 0.0  ;;  %v2653_v59 = vld [vmem:[#allocation2 + $0x70] sm:$0xff] }
 0x258   : > { %v3445_v13 = vadd.f32 %v3444_v42, %v3443_v61  ;;  %2590 = vst.msk [vmem:[#allocation2 + $0x78] sm:$0xff] %vm200_vm1, %v2558_v12  ;;  %v2896_v16 = vadd.f32 %v2828_v55, %v2653_v59 }
 0x259   : > { %v2991_v17 = vld [vmem:[#allocation2 + $0x68] sm:$0xff] }
 0x25a   : > { %v2495_v20 = vpop.f32.mrf.mxu2  ;;  %2928 = vst.msk [vmem:[#allocation2 + $0x70] sm:$0xff] %vm200_vm1, %v2896_v16  ;;  %v3234_v14 = vadd.f32 %v5142_v38, %v2991_v17 }
 0x25b   : > { %v3297_v24 = vld [vmem:[#allocation2 + $0x60] sm:$0xff]  ;;  %v2158_v25 = vpop.f32.mrf.mxu1 }
 0x25c   : > { %v3341_v26 = vsel %vm200_vm1, %v3297_v24, 0.0  ;;  %v3403_v19 = vmul.f32 %v3297_v24, %v3297_v24  ;;  %3506 = vst.msk [vmem:[%s4153_s22 + $0x60] sm:$0xff] %vm200_vm1, %v3297_v24  ;;  %v2220_v27 = vadd.f32 %v2158_v25, %v1977_v33  ;;  %v2834_v30 = vpop.f32.mrf.mxu3 }
 0x25d   : > { %v3342_v31 = vadd.f32 %v3341_v26, %v3340_v10  ;;  %3266 = vst.msk [vmem:[#allocation2 + $0x68] sm:$0xff] %vm200_vm1, %v3234_v14  ;;  %v2316_v32 = vld [vmem:[#allocation2 + $0x80] sm:$0xff] }
 0x25e   : > { %v3446_v35 = vsel %vm200_vm1, %v3403_v19, 0.0  ;;  %2252 = vst.msk [vmem:[#allocation2 + $0x88] sm:$0xff] %vm200_vm1, %v2220_v27  ;;  %v2559_v36 = vadd.f32 %v2495_v20, %v2316_v32  ;;  %v5203_v38 = vpop.f32.mrf.mxu0  ;;  %v1980_v10 = vld [vmem:[#allocation2 + $0xa0] sm:$0xff] }
 0x25f   : > { %v3447_v39 = vadd.f32 %v3446_v35, %v3445_v13  ;;  %v2654_v40 = vld [vmem:[#allocation2 + $0x78] sm:$0xff]  ;;  %v1981_v35 = vld [vmem:[#allocation2 + $0xa8] sm:$0xff] }
 0x260   : > { %2591 = vst.msk [vmem:[#allocation2 + $0x80] sm:$0xff] %vm200_vm1, %v2559_v36  ;;  %v2897_v3 = vadd.f32 %v2831_v6, %v2654_v40 }
 0x261   : > { %v2992_v21 = vld [vmem:[#allocation2 + $0x70] sm:$0xff] }
 0x262   : > { %v2498_v41 = vpop.f32.mrf.mxu2  ;;  %2929 = vst.msk [vmem:[#allocation2 + $0x78] sm:$0xff] %vm200_vm1, %v2897_v3  ;;  %v3235_v37 = vadd.f32 %v5159_v15, %v2992_v21 }
 0x263   : > { %v2161_v44 = vpop.f32.mrf.mxu1 }
 0x264   : > { %v3298_v45 = vld [vmem:[#allocation2 + $0x68] sm:$0xff]  ;;  %3267 = vst.msk [vmem:[#allocation2 + $0x70] sm:$0xff] %vm200_vm1, %v3235_v37  ;;  %v2221_v46 = vadd.f32 %v2161_v44, %v1978_v43  ;;  %v2837_v47 = vpop.f32.mrf.mxu3 }
 0x265   : > { %v3343_v48 = vsel %vm200_vm1, %v3298_v45, 0.0  ;;  %v3404_v49 = vmul.f32 %v3298_v45, %v3298_v45  ;;  %3507 = vst.msk [vmem:[%s4153_s22 + $0x68] sm:$0xff] %vm200_vm1, %v3298_v45  ;;  %v2317_v50 = vld [vmem:[#allocation2 + $0x88] sm:$0xff] }
 0x266   : > { %v3344_v51 = vadd.f32 %v3343_v48, %v3342_v31  ;;  %2253 = vst.msk [vmem:[#allocation2 + $0x90] sm:$0xff] %vm200_vm1, %v2221_v46  ;;  %v2560_v52 = vadd.f32 %v2498_v41, %v2317_v50  ;;  %v5213_v53 = vpop.f32.mrf.mxu0 }
 0x267   : > { %v3448_v15 = vsel %vm200_vm1, %v3404_v49, 0.0  ;;  %v2655_v29 = vld [vmem:[#allocation2 + $0x80] sm:$0xff] }
 0x268   : > { %v3449_v54 = vadd.f32 %v3448_v15, %v3447_v39  ;;  %2592 = vst.msk [vmem:[#allocation2 + $0x88] sm:$0xff] %vm200_vm1, %v2560_v52  ;;  %v2898_v55 = vadd.f32 %v2834_v30, %v2655_v29 }
 0x269   : > { %v2993_v4 = vld [vmem:[#allocation2 + $0x78] sm:$0xff] }
 0x26a   : > { %v2501_v22 = vpop.f32.mrf.mxu2  ;;  %2930 = vst.msk [vmem:[#allocation2 + $0x80] sm:$0xff] %vm200_vm1, %v2898_v55  ;;  %v3236_v23 = vadd.f32 %v5178_v58, %v2993_v4 }
 0x26b   : > { %v3299_v18 = vld [vmem:[#allocation2 + $0x70] sm:$0xff]  ;;  %v2164_v60 = vpop.f32.mrf.mxu1 }
 0x26c   : > { %v3345_v61 = vsel %vm200_vm1, %v3299_v18, 0.0  ;;  %v3405_v62 = vmul.f32 %v3299_v18, %v3299_v18  ;;  %3508 = vst.msk [vmem:[%s4153_s22 + $0x70] sm:$0xff] %vm200_vm1, %v3299_v18  ;;  %v2222_v63 = vadd.f32 %v2164_v60, %v1979_v56  ;;  %v2840_v0 = vpop.f32.mrf.mxu3 }
 0x26d   : > { %v3346_v34 = vadd.f32 %v3345_v61, %v3344_v51  ;;  %3268 = vst.msk [vmem:[#allocation2 + $0x78] sm:$0xff] %vm200_vm1, %v3236_v23  ;;  %v2318_v1 = vld [vmem:[#allocation2 + $0x90] sm:$0xff] }
 0x26e   : > { %v3450_v2 = vsel %vm200_vm1, %v3405_v62, 0.0  ;;  %2254 = vst.msk [vmem:[#allocation2 + $0x98] sm:$0xff] %vm200_vm1, %v2222_v63  ;;  %v2561_v11 = vadd.f32 %v2501_v22, %v2318_v1  ;;  %v5225_v58 = vpop.f32.mrf.mxu0  ;;  %v1982_v51 = vld [vmem:[#allocation2 + $0xb0] sm:$0xff]  ;;  %v1983_v1 = vld [vmem:[#allocation2 + $0xb8] sm:$0xff] }
 0x26f   : > { %v3451_v5 = vadd.f32 %v3450_v2, %v3449_v54  ;;  %v2656_v28 = vld [vmem:[#allocation2 + $0x88] sm:$0xff] }
 0x270   : > { %2593 = vst.msk [vmem:[#allocation2 + $0x90] sm:$0xff] %vm200_vm1, %v2561_v11  ;;  %v2899_v6 = vadd.f32 %v2837_v47, %v2656_v28 }
 0x271   : > { %v2994_v7 = vld [vmem:[#allocation2 + $0x80] sm:$0xff] }
 0x272   : > { %v2504_v8 = vpop.f32.mrf.mxu2  ;;  %2931 = vst.msk [vmem:[#allocation2 + $0x88] sm:$0xff] %vm200_vm1, %v2899_v6  ;;  %v3237_v9 = vadd.f32 %v5191_v57, %v2994_v7 }
 0x273   : > { %v2167_v12 = vpop.f32.mrf.mxu1 }
 0x274   : > { %v3300_v42 = vld [vmem:[#allocation2 + $0x78] sm:$0xff]  ;;  %3269 = vst.msk [vmem:[#allocation2 + $0x80] sm:$0xff] %vm200_vm1, %v3237_v9  ;;  %v2223_v59 = vadd.f32 %v2167_v12, %v1980_v10  ;;  %v2843_v13 = vpop.f32.mrf.mxu3 }
 0x275   : > { %v3347_v16 = vsel %vm200_vm1, %v3300_v42, 0.0  ;;  %v3406_v17 = vmul.f32 %v3300_v42, %v3300_v42  ;;  %3509 = vst.msk [vmem:[%s4153_s22 + $0x78] sm:$0xff] %vm200_vm1, %v3300_v42  ;;  %v2319_v20 = vld [vmem:[#allocation2 + $0x98] sm:$0xff] }
 0x276   : > { %v3348_v14 = vadd.f32 %v3347_v16, %v3346_v34  ;;  %2255 = vst.msk [vmem:[#allocation2 + $0xa0] sm:$0xff] %vm200_vm1, %v2223_v59  ;;  %v2562_v24 = vadd.f32 %v2504_v8, %v2319_v20  ;;  %v5237_v19 = vpop.f32.mrf.mxu0  ;;  %v1984_v20 = vld [vmem:[#allocation2 + $0xc0] sm:$0xff] }
 0x277   : > { %v3452_v57 = vsel %vm200_vm1, %v3406_v17, 0.0  ;;  %v2657_v33 = vld [vmem:[#allocation2 + $0x90] sm:$0xff] }
 0x278   : > { %v3453_v25 = vadd.f32 %v3452_v57, %v3451_v5  ;;  %2594 = vst.msk [vmem:[#allocation2 + $0x98] sm:$0xff] %vm200_vm1, %v2562_v24  ;;  %v2900_v26 = vadd.f32 %v2840_v0, %v2657_v33 }
 0x279   : > { %v2995_v27 = vld [vmem:[#allocation2 + $0x88] sm:$0xff] }
 0x27a   : > { %v2507_v30 = vpop.f32.mrf.mxu2  ;;  %2932 = vst.msk [vmem:[#allocation2 + $0x90] sm:$0xff] %vm200_vm1, %v2900_v26  ;;  %v3238_v31 = vadd.f32 %v5203_v38, %v2995_v27 }
 0x27b   : > { %v3301_v32 = vld [vmem:[#allocation2 + $0x80] sm:$0xff]  ;;  %v2170_v36 = vpop.f32.mrf.mxu1 }
 0x27c   : > { %v3349_v39 = vsel %vm200_vm1, %v3301_v32, 0.0  ;;  %v3407_v40 = vmul.f32 %v3301_v32, %v3301_v32  ;;  %3510 = vst.msk [vmem:[%s4153_s22 + $0x80] sm:$0xff] %vm200_vm1, %v3301_v32  ;;  %v2224_v3 = vadd.f32 %v2170_v36, %v1981_v35  ;;  %v2846_v21 = vpop.f32.mrf.mxu3 }
 0x27d   : > { %v3350_v41 = vadd.f32 %v3349_v39, %v3348_v14  ;;  %3270 = vst.msk [vmem:[#allocation2 + $0x88] sm:$0xff] %vm200_vm1, %v3238_v31  ;;  %v2320_v37 = vld [vmem:[#allocation2 + $0xa0] sm:$0xff] }
 0x27e   : > { %v3454_v43 = vsel %vm200_vm1, %v3407_v40, 0.0  ;;  %2256 = vst.msk [vmem:[#allocation2 + $0xa8] sm:$0xff] %vm200_vm1, %v2224_v3  ;;  %v2563_v44 = vadd.f32 %v2507_v30, %v2320_v37  ;;  %v5250_v50 = vpop.f32.mrf.mxu0  ;;  %v1985_v37 = vld [vmem:[#allocation2 + $0xc8] sm:$0xff] }
 0x27f   : > { %v3455_v38 = vadd.f32 %v3454_v43, %v3453_v25  ;;  %v2658_v45 = vld [vmem:[#allocation2 + $0x98] sm:$0xff] }
 0x280   : > { %2595 = vst.msk [vmem:[#allocation2 + $0xa0] sm:$0xff] %vm200_vm1, %v2563_v44  ;;  %v2901_v46 = vadd.f32 %v2843_v13, %v2658_v45 }
 0x281   : > { %v2996_v47 = vld [vmem:[#allocation2 + $0x90] sm:$0xff] }
 0x282   : > { %v2510_v48 = vpop.f32.mrf.mxu2  ;;  %2933 = vst.msk [vmem:[#allocation2 + $0x98] sm:$0xff] %vm200_vm1, %v2901_v46  ;;  %v3239_v49 = vadd.f32 %v5213_v53, %v2996_v47 }
 0x283   : > { %v2173_v52 = vpop.f32.mrf.mxu1 }
 0x284   : > { %v3302_v15 = vld [vmem:[#allocation2 + $0x88] sm:$0xff]  ;;  %3271 = vst.msk [vmem:[#allocation2 + $0x90] sm:$0xff] %vm200_vm1, %v3239_v49  ;;  %v2225_v29 = vadd.f32 %v2173_v52, %v1982_v51  ;;  %v2849_v54 = vpop.f32.mrf.mxu3 }
 0x285   : > { %v3351_v55 = vsel %vm200_vm1, %v3302_v15, 0.0  ;;  %v3408_v4 = vmul.f32 %v3302_v15, %v3302_v15  ;;  %3511 = vst.msk [vmem:[%s4153_s22 + $0x88] sm:$0xff] %vm200_vm1, %v3302_v15  ;;  %v2321_v22 = vld [vmem:[#allocation2 + $0xa8] sm:$0xff] }
 0x286   : > { %v3352_v23 = vadd.f32 %v3351_v55, %v3350_v41  ;;  %2257 = vst.msk [vmem:[#allocation2 + $0xb0] sm:$0xff] %vm200_vm1, %v2225_v29  ;;  %v2564_v53 = vadd.f32 %v2510_v48, %v2321_v22  ;;  %v3191_v7 = vpop.f32.mrf.mxu0  ;;  %v1986_v22 = vld [vmem:[#allocation2 + $0xd0] sm:$0xff] }
 0x287   : > { %v3456_v18 = vsel %vm200_vm1, %v3408_v4, 0.0  ;;  %v2659_v56 = vld [vmem:[#allocation2 + $0xa0] sm:$0xff] }
 0x288   : > { %v3457_v60 = vadd.f32 %v3456_v18, %v3455_v38  ;;  %2596 = vst.msk [vmem:[#allocation2 + $0xa8] sm:$0xff] %vm200_vm1, %v2564_v53  ;;  %v2902_v61 = vadd.f32 %v2846_v21, %v2659_v56 }
 0x289   : > { %v2997_v62 = vld [vmem:[#allocation2 + $0x98] sm:$0xff] }
 0x28a   : > { %v2513_v63 = vpop.f32.mrf.mxu2  ;;  %2934 = vst.msk [vmem:[#allocation2 + $0xa0] sm:$0xff] %vm200_vm1, %v2902_v61  ;;  %v3240_v0 = vadd.f32 %v5225_v58, %v2997_v62 }
 0x28b   : > { %v3303_v34 = vld [vmem:[#allocation2 + $0x90] sm:$0xff]  ;;  %v2176_v2 = vpop.f32.mrf.mxu1 }
 0x28c   : > { %v3353_v11 = vsel %vm200_vm1, %v3303_v34, 0.0  ;;  %v3409_v5 = vmul.f32 %v3303_v34, %v3303_v34  ;;  %3512 = vst.msk [vmem:[%s4153_s22 + $0x90] sm:$0xff] %vm200_vm1, %v3303_v34  ;;  %v2226_v28 = vadd.f32 %v2176_v2, %v1983_v1  ;;  %v2852_v6 = vpop.f32.mrf.mxu3 }
 0x28d   : > { %v3354_v8 = vadd.f32 %v3353_v11, %v3352_v23  ;;  %3272 = vst.msk [vmem:[#allocation2 + $0x98] sm:$0xff] %vm200_vm1, %v3240_v0  ;;  %v2322_v9 = vld [vmem:[#allocation2 + $0xb0] sm:$0xff] }
 0x28e   : > { %v3458_v10 = vsel %vm200_vm1, %v3409_v5, 0.0  ;;  %2258 = vst.msk [vmem:[#allocation2 + $0xb8] sm:$0xff] %vm200_vm1, %v2226_v28  ;;  %v2565_v58 = vadd.f32 %v2513_v63, %v2322_v9  ;;  %v3194_v32 = vpop.f32.mrf.mxu0  ;;  %v1987_v5 = vld [vmem:[#allocation2 + $0xd8] sm:$0xff] }
 0x28f   : > { %v3459_v12 = vadd.f32 %v3458_v10, %v3457_v60  ;;  %v2660_v42 = vld [vmem:[#allocation2 + $0xa8] sm:$0xff] }
 0x290   : > { %2597 = vst.msk [vmem:[#allocation2 + $0xb0] sm:$0xff] %vm200_vm1, %v2565_v58  ;;  %v2903_v59 = vadd.f32 %v2849_v54, %v2660_v42 }
 0x291   : > { %v2998_v13 = vld [vmem:[#allocation2 + $0xa0] sm:$0xff] }
 0x292   : > { %v2516_v16 = vpop.f32.mrf.mxu2  ;;  %2935 = vst.msk [vmem:[#allocation2 + $0xa8] sm:$0xff] %vm200_vm1, %v2903_v59  ;;  %v3241_v17 = vadd.f32 %v5237_v19, %v2998_v13  ;;  %v1988_v13 = vld [vmem:[#allocation2 + $0xe0] sm:$0xff] }
 0x293   : > { %v2179_v14 = vpop.f32.mrf.mxu1 }
 0x294   : > { %v3304_v24 = vld [vmem:[#allocation2 + $0x98] sm:$0xff]  ;;  %3273 = vst.msk [vmem:[#allocation2 + $0xa0] sm:$0xff] %vm200_vm1, %v3241_v17  ;;  %v2227_v57 = vadd.f32 %v2179_v14, %v1984_v20  ;;  %v2855_v33 = vpop.f32.mrf.mxu3 }
 0x295   : > { %v3355_v25 = vsel %vm200_vm1, %v3304_v24, 0.0  ;;  %v3410_v26 = vmul.f32 %v3304_v24, %v3304_v24  ;;  %3513 = vst.msk [vmem:[%s4153_s22 + $0x98] sm:$0xff] %vm200_vm1, %v3304_v24  ;;  %v2323_v27 = vld [vmem:[#allocation2 + $0xb8] sm:$0xff] }
 0x296   : > { %v3356_v30 = vadd.f32 %v3355_v25, %v3354_v8  ;;  %2259 = vst.msk [vmem:[#allocation2 + $0xc0] sm:$0xff] %vm200_vm1, %v2227_v57  ;;  %v2566_v31 = vadd.f32 %v2516_v16, %v2323_v27  ;;  %v3197_v29 = vpop.f32.mrf.mxu0 }
 0x297   : > { %v3460_v19 = vsel %vm200_vm1, %v3410_v26, 0.0  ;;  %v2661_v35 = vld [vmem:[#allocation2 + $0xb0] sm:$0xff] }
 0x298   : > { %v3461_v36 = vadd.f32 %v3460_v19, %v3459_v12  ;;  %2598 = vst.msk [vmem:[#allocation2 + $0xb8] sm:$0xff] %vm200_vm1, %v2566_v31  ;;  %v2904_v39 = vadd.f32 %v2852_v6, %v2661_v35  ;;  %v1989_v19 = vld [vmem:[#allocation2 + $0xe8] sm:$0xff] }
 0x299   : > { %v2999_v40 = vld [vmem:[#allocation2 + $0xa8] sm:$0xff] }
 0x29a   : > { %v2519_v3 = vpop.f32.mrf.mxu2  ;;  %2936 = vst.msk [vmem:[#allocation2 + $0xb0] sm:$0xff] %vm200_vm1, %v2904_v39  ;;  %v3242_v21 = vadd.f32 %v5250_v50, %v2999_v40 }
 0x29b   : > { %v3305_v41 = vld [vmem:[#allocation2 + $0xa0] sm:$0xff]  ;;  %v2182_v43 = vpop.f32.mrf.mxu1 }
 0x29c   : > { %v3357_v44 = vsel %vm200_vm1, %v3305_v41, 0.0  ;;  %v3411_v38 = vmul.f32 %v3305_v41, %v3305_v41  ;;  %3514 = vst.msk [vmem:[%s4153_s22 + $0xa0] sm:$0xff] %vm200_vm1, %v3305_v41  ;;  %v2228_v45 = vadd.f32 %v2182_v43, %v1985_v37  ;;  %v2858_v46 = vpop.f32.mrf.mxu3 }
 0x29d   : > { %v5282_v47 = vadd.f32 %v3357_v44, %v3356_v30  ;;  %3274 = vst.msk [vmem:[#allocation2 + $0xa8] sm:$0xff] %vm200_vm1, %v3242_v21  ;;  %v2324_v48 = vld [vmem:[#allocation2 + $0xc0] sm:$0xff] }
 0x29e   : > { %v3462_v49 = vsel %vm200_vm1, %v3411_v38, 0.0  ;;  %2260 = vst.msk [vmem:[#allocation2 + $0xc8] sm:$0xff] %vm200_vm1, %v2228_v45  ;;  %v2567_v50 = vadd.f32 %v2519_v3, %v2324_v48  ;;  %v3200_v2 = vpop.f32.mrf.mxu0  ;;  %v1990_v45 = vld [vmem:[#allocation2 + $0xf0] sm:$0xff] }
 0x29f   : > { %v5287_v51 = vadd.f32 %v3462_v49, %v3461_v36  ;;  %v2662_v52 = vld [vmem:[#allocation2 + $0xb8] sm:$0xff] }
 0x2a0   : > { %2599 = vst.msk [vmem:[#allocation2 + $0xc0] sm:$0xff] %vm200_vm1, %v2567_v50  ;;  %v2905_v15 = vadd.f32 %v2855_v33, %v2662_v52 }
 0x2a1   : > { %v3000_v54 = vld [vmem:[#allocation2 + $0xb0] sm:$0xff] }
 0x2a2   : > { %v2522_v55 = vpop.f32.mrf.mxu2  ;;  %2937 = vst.msk [vmem:[#allocation2 + $0xb8] sm:$0xff] %vm200_vm1, %v2905_v15  ;;  %v3243_v4 = vadd.f32 %v3191_v7, %v3000_v54 }
 0x2a3   : > { %v2185_v23 = vpop.f32.mrf.mxu1 }
 0x2a4   : > { %v5291_v53 = vld [vmem:[#allocation2 + $0xa8] sm:$0xff]  ;;  %3275 = vst.msk [vmem:[#allocation2 + $0xb0] sm:$0xff] %vm200_vm1, %v3243_v4  ;;  %v2229_v18 = vadd.f32 %v2185_v23, %v1986_v22  ;;  %v2861_v56 = vpop.f32.mrf.mxu3 }
 0x2a5   : > { %3515 = vst.msk [vmem:[%s4153_s22 + $0xa8] sm:$0xff] %vm200_vm1, %v5291_v53  ;;  %v2325_v60 = vld [vmem:[#allocation2 + $0xc8] sm:$0xff] }
 0x2a6   : > { %2261 = vst.msk [vmem:[#allocation2 + $0xd0] sm:$0xff] %vm200_vm1, %v2229_v18  ;;  %v2568_v61 = vadd.f32 %v2522_v55, %v2325_v60  ;;  %v3203_v14 = vpop.f32.mrf.mxu0 }
 0x2a7   : > { %v2663_v62 = vld [vmem:[#allocation2 + $0xc0] sm:$0xff] }
 0x2a8   : > { %2600 = vst.msk [vmem:[#allocation2 + $0xc8] sm:$0xff] %vm200_vm1, %v2568_v61  ;;  %v2906_v63 = vadd.f32 %v2858_v46, %v2663_v62 }
 0x2a9   : > { %v3001_v0 = vld [vmem:[#allocation2 + $0xb8] sm:$0xff] }
 0x2aa   : > { %v2525_v34 = vpop.f32.mrf.mxu2  ;;  %2938 = vst.msk [vmem:[#allocation2 + $0xc0] sm:$0xff] %vm200_vm1, %v2906_v63  ;;  %v3244_v1 = vadd.f32 %v3194_v32, %v3001_v0 }
 0x2ab   : > { %v5300_v11 = vld [vmem:[#allocation2 + $0xb0] sm:$0xff]  ;;  %v2188_v28 = vpop.f32.mrf.mxu1 }
 0x2ac   : > { %3516 = vst.msk [vmem:[%s4153_s22 + $0xb0] sm:$0xff] %vm200_vm1, %v5300_v11  ;;  %v2230_v6 = vadd.f32 %v2188_v28, %v1987_v5  ;;  %v2864_v7 = vpop.f32.mrf.mxu3 }
 0x2ad   : > { %3276 = vst.msk [vmem:[#allocation2 + $0xb8] sm:$0xff] %vm200_vm1, %v3244_v1  ;;  %v2326_v8 = vld [vmem:[#allocation2 + $0xd0] sm:$0xff] }
 0x2ae   : > { %2262 = vst.msk [vmem:[#allocation2 + $0xd8] sm:$0xff] %vm200_vm1, %v2230_v6  ;;  %v2569_v9 = vadd.f32 %v2525_v34, %v2326_v8  ;;  %v3206_v3 = vpop.f32.mrf.mxu0 }
 0x2af   : > { %v2664_v10 = vld [vmem:[#allocation2 + $0xc8] sm:$0xff] }
 0x2b0   : > { %2601 = vst.msk [vmem:[#allocation2 + $0xd0] sm:$0xff] %vm200_vm1, %v2569_v9  ;;  %v2907_v58 = vadd.f32 %v2861_v56, %v2664_v10  ;;  %v1991_v56 = vld [vmem:[#allocation2 + $0xf8] sm:$0xff] }
 0x2b1   : > { %v3002_v12 = vld [vmem:[#allocation2 + $0xc0] sm:$0xff] }
 0x2b2   : > { %v2528_v42 = vpop.f32.mrf.mxu2  ;;  %2939 = vst.msk [vmem:[#allocation2 + $0xc8] sm:$0xff] %vm200_vm1, %v2907_v58  ;;  %v3245_v59 = vadd.f32 %v3197_v29, %v3002_v12 }
 0x2b3   : > { %v2191_v16 = vpop.f32.mrf.mxu1 }
 0x2b4   : > { %v5309_v17 = vld [vmem:[#allocation2 + $0xb8] sm:$0xff]  ;;  %3277 = vst.msk [vmem:[#allocation2 + $0xc0] sm:$0xff] %vm200_vm1, %v3245_v59  ;;  %v2231_v20 = vadd.f32 %v2191_v16, %v1988_v13  ;;  %v2867_v57 = vpop.f32.mrf.mxu3  ;;  %v3412_v13 = vmul.f32 %v5291_v53, %v5291_v53 }
 0x2b5   : > { %3517 = vst.msk [vmem:[%s4153_s22 + $0xb8] sm:$0xff] %vm200_vm1, %v5309_v17  ;;  %v2327_v24 = vld [vmem:[#allocation2 + $0xd8] sm:$0xff] }
 0x2b6   : > { %2263 = vst.msk [vmem:[#allocation2 + $0xe0] sm:$0xff] %vm200_vm1, %v2231_v20  ;;  %v2570_v33 = vadd.f32 %v2528_v42, %v2327_v24  ;;  %v3209_v54 = vpop.f32.mrf.mxu0  ;;  %v3413_v24 = vmul.f32 %v5300_v11, %v5300_v11 }
 0x2b7   : > { %v2665_v25 = vld [vmem:[#allocation2 + $0xd0] sm:$0xff] }
 0x2b8   : > { %2602 = vst.msk [vmem:[#allocation2 + $0xd8] sm:$0xff] %vm200_vm1, %v2570_v33  ;;  %v2908_v26 = vadd.f32 %v2864_v7, %v2665_v25  ;;  %v3464_v25 = vsel %vm200_vm1, %v3412_v13, 0.0 }
 0x2b9   : > { %v3003_v27 = vld [vmem:[#allocation2 + $0xc8] sm:$0xff] }
 0x2ba   : > { %v2531_v30 = vpop.f32.mrf.mxu2  ;;  %2940 = vst.msk [vmem:[#allocation2 + $0xd0] sm:$0xff] %vm200_vm1, %v2908_v26  ;;  %v3246_v31 = vadd.f32 %v3200_v2, %v3003_v27  ;;  %v3361_v26 = vsel %vm200_vm1, %v5300_v11, 0.0  ;;  %v3414_v27 = vmul.f32 %v5309_v17, %v5309_v17  ;;  %v3465_v11 = vadd.f32 %v3464_v25, %v5287_v51 }
 0x2bb   : > { %v5318_v32 = vld [vmem:[#allocation2 + $0xc0] sm:$0xff]  ;;  %v2194_v35 = vpop.f32.mrf.mxu1 }
 0x2bc   : > { %3518 = vst.msk [vmem:[%s4153_s22 + $0xc0] sm:$0xff] %vm200_vm1, %v5318_v32  ;;  %v2232_v36 = vadd.f32 %v2194_v35, %v1989_v19  ;;  %v2870_v41 = vpop.f32.mrf.mxu3  ;;  %v3466_v19 = vsel %vm200_vm1, %v3413_v24, 0.0  ;;  %v3363_v35 = vsel %vm200_vm1, %v5309_v17, 0.0 }
 0x2bd   : > { %3278 = vst.msk [vmem:[#allocation2 + $0xc8] sm:$0xff] %vm200_vm1, %v3246_v31  ;;  %v2328_v39 = vld [vmem:[#allocation2 + $0xe0] sm:$0xff]  ;;  %v3467_v17 = vadd.f32 %v3466_v19, %v3465_v11 }
 0x2be   : > { %2264 = vst.msk [vmem:[#allocation2 + $0xe8] sm:$0xff] %vm200_vm1, %v2232_v36  ;;  %v2571_v40 = vadd.f32 %v2531_v30, %v2328_v39  ;;  %v3212_v5 = vpop.f32.mrf.mxu0  ;;  %v3415_v36 = vmul.f32 %v5318_v32, %v5318_v32 }
 0x2bf   : > { %v2666_v21 = vld [vmem:[#allocation2 + $0xd8] sm:$0xff] }
 0x2c0   : > { %2603 = vst.msk [vmem:[#allocation2 + $0xe0] sm:$0xff] %vm200_vm1, %v2571_v40  ;;  %v2909_v37 = vadd.f32 %v2867_v57, %v2666_v21 }
 0x2c1   : > { %v3004_v43 = vld [vmem:[#allocation2 + $0xd0] sm:$0xff] }
 0x2c2   : > { %v2534_v44 = vpop.f32.mrf.mxu2  ;;  %2941 = vst.msk [vmem:[#allocation2 + $0xd8] sm:$0xff] %vm200_vm1, %v2909_v37  ;;  %v3247_v38 = vadd.f32 %v3203_v14, %v3004_v43  ;;  %v3359_v14 = vsel %vm200_vm1, %v5291_v53, 0.0  ;;  %v3470_v37 = vsel %vm200_vm1, %v3415_v36, 0.0  ;;  %v3390_v36 = vld [vmem:[%s5423_s4] sm:$0x1] }
 0x2c3   : > { %v2197_v46 = vpop.f32.mrf.mxu1  ;;  %v3360_v31 = vadd.f32 %v3359_v14, %v5282_v47  ;;  %v3365_v47 = vsel %vm200_vm1, %v5318_v32, 0.0 }
 0x2c4   : > { %v5327_v48 = vld [vmem:[#allocation2 + $0xc8] sm:$0xff]  ;;  %3279 = vst.msk [vmem:[#allocation2 + $0xd0] sm:$0xff] %vm200_vm1, %v3247_v38  ;;  %v2233_v49 = vadd.f32 %v2197_v46, %v1990_v45  ;;  %v2873_v22 = vpop.f32.mrf.mxu3 }
 0x2c5   : > { %3519 = vst.msk [vmem:[%s4153_s22 + $0xc8] sm:$0xff] %vm200_vm1, %v5327_v48  ;;  %v2329_v50 = vld [vmem:[#allocation2 + $0xe8] sm:$0xff]  ;;  %v3362_v39 = vadd.f32 %v3361_v26, %v3360_v31  ;;  %v3416_v21 = vmul.f32 %v5327_v48, %v5327_v48  ;;  %v3367_v51 = vsel %vm200_vm1, %v5327_v48, 0.0 }
 0x2c6   : > { %2265 = vst.msk [vmem:[#allocation2 + $0xf0] sm:$0xff] %vm200_vm1, %v2233_v49  ;;  %v2572_v52 = vadd.f32 %v2534_v44, %v2329_v50  ;;  %v3215_v20 = vpop.f32.mrf.mxu0 }
 0x2c7   : > { %v2667_v15 = vld [vmem:[#allocation2 + $0xe0] sm:$0xff]  ;;  %v3472_v32 = vsel %vm200_vm1, %v3416_v21, 0.0 }
 0x2c8   : > { %2604 = vst.msk [vmem:[#allocation2 + $0xe8] sm:$0xff] %vm200_vm1, %v2572_v52  ;;  %v2910_v29 = vadd.f32 %v2870_v41, %v2667_v15  ;;  %v3364_v41 = vadd.f32 %v3363_v35, %v3362_v39 }
 0x2c9   : > { %v3005_v55 = vld [vmem:[#allocation2 + $0xd8] sm:$0xff] }
 0x2ca   : > { %v2537_v4 = vpop.f32.mrf.mxu2  ;;  %2942 = vst.msk [vmem:[#allocation2 + $0xe0] sm:$0xff] %vm200_vm1, %v2910_v29  ;;  %v3248_v23 = vadd.f32 %v3206_v3, %v3005_v55  ;;  %v3468_v3 = vsel %vm200_vm1, %v3414_v27, 0.0  ;;  %v3366_v45 = vadd.f32 %v3365_v47, %v3364_v41 }
 0x2cb   : > { %v5336_v18 = vld [vmem:[#allocation2 + $0xd0] sm:$0xff]  ;;  %v2200_v60 = vpop.f32.mrf.mxu1  ;;  %v3469_v38 = vadd.f32 %v3468_v3, %v3467_v17 }
 0x2cc   : > { %3520 = vst.msk [vmem:[%s4153_s22 + $0xd0] sm:$0xff] %vm200_vm1, %v5336_v18  ;;  %v2234_v61 = vadd.f32 %v2200_v60, %v1991_v56  ;;  %v2876_v6 = vpop.f32.mrf.mxu3  ;;  %v3417_v43 = vmul.f32 %v5336_v18, %v5336_v18  ;;  %v3369_v46 = vsel %vm200_vm1, %v5336_v18, 0.0  ;;  %v3368_v15 = vadd.f32 %v3367_v51, %v3366_v45 }
 0x2cd   : > { %3280 = vst.msk [vmem:[#allocation2 + $0xd8] sm:$0xff] %vm200_vm1, %v3248_v23  ;;  %v2330_v62 = vld [vmem:[#allocation2 + $0xf0] sm:$0xff]  ;;  %v3471_v52 = vadd.f32 %v3470_v37, %v3469_v38 }
 0x2ce   : > { %2266 = vst.msk [vmem:[#allocation2 + $0xf8] sm:$0xff] %vm200_vm1, %v2234_v61  ;;  %v2573_v63 = vadd.f32 %v2537_v4, %v2330_v62  ;;  %v3218_v44 = vpop.f32.mrf.mxu0  ;;  %v3370_v23 = vadd.f32 %v3369_v46, %v3368_v15 }
 0x2cf   : > { %v2668_v0 = vld [vmem:[#allocation2 + $0xe8] sm:$0xff] }
 0x2d0   : > { %2605 = vst.msk [vmem:[#allocation2 + $0xf0] sm:$0xff] %vm200_vm1, %v2573_v63  ;;  %v2911_v34 = vadd.f32 %v2873_v22, %v2668_v0  ;;  %v3473_v22 = vadd.f32 %v3472_v32, %v3471_v52 }
 0x2d1   : > { %v3006_v1 = vld [vmem:[#allocation2 + $0xe0] sm:$0xff] }
 0x2d2   : > { %2943 = vst.msk [vmem:[#allocation2 + $0xe8] sm:$0xff] %vm200_vm1, %v2911_v34  ;;  %v3249_v2 = vadd.f32 %v3209_v54, %v3006_v1  ;;  %v2540_v28 = vpop.f32.mrf.mxu2  ;;  %v3474_v54 = vsel %vm200_vm1, %v3417_v43, 0.0 }
 0x2d3   : > { %v3475_v61 = vadd.f32 %v3474_v54, %v3473_v22 }
 0x2d4   : > { %v3312_v7 = vld [vmem:[#allocation2 + $0xd8] sm:$0xff]  ;;  %3281 = vst.msk [vmem:[#allocation2 + $0xe0] sm:$0xff] %vm200_vm1, %v3249_v2  ;;  %v2879_v16 = vpop.f32.mrf.mxu3 }
 0x2d5   : > { %3521 = vst.msk [vmem:[%s4153_s22 + $0xd8] sm:$0xff] %vm200_vm1, %v3312_v7  ;;  %v2331_v8 = vld [vmem:[#allocation2 + $0xf8] sm:$0xff]  ;;  %v3418_v49 = vmul.f32 %v3312_v7, %v3312_v7  ;;  %v3371_v48 = vsel %vm200_vm1, %v3312_v7, 0.0 }
 0x2d6   : > { %v2574_v9 = vadd.f32 %v2540_v28, %v2331_v8  ;;  %v3372_v62 = vadd.f32 %v3371_v48, %v3370_v23 }
 0x2d7   : > { %v2669_v10 = vld [vmem:[#allocation2 + $0xf0] sm:$0xff]  ;;  %v3476_v56 = vsel %vm200_vm1, %v3418_v49, 0.0 }
 0x2d8   : > { %2606 = vst.msk [vmem:[#allocation2 + $0xf8] sm:$0xff] %vm200_vm1, %v2574_v9  ;;  %v2912_v58 = vadd.f32 %v2876_v6, %v2669_v10  ;;  %v3477_v1 = vadd.f32 %v3476_v56, %v3475_v61 }
 0x2d9   : > { %v3007_v12 = vld [vmem:[#allocation2 + $0xe8] sm:$0xff] }
 0x2da   : > { %2944 = vst.msk [vmem:[#allocation2 + $0xf0] sm:$0xff] %vm200_vm1, %v2912_v58  ;;  %v3250_v42 = vadd.f32 %v3212_v5, %v3007_v12 }
 0x2db   : > { %v3313_v59 = vld [vmem:[#allocation2 + $0xe0] sm:$0xff] }
 0x2dc   : > { %3522 = vst.msk [vmem:[%s4153_s22 + $0xe0] sm:$0xff] %vm200_vm1, %v3313_v59  ;;  %v3419_v55 = vmul.f32 %v3313_v59, %v3313_v59  ;;  %v3373_v60 = vsel %vm200_vm1, %v3313_v59, 0.0 }
 0x2dd   : > { %3282 = vst.msk [vmem:[#allocation2 + $0xe8] sm:$0xff] %vm200_vm1, %v3250_v42  ;;  %v3374_v2 = vadd.f32 %v3373_v60, %v3372_v62 }
 0x2de   : > { %v3478_v63 = vsel %vm200_vm1, %v3419_v55, 0.0 }
 0x2df   : > { %v2670_v57 = vld [vmem:[#allocation2 + $0xf8] sm:$0xff]  ;;  %v3479_v6 = vadd.f32 %v3478_v63, %v3477_v1 }
 0x2e0   : > { %v2913_v33 = vadd.f32 %v2879_v16, %v2670_v57 }
 0x2e1   : > { %v3008_v30 = vld [vmem:[#allocation2 + $0xf0] sm:$0xff] }
 0x2e2   : > { %2945 = vst.msk [vmem:[#allocation2 + $0xf8] sm:$0xff] %vm200_vm1, %v2913_v33  ;;  %v3251_v53 = vadd.f32 %v3215_v20, %v3008_v30 }
 0x2e4   : > { %v3314_v40 = vld [vmem:[#allocation2 + $0xe8] sm:$0xff]  ;;  %3283 = vst.msk [vmem:[#allocation2 + $0xf0] sm:$0xff] %vm200_vm1, %v3251_v53  ;;  %v3317_v53 = vld [vmem:[%s5422_s3] sm:$0x1] }
 0x2e5   : > { %3523 = vst.msk [vmem:[%s4153_s22 + $0xe8] sm:$0xff] %vm200_vm1, %v3314_v40  ;;  %v3420_v18 = vmul.f32 %v3314_v40, %v3314_v40  ;;  %v3375_v0 = vsel %vm200_vm1, %v3314_v40, 0.0 }
 0x2e6   : > { %v3376_v7 = vadd.f32 %v3375_v0, %v3374_v2 }
 0x2e7   : > { %v3480_v5 = vsel %vm200_vm1, %v3420_v18, 0.0 }
 0x2e8   : > { %v3481_v9 = vadd.f32 %v3480_v5, %v3479_v6 }
 0x2e9   : > { %v3009_v50 = vld [vmem:[#allocation2 + $0xf8] sm:$0xff] }
 0x2ea   : > { %v3252_v29 = vadd.f32 %v3218_v44, %v3009_v50 }
 0x2eb   : > { %v3315_v4 = vld [vmem:[#allocation2 + $0xf0] sm:$0xff] }
 0x2ec   : > { %3524 = vst.msk [vmem:[%s4153_s22 + $0xf0] sm:$0xff] %vm200_vm1, %v3315_v4  ;;  %v3421_v34 = vmul.f32 %v3315_v4, %v3315_v4  ;;  %v3377_v28 = vsel %vm200_vm1, %v3315_v4, 0.0 }
 0x2ed   : > { %3284 = vst.msk [vmem:[#allocation2 + $0xf8] sm:$0xff] %vm200_vm1, %v3252_v29  ;;  %v3378_v10 = vadd.f32 %v3377_v28, %v3376_v7 }
 0x2ee   : > { %v3482_v8 = vsel %vm200_vm1, %v3421_v34, 0.0 }
 0x2ef   : > { %v3483_v59 = vadd.f32 %v3482_v8, %v3481_v9 }
 0x2f4   : > { %v3316_v58 = vld [vmem:[#allocation2 + $0xf8] sm:$0xff] }
 0x2f5   : > { %v3379_v12 = vsel %vm200_vm1, %v3316_v58, 0.0  ;;  %v3422_v42 = vmul.f32 %v3316_v58, %v3316_v58  ;;  %3525 = vst.msk [vmem:[%s4153_s22 + $0xf8] sm:$0xff] %vm200_vm1, %v3316_v58 }
 0x2f6   : > { %v3380_v13 = vadd.f32 %v3379_v12, %v3378_v10 }
 0x2f7   : > { %v3484_v16 = vsel %vm200_vm1, %v3422_v42, 0.0 }
 0x2f8   : > { %v3381_v20 = vrot.slane %v3380_v13, 4  ;;  %v3485_v14 = vadd.f32 %v3484_v16, %v3483_v59 }
 0x2fa   : > { %v3382_v24 = vadd.f32 %v3381_v20, %v3380_v13  ;;  %v3486_v57 = vrot.slane %v3485_v14, 4 }
 0x2fc   : > { %v3383_v33 = vrot.slane %v3382_v24, 2  ;;  %v3487_v25 = vadd.f32 %v3486_v57, %v3485_v14 }
 0x2fe   : > { %v3384_v26 = vadd.f32 %v3383_v33, %v3382_v24  ;;  %v3488_v27 = vrot.slane %v3487_v25, 2 }
 0x300   : > { %v3385_v30 = vrot.slane %v3384_v26, 1  ;;  %v3489_v31 = vadd.f32 %v3488_v27, %v3487_v25 }
 0x302   : > { %v3386_v19 = vadd.f32 %v3385_v30, %v3384_v26  ;;  %v3490_v35 = vrot.slane %v3489_v31, 1 }
 0x304   : > { %v3387_v11 = vadd.f32 %v3386_v19, %v3317_v53  ;;  %v3491_v39 = vadd.f32 %v3490_v35, %v3489_v31 }
 0x306   : > { %3389 = vst.msk [vmem:[%s5422_s3] sm:$0x1] %vm3388_vm2, %v3387_v11  ;;  %v3492_v40 = vadd.f32 %v3491_v39, %v3390_v36 }
 0x308   : > { %3493 = vst.msk [vmem:[%s5423_s4] sm:$0x1] %vm3388_vm2, %v3492_v40 }
 0x309 PF: > { %s15_s15 = sadd.s32 1, %s4113_s15  }
 0x30a   : > { %p12_p5 = scmp.ge.s32.totalorder %s15_s15, 4  }
 0x30c   :  { %14 = sbr.rel (!%p12_p5) target bundleno = 1 (0x1), region = 88 }

</bundles_post_ra>
